<compile_context>
chip_gen: v7x
topology: tpu7x:2x2x1
jax: 0.10.0
libtpu: 0.0.40
codegen_flags: <defaults>
</compile_context>

<pallas_src>
import functools

import jax
import jax.numpy as jnp
import numpy as np
from jax.experimental import pallas as pl
from jax.experimental.pallas import tpu as pltpu


# ----------------------------------------------------------------------------
# Module configuration (replication_padding=True, gru_kernel_size=1,
# dense_connect=0): conv block idx -> (kernel, dilation, replication pad).
# ----------------------------------------------------------------------------
def _conv_block_cfg(idx, num_layers):
    k = 5 if idx == 0 else 3
    d = 2 if idx == 1 else 1
    p = 2 if idx <= 1 else 1
    return k, d, p


# ----------------------------------------------------------------------------
# Fused Pallas kernel: per grid step = one batch element, full forward pass.
# ----------------------------------------------------------------------------
def _sa2dgru_kernel(*refs, H, W, num_layers, conv_cfg, matmul_dtype):
    nconv = num_layers + 1
    x_ref, prev_ref = refs[0], refs[1]
    conv_w_refs = refs[2:2 + nconv]
    (wuh_ref, wup_ref, bu_ref, wu1_ref, wu2_ref,
     woh_ref, wop_ref, bo_ref, wo1_ref, wo2_ref) = refs[2 + nconv:12 + nconv]
    out_ref = refs[12 + nconv]
    ns_ref = refs[13 + nconv]
    col_s = refs[14 + nconv]     # (K_max + 1, H*W) im2col scratch
    halo_s = refs[15 + nconv]    # (C_max, (H + 2*p_max) * W) halo scratch

    f32 = jnp.float32
    HW = H * W
    cast = jnp.dtype(matmul_dtype) != jnp.dtype(jnp.float32)

    # Lane-position masks (x == 0 / x == W-1 within every image row).
    lane = jax.lax.broadcasted_iota(jnp.int32, (1, HW), 1)
    if W & (W - 1) == 0:
        colpos = jnp.bitwise_and(lane, W - 1)
    else:
        colpos = lane % W
    col_first = colpos == 0
    col_last = colpos == (W - 1)

    def mm(a, b):
        if cast:
            a = a.astype(matmul_dtype)
            b = b.astype(matmul_dtype)
        return jnp.dot(a, b, preferred_element_type=f32)

    def conv(z, idx, relu):
        """Replication-padded conv on a lane-dense (Cin, H*W) activation.

        Builds the (k*k*Cin + 1, H*W) im2col matrix in VMEM (last row = 1.0
        for the folded bias) and contracts it against the (Cout, k*k*Cin + 1)
        weight in a single wide-K MXU matmul -> (Cout, H*W).
        """
        k, d, p = conv_cfg[idx]
        cin = z.shape[0]
        K = k * k * cin
        base = p * W  # start of the "centre" image inside the halo buffer

        # Column-clamped shifts: colimg[s][c, y*W+x] = z[c, y*W + clip(x+s)].
        colimg = {0: z}
        cur = z
        for _ in range(p):                       # +1 .. +p
            halo_s[0:cin, base:base + HW] = cur
            shifted = halo_s[0:cin, base + 1:base + 1 + HW]
            cur = jnp.where(col_last, cur, shifted)
            colimg[len([s for s in colimg if s > 0]) + 1] = cur
        cur = z
        for _ in range(p):                       # -1 .. -p
            halo_s[0:cin, base:base + HW] = cur
            shifted = halo_s[0:cin, base - 1:base - 1 + HW]
            cur = jnp.where(col_first, cur, shifted)
            colimg[-(len([s for s in colimg if s < 0]) + 1)] = cur

        # For every kernel column: write the row-halo'd image (first/last row
        # replicated), then slice the k row-shifted taps straight into im2col.
        for kx in range(k):
            dx = kx * d - p
            img = colimg[dx]
            halo_s[0:cin, base:base + HW] = img
            for i in range(p):
                halo_s[0:cin, i * W:(i + 1) * W] = (
                    halo_s[0:cin, base:base + W])
                halo_s[0:cin, (p + H + i) * W:(p + H + i + 1) * W] = (
                    halo_s[0:cin, base + (H - 1) * W:base + HW])
            for ky in range(k):
                tap = halo_s[0:cin, ky * d * W:ky * d * W + HW]
                t = ky * k + kx
                col_s[t * cin:(t + 1) * cin, :] = tap

        col_s[K:K + 1, :] = jnp.ones((1, HW), f32)      # folded-bias row
        w = conv_w_refs[idx][...]                        # (Cout, K+1)
        acc = mm(w, col_s[0:K + 1, :])                   # (Cout, HW) lane dense
        return jnp.maximum(acc, 0.0) if relu else acc

    def gru(h, l):
        """ConvGRU cell (1x1 gates + CAB channel attention), (hid, H*W)."""
        p_st = prev_ref[l].astype(f32)                   # (hid, HW)

        # update gate: 1x1 conv on [h, p] + CAB (CA(u)*u) + sigmoid
        u = mm(wuh_ref[l], h) + mm(wup_ref[l], p_st) + bu_ref[l]
        yu = jnp.mean(u, axis=1, keepdims=True)          # lane (XLU) reduce
        yu = jnp.maximum(mm(wu1_ref[l], yu), 0.0)
        yu = jax.nn.sigmoid(mm(wu2_ref[l], yu))
        update = jax.nn.sigmoid(yu * u)

        # out gate: 1x1 conv on [h, p*update] + CAB + tanh
        o = mm(woh_ref[l], h) + mm(wop_ref[l], p_st * update) + bo_ref[l]
        yo = jnp.mean(o, axis=1, keepdims=True)
        yo = jnp.maximum(mm(wo1_ref[l], yo), 0.0)
        yo = jax.nn.sigmoid(mm(wo2_ref[l], yo))
        delta = jnp.tanh(yo * o)

        ns = p_st * (1.0 - update) + delta * update
        ns_ref[l] = ns.astype(ns_ref.dtype)
        return jnp.maximum(ns, 0.0)                      # inter-layer ReLU

    h = x_ref[...].astype(f32)                           # (Cin, HW)
    for l in range(num_layers):
        h = conv(h, l, relu=True)
        h = gru(h, l)
    out = conv(h, num_layers, relu=False)
    out_ref[...] = out.astype(out_ref.dtype)


# ----------------------------------------------------------------------------
# Wrapper: NCHW <-> lane-dense (C, H*W) plumbing, weight packing, pallas_call.
# ----------------------------------------------------------------------------
def sa2dgru_forward(cell_input, previous_state, params, *, num_layers=2,
                    matmul_dtype=jnp.float32):
    B, in_ch, H, W = cell_input.shape
    hid = previous_state.shape[1]
    L = num_layers
    HW = H * W
    out_ch = params["convs"][num_layers]["w"].shape[-1]

    conv_cfg = tuple(_conv_block_cfg(i, num_layers) for i in range(num_layers + 1))
    cins = [in_ch] + [hid] * num_layers
    k_max = max(k * k * c for (k, _, _), c in zip(conv_cfg, cins))
    p_max = max(p for (_, _, p) in conv_cfg)
    c_halo = max(cins)

    # Flatten to lane-dense (C, H*W); NCHW row-major makes this a free reshape.
    x = cell_input.reshape(B, in_ch, HW)
    prev = jnp.moveaxis(previous_state, -1, 1).reshape(B, L, hid, HW)

    # Conv weights: (kh, kw, cin, cout) -> (cout, kh*kw*cin + 1), bias folded.
    def pack_conv(idx):
        w = params["convs"][idx]["w"]
        b = params["convs"][idx]["b"]
        kh, kw, ci, co = w.shape
        w_mat = jnp.transpose(w.reshape(kh * kw * ci, co))
        return jnp.concatenate([w_mat, b[:, None]], axis=1)

    w_aug = [pack_conv(i) for i in range(num_layers + 1)]

    def stack(name, trailing_unit=False):
        a = jnp.stack([lp[name] for lp in params["layers"]])
        return a[..., None] if trailing_unit else a

    wuh, wup = stack("wu_h"), stack("wu_p")
    woh, wop = stack("wo_h"), stack("wo_p")
    bu, bo = stack("bu", True), stack("bo", True)
    wu1, wu2 = stack("wu1"), stack("wu2")
    wo1, wo2 = stack("wo1"), stack("wo2")

    def bspec(shape):            # per-batch block, batch dim squeezed
        nd = len(shape)

        def imap(b):
            return (b,) + (0,) * (nd - 1)

        return pl.BlockSpec((pl.Squeezed(),) + tuple(shape[1:]), imap)

    def fspec(shape):            # full-array block (weights, DMA'd once)
        nd = len(shape)

        def imap(b):
            return (0,) * nd

        return pl.BlockSpec(tuple(shape), imap)

    operands = (x, prev, *w_aug, wuh, wup, bu, wu1, wu2, woh, wop, bo, wo1, wo2)
    in_specs = [bspec(x.shape), bspec(prev.shape)]
    in_specs += [fspec(w.shape) for w in w_aug]
    in_specs += [fspec(a.shape) for a in
                 (wuh, wup, bu, wu1, wu2, woh, wop, bo, wo1, wo2)]

    kern = functools.partial(
        _sa2dgru_kernel, H=H, W=W, num_layers=num_layers,
        conv_cfg=conv_cfg, matmul_dtype=matmul_dtype)

    out_flat, ns_flat = pl.pallas_call(
        kern,
        out_shape=(jax.ShapeDtypeStruct((B, out_ch, HW), cell_input.dtype),
                   jax.ShapeDtypeStruct((B, L, hid, HW), cell_input.dtype)),
        grid=(B,),
        in_specs=in_specs,
        out_specs=(bspec((B, out_ch, HW)), bspec((B, L, hid, HW))),
        scratch_shapes=[
            pltpu.VMEM((k_max + 1, HW), jnp.float32),
            pltpu.VMEM((c_halo, (H + 2 * p_max) * W), jnp.float32),
        ],
        compiler_params=pltpu.CompilerParams(
            dimension_semantics=("parallel",)),
    )(*operands)

    out = out_flat.reshape(B, out_ch, H, W)
    new_state = jnp.moveaxis(ns_flat.reshape(B, L, hid, H, W), 1, -1)
    return out, new_state


# ----------------------------------------------------------------------------
# Deterministic synthetic parameters (shapes consistent with the PyTorch module)
# ----------------------------------------------------------------------------
def init_params(key, in_ch, hid, out_ch, num_layers):
    keys = iter(jax.random.split(key, 16 * (num_layers + 2)))

    def nrm(shape, scale=0.1):
        return scale * jax.random.normal(next(keys), shape, jnp.float32)

    convs = []
    for idx in range(num_layers + 1):
        k, _, _ = _conv_block_cfg(idx, num_layers)
        ci = in_ch if idx == 0 else hid
        co = hid if idx < num_layers else out_ch
        convs.append({"w": nrm((k, k, ci, co)), "b": nrm((co,))})
    layers = []
    for _ in range(num_layers):
        layers.append(dict(
            wu_h=nrm((hid, hid)), wu_p=nrm((hid, hid)), bu=nrm((hid,)),
            wu1=nrm((hid // 4, hid)), wu2=nrm((hid, hid // 4)),
            wo_h=nrm((hid, hid)), wo_p=nrm((hid, hid)), bo=nrm((hid,)),
            wo1=nrm((hid // 4, hid)), wo2=nrm((hid, hid // 4)),
        ))
    return {"convs": convs, "layers": layers}


# ----------------------------------------------------------------------------
# Pure-JAX reference (correctness check for the fused Pallas path)
# ----------------------------------------------------------------------------
def _ref_conv(x, w_hwio, b, dil, pad, relu):
    xp = jnp.pad(x, ((0, 0), (0, 0), (pad, pad), (pad, pad)), mode="edge")
    y = jax.lax.conv_general_dilated(
        xp, w_hwio, (1, 1), "VALID", rhs_dilation=(dil, dil),
        dimension_numbers=("NCHW", "HWIO", "NCHW"))
    y = y + b[None, :, None, None]
    return jnp.maximum(y, 0.0) if relu else y


def _ref_ca(x, w1, w2):
    y = jnp.mean(x, axis=(2, 3), keepdims=True)
    y = jnp.maximum(jnp.einsum("oc,bcij->boij", w1, y), 0.0)
    return jax.nn.sigmoid(jnp.einsum("oc,bcij->boij", w2, y))


def ref_forward(cell_input, previous_state, params, *, num_layers=2):
    h = cell_input
    new_states = []
    for idx in range(num_layers):
        _, d, p = _conv_block_cfg(idx, num_layers)
        h = _ref_conv(h, params["convs"][idx]["w"], params["convs"][idx]["b"],
                      d, p, True)
        lp = params["layers"][idx]
        p_st = previous_state[..., idx]
        u = (jnp.einsum("oc,bchw->bohw", lp["wu_h"], h)
             + jnp.einsum("oc,bchw->bohw", lp["wu_p"], p_st)
             + lp["bu"][None, :, None, None])
        update = jax.nn.sigmoid(_ref_ca(u, lp["wu1"], lp["wu2"]) * u)
        o = (jnp.einsum("oc,bchw->bohw", lp["wo_h"], h)
             + jnp.einsum("oc,bchw->bohw", lp["wo_p"], p_st * update)
             + lp["bo"][None, :, None, None])
        delta = jnp.tanh(_ref_ca(o, lp["wo1"], lp["wo2"]) * o)
        ns = p_st * (1.0 - update) + delta * update
        new_states.append(ns)
        h = jnp.maximum(ns, 0.0)
    _, d, p = _conv_block_cfg(num_layers, num_layers)
    out = _ref_conv(h, params["convs"][num_layers]["w"],
                    params["convs"][num_layers]["b"], d, p, False)
    return out, jnp.stack(new_states, axis=-1)


# ----------------------------------------------------------------------------
if __name__ == "__main__":
    B, Cin, H, W = 2, 4, 16, 16
    hidden, num_layers = 32, 2
    out_ch = Cin  # out_channels=None -> in_channels

    key = jax.random.PRNGKey(0)
    k_x, k_p, k_w = jax.random.split(key, 3)
    cell_input = jax.random.normal(k_x, (B, Cin, H, W), jnp.float32)
    previous_state = jax.random.normal(k_p, (B, hidden, H, W, num_layers),
                                       jnp.float32)
    params = init_params(k_w, Cin, hidden, out_ch, num_layers)

    fwd = jax.jit(functools.partial(sa2dgru_forward, num_layers=num_layers))
    out, new_state = fwd(cell_input, previous_state, params)
    jax.block_until_ready((out, new_state))

    ref_out, ref_state = ref_forward(cell_input, previous_state, params,
                                     num_layers=num_layers)
    np.testing.assert_allclose(np.asarray(out), np.asarray(ref_out),
                               atol=2e-3, rtol=2e-3)
    np.testing.assert_allclose(np.asarray(new_state), np.asarray(ref_state),
                               atol=2e-3, rtol=2e-3)

    assert out.shape == (B, out_ch, H, W)
    assert new_state.shape == (B, hidden, H, W, num_layers)
    print("KERNEL_OK")
</pallas_src>

<mosaic_0001>
module attributes {stable_mosaic.version = 11 : i64} {
  func.func @_sa2dgru_kernel(%arg0: i32, %arg1: memref<1x4x256xf32, #tpu.memory_space<vmem>>, %arg2: memref<1x2x32x256xf32, #tpu.memory_space<vmem>>, %arg3: memref<32x101xf32, #tpu.memory_space<vmem>>, %arg4: memref<32x289xf32, #tpu.memory_space<vmem>>, %arg5: memref<4x289xf32, #tpu.memory_space<vmem>>, %arg6: memref<2x32x32xf32, #tpu.memory_space<vmem>>, %arg7: memref<2x32x32xf32, #tpu.memory_space<vmem>>, %arg8: memref<2x32x1xf32, #tpu.memory_space<vmem>>, %arg9: memref<2x8x32xf32, #tpu.memory_space<vmem>>, %arg10: memref<2x32x8xf32, #tpu.memory_space<vmem>>, %arg11: memref<2x32x32xf32, #tpu.memory_space<vmem>>, %arg12: memref<2x32x32xf32, #tpu.memory_space<vmem>>, %arg13: memref<2x32x1xf32, #tpu.memory_space<vmem>>, %arg14: memref<2x8x32xf32, #tpu.memory_space<vmem>>, %arg15: memref<2x32x8xf32, #tpu.memory_space<vmem>>, %arg16: memref<1x4x256xf32, #tpu.memory_space<vmem>>, %arg17: memref<1x2x32x256xf32, #tpu.memory_space<vmem>>, %arg18: memref<289x256xf32, #tpu.memory_space<vmem>>, %arg19: memref<32x320xf32, #tpu.memory_space<vmem>>) attributes {dimension_semantics = [#tpu.dimension_semantics<parallel>], iteration_bounds = array<i64: 2>, scalar_prefetch = 0 : i64, scratch_operands = 2 : i64, tpu.core_type = #tpu.core_type<tc>, window_params = [{transform_indices = @transform_0, window_bounds = array<i64: 1, 4, 256>}, {transform_indices = @transform_1, window_bounds = array<i64: 1, 2, 32, 256>}, {pipeline_mode = #tpu.pipeline_mode<synchronous>, transform_indices = @transform_2, window_bounds = array<i64: 32, 101>}, {pipeline_mode = #tpu.pipeline_mode<synchronous>, transform_indices = @transform_3, window_bounds = array<i64: 32, 289>}, {pipeline_mode = #tpu.pipeline_mode<synchronous>, transform_indices = @transform_4, window_bounds = array<i64: 4, 289>}, {pipeline_mode = #tpu.pipeline_mode<synchronous>, transform_indices = @transform_5, window_bounds = array<i64: 2, 32, 32>}, {pipeline_mode = #tpu.pipeline_mode<synchronous>, transform_indices = @transform_6, window_bounds = array<i64: 2, 32, 32>}, {pipeline_mode = #tpu.pipeline_mode<synchronous>, transform_indices = @transform_7, window_bounds = array<i64: 2, 32, 1>}, {pipeline_mode = #tpu.pipeline_mode<synchronous>, transform_indices = @transform_8, window_bounds = array<i64: 2, 8, 32>}, {pipeline_mode = #tpu.pipeline_mode<synchronous>, transform_indices = @transform_9, window_bounds = array<i64: 2, 32, 8>}, {pipeline_mode = #tpu.pipeline_mode<synchronous>, transform_indices = @transform_10, window_bounds = array<i64: 2, 32, 32>}, {pipeline_mode = #tpu.pipeline_mode<synchronous>, transform_indices = @transform_11, window_bounds = array<i64: 2, 32, 32>}, {pipeline_mode = #tpu.pipeline_mode<synchronous>, transform_indices = @transform_12, window_bounds = array<i64: 2, 32, 1>}, {pipeline_mode = #tpu.pipeline_mode<synchronous>, transform_indices = @transform_13, window_bounds = array<i64: 2, 8, 32>}, {pipeline_mode = #tpu.pipeline_mode<synchronous>, transform_indices = @transform_14, window_bounds = array<i64: 2, 32, 8>}, {transform_indices = @transform_15, window_bounds = array<i64: 1, 4, 256>}, {transform_indices = @transform_16, window_bounds = array<i64: 1, 2, 32, 256>}]} {
    %0 = tpu.iota {dimensions = array<i32: 1>} : vector<1x256xi32>
    %c15_i32 = arith.constant 15 : i32
    %1 = vector.broadcast %c15_i32 : i32 to vector<1x256xi32>
    %2 = arith.andi %0, %1 : vector<1x256xi32>
    %c0_i32 = arith.constant 0 : i32
    %3 = vector.broadcast %c0_i32 : i32 to vector<1x256xi32>
    %4 = arith.cmpi eq, %2, %3 : vector<1x256xi32>
    %c15_i32_0 = arith.constant 15 : i32
    %5 = vector.broadcast %c15_i32_0 : i32 to vector<1x256xi32>
    %6 = arith.cmpi eq, %2, %5 : vector<1x256xi32>
    %c0 = arith.constant 0 : index
    %c0_1 = arith.constant 0 : index
    %c0_2 = arith.constant 0 : index
    %7 = vector.load %arg1[%c0, %c0_1, %c0_2] : memref<1x4x256xf32, #tpu.memory_space<vmem>>, vector<1x4x256xf32>
    %8 = vector.shape_cast %7 : vector<1x4x256xf32> to vector<4x256xf32>
    %c0_3 = arith.constant 0 : index
    %c32 = arith.constant 32 : index
    %9 = vector.load %arg19[%c0_3, %c32] : memref<32x320xf32, #tpu.memory_space<vmem>>, vector<4x256xf32>
    tpu.vector_store %arg19[%c0_3, %c32], %8 {strides = array<i32>} : memref<32x320xf32, #tpu.memory_space<vmem>>, vector<4x256xf32>,
    %c0_4 = arith.constant 0 : index
    %c33 = arith.constant 33 : index
    %10 = vector.load %arg19[%c0_4, %c33] : memref<32x320xf32, #tpu.memory_space<vmem>>, vector<4x256xf32>
    %11 = vector.shape_cast %6 : vector<1x256xi1> to vector<1x256xi1>
    %12 = vector.broadcast %11 : vector<1x256xi1> to vector<4x256xi1>
    %13 = arith.select %12, %8, %10 : vector<4x256xi1>, vector<4x256xf32>
    %c0_5 = arith.constant 0 : index
    %c32_6 = arith.constant 32 : index
    %14 = vector.load %arg19[%c0_5, %c32_6] : memref<32x320xf32, #tpu.memory_space<vmem>>, vector<4x256xf32>
    tpu.vector_store %arg19[%c0_5, %c32_6], %13 {strides = array<i32>} : memref<32x320xf32, #tpu.memory_space<vmem>>, vector<4x256xf32>,
    %c0_7 = arith.constant 0 : index
    %c33_8 = arith.constant 33 : index
    %15 = vector.load %arg19[%c0_7, %c33_8] : memref<32x320xf32, #tpu.memory_space<vmem>>, vector<4x256xf32>
    %16 = vector.shape_cast %6 : vector<1x256xi1> to vector<1x256xi1>
    %17 = vector.broadcast %16 : vector<1x256xi1> to vector<4x256xi1>
    %18 = arith.select %17, %13, %15 : vector<4x256xi1>, vector<4x256xf32>
    %c0_9 = arith.constant 0 : index
    %c32_10 = arith.constant 32 : index
    %19 = vector.load %arg19[%c0_9, %c32_10] : memref<32x320xf32, #tpu.memory_space<vmem>>, vector<4x256xf32>
    tpu.vector_store %arg19[%c0_9, %c32_10], %8 {strides = array<i32>} : memref<32x320xf32, #tpu.memory_space<vmem>>, vector<4x256xf32>,
    %c0_11 = arith.constant 0 : index
    %c31 = arith.constant 31 : index
    %20 = vector.load %arg19[%c0_11, %c31] : memref<32x320xf32, #tpu.memory_space<vmem>>, vector<4x256xf32>
    %21 = vector.shape_cast %4 : vector<1x256xi1> to vector<1x256xi1>
    %22 = vector.broadcast %21 : vector<1x256xi1> to vector<4x256xi1>
    %23 = arith.select %22, %8, %20 : vector<4x256xi1>, vector<4x256xf32>
    %c0_12 = arith.constant 0 : index
    %c32_13 = arith.constant 32 : index
    %24 = vector.load %arg19[%c0_12, %c32_13] : memref<32x320xf32, #tpu.memory_space<vmem>>, vector<4x256xf32>
    tpu.vector_store %arg19[%c0_12, %c32_13], %23 {strides = array<i32>} : memref<32x320xf32, #tpu.memory_space<vmem>>, vector<4x256xf32>,
    %c0_14 = arith.constant 0 : index
    %c31_15 = arith.constant 31 : index
    %25 = vector.load %arg19[%c0_14, %c31_15] : memref<32x320xf32, #tpu.memory_space<vmem>>, vector<4x256xf32>
    %26 = vector.shape_cast %4 : vector<1x256xi1> to vector<1x256xi1>
    %27 = vector.broadcast %26 : vector<1x256xi1> to vector<4x256xi1>
    %28 = arith.select %27, %23, %25 : vector<4x256xi1>, vector<4x256xf32>
    %c0_16 = arith.constant 0 : index
    %c32_17 = arith.constant 32 : index
    %29 = vector.load %arg19[%c0_16, %c32_17] : memref<32x320xf32, #tpu.memory_space<vmem>>, vector<4x256xf32>
    tpu.vector_store %arg19[%c0_16, %c32_17], %28 {strides = array<i32>} : memref<32x320xf32, #tpu.memory_space<vmem>>, vector<4x256xf32>,
    %c0_18 = arith.constant 0 : index
    %c32_19 = arith.constant 32 : index
    %30 = vector.load %arg19[%c0_18, %c32_19] : memref<32x320xf32, #tpu.memory_space<vmem>>, vector<4x16xf32>
    %c0_20 = arith.constant 0 : index
    %c0_21 = arith.constant 0 : index
    %31 = vector.load %arg19[%c0_20, %c0_21] : memref<32x320xf32, #tpu.memory_space<vmem>>, vector<4x16xf32>
    tpu.vector_store %arg19[%c0_20, %c0_21], %30 {strides = array<i32>} : memref<32x320xf32, #tpu.memory_space<vmem>>, vector<4x16xf32>,
    %c0_22 = arith.constant 0 : index
    %c272 = arith.constant 272 : index
    %32 = vector.load %arg19[%c0_22, %c272] : memref<32x320xf32, #tpu.memory_space<vmem>>, vector<4x16xf32>
    %c0_23 = arith.constant 0 : index
    %c288 = arith.constant 288 : index
    %33 = vector.load %arg19[%c0_23, %c288] : memref<32x320xf32, #tpu.memory_space<vmem>>, vector<4x16xf32>
    tpu.vector_store %arg19[%c0_23, %c288], %32 {strides = array<i32>} : memref<32x320xf32, #tpu.memory_space<vmem>>, vector<4x16xf32>,
    %c0_24 = arith.constant 0 : index
    %c32_25 = arith.constant 32 : index
    %34 = vector.load %arg19[%c0_24, %c32_25] : memref<32x320xf32, #tpu.memory_space<vmem>>, vector<4x16xf32>
    %c0_26 = arith.constant 0 : index
    %c16 = arith.constant 16 : index
    %35 = vector.load %arg19[%c0_26, %c16] : memref<32x320xf32, #tpu.memory_space<vmem>>, vector<4x16xf32>
    tpu.vector_store %arg19[%c0_26, %c16], %34 {strides = array<i32>} : memref<32x320xf32, #tpu.memory_space<vmem>>, vector<4x16xf32>,
    %c0_27 = arith.constant 0 : index
    %c272_28 = arith.constant 272 : index
    %36 = vector.load %arg19[%c0_27, %c272_28] : memref<32x320xf32, #tpu.memory_space<vmem>>, vector<4x16xf32>
    %c0_29 = arith.constant 0 : index
    %c304 = arith.constant 304 : index
    %37 = vector.load %arg19[%c0_29, %c304] : memref<32x320xf32, #tpu.memory_space<vmem>>, vector<4x16xf32>
    tpu.vector_store %arg19[%c0_29, %c304], %36 {strides = array<i32>} : memref<32x320xf32, #tpu.memory_space<vmem>>, vector<4x16xf32>,
    %c0_30 = arith.constant 0 : index
    %c0_31 = arith.constant 0 : index
    %38 = vector.load %arg19[%c0_30, %c0_31] : memref<32x320xf32, #tpu.memory_space<vmem>>, vector<4x256xf32>
    %c0_32 = arith.constant 0 : index
    %c0_33 = arith.constant 0 : index
    %39 = vector.load %arg18[%c0_32, %c0_33] : memref<289x256xf32, #tpu.memory_space<vmem>>, vector<4x256xf32>
    tpu.vector_store %arg18[%c0_32, %c0_33], %38 {strides = array<i32>} : memref<289x256xf32, #tpu.memory_space<vmem>>, vector<4x256xf32>,
    %c0_34 = arith.constant 0 : index
    %c16_35 = arith.constant 16 : index
    %40 = vector.load %arg19[%c0_34, %c16_35] : memref<32x320xf32, #tpu.memory_space<vmem>>, vector<4x256xf32>
    %c20 = arith.constant 20 : index
    %c0_36 = arith.constant 0 : index
    %41 = vector.load %arg18[%c20, %c0_36] : memref<289x256xf32, #tpu.memory_space<vmem>>, vector<4x256xf32>
    tpu.vector_store %arg18[%c20, %c0_36], %40 {strides = array<i32>} : memref<289x256xf32, #tpu.memory_space<vmem>>, vector<4x256xf32>,
    %c0_37 = arith.constant 0 : index
    %c32_38 = arith.constant 32 : index
    %42 = vector.load %arg19[%c0_37, %c32_38] : memref<32x320xf32, #tpu.memory_space<vmem>>, vector<4x256xf32>
    %c40 = arith.constant 40 : index
    %c0_39 = arith.constant 0 : index
    %43 = vector.load %arg18[%c40, %c0_39] : memref<289x256xf32, #tpu.memory_space<vmem>>, vector<4x256xf32>
    tpu.vector_store %arg18[%c40, %c0_39], %42 {strides = array<i32>} : memref<289x256xf32, #tpu.memory_space<vmem>>, vector<4x256xf32>,
    %c0_40 = arith.constant 0 : index
    %c48 = arith.constant 48 : index
    %44 = vector.load %arg19[%c0_40, %c48] : memref<32x320xf32, #tpu.memory_space<vmem>>, vector<4x256xf32>
    %c60 = arith.constant 60 : index
    %c0_41 = arith.constant 0 : index
    %45 = vector.load %arg18[%c60, %c0_41] : memref<289x256xf32, #tpu.memory_space<vmem>>, vector<4x256xf32>
    tpu.vector_store %arg18[%c60, %c0_41], %44 {strides = array<i32>} : memref<289x256xf32, #tpu.memory_space<vmem>>, vector<4x256xf32>,
    %c0_42 = arith.constant 0 : index
    %c64 = arith.constant 64 : index
    %46 = vector.load %arg19[%c0_42, %c64] : memref<32x320xf32, #tpu.memory_space<vmem>>, vector<4x256xf32>
    %c80 = arith.constant 80 : index
    %c0_43 = arith.constant 0 : index
    %47 = vector.load %arg18[%c80, %c0_43] : memref<289x256xf32, #tpu.memory_space<vmem>>, vector<4x256xf32>
    tpu.vector_store %arg18[%c80, %c0_43], %46 {strides = array<i32>} : memref<289x256xf32, #tpu.memory_space<vmem>>, vector<4x256xf32>,
    %c0_44 = arith.constant 0 : index
    %c32_45 = arith.constant 32 : index
    %48 = vector.load %arg19[%c0_44, %c32_45] : memref<32x320xf32, #tpu.memory_space<vmem>>, vector<4x256xf32>
    tpu.vector_store %arg19[%c0_44, %c32_45], %23 {strides = array<i32>} : memref<32x320xf32, #tpu.memory_space<vmem>>, vector<4x256xf32>,
    %c0_46 = arith.constant 0 : index
    %c32_47 = arith.constant 32 : index
    %49 = vector.load %arg19[%c0_46, %c32_47] : memref<32x320xf32, #tpu.memory_space<vmem>>, vector<4x16xf32>
    %c0_48 = arith.constant 0 : index
    %c0_49 = arith.constant 0 : index
    %50 = vector.load %arg19[%c0_48, %c0_49] : memref<32x320xf32, #tpu.memory_space<vmem>>, vector<4x16xf32>
    tpu.vector_store %arg19[%c0_48, %c0_49], %49 {strides = array<i32>} : memref<32x320xf32, #tpu.memory_space<vmem>>, vector<4x16xf32>,
    %c0_50 = arith.constant 0 : index
    %c272_51 = arith.constant 272 : index
    %51 = vector.load %arg19[%c0_50, %c272_51] : memref<32x320xf32, #tpu.memory_space<vmem>>, vector<4x16xf32>
    %c0_52 = arith.constant 0 : index
    %c288_53 = arith.constant 288 : index
    %52 = vector.load %arg19[%c0_52, %c288_53] : memref<32x320xf32, #tpu.memory_space<vmem>>, vector<4x16xf32>
    tpu.vector_store %arg19[%c0_52, %c288_53], %51 {strides = array<i32>} : memref<32x320xf32, #tpu.memory_space<vmem>>, vector<4x16xf32>,
    %c0_54 = arith.constant 0 : index
    %c32_55 = arith.constant 32 : index
    %53 = vector.load %arg19[%c0_54, %c32_55] : memref<32x320xf32, #tpu.memory_space<vmem>>, vector<4x16xf32>
    %c0_56 = arith.constant 0 : index
    %c16_57 = arith.constant 16 : index
    %54 = vector.load %arg19[%c0_56, %c16_57] : memref<32x320xf32, #tpu.memory_space<vmem>>, vector<4x16xf32>
    tpu.vector_store %arg19[%c0_56, %c16_57], %53 {strides = array<i32>} : memref<32x320xf32, #tpu.memory_space<vmem>>, vector<4x16xf32>,
    %c0_58 = arith.constant 0 : index
    %c272_59 = arith.constant 272 : index
    %55 = vector.load %arg19[%c0_58, %c272_59] : memref<32x320xf32, #tpu.memory_space<vmem>>, vector<4x16xf32>
    %c0_60 = arith.constant 0 : index
    %c304_61 = arith.constant 304 : index
    %56 = vector.load %arg19[%c0_60, %c304_61] : memref<32x320xf32, #tpu.memory_space<vmem>>, vector<4x16xf32>
    tpu.vector_store %arg19[%c0_60, %c304_61], %55 {strides = array<i32>} : memref<32x320xf32, #tpu.memory_space<vmem>>, vector<4x16xf32>,
    %c0_62 = arith.constant 0 : index
    %c0_63 = arith.constant 0 : index
    %57 = vector.load %arg19[%c0_62, %c0_63] : memref<32x320xf32, #tpu.memory_space<vmem>>, vector<4x256xf32>
    %c4 = arith.constant 4 : index
    %c0_64 = arith.constant 0 : index
    %58 = vector.load %arg18[%c4, %c0_64] : memref<289x256xf32, #tpu.memory_space<vmem>>, vector<4x256xf32>
    tpu.vector_store %arg18[%c4, %c0_64], %57 {strides = array<i32>} : memref<289x256xf32, #tpu.memory_space<vmem>>, vector<4x256xf32>,
    %c0_65 = arith.constant 0 : index
    %c16_66 = arith.constant 16 : index
    %59 = vector.load %arg19[%c0_65, %c16_66] : memref<32x320xf32, #tpu.memory_space<vmem>>, vector<4x256xf32>
    %c24 = arith.constant 24 : index
    %c0_67 = arith.constant 0 : index
    %60 = vector.load %arg18[%c24, %c0_67] : memref<289x256xf32, #tpu.memory_space<vmem>>, vector<4x256xf32>
    tpu.vector_store %arg18[%c24, %c0_67], %59 {strides = array<i32>} : memref<289x256xf32, #tpu.memory_space<vmem>>, vector<4x256xf32>,
    %c0_68 = arith.constant 0 : index
    %c32_69 = arith.constant 32 : index
    %61 = vector.load %arg19[%c0_68, %c32_69] : memref<32x320xf32, #tpu.memory_space<vmem>>, vector<4x256xf32>
    %c44 = arith.constant 44 : index
    %c0_70 = arith.constant 0 : index
    %62 = vector.load %arg18[%c44, %c0_70] : memref<289x256xf32, #tpu.memory_space<vmem>>, vector<4x256xf32>
    tpu.vector_store %arg18[%c44, %c0_70], %61 {strides = array<i32>} : memref<289x256xf32, #tpu.memory_space<vmem>>, vector<4x256xf32>,
    %c0_71 = arith.constant 0 : index
    %c48_72 = arith.constant 48 : index
    %63 = vector.load %arg19[%c0_71, %c48_72] : memref<32x320xf32, #tpu.memory_space<vmem>>, vector<4x256xf32>
    %c64_73 = arith.constant 64 : index
    %c0_74 = arith.constant 0 : index
    %64 = vector.load %arg18[%c64_73, %c0_74] : memref<289x256xf32, #tpu.memory_space<vmem>>, vector<4x256xf32>
    tpu.vector_store %arg18[%c64_73, %c0_74], %63 {strides = array<i32>} : memref<289x256xf32, #tpu.memory_space<vmem>>, vector<4x256xf32>,
    %c0_75 = arith.constant 0 : index
    %c64_76 = arith.constant 64 : index
    %65 = vector.load %arg19[%c0_75, %c64_76] : memref<32x320xf32, #tpu.memory_space<vmem>>, vector<4x256xf32>
    %c84 = arith.constant 84 : index
    %c0_77 = arith.constant 0 : index
    %66 = vector.load %arg18[%c84, %c0_77] : memref<289x256xf32, #tpu.memory_space<vmem>>, vector<4x256xf32>
    tpu.vector_store %arg18[%c84, %c0_77], %65 {strides = array<i32>} : memref<289x256xf32, #tpu.memory_space<vmem>>, vector<4x256xf32>,
    %c0_78 = arith.constant 0 : index
    %c32_79 = arith.constant 32 : index
    %67 = vector.load %arg19[%c0_78, %c32_79] : memref<32x320xf32, #tpu.memory_space<vmem>>, vector<4x256xf32>
    tpu.vector_store %arg19[%c0_78, %c32_79], %8 {strides = array<i32>} : memref<32x320xf32, #tpu.memory_space<vmem>>, vector<4x256xf32>,
    %c0_80 = arith.constant 0 : index
    %c32_81 = arith.constant 32 : index
    %68 = vector.load %arg19[%c0_80, %c32_81] : memref<32x320xf32, #tpu.memory_space<vmem>>, vector<4x16xf32>
    %c0_82 = arith.constant 0 : index
    %c0_83 = arith.constant 0 : index
    %69 = vector.load %arg19[%c0_82, %c0_83] : memref<32x320xf32, #tpu.memory_space<vmem>>, vector<4x16xf32>
    tpu.vector_store %arg19[%c0_82, %c0_83], %68 {strides = array<i32>} : memref<32x320xf32, #tpu.memory_space<vmem>>, vector<4x16xf32>,
    %c0_84 = arith.constant 0 : index
    %c272_85 = arith.constant 272 : index
    %70 = vector.load %arg19[%c0_84, %c272_85] : memref<32x320xf32, #tpu.memory_space<vmem>>, vector<4x16xf32>
    %c0_86 = arith.constant 0 : index
    %c288_87 = arith.constant 288 : index
    %71 = vector.load %arg19[%c0_86, %c288_87] : memref<32x320xf32, #tpu.memory_space<vmem>>, vector<4x16xf32>
    tpu.vector_store %arg19[%c0_86, %c288_87], %70 {strides = array<i32>} : memref<32x320xf32, #tpu.memory_space<vmem>>, vector<4x16xf32>,
    %c0_88 = arith.constant 0 : index
    %c32_89 = arith.constant 32 : index
    %72 = vector.load %arg19[%c0_88, %c32_89] : memref<32x320xf32, #tpu.memory_space<vmem>>, vector<4x16xf32>
    %c0_90 = arith.constant 0 : index
    %c16_91 = arith.constant 16 : index
    %73 = vector.load %arg19[%c0_90, %c16_91] : memref<32x320xf32, #tpu.memory_space<vmem>>, vector<4x16xf32>
    tpu.vector_store %arg19[%c0_90, %c16_91], %72 {strides = array<i32>} : memref<32x320xf32, #tpu.memory_space<vmem>>, vector<4x16xf32>,
    %c0_92 = arith.constant 0 : index
    %c272_93 = arith.constant 272 : index
    %74 = vector.load %arg19[%c0_92, %c272_93] : memref<32x320xf32, #tpu.memory_space<vmem>>, vector<4x16xf32>
    %c0_94 = arith.constant 0 : index
    %c304_95 = arith.constant 304 : index
    %75 = vector.load %arg19[%c0_94, %c304_95] : memref<32x320xf32, #tpu.memory_space<vmem>>, vector<4x16xf32>
    tpu.vector_store %arg19[%c0_94, %c304_95], %74 {strides = array<i32>} : memref<32x320xf32, #tpu.memory_space<vmem>>, vector<4x16xf32>,
    %c0_96 = arith.constant 0 : index
    %c0_97 = arith.constant 0 : index
    %76 = vector.load %arg19[%c0_96, %c0_97] : memref<32x320xf32, #tpu.memory_space<vmem>>, vector<4x256xf32>
    %c8 = arith.constant 8 : index
    %c0_98 = arith.constant 0 : index
    %77 = vector.load %arg18[%c8, %c0_98] : memref<289x256xf32, #tpu.memory_space<vmem>>, vector<4x256xf32>
    tpu.vector_store %arg18[%c8, %c0_98], %76 {strides = array<i32>} : memref<289x256xf32, #tpu.memory_space<vmem>>, vector<4x256xf32>,
    %c0_99 = arith.constant 0 : index
    %c16_100 = arith.constant 16 : index
    %78 = vector.load %arg19[%c0_99, %c16_100] : memref<32x320xf32, #tpu.memory_space<vmem>>, vector<4x256xf32>
    %c28 = arith.constant 28 : index
    %c0_101 = arith.constant 0 : index
    %79 = vector.load %arg18[%c28, %c0_101] : memref<289x256xf32, #tpu.memory_space<vmem>>, vector<4x256xf32>
    tpu.vector_store %arg18[%c28, %c0_101], %78 {strides = array<i32>} : memref<289x256xf32, #tpu.memory_space<vmem>>, vector<4x256xf32>,
    %c0_102 = arith.constant 0 : index
    %c32_103 = arith.constant 32 : index
    %80 = vector.load %arg19[%c0_102, %c32_103] : memref<32x320xf32, #tpu.memory_space<vmem>>, vector<4x256xf32>
    %c48_104 = arith.constant 48 : index
    %c0_105 = arith.constant 0 : index
    %81 = vector.load %arg18[%c48_104, %c0_105] : memref<289x256xf32, #tpu.memory_space<vmem>>, vector<4x256xf32>
    tpu.vector_store %arg18[%c48_104, %c0_105], %80 {strides = array<i32>} : memref<289x256xf32, #tpu.memory_space<vmem>>, vector<4x256xf32>,
    %c0_106 = arith.constant 0 : index
    %c48_107 = arith.constant 48 : index
    %82 = vector.load %arg19[%c0_106, %c48_107] : memref<32x320xf32, #tpu.memory_space<vmem>>, vector<4x256xf32>
    %c68 = arith.constant 68 : index
    %c0_108 = arith.constant 0 : index
    %83 = vector.load %arg18[%c68, %c0_108] : memref<289x256xf32, #tpu.memory_space<vmem>>, vector<4x256xf32>
    tpu.vector_store %arg18[%c68, %c0_108], %82 {strides = array<i32>} : memref<289x256xf32, #tpu.memory_space<vmem>>, vector<4x256xf32>,
    %c0_109 = arith.constant 0 : index
    %c64_110 = arith.constant 64 : index
    %84 = vector.load %arg19[%c0_109, %c64_110] : memref<32x320xf32, #tpu.memory_space<vmem>>, vector<4x256xf32>
    %c88 = arith.constant 88 : index
    %c0_111 = arith.constant 0 : index
    %85 = vector.load %arg18[%c88, %c0_111] : memref<289x256xf32, #tpu.memory_space<vmem>>, vector<4x256xf32>
    tpu.vector_store %arg18[%c88, %c0_111], %84 {strides = array<i32>} : memref<289x256xf32, #tpu.memory_space<vmem>>, vector<4x256xf32>,
    %c0_112 = arith.constant 0 : index
    %c32_113 = arith.constant 32 : index
    %86 = vector.load %arg19[%c0_112, %c32_113] : memref<32x320xf32, #tpu.memory_space<vmem>>, vector<4x256xf32>
    tpu.vector_store %arg19[%c0_112, %c32_113], %13 {strides = array<i32>} : memref<32x320xf32, #tpu.memory_space<vmem>>, vector<4x256xf32>,
    %c0_114 = arith.constant 0 : index
    %c32_115 = arith.constant 32 : index
    %87 = vector.load %arg19[%c0_114, %c32_115] : memref<32x320xf32, #tpu.memory_space<vmem>>, vector<4x16xf32>
    %c0_116 = arith.constant 0 : index
    %c0_117 = arith.constant 0 : index
    %88 = vector.load %arg19[%c0_116, %c0_117] : memref<32x320xf32, #tpu.memory_space<vmem>>, vector<4x16xf32>
    tpu.vector_store %arg19[%c0_116, %c0_117], %87 {strides = array<i32>} : memref<32x320xf32, #tpu.memory_space<vmem>>, vector<4x16xf32>,
    %c0_118 = arith.constant 0 : index
    %c272_119 = arith.constant 272 : index
    %89 = vector.load %arg19[%c0_118, %c272_119] : memref<32x320xf32, #tpu.memory_space<vmem>>, vector<4x16xf32>
    %c0_120 = arith.constant 0 : index
    %c288_121 = arith.constant 288 : index
    %90 = vector.load %arg19[%c0_120, %c288_121] : memref<32x320xf32, #tpu.memory_space<vmem>>, vector<4x16xf32>
    tpu.vector_store %arg19[%c0_120, %c288_121], %89 {strides = array<i32>} : memref<32x320xf32, #tpu.memory_space<vmem>>, vector<4x16xf32>,
    %c0_122 = arith.constant 0 : index
    %c32_123 = arith.constant 32 : index
    %91 = vector.load %arg19[%c0_122, %c32_123] : memref<32x320xf32, #tpu.memory_space<vmem>>, vector<4x16xf32>
    %c0_124 = arith.constant 0 : index
    %c16_125 = arith.constant 16 : index
    %92 = vector.load %arg19[%c0_124, %c16_125] : memref<32x320xf32, #tpu.memory_space<vmem>>, vector<4x16xf32>
    tpu.vector_store %arg19[%c0_124, %c16_125], %91 {strides = array<i32>} : memref<32x320xf32, #tpu.memory_space<vmem>>, vector<4x16xf32>,
    %c0_126 = arith.constant 0 : index
    %c272_127 = arith.constant 272 : index
    %93 = vector.load %arg19[%c0_126, %c272_127] : memref<32x320xf32, #tpu.memory_space<vmem>>, vector<4x16xf32>
    %c0_128 = arith.constant 0 : index
    %c304_129 = arith.constant 304 : index
    %94 = vector.load %arg19[%c0_128, %c304_129] : memref<32x320xf32, #tpu.memory_space<vmem>>, vector<4x16xf32>
    tpu.vector_store %arg19[%c0_128, %c304_129], %93 {strides = array<i32>} : memref<32x320xf32, #tpu.memory_space<vmem>>, vector<4x16xf32>,
    %c0_130 = arith.constant 0 : index
    %c0_131 = arith.constant 0 : index
    %95 = vector.load %arg19[%c0_130, %c0_131] : memref<32x320xf32, #tpu.memory_space<vmem>>, vector<4x256xf32>
    %c12 = arith.constant 12 : index
    %c0_132 = arith.constant 0 : index
    %96 = vector.load %arg18[%c12, %c0_132] : memref<289x256xf32, #tpu.memory_space<vmem>>, vector<4x256xf32>
    tpu.vector_store %arg18[%c12, %c0_132], %95 {strides = array<i32>} : memref<289x256xf32, #tpu.memory_space<vmem>>, vector<4x256xf32>,
    %c0_133 = arith.constant 0 : index
    %c16_134 = arith.constant 16 : index
    %97 = vector.load %arg19[%c0_133, %c16_134] : memref<32x320xf32, #tpu.memory_space<vmem>>, vector<4x256xf32>
    %c32_135 = arith.constant 32 : index
    %c0_136 = arith.constant 0 : index
    %98 = vector.load %arg18[%c32_135, %c0_136] : memref<289x256xf32, #tpu.memory_space<vmem>>, vector<4x256xf32>
    tpu.vector_store %arg18[%c32_135, %c0_136], %97 {strides = array<i32>} : memref<289x256xf32, #tpu.memory_space<vmem>>, vector<4x256xf32>,
    %c0_137 = arith.constant 0 : index
    %c32_138 = arith.constant 32 : index
    %99 = vector.load %arg19[%c0_137, %c32_138] : memref<32x320xf32, #tpu.memory_space<vmem>>, vector<4x256xf32>
    %c52 = arith.constant 52 : index
    %c0_139 = arith.constant 0 : index
    %100 = vector.load %arg18[%c52, %c0_139] : memref<289x256xf32, #tpu.memory_space<vmem>>, vector<4x256xf32>
    tpu.vector_store %arg18[%c52, %c0_139], %99 {strides = array<i32>} : memref<289x256xf32, #tpu.memory_space<vmem>>, vector<4x256xf32>,
    %c0_140 = arith.constant 0 : index
    %c48_141 = arith.constant 48 : index
    %101 = vector.load %arg19[%c0_140, %c48_141] : memref<32x320xf32, #tpu.memory_space<vmem>>, vector<4x256xf32>
    %c72 = arith.constant 72 : index
    %c0_142 = arith.constant 0 : index
    %102 = vector.load %arg18[%c72, %c0_142] : memref<289x256xf32, #tpu.memory_space<vmem>>, vector<4x256xf32>
    tpu.vector_store %arg18[%c72, %c0_142], %101 {strides = array<i32>} : memref<289x256xf32, #tpu.memory_space<vmem>>, vector<4x256xf32>,
    %c0_143 = arith.constant 0 : index
    %c64_144 = arith.constant 64 : index
    %103 = vector.load %arg19[%c0_143, %c64_144] : memref<32x320xf32, #tpu.memory_space<vmem>>, vector<4x256xf32>
    %c92 = arith.constant 92 : index
    %c0_145 = arith.constant 0 : index
    %104 = vector.load %arg18[%c92, %c0_145] : memref<289x256xf32, #tpu.memory_space<vmem>>, vector<4x256xf32>
    tpu.vector_store %arg18[%c92, %c0_145], %103 {strides = array<i32>} : memref<289x256xf32, #tpu.memory_space<vmem>>, vector<4x256xf32>,
    %c0_146 = arith.constant 0 : index
    %c32_147 = arith.constant 32 : index
    %105 = vector.load %arg19[%c0_146, %c32_147] : memref<32x320xf32, #tpu.memory_space<vmem>>, vector<4x256xf32>
    tpu.vector_store %arg19[%c0_146, %c32_147], %18 {strides = array<i32>} : memref<32x320xf32, #tpu.memory_space<vmem>>, vector<4x256xf32>,
    %c0_148 = arith.constant 0 : index
    %c32_149 = arith.constant 32 : index
    %106 = vector.load %arg19[%c0_148, %c32_149] : memref<32x320xf32, #tpu.memory_space<vmem>>, vector<4x16xf32>
    %c0_150 = arith.constant 0 : index
    %c0_151 = arith.constant 0 : index
    %107 = vector.load %arg19[%c0_150, %c0_151] : memref<32x320xf32, #tpu.memory_space<vmem>>, vector<4x16xf32>
    tpu.vector_store %arg19[%c0_150, %c0_151], %106 {strides = array<i32>} : memref<32x320xf32, #tpu.memory_space<vmem>>, vector<4x16xf32>,
    %c0_152 = arith.constant 0 : index
    %c272_153 = arith.constant 272 : index
    %108 = vector.load %arg19[%c0_152, %c272_153] : memref<32x320xf32, #tpu.memory_space<vmem>>, vector<4x16xf32>
    %c0_154 = arith.constant 0 : index
    %c288_155 = arith.constant 288 : index
    %109 = vector.load %arg19[%c0_154, %c288_155] : memref<32x320xf32, #tpu.memory_space<vmem>>, vector<4x16xf32>
    tpu.vector_store %arg19[%c0_154, %c288_155], %108 {strides = array<i32>} : memref<32x320xf32, #tpu.memory_space<vmem>>, vector<4x16xf32>,
    %c0_156 = arith.constant 0 : index
    %c32_157 = arith.constant 32 : index
    %110 = vector.load %arg19[%c0_156, %c32_157] : memref<32x320xf32, #tpu.memory_space<vmem>>, vector<4x16xf32>
    %c0_158 = arith.constant 0 : index
    %c16_159 = arith.constant 16 : index
    %111 = vector.load %arg19[%c0_158, %c16_159] : memref<32x320xf32, #tpu.memory_space<vmem>>, vector<4x16xf32>
    tpu.vector_store %arg19[%c0_158, %c16_159], %110 {strides = array<i32>} : memref<32x320xf32, #tpu.memory_space<vmem>>, vector<4x16xf32>,
    %c0_160 = arith.constant 0 : index
    %c272_161 = arith.constant 272 : index
    %112 = vector.load %arg19[%c0_160, %c272_161] : memref<32x320xf32, #tpu.memory_space<vmem>>, vector<4x16xf32>
    %c0_162 = arith.constant 0 : index
    %c304_163 = arith.constant 304 : index
    %113 = vector.load %arg19[%c0_162, %c304_163] : memref<32x320xf32, #tpu.memory_space<vmem>>, vector<4x16xf32>
    tpu.vector_store %arg19[%c0_162, %c304_163], %112 {strides = array<i32>} : memref<32x320xf32, #tpu.memory_space<vmem>>, vector<4x16xf32>,
    %c0_164 = arith.constant 0 : index
    %c0_165 = arith.constant 0 : index
    %114 = vector.load %arg19[%c0_164, %c0_165] : memref<32x320xf32, #tpu.memory_space<vmem>>, vector<4x256xf32>
    %c16_166 = arith.constant 16 : index
    %c0_167 = arith.constant 0 : index
    %115 = vector.load %arg18[%c16_166, %c0_167] : memref<289x256xf32, #tpu.memory_space<vmem>>, vector<4x256xf32>
    tpu.vector_store %arg18[%c16_166, %c0_167], %114 {strides = array<i32>} : memref<289x256xf32, #tpu.memory_space<vmem>>, vector<4x256xf32>,
    %c0_168 = arith.constant 0 : index
    %c16_169 = arith.constant 16 : index
    %116 = vector.load %arg19[%c0_168, %c16_169] : memref<32x320xf32, #tpu.memory_space<vmem>>, vector<4x256xf32>
    %c36 = arith.constant 36 : index
    %c0_170 = arith.constant 0 : index
    %117 = vector.load %arg18[%c36, %c0_170] : memref<289x256xf32, #tpu.memory_space<vmem>>, vector<4x256xf32>
    tpu.vector_store %arg18[%c36, %c0_170], %116 {strides = array<i32>} : memref<289x256xf32, #tpu.memory_space<vmem>>, vector<4x256xf32>,
    %c0_171 = arith.constant 0 : index
    %c32_172 = arith.constant 32 : index
    %118 = vector.load %arg19[%c0_171, %c32_172] : memref<32x320xf32, #tpu.memory_space<vmem>>, vector<4x256xf32>
    %c56 = arith.constant 56 : index
    %c0_173 = arith.constant 0 : index
    %119 = vector.load %arg18[%c56, %c0_173] : memref<289x256xf32, #tpu.memory_space<vmem>>, vector<4x256xf32>
    tpu.vector_store %arg18[%c56, %c0_173], %118 {strides = array<i32>} : memref<289x256xf32, #tpu.memory_space<vmem>>, vector<4x256xf32>,
    %c0_174 = arith.constant 0 : index
    %c48_175 = arith.constant 48 : index
    %120 = vector.load %arg19[%c0_174, %c48_175] : memref<32x320xf32, #tpu.memory_space<vmem>>, vector<4x256xf32>
    %c76 = arith.constant 76 : index
    %c0_176 = arith.constant 0 : index
    %121 = vector.load %arg18[%c76, %c0_176] : memref<289x256xf32, #tpu.memory_space<vmem>>, vector<4x256xf32>
    tpu.vector_store %arg18[%c76, %c0_176], %120 {strides = array<i32>} : memref<289x256xf32, #tpu.memory_space<vmem>>, vector<4x256xf32>,
    %c0_177 = arith.constant 0 : index
    %c64_178 = arith.constant 64 : index
    %122 = vector.load %arg19[%c0_177, %c64_178] : memref<32x320xf32, #tpu.memory_space<vmem>>, vector<4x256xf32>
    %c96 = arith.constant 96 : index
    %c0_179 = arith.constant 0 : index
    %123 = vector.load %arg18[%c96, %c0_179] : memref<289x256xf32, #tpu.memory_space<vmem>>, vector<4x256xf32>
    tpu.vector_store %arg18[%c96, %c0_179], %122 {strides = array<i32>} : memref<289x256xf32, #tpu.memory_space<vmem>>, vector<4x256xf32>,
    %cst = arith.constant 1.000000e+00 : f32
    %124 = vector.broadcast %cst : f32 to vector<1x256xf32>
    %c100 = arith.constant 100 : index
    %c0_180 = arith.constant 0 : index
    %125 = vector.load %arg18[%c100, %c0_180] : memref<289x256xf32, #tpu.memory_space<vmem>>, vector<1x256xf32>
    tpu.vector_store %arg18[%c100, %c0_180], %124 {strides = array<i32>} : memref<289x256xf32, #tpu.memory_space<vmem>>, vector<1x256xf32>,
    %c0_181 = arith.constant 0 : index
    %c0_182 = arith.constant 0 : index
    %126 = vector.load %arg3[%c0_181, %c0_182] : memref<32x101xf32, #tpu.memory_space<vmem>>, vector<32x101xf32>
    %c0_183 = arith.constant 0 : index
    %c0_184 = arith.constant 0 : index
    %127 = vector.load %arg18[%c0_183, %c0_184] : memref<289x256xf32, #tpu.memory_space<vmem>>, vector<101x256xf32>
    %cst_185 = arith.constant dense<0.000000e+00> : vector<32x256xf32>
    %128 = tpu.matmul %126, %127, %cst_185 {dimension_numbers = #tpu.dot_dimension_numbers<[1], [0], [0], [1], [0, 0, 1, 1], [], []>} : vector<32x101xf32>, vector<101x256xf32>, vector<32x256xf32> -> vector<32x256xf32>
    %cst_186 = arith.constant 0.000000e+00 : f32
    %129 = vector.broadcast %cst_186 : f32 to vector<32x256xf32>
    %130 = arith.maximumf %128, %129 : vector<32x256xf32>
    %c0_187 = arith.constant 0 : index
    %c0_188 = arith.constant 0 : index
    %c0_189 = arith.constant 0 : index
    %c0_190 = arith.constant 0 : index
    %131 = vector.load %arg2[%c0_187, %c0_188, %c0_189, %c0_190] : memref<1x2x32x256xf32, #tpu.memory_space<vmem>>, vector<1x1x32x256xf32>
    %132 = vector.shape_cast %131 : vector<1x1x32x256xf32> to vector<32x256xf32>
    %c0_191 = arith.constant 0 : index
    %c0_192 = arith.constant 0 : index
    %c0_193 = arith.constant 0 : index
    %133 = vector.load %arg6[%c0_191, %c0_192, %c0_193] : memref<2x32x32xf32, #tpu.memory_space<vmem>>, vector<1x32x32xf32>
    %134 = vector.shape_cast %133 : vector<1x32x32xf32> to vector<32x32xf32>
    %cst_194 = arith.constant dense<0.000000e+00> : vector<32x256xf32>
    %135 = tpu.matmul %134, %130, %cst_194 {dimension_numbers = #tpu.dot_dimension_numbers<[1], [0], [0], [1], [0, 0, 1, 1], [], []>} : vector<32x32xf32>, vector<32x256xf32>, vector<32x256xf32> -> vector<32x256xf32>
    %c0_195 = arith.constant 0 : index
    %c0_196 = arith.constant 0 : index
    %c0_197 = arith.constant 0 : index
    %136 = vector.load %arg7[%c0_195, %c0_196, %c0_197] : memref<2x32x32xf32, #tpu.memory_space<vmem>>, vector<1x32x32xf32>
    %137 = vector.shape_cast %136 : vector<1x32x32xf32> to vector<32x32xf32>
    %cst_198 = arith.constant dense<0.000000e+00> : vector<32x256xf32>
    %138 = tpu.matmul %137, %132, %cst_198 {dimension_numbers = #tpu.dot_dimension_numbers<[1], [0], [0], [1], [0, 0, 1, 1], [], []>} : vector<32x32xf32>, vector<32x256xf32>, vector<32x256xf32> -> vector<32x256xf32>
    %139 = arith.addf %135, %138 : vector<32x256xf32>
    %c0_199 = arith.constant 0 : index
    %c0_200 = arith.constant 0 : index
    %c0_201 = arith.constant 0 : index
    %140 = vector.load %arg8[%c0_199, %c0_200, %c0_201] : memref<2x32x1xf32, #tpu.memory_space<vmem>>, vector<1x32x1xf32>
    %141 = vector.shape_cast %140 : vector<1x32x1xf32> to vector<32x1xf32>
    %142 = vector.broadcast %141 : vector<32x1xf32> to vector<32x256xf32>
    %143 = arith.addf %139, %142 : vector<32x256xf32>
    %cst_202 = arith.constant dense<0.000000e+00> : vector<32xf32>
    %144 = vector.multi_reduction <add>, %143, %cst_202 [1] : vector<32x256xf32> to vector<32xf32>
    %145 = vector.shape_cast %144 : vector<32xf32> to vector<32x1xf32>
    %cst_203 = arith.constant 2.560000e+02 : f32
    %146 = vector.broadcast %cst_203 : f32 to vector<32x1xf32>
    %147 = arith.divf %145, %146 : vector<32x1xf32>
    %c0_204 = arith.constant 0 : index
    %c0_205 = arith.constant 0 : index
    %c0_206 = arith.constant 0 : index
    %148 = vector.load %arg9[%c0_204, %c0_205, %c0_206] : memref<2x8x32xf32, #tpu.memory_space<vmem>>, vector<1x8x32xf32>
    %149 = vector.shape_cast %148 : vector<1x8x32xf32> to vector<8x32xf32>
    %cst_207 = arith.constant dense<0.000000e+00> : vector<8x1xf32>
    %150 = tpu.matmul %149, %147, %cst_207 {dimension_numbers = #tpu.dot_dimension_numbers<[1], [0], [0], [1], [0, 0, 1, 1], [], []>} : vector<8x32xf32>, vector<32x1xf32>, vector<8x1xf32> -> vector<8x1xf32>
    %cst_208 = arith.constant 0.000000e+00 : f32
    %151 = vector.broadcast %cst_208 : f32 to vector<8x1xf32>
    %152 = arith.maximumf %150, %151 : vector<8x1xf32>
    %c0_209 = arith.constant 0 : index
    %c0_210 = arith.constant 0 : index
    %c0_211 = arith.constant 0 : index
    %153 = vector.load %arg10[%c0_209, %c0_210, %c0_211] : memref<2x32x8xf32, #tpu.memory_space<vmem>>, vector<1x32x8xf32>
    %154 = vector.shape_cast %153 : vector<1x32x8xf32> to vector<32x8xf32>
    %cst_212 = arith.constant dense<0.000000e+00> : vector<32x1xf32>
    %155 = tpu.matmul %154, %152, %cst_212 {dimension_numbers = #tpu.dot_dimension_numbers<[1], [0], [0], [1], [0, 0, 1, 1], [], []>} : vector<32x8xf32>, vector<8x1xf32>, vector<32x1xf32> -> vector<32x1xf32>
    %156 = arith.negf %155 : vector<32x1xf32>
    %157 = math.exp %156 : vector<32x1xf32>
    %cst_213 = arith.constant 1.000000e+00 : f32
    %158 = vector.broadcast %cst_213 : f32 to vector<32x1xf32>
    %159 = arith.addf %158, %157 : vector<32x1xf32>
    %160 = arith.divf %158, %159 : vector<32x1xf32>
    %161 = vector.broadcast %160 : vector<32x1xf32> to vector<32x256xf32>
    %162 = arith.mulf %161, %143 : vector<32x256xf32>
    %163 = arith.negf %162 : vector<32x256xf32>
    %164 = math.exp %163 : vector<32x256xf32>
    %cst_214 = arith.constant 1.000000e+00 : f32
    %165 = vector.broadcast %cst_214 : f32 to vector<32x256xf32>
    %166 = arith.addf %165, %164 : vector<32x256xf32>
    %167 = arith.divf %165, %166 : vector<32x256xf32>
    %c0_215 = arith.constant 0 : index
    %c0_216 = arith.constant 0 : index
    %c0_217 = arith.constant 0 : index
    %168 = vector.load %arg11[%c0_215, %c0_216, %c0_217] : memref<2x32x32xf32, #tpu.memory_space<vmem>>, vector<1x32x32xf32>
    %169 = vector.shape_cast %168 : vector<1x32x32xf32> to vector<32x32xf32>
    %cst_218 = arith.constant dense<0.000000e+00> : vector<32x256xf32>
    %170 = tpu.matmul %169, %130, %cst_218 {dimension_numbers = #tpu.dot_dimension_numbers<[1], [0], [0], [1], [0, 0, 1, 1], [], []>} : vector<32x32xf32>, vector<32x256xf32>, vector<32x256xf32> -> vector<32x256xf32>
    %c0_219 = arith.constant 0 : index
    %c0_220 = arith.constant 0 : index
    %c0_221 = arith.constant 0 : index
    %171 = vector.load %arg12[%c0_219, %c0_220, %c0_221] : memref<2x32x32xf32, #tpu.memory_space<vmem>>, vector<1x32x32xf32>
    %172 = vector.shape_cast %171 : vector<1x32x32xf32> to vector<32x32xf32>
    %173 = arith.mulf %132, %167 : vector<32x256xf32>
    %cst_222 = arith.constant dense<0.000000e+00> : vector<32x256xf32>
    %174 = tpu.matmul %172, %173, %cst_222 {dimension_numbers = #tpu.dot_dimension_numbers<[1], [0], [0], [1], [0, 0, 1, 1], [], []>} : vector<32x32xf32>, vector<32x256xf32>, vector<32x256xf32> -> vector<32x256xf32>
    %175 = arith.addf %170, %174 : vector<32x256xf32>
    %c0_223 = arith.constant 0 : index
    %c0_224 = arith.constant 0 : index
    %c0_225 = arith.constant 0 : index
    %176 = vector.load %arg13[%c0_223, %c0_224, %c0_225] : memref<2x32x1xf32, #tpu.memory_space<vmem>>, vector<1x32x1xf32>
    %177 = vector.shape_cast %176 : vector<1x32x1xf32> to vector<32x1xf32>
    %178 = vector.broadcast %177 : vector<32x1xf32> to vector<32x256xf32>
    %179 = arith.addf %175, %178 : vector<32x256xf32>
    %cst_226 = arith.constant dense<0.000000e+00> : vector<32xf32>
    %180 = vector.multi_reduction <add>, %179, %cst_226 [1] : vector<32x256xf32> to vector<32xf32>
    %181 = vector.shape_cast %180 : vector<32xf32> to vector<32x1xf32>
    %cst_227 = arith.constant 2.560000e+02 : f32
    %182 = vector.broadcast %cst_227 : f32 to vector<32x1xf32>
    %183 = arith.divf %181, %182 : vector<32x1xf32>
    %c0_228 = arith.constant 0 : index
    %c0_229 = arith.constant 0 : index
    %c0_230 = arith.constant 0 : index
    %184 = vector.load %arg14[%c0_228, %c0_229, %c0_230] : memref<2x8x32xf32, #tpu.memory_space<vmem>>, vector<1x8x32xf32>
    %185 = vector.shape_cast %184 : vector<1x8x32xf32> to vector<8x32xf32>
    %cst_231 = arith.constant dense<0.000000e+00> : vector<8x1xf32>
    %186 = tpu.matmul %185, %183, %cst_231 {dimension_numbers = #tpu.dot_dimension_numbers<[1], [0], [0], [1], [0, 0, 1, 1], [], []>} : vector<8x32xf32>, vector<32x1xf32>, vector<8x1xf32> -> vector<8x1xf32>
    %cst_232 = arith.constant 0.000000e+00 : f32
    %187 = vector.broadcast %cst_232 : f32 to vector<8x1xf32>
    %188 = arith.maximumf %186, %187 : vector<8x1xf32>
    %c0_233 = arith.constant 0 : index
    %c0_234 = arith.constant 0 : index
    %c0_235 = arith.constant 0 : index
    %189 = vector.load %arg15[%c0_233, %c0_234, %c0_235] : memref<2x32x8xf32, #tpu.memory_space<vmem>>, vector<1x32x8xf32>
    %190 = vector.shape_cast %189 : vector<1x32x8xf32> to vector<32x8xf32>
    %cst_236 = arith.constant dense<0.000000e+00> : vector<32x1xf32>
    %191 = tpu.matmul %190, %188, %cst_236 {dimension_numbers = #tpu.dot_dimension_numbers<[1], [0], [0], [1], [0, 0, 1, 1], [], []>} : vector<32x8xf32>, vector<8x1xf32>, vector<32x1xf32> -> vector<32x1xf32>
    %192 = arith.negf %191 : vector<32x1xf32>
    %193 = math.exp %192 : vector<32x1xf32>
    %cst_237 = arith.constant 1.000000e+00 : f32
    %194 = vector.broadcast %cst_237 : f32 to vector<32x1xf32>
    %195 = arith.addf %194, %193 : vector<32x1xf32>
    %196 = arith.divf %194, %195 : vector<32x1xf32>
    %197 = vector.broadcast %196 : vector<32x1xf32> to vector<32x256xf32>
    %198 = arith.mulf %197, %179 : vector<32x256xf32>
    %199 = math.tanh %198 : vector<32x256xf32>
    %cst_238 = arith.constant 1.000000e+00 : f32
    %200 = vector.broadcast %cst_238 : f32 to vector<32x256xf32>
    %201 = arith.subf %200, %167 : vector<32x256xf32>
    %202 = arith.mulf %132, %201 : vector<32x256xf32>
    %203 = arith.mulf %199, %167 : vector<32x256xf32>
    %204 = arith.addf %202, %203 : vector<32x256xf32>
    %c0_239 = arith.constant 0 : index
    %c0_240 = arith.constant 0 : index
    %c0_241 = arith.constant 0 : index
    %c0_242 = arith.constant 0 : index
    %205 = vector.load %arg17[%c0_239, %c0_240, %c0_241, %c0_242] : memref<1x2x32x256xf32, #tpu.memory_space<vmem>>, vector<1x1x32x256xf32>
    %206 = vector.shape_cast %205 : vector<1x1x32x256xf32> to vector<32x256xf32>
    %207 = vector.shape_cast %204 : vector<32x256xf32> to vector<1x1x32x256xf32>
    tpu.vector_store %arg17[%c0_239, %c0_240, %c0_241, %c0_242], %207 {strides = array<i32>} : memref<1x2x32x256xf32, #tpu.memory_space<vmem>>, vector<1x1x32x256xf32>,
    %cst_243 = arith.constant 0.000000e+00 : f32
    %208 = vector.broadcast %cst_243 : f32 to vector<32x256xf32>
    %209 = arith.maximumf %204, %208 : vector<32x256xf32>
    %c0_244 = arith.constant 0 : index
    %c32_245 = arith.constant 32 : index
    %210 = vector.load %arg19[%c0_244, %c32_245] : memref<32x320xf32, #tpu.memory_space<vmem>>, vector<32x256xf32>
    tpu.vector_store %arg19[%c0_244, %c32_245], %209 {strides = array<i32>} : memref<32x320xf32, #tpu.memory_space<vmem>>, vector<32x256xf32>,
    %c0_246 = arith.constant 0 : index
    %c33_247 = arith.constant 33 : index
    %211 = vector.load %arg19[%c0_246, %c33_247] : memref<32x320xf32, #tpu.memory_space<vmem>>, vector<32x256xf32>
    %212 = vector.shape_cast %6 : vector<1x256xi1> to vector<1x256xi1>
    %213 = vector.broadcast %212 : vector<1x256xi1> to vector<32x256xi1>
    %214 = arith.select %213, %209, %211 : vector<32x256xi1>, vector<32x256xf32>
    %c0_248 = arith.constant 0 : index
    %c32_249 = arith.constant 32 : index
    %215 = vector.load %arg19[%c0_248, %c32_249] : memref<32x320xf32, #tpu.memory_space<vmem>>, vector<32x256xf32>
    tpu.vector_store %arg19[%c0_248, %c32_249], %214 {strides = array<i32>} : memref<32x320xf32, #tpu.memory_space<vmem>>, vector<32x256xf32>,
    %c0_250 = arith.constant 0 : index
    %c33_251 = arith.constant 33 : index
    %216 = vector.load %arg19[%c0_250, %c33_251] : memref<32x320xf32, #tpu.memory_space<vmem>>, vector<32x256xf32>
    %217 = vector.shape_cast %6 : vector<1x256xi1> to vector<1x256xi1>
    %218 = vector.broadcast %217 : vector<1x256xi1> to vector<32x256xi1>
    %219 = arith.select %218, %214, %216 : vector<32x256xi1>, vector<32x256xf32>
    %c0_252 = arith.constant 0 : index
    %c32_253 = arith.constant 32 : index
    %220 = vector.load %arg19[%c0_252, %c32_253] : memref<32x320xf32, #tpu.memory_space<vmem>>, vector<32x256xf32>
    tpu.vector_store %arg19[%c0_252, %c32_253], %209 {strides = array<i32>} : memref<32x320xf32, #tpu.memory_space<vmem>>, vector<32x256xf32>,
    %c0_254 = arith.constant 0 : index
    %c31_255 = arith.constant 31 : index
    %221 = vector.load %arg19[%c0_254, %c31_255] : memref<32x320xf32, #tpu.memory_space<vmem>>, vector<32x256xf32>
    %222 = vector.shape_cast %4 : vector<1x256xi1> to vector<1x256xi1>
    %223 = vector.broadcast %222 : vector<1x256xi1> to vector<32x256xi1>
    %224 = arith.select %223, %209, %221 : vector<32x256xi1>, vector<32x256xf32>
    %c0_256 = arith.constant 0 : index
    %c32_257 = arith.constant 32 : index
    %225 = vector.load %arg19[%c0_256, %c32_257] : memref<32x320xf32, #tpu.memory_space<vmem>>, vector<32x256xf32>
    tpu.vector_store %arg19[%c0_256, %c32_257], %224 {strides = array<i32>} : memref<32x320xf32, #tpu.memory_space<vmem>>, vector<32x256xf32>,
    %c0_258 = arith.constant 0 : index
    %c31_259 = arith.constant 31 : index
    %226 = vector.load %arg19[%c0_258, %c31_259] : memref<32x320xf32, #tpu.memory_space<vmem>>, vector<32x256xf32>
    %227 = vector.shape_cast %4 : vector<1x256xi1> to vector<1x256xi1>
    %228 = vector.broadcast %227 : vector<1x256xi1> to vector<32x256xi1>
    %229 = arith.select %228, %224, %226 : vector<32x256xi1>, vector<32x256xf32>
    %c0_260 = arith.constant 0 : index
    %c32_261 = arith.constant 32 : index
    %230 = vector.load %arg19[%c0_260, %c32_261] : memref<32x320xf32, #tpu.memory_space<vmem>>, vector<32x256xf32>
    tpu.vector_store %arg19[%c0_260, %c32_261], %229 {strides = array<i32>} : memref<32x320xf32, #tpu.memory_space<vmem>>, vector<32x256xf32>,
    %c0_262 = arith.constant 0 : index
    %c32_263 = arith.constant 32 : index
    %231 = vector.load %arg19[%c0_262, %c32_263] : memref<32x320xf32, #tpu.memory_space<vmem>>, vector<32x16xf32>
    %c0_264 = arith.constant 0 : index
    %c0_265 = arith.constant 0 : index
    %232 = vector.load %arg19[%c0_264, %c0_265] : memref<32x320xf32, #tpu.memory_space<vmem>>, vector<32x16xf32>
    tpu.vector_store %arg19[%c0_264, %c0_265], %231 {strides = array<i32>} : memref<32x320xf32, #tpu.memory_space<vmem>>, vector<32x16xf32>,
    %c0_266 = arith.constant 0 : index
    %c272_267 = arith.constant 272 : index
    %233 = vector.load %arg19[%c0_266, %c272_267] : memref<32x320xf32, #tpu.memory_space<vmem>>, vector<32x16xf32>
    %c0_268 = arith.constant 0 : index
    %c288_269 = arith.constant 288 : index
    %234 = vector.load %arg19[%c0_268, %c288_269] : memref<32x320xf32, #tpu.memory_space<vmem>>, vector<32x16xf32>
    tpu.vector_store %arg19[%c0_268, %c288_269], %233 {strides = array<i32>} : memref<32x320xf32, #tpu.memory_space<vmem>>, vector<32x16xf32>,
    %c0_270 = arith.constant 0 : index
    %c32_271 = arith.constant 32 : index
    %235 = vector.load %arg19[%c0_270, %c32_271] : memref<32x320xf32, #tpu.memory_space<vmem>>, vector<32x16xf32>
    %c0_272 = arith.constant 0 : index
    %c16_273 = arith.constant 16 : index
    %236 = vector.load %arg19[%c0_272, %c16_273] : memref<32x320xf32, #tpu.memory_space<vmem>>, vector<32x16xf32>
    tpu.vector_store %arg19[%c0_272, %c16_273], %235 {strides = array<i32>} : memref<32x320xf32, #tpu.memory_space<vmem>>, vector<32x16xf32>,
    %c0_274 = arith.constant 0 : index
    %c272_275 = arith.constant 272 : index
    %237 = vector.load %arg19[%c0_274, %c272_275] : memref<32x320xf32, #tpu.memory_space<vmem>>, vector<32x16xf32>
    %c0_276 = arith.constant 0 : index
    %c304_277 = arith.constant 304 : index
    %238 = vector.load %arg19[%c0_276, %c304_277] : memref<32x320xf32, #tpu.memory_space<vmem>>, vector<32x16xf32>
    tpu.vector_store %arg19[%c0_276, %c304_277], %237 {strides = array<i32>} : memref<32x320xf32, #tpu.memory_space<vmem>>, vector<32x16xf32>,
    %c0_278 = arith.constant 0 : index
    %c0_279 = arith.constant 0 : index
    %239 = vector.load %arg19[%c0_278, %c0_279] : memref<32x320xf32, #tpu.memory_space<vmem>>, vector<32x256xf32>
    %c0_280 = arith.constant 0 : index
    %c0_281 = arith.constant 0 : index
    %240 = vector.load %arg18[%c0_280, %c0_281] : memref<289x256xf32, #tpu.memory_space<vmem>>, vector<32x256xf32>
    tpu.vector_store %arg18[%c0_280, %c0_281], %239 {strides = array<i32>} : memref<289x256xf32, #tpu.memory_space<vmem>>, vector<32x256xf32>,
    %c0_282 = arith.constant 0 : index
    %c32_283 = arith.constant 32 : index
    %241 = vector.load %arg19[%c0_282, %c32_283] : memref<32x320xf32, #tpu.memory_space<vmem>>, vector<32x256xf32>
    %c96_284 = arith.constant 96 : index
    %c0_285 = arith.constant 0 : index
    %242 = vector.load %arg18[%c96_284, %c0_285] : memref<289x256xf32, #tpu.memory_space<vmem>>, vector<32x256xf32>
    tpu.vector_store %arg18[%c96_284, %c0_285], %241 {strides = array<i32>} : memref<289x256xf32, #tpu.memory_space<vmem>>, vector<32x256xf32>,
    %c0_286 = arith.constant 0 : index
    %c64_287 = arith.constant 64 : index
    %243 = vector.load %arg19[%c0_286, %c64_287] : memref<32x320xf32, #tpu.memory_space<vmem>>, vector<32x256xf32>
    %c192 = arith.constant 192 : index
    %c0_288 = arith.constant 0 : index
    %244 = vector.load %arg18[%c192, %c0_288] : memref<289x256xf32, #tpu.memory_space<vmem>>, vector<32x256xf32>
    tpu.vector_store %arg18[%c192, %c0_288], %243 {strides = array<i32>} : memref<289x256xf32, #tpu.memory_space<vmem>>, vector<32x256xf32>,
    %c0_289 = arith.constant 0 : index
    %c32_290 = arith.constant 32 : index
    %245 = vector.load %arg19[%c0_289, %c32_290] : memref<32x320xf32, #tpu.memory_space<vmem>>, vector<32x256xf32>
    tpu.vector_store %arg19[%c0_289, %c32_290], %209 {strides = array<i32>} : memref<32x320xf32, #tpu.memory_space<vmem>>, vector<32x256xf32>,
    %c0_291 = arith.constant 0 : index
    %c32_292 = arith.constant 32 : index
    %246 = vector.load %arg19[%c0_291, %c32_292] : memref<32x320xf32, #tpu.memory_space<vmem>>, vector<32x16xf32>
    %c0_293 = arith.constant 0 : index
    %c0_294 = arith.constant 0 : index
    %247 = vector.load %arg19[%c0_293, %c0_294] : memref<32x320xf32, #tpu.memory_space<vmem>>, vector<32x16xf32>
    tpu.vector_store %arg19[%c0_293, %c0_294], %246 {strides = array<i32>} : memref<32x320xf32, #tpu.memory_space<vmem>>, vector<32x16xf32>,
    %c0_295 = arith.constant 0 : index
    %c272_296 = arith.constant 272 : index
    %248 = vector.load %arg19[%c0_295, %c272_296] : memref<32x320xf32, #tpu.memory_space<vmem>>, vector<32x16xf32>
    %c0_297 = arith.constant 0 : index
    %c288_298 = arith.constant 288 : index
    %249 = vector.load %arg19[%c0_297, %c288_298] : memref<32x320xf32, #tpu.memory_space<vmem>>, vector<32x16xf32>
    tpu.vector_store %arg19[%c0_297, %c288_298], %248 {strides = array<i32>} : memref<32x320xf32, #tpu.memory_space<vmem>>, vector<32x16xf32>,
    %c0_299 = arith.constant 0 : index
    %c32_300 = arith.constant 32 : index
    %250 = vector.load %arg19[%c0_299, %c32_300] : memref<32x320xf32, #tpu.memory_space<vmem>>, vector<32x16xf32>
    %c0_301 = arith.constant 0 : index
    %c16_302 = arith.constant 16 : index
    %251 = vector.load %arg19[%c0_301, %c16_302] : memref<32x320xf32, #tpu.memory_space<vmem>>, vector<32x16xf32>
    tpu.vector_store %arg19[%c0_301, %c16_302], %250 {strides = array<i32>} : memref<32x320xf32, #tpu.memory_space<vmem>>, vector<32x16xf32>,
    %c0_303 = arith.constant 0 : index
    %c272_304 = arith.constant 272 : index
    %252 = vector.load %arg19[%c0_303, %c272_304] : memref<32x320xf32, #tpu.memory_space<vmem>>, vector<32x16xf32>
    %c0_305 = arith.constant 0 : index
    %c304_306 = arith.constant 304 : index
    %253 = vector.load %arg19[%c0_305, %c304_306] : memref<32x320xf32, #tpu.memory_space<vmem>>, vector<32x16xf32>
    tpu.vector_store %arg19[%c0_305, %c304_306], %252 {strides = array<i32>} : memref<32x320xf32, #tpu.memory_space<vmem>>, vector<32x16xf32>,
    %c0_307 = arith.constant 0 : index
    %c0_308 = arith.constant 0 : index
    %254 = vector.load %arg19[%c0_307, %c0_308] : memref<32x320xf32, #tpu.memory_space<vmem>>, vector<32x256xf32>
    %c32_309 = arith.constant 32 : index
    %c0_310 = arith.constant 0 : index
    %255 = vector.load %arg18[%c32_309, %c0_310] : memref<289x256xf32, #tpu.memory_space<vmem>>, vector<32x256xf32>
    tpu.vector_store %arg18[%c32_309, %c0_310], %254 {strides = array<i32>} : memref<289x256xf32, #tpu.memory_space<vmem>>, vector<32x256xf32>,
    %c0_311 = arith.constant 0 : index
    %c32_312 = arith.constant 32 : index
    %256 = vector.load %arg19[%c0_311, %c32_312] : memref<32x320xf32, #tpu.memory_space<vmem>>, vector<32x256xf32>
    %c128 = arith.constant 128 : index
    %c0_313 = arith.constant 0 : index
    %257 = vector.load %arg18[%c128, %c0_313] : memref<289x256xf32, #tpu.memory_space<vmem>>, vector<32x256xf32>
    tpu.vector_store %arg18[%c128, %c0_313], %256 {strides = array<i32>} : memref<289x256xf32, #tpu.memory_space<vmem>>, vector<32x256xf32>,
    %c0_314 = arith.constant 0 : index
    %c64_315 = arith.constant 64 : index
    %258 = vector.load %arg19[%c0_314, %c64_315] : memref<32x320xf32, #tpu.memory_space<vmem>>, vector<32x256xf32>
    %c224 = arith.constant 224 : index
    %c0_316 = arith.constant 0 : index
    %259 = vector.load %arg18[%c224, %c0_316] : memref<289x256xf32, #tpu.memory_space<vmem>>, vector<32x256xf32>
    tpu.vector_store %arg18[%c224, %c0_316], %258 {strides = array<i32>} : memref<289x256xf32, #tpu.memory_space<vmem>>, vector<32x256xf32>,
    %c0_317 = arith.constant 0 : index
    %c32_318 = arith.constant 32 : index
    %260 = vector.load %arg19[%c0_317, %c32_318] : memref<32x320xf32, #tpu.memory_space<vmem>>, vector<32x256xf32>
    tpu.vector_store %arg19[%c0_317, %c32_318], %219 {strides = array<i32>} : memref<32x320xf32, #tpu.memory_space<vmem>>, vector<32x256xf32>,
    %c0_319 = arith.constant 0 : index
    %c32_320 = arith.constant 32 : index
    %261 = vector.load %arg19[%c0_319, %c32_320] : memref<32x320xf32, #tpu.memory_space<vmem>>, vector<32x16xf32>
    %c0_321 = arith.constant 0 : index
    %c0_322 = arith.constant 0 : index
    %262 = vector.load %arg19[%c0_321, %c0_322] : memref<32x320xf32, #tpu.memory_space<vmem>>, vector<32x16xf32>
    tpu.vector_store %arg19[%c0_321, %c0_322], %261 {strides = array<i32>} : memref<32x320xf32, #tpu.memory_space<vmem>>, vector<32x16xf32>,
    %c0_323 = arith.constant 0 : index
    %c272_324 = arith.constant 272 : index
    %263 = vector.load %arg19[%c0_323, %c272_324] : memref<32x320xf32, #tpu.memory_space<vmem>>, vector<32x16xf32>
    %c0_325 = arith.constant 0 : index
    %c288_326 = arith.constant 288 : index
    %264 = vector.load %arg19[%c0_325, %c288_326] : memref<32x320xf32, #tpu.memory_space<vmem>>, vector<32x16xf32>
    tpu.vector_store %arg19[%c0_325, %c288_326], %263 {strides = array<i32>} : memref<32x320xf32, #tpu.memory_space<vmem>>, vector<32x16xf32>,
    %c0_327 = arith.constant 0 : index
    %c32_328 = arith.constant 32 : index
    %265 = vector.load %arg19[%c0_327, %c32_328] : memref<32x320xf32, #tpu.memory_space<vmem>>, vector<32x16xf32>
    %c0_329 = arith.constant 0 : index
    %c16_330 = arith.constant 16 : index
    %266 = vector.load %arg19[%c0_329, %c16_330] : memref<32x320xf32, #tpu.memory_space<vmem>>, vector<32x16xf32>
    tpu.vector_store %arg19[%c0_329, %c16_330], %265 {strides = array<i32>} : memref<32x320xf32, #tpu.memory_space<vmem>>, vector<32x16xf32>,
    %c0_331 = arith.constant 0 : index
    %c272_332 = arith.constant 272 : index
    %267 = vector.load %arg19[%c0_331, %c272_332] : memref<32x320xf32, #tpu.memory_space<vmem>>, vector<32x16xf32>
    %c0_333 = arith.constant 0 : index
    %c304_334 = arith.constant 304 : index
    %268 = vector.load %arg19[%c0_333, %c304_334] : memref<32x320xf32, #tpu.memory_space<vmem>>, vector<32x16xf32>
    tpu.vector_store %arg19[%c0_333, %c304_334], %267 {strides = array<i32>} : memref<32x320xf32, #tpu.memory_space<vmem>>, vector<32x16xf32>,
    %c0_335 = arith.constant 0 : index
    %c0_336 = arith.constant 0 : index
    %269 = vector.load %arg19[%c0_335, %c0_336] : memref<32x320xf32, #tpu.memory_space<vmem>>, vector<32x256xf32>
    %c64_337 = arith.constant 64 : index
    %c0_338 = arith.constant 0 : index
    %270 = vector.load %arg18[%c64_337, %c0_338] : memref<289x256xf32, #tpu.memory_space<vmem>>, vector<32x256xf32>
    tpu.vector_store %arg18[%c64_337, %c0_338], %269 {strides = array<i32>} : memref<289x256xf32, #tpu.memory_space<vmem>>, vector<32x256xf32>,
    %c0_339 = arith.constant 0 : index
    %c32_340 = arith.constant 32 : index
    %271 = vector.load %arg19[%c0_339, %c32_340] : memref<32x320xf32, #tpu.memory_space<vmem>>, vector<32x256xf32>
    %c160 = arith.constant 160 : index
    %c0_341 = arith.constant 0 : index
    %272 = vector.load %arg18[%c160, %c0_341] : memref<289x256xf32, #tpu.memory_space<vmem>>, vector<32x256xf32>
    tpu.vector_store %arg18[%c160, %c0_341], %271 {strides = array<i32>} : memref<289x256xf32, #tpu.memory_space<vmem>>, vector<32x256xf32>,
    %c0_342 = arith.constant 0 : index
    %c64_343 = arith.constant 64 : index
    %273 = vector.load %arg19[%c0_342, %c64_343] : memref<32x320xf32, #tpu.memory_space<vmem>>, vector<32x256xf32>
    %c256 = arith.constant 256 : index
    %c0_344 = arith.constant 0 : index
    %274 = vector.load %arg18[%c256, %c0_344] : memref<289x256xf32, #tpu.memory_space<vmem>>, vector<32x256xf32>
    tpu.vector_store %arg18[%c256, %c0_344], %273 {strides = array<i32>} : memref<289x256xf32, #tpu.memory_space<vmem>>, vector<32x256xf32>,
    %cst_345 = arith.constant 1.000000e+00 : f32
    %275 = vector.broadcast %cst_345 : f32 to vector<1x256xf32>
    %c288_346 = arith.constant 288 : index
    %c0_347 = arith.constant 0 : index
    %276 = vector.load %arg18[%c288_346, %c0_347] : memref<289x256xf32, #tpu.memory_space<vmem>>, vector<1x256xf32>
    tpu.vector_store %arg18[%c288_346, %c0_347], %275 {strides = array<i32>} : memref<289x256xf32, #tpu.memory_space<vmem>>, vector<1x256xf32>,
    %c0_348 = arith.constant 0 : index
    %c0_349 = arith.constant 0 : index
    %277 = vector.load %arg4[%c0_348, %c0_349] : memref<32x289xf32, #tpu.memory_space<vmem>>, vector<32x289xf32>
    %c0_350 = arith.constant 0 : index
    %c0_351 = arith.constant 0 : index
    %278 = vector.load %arg18[%c0_350, %c0_351] : memref<289x256xf32, #tpu.memory_space<vmem>>, vector<289x256xf32>
    %cst_352 = arith.constant dense<0.000000e+00> : vector<32x256xf32>
    %279 = tpu.matmul %277, %278, %cst_352 {dimension_numbers = #tpu.dot_dimension_numbers<[1], [0], [0], [1], [0, 0, 1, 1], [], []>} : vector<32x289xf32>, vector<289x256xf32>, vector<32x256xf32> -> vector<32x256xf32>
    %cst_353 = arith.constant 0.000000e+00 : f32
    %280 = vector.broadcast %cst_353 : f32 to vector<32x256xf32>
    %281 = arith.maximumf %279, %280 : vector<32x256xf32>
    %c0_354 = arith.constant 0 : index
    %c1 = arith.constant 1 : index
    %c0_355 = arith.constant 0 : index
    %c0_356 = arith.constant 0 : index
    %282 = vector.load %arg2[%c0_354, %c1, %c0_355, %c0_356] : memref<1x2x32x256xf32, #tpu.memory_space<vmem>>, vector<1x1x32x256xf32>
    %283 = vector.shape_cast %282 : vector<1x1x32x256xf32> to vector<32x256xf32>
    %c1_357 = arith.constant 1 : index
    %c0_358 = arith.constant 0 : index
    %c0_359 = arith.constant 0 : index
    %284 = vector.load %arg6[%c1_357, %c0_358, %c0_359] : memref<2x32x32xf32, #tpu.memory_space<vmem>>, vector<1x32x32xf32>
    %285 = vector.shape_cast %284 : vector<1x32x32xf32> to vector<32x32xf32>
    %cst_360 = arith.constant dense<0.000000e+00> : vector<32x256xf32>
    %286 = tpu.matmul %285, %281, %cst_360 {dimension_numbers = #tpu.dot_dimension_numbers<[1], [0], [0], [1], [0, 0, 1, 1], [], []>} : vector<32x32xf32>, vector<32x256xf32>, vector<32x256xf32> -> vector<32x256xf32>
    %c1_361 = arith.constant 1 : index
    %c0_362 = arith.constant 0 : index
    %c0_363 = arith.constant 0 : index
    %287 = vector.load %arg7[%c1_361, %c0_362, %c0_363] : memref<2x32x32xf32, #tpu.memory_space<vmem>>, vector<1x32x32xf32>
    %288 = vector.shape_cast %287 : vector<1x32x32xf32> to vector<32x32xf32>
    %cst_364 = arith.constant dense<0.000000e+00> : vector<32x256xf32>
    %289 = tpu.matmul %288, %283, %cst_364 {dimension_numbers = #tpu.dot_dimension_numbers<[1], [0], [0], [1], [0, 0, 1, 1], [], []>} : vector<32x32xf32>, vector<32x256xf32>, vector<32x256xf32> -> vector<32x256xf32>
    %290 = arith.addf %286, %289 : vector<32x256xf32>
    %c1_365 = arith.constant 1 : index
    %c0_366 = arith.constant 0 : index
    %c0_367 = arith.constant 0 : index
    %291 = vector.load %arg8[%c1_365, %c0_366, %c0_367] : memref<2x32x1xf32, #tpu.memory_space<vmem>>, vector<1x32x1xf32>
    %292 = vector.shape_cast %291 : vector<1x32x1xf32> to vector<32x1xf32>
    %293 = vector.broadcast %292 : vector<32x1xf32> to vector<32x256xf32>
    %294 = arith.addf %290, %293 : vector<32x256xf32>
    %cst_368 = arith.constant dense<0.000000e+00> : vector<32xf32>
    %295 = vector.multi_reduction <add>, %294, %cst_368 [1] : vector<32x256xf32> to vector<32xf32>
    %296 = vector.shape_cast %295 : vector<32xf32> to vector<32x1xf32>
    %cst_369 = arith.constant 2.560000e+02 : f32
    %297 = vector.broadcast %cst_369 : f32 to vector<32x1xf32>
    %298 = arith.divf %296, %297 : vector<32x1xf32>
    %c1_370 = arith.constant 1 : index
    %c0_371 = arith.constant 0 : index
    %c0_372 = arith.constant 0 : index
    %299 = vector.load %arg9[%c1_370, %c0_371, %c0_372] : memref<2x8x32xf32, #tpu.memory_space<vmem>>, vector<1x8x32xf32>
    %300 = vector.shape_cast %299 : vector<1x8x32xf32> to vector<8x32xf32>
    %cst_373 = arith.constant dense<0.000000e+00> : vector<8x1xf32>
    %301 = tpu.matmul %300, %298, %cst_373 {dimension_numbers = #tpu.dot_dimension_numbers<[1], [0], [0], [1], [0, 0, 1, 1], [], []>} : vector<8x32xf32>, vector<32x1xf32>, vector<8x1xf32> -> vector<8x1xf32>
    %cst_374 = arith.constant 0.000000e+00 : f32
    %302 = vector.broadcast %cst_374 : f32 to vector<8x1xf32>
    %303 = arith.maximumf %301, %302 : vector<8x1xf32>
    %c1_375 = arith.constant 1 : index
    %c0_376 = arith.constant 0 : index
    %c0_377 = arith.constant 0 : index
    %304 = vector.load %arg10[%c1_375, %c0_376, %c0_377] : memref<2x32x8xf32, #tpu.memory_space<vmem>>, vector<1x32x8xf32>
    %305 = vector.shape_cast %304 : vector<1x32x8xf32> to vector<32x8xf32>
    %cst_378 = arith.constant dense<0.000000e+00> : vector<32x1xf32>
    %306 = tpu.matmul %305, %303, %cst_378 {dimension_numbers = #tpu.dot_dimension_numbers<[1], [0], [0], [1], [0, 0, 1, 1], [], []>} : vector<32x8xf32>, vector<8x1xf32>, vector<32x1xf32> -> vector<32x1xf32>
    %307 = arith.negf %306 : vector<32x1xf32>
    %308 = math.exp %307 : vector<32x1xf32>
    %cst_379 = arith.constant 1.000000e+00 : f32
    %309 = vector.broadcast %cst_379 : f32 to vector<32x1xf32>
    %310 = arith.addf %309, %308 : vector<32x1xf32>
    %311 = arith.divf %309, %310 : vector<32x1xf32>
    %312 = vector.broadcast %311 : vector<32x1xf32> to vector<32x256xf32>
    %313 = arith.mulf %312, %294 : vector<32x256xf32>
    %314 = arith.negf %313 : vector<32x256xf32>
    %315 = math.exp %314 : vector<32x256xf32>
    %cst_380 = arith.constant 1.000000e+00 : f32
    %316 = vector.broadcast %cst_380 : f32 to vector<32x256xf32>
    %317 = arith.addf %316, %315 : vector<32x256xf32>
    %318 = arith.divf %316, %317 : vector<32x256xf32>
    %c1_381 = arith.constant 1 : index
    %c0_382 = arith.constant 0 : index
    %c0_383 = arith.constant 0 : index
    %319 = vector.load %arg11[%c1_381, %c0_382, %c0_383] : memref<2x32x32xf32, #tpu.memory_space<vmem>>, vector<1x32x32xf32>
    %320 = vector.shape_cast %319 : vector<1x32x32xf32> to vector<32x32xf32>
    %cst_384 = arith.constant dense<0.000000e+00> : vector<32x256xf32>
    %321 = tpu.matmul %320, %281, %cst_384 {dimension_numbers = #tpu.dot_dimension_numbers<[1], [0], [0], [1], [0, 0, 1, 1], [], []>} : vector<32x32xf32>, vector<32x256xf32>, vector<32x256xf32> -> vector<32x256xf32>
    %c1_385 = arith.constant 1 : index
    %c0_386 = arith.constant 0 : index
    %c0_387 = arith.constant 0 : index
    %322 = vector.load %arg12[%c1_385, %c0_386, %c0_387] : memref<2x32x32xf32, #tpu.memory_space<vmem>>, vector<1x32x32xf32>
    %323 = vector.shape_cast %322 : vector<1x32x32xf32> to vector<32x32xf32>
    %324 = arith.mulf %283, %318 : vector<32x256xf32>
    %cst_388 = arith.constant dense<0.000000e+00> : vector<32x256xf32>
    %325 = tpu.matmul %323, %324, %cst_388 {dimension_numbers = #tpu.dot_dimension_numbers<[1], [0], [0], [1], [0, 0, 1, 1], [], []>} : vector<32x32xf32>, vector<32x256xf32>, vector<32x256xf32> -> vector<32x256xf32>
    %326 = arith.addf %321, %325 : vector<32x256xf32>
    %c1_389 = arith.constant 1 : index
    %c0_390 = arith.constant 0 : index
    %c0_391 = arith.constant 0 : index
    %327 = vector.load %arg13[%c1_389, %c0_390, %c0_391] : memref<2x32x1xf32, #tpu.memory_space<vmem>>, vector<1x32x1xf32>
    %328 = vector.shape_cast %327 : vector<1x32x1xf32> to vector<32x1xf32>
    %329 = vector.broadcast %328 : vector<32x1xf32> to vector<32x256xf32>
    %330 = arith.addf %326, %329 : vector<32x256xf32>
    %cst_392 = arith.constant dense<0.000000e+00> : vector<32xf32>
    %331 = vector.multi_reduction <add>, %330, %cst_392 [1] : vector<32x256xf32> to vector<32xf32>
    %332 = vector.shape_cast %331 : vector<32xf32> to vector<32x1xf32>
    %cst_393 = arith.constant 2.560000e+02 : f32
    %333 = vector.broadcast %cst_393 : f32 to vector<32x1xf32>
    %334 = arith.divf %332, %333 : vector<32x1xf32>
    %c1_394 = arith.constant 1 : index
    %c0_395 = arith.constant 0 : index
    %c0_396 = arith.constant 0 : index
    %335 = vector.load %arg14[%c1_394, %c0_395, %c0_396] : memref<2x8x32xf32, #tpu.memory_space<vmem>>, vector<1x8x32xf32>
    %336 = vector.shape_cast %335 : vector<1x8x32xf32> to vector<8x32xf32>
    %cst_397 = arith.constant dense<0.000000e+00> : vector<8x1xf32>
    %337 = tpu.matmul %336, %334, %cst_397 {dimension_numbers = #tpu.dot_dimension_numbers<[1], [0], [0], [1], [0, 0, 1, 1], [], []>} : vector<8x32xf32>, vector<32x1xf32>, vector<8x1xf32> -> vector<8x1xf32>
    %cst_398 = arith.constant 0.000000e+00 : f32
    %338 = vector.broadcast %cst_398 : f32 to vector<8x1xf32>
    %339 = arith.maximumf %337, %338 : vector<8x1xf32>
    %c1_399 = arith.constant 1 : index
    %c0_400 = arith.constant 0 : index
    %c0_401 = arith.constant 0 : index
    %340 = vector.load %arg15[%c1_399, %c0_400, %c0_401] : memref<2x32x8xf32, #tpu.memory_space<vmem>>, vector<1x32x8xf32>
    %341 = vector.shape_cast %340 : vector<1x32x8xf32> to vector<32x8xf32>
    %cst_402 = arith.constant dense<0.000000e+00> : vector<32x1xf32>
    %342 = tpu.matmul %341, %339, %cst_402 {dimension_numbers = #tpu.dot_dimension_numbers<[1], [0], [0], [1], [0, 0, 1, 1], [], []>} : vector<32x8xf32>, vector<8x1xf32>, vector<32x1xf32> -> vector<32x1xf32>
    %343 = arith.negf %342 : vector<32x1xf32>
    %344 = math.exp %343 : vector<32x1xf32>
    %cst_403 = arith.constant 1.000000e+00 : f32
    %345 = vector.broadcast %cst_403 : f32 to vector<32x1xf32>
    %346 = arith.addf %345, %344 : vector<32x1xf32>
    %347 = arith.divf %345, %346 : vector<32x1xf32>
    %348 = vector.broadcast %347 : vector<32x1xf32> to vector<32x256xf32>
    %349 = arith.mulf %348, %330 : vector<32x256xf32>
    %350 = math.tanh %349 : vector<32x256xf32>
    %cst_404 = arith.constant 1.000000e+00 : f32
    %351 = vector.broadcast %cst_404 : f32 to vector<32x256xf32>
    %352 = arith.subf %351, %318 : vector<32x256xf32>
    %353 = arith.mulf %283, %352 : vector<32x256xf32>
    %354 = arith.mulf %350, %318 : vector<32x256xf32>
    %355 = arith.addf %353, %354 : vector<32x256xf32>
    %c0_405 = arith.constant 0 : index
    %c1_406 = arith.constant 1 : index
    %c0_407 = arith.constant 0 : index
    %c0_408 = arith.constant 0 : index
    %356 = vector.load %arg17[%c0_405, %c1_406, %c0_407, %c0_408] : memref<1x2x32x256xf32, #tpu.memory_space<vmem>>, vector<1x1x32x256xf32>
    %357 = vector.shape_cast %356 : vector<1x1x32x256xf32> to vector<32x256xf32>
    %358 = vector.shape_cast %355 : vector<32x256xf32> to vector<1x1x32x256xf32>
    tpu.vector_store %arg17[%c0_405, %c1_406, %c0_407, %c0_408], %358 {strides = array<i32>} : memref<1x2x32x256xf32, #tpu.memory_space<vmem>>, vector<1x1x32x256xf32>,
    %cst_409 = arith.constant 0.000000e+00 : f32
    %359 = vector.broadcast %cst_409 : f32 to vector<32x256xf32>
    %360 = arith.maximumf %355, %359 : vector<32x256xf32>
    %c0_410 = arith.constant 0 : index
    %c16_411 = arith.constant 16 : index
    %361 = vector.load %arg19[%c0_410, %c16_411] : memref<32x320xf32, #tpu.memory_space<vmem>>, vector<32x256xf32>
    tpu.vector_store %arg19[%c0_410, %c16_411], %360 {strides = array<i32>} : memref<32x320xf32, #tpu.memory_space<vmem>>, vector<32x256xf32>,
    %c0_412 = arith.constant 0 : index
    %c17 = arith.constant 17 : index
    %362 = vector.load %arg19[%c0_412, %c17] : memref<32x320xf32, #tpu.memory_space<vmem>>, vector<32x256xf32>
    %363 = vector.shape_cast %6 : vector<1x256xi1> to vector<1x256xi1>
    %364 = vector.broadcast %363 : vector<1x256xi1> to vector<32x256xi1>
    %365 = arith.select %364, %360, %362 : vector<32x256xi1>, vector<32x256xf32>
    %c0_413 = arith.constant 0 : index
    %c16_414 = arith.constant 16 : index
    %366 = vector.load %arg19[%c0_413, %c16_414] : memref<32x320xf32, #tpu.memory_space<vmem>>, vector<32x256xf32>
    tpu.vector_store %arg19[%c0_413, %c16_414], %360 {strides = array<i32>} : memref<32x320xf32, #tpu.memory_space<vmem>>, vector<32x256xf32>,
    %c0_415 = arith.constant 0 : index
    %c15 = arith.constant 15 : index
    %367 = vector.load %arg19[%c0_415, %c15] : memref<32x320xf32, #tpu.memory_space<vmem>>, vector<32x256xf32>
    %368 = vector.shape_cast %4 : vector<1x256xi1> to vector<1x256xi1>
    %369 = vector.broadcast %368 : vector<1x256xi1> to vector<32x256xi1>
    %370 = arith.select %369, %360, %367 : vector<32x256xi1>, vector<32x256xf32>
    %c0_416 = arith.constant 0 : index
    %c16_417 = arith.constant 16 : index
    %371 = vector.load %arg19[%c0_416, %c16_417] : memref<32x320xf32, #tpu.memory_space<vmem>>, vector<32x256xf32>
    tpu.vector_store %arg19[%c0_416, %c16_417], %370 {strides = array<i32>} : memref<32x320xf32, #tpu.memory_space<vmem>>, vector<32x256xf32>,
    %c0_418 = arith.constant 0 : index
    %c16_419 = arith.constant 16 : index
    %372 = vector.load %arg19[%c0_418, %c16_419] : memref<32x320xf32, #tpu.memory_space<vmem>>, vector<32x16xf32>
    %c0_420 = arith.constant 0 : index
    %c0_421 = arith.constant 0 : index
    %373 = vector.load %arg19[%c0_420, %c0_421] : memref<32x320xf32, #tpu.memory_space<vmem>>, vector<32x16xf32>
    tpu.vector_store %arg19[%c0_420, %c0_421], %372 {strides = array<i32>} : memref<32x320xf32, #tpu.memory_space<vmem>>, vector<32x16xf32>,
    %c0_422 = arith.constant 0 : index
    %c256_423 = arith.constant 256 : index
    %374 = vector.load %arg19[%c0_422, %c256_423] : memref<32x320xf32, #tpu.memory_space<vmem>>, vector<32x16xf32>
    %c0_424 = arith.constant 0 : index
    %c272_425 = arith.constant 272 : index
    %375 = vector.load %arg19[%c0_424, %c272_425] : memref<32x320xf32, #tpu.memory_space<vmem>>, vector<32x16xf32>
    tpu.vector_store %arg19[%c0_424, %c272_425], %374 {strides = array<i32>} : memref<32x320xf32, #tpu.memory_space<vmem>>, vector<32x16xf32>,
    %c0_426 = arith.constant 0 : index
    %c0_427 = arith.constant 0 : index
    %376 = vector.load %arg19[%c0_426, %c0_427] : memref<32x320xf32, #tpu.memory_space<vmem>>, vector<32x256xf32>
    %c0_428 = arith.constant 0 : index
    %c0_429 = arith.constant 0 : index
    %377 = vector.load %arg18[%c0_428, %c0_429] : memref<289x256xf32, #tpu.memory_space<vmem>>, vector<32x256xf32>
    tpu.vector_store %arg18[%c0_428, %c0_429], %376 {strides = array<i32>} : memref<289x256xf32, #tpu.memory_space<vmem>>, vector<32x256xf32>,
    %c0_430 = arith.constant 0 : index
    %c16_431 = arith.constant 16 : index
    %378 = vector.load %arg19[%c0_430, %c16_431] : memref<32x320xf32, #tpu.memory_space<vmem>>, vector<32x256xf32>
    %c96_432 = arith.constant 96 : index
    %c0_433 = arith.constant 0 : index
    %379 = vector.load %arg18[%c96_432, %c0_433] : memref<289x256xf32, #tpu.memory_space<vmem>>, vector<32x256xf32>
    tpu.vector_store %arg18[%c96_432, %c0_433], %378 {strides = array<i32>} : memref<289x256xf32, #tpu.memory_space<vmem>>, vector<32x256xf32>,
    %c0_434 = arith.constant 0 : index
    %c32_435 = arith.constant 32 : index
    %380 = vector.load %arg19[%c0_434, %c32_435] : memref<32x320xf32, #tpu.memory_space<vmem>>, vector<32x256xf32>
    %c192_436 = arith.constant 192 : index
    %c0_437 = arith.constant 0 : index
    %381 = vector.load %arg18[%c192_436, %c0_437] : memref<289x256xf32, #tpu.memory_space<vmem>>, vector<32x256xf32>
    tpu.vector_store %arg18[%c192_436, %c0_437], %380 {strides = array<i32>} : memref<289x256xf32, #tpu.memory_space<vmem>>, vector<32x256xf32>,
    %c0_438 = arith.constant 0 : index
    %c16_439 = arith.constant 16 : index
    %382 = vector.load %arg19[%c0_438, %c16_439] : memref<32x320xf32, #tpu.memory_space<vmem>>, vector<32x256xf32>
    tpu.vector_store %arg19[%c0_438, %c16_439], %360 {strides = array<i32>} : memref<32x320xf32, #tpu.memory_space<vmem>>, vector<32x256xf32>,
    %c0_440 = arith.constant 0 : index
    %c16_441 = arith.constant 16 : index
    %383 = vector.load %arg19[%c0_440, %c16_441] : memref<32x320xf32, #tpu.memory_space<vmem>>, vector<32x16xf32>
    %c0_442 = arith.constant 0 : index
    %c0_443 = arith.constant 0 : index
    %384 = vector.load %arg19[%c0_442, %c0_443] : memref<32x320xf32, #tpu.memory_space<vmem>>, vector<32x16xf32>
    tpu.vector_store %arg19[%c0_442, %c0_443], %383 {strides = array<i32>} : memref<32x320xf32, #tpu.memory_space<vmem>>, vector<32x16xf32>,
    %c0_444 = arith.constant 0 : index
    %c256_445 = arith.constant 256 : index
    %385 = vector.load %arg19[%c0_444, %c256_445] : memref<32x320xf32, #tpu.memory_space<vmem>>, vector<32x16xf32>
    %c0_446 = arith.constant 0 : index
    %c272_447 = arith.constant 272 : index
    %386 = vector.load %arg19[%c0_446, %c272_447] : memref<32x320xf32, #tpu.memory_space<vmem>>, vector<32x16xf32>
    tpu.vector_store %arg19[%c0_446, %c272_447], %385 {strides = array<i32>} : memref<32x320xf32, #tpu.memory_space<vmem>>, vector<32x16xf32>,
    %c0_448 = arith.constant 0 : index
    %c0_449 = arith.constant 0 : index
    %387 = vector.load %arg19[%c0_448, %c0_449] : memref<32x320xf32, #tpu.memory_space<vmem>>, vector<32x256xf32>
    %c32_450 = arith.constant 32 : index
    %c0_451 = arith.constant 0 : index
    %388 = vector.load %arg18[%c32_450, %c0_451] : memref<289x256xf32, #tpu.memory_space<vmem>>, vector<32x256xf32>
    tpu.vector_store %arg18[%c32_450, %c0_451], %387 {strides = array<i32>} : memref<289x256xf32, #tpu.memory_space<vmem>>, vector<32x256xf32>,
    %c0_452 = arith.constant 0 : index
    %c16_453 = arith.constant 16 : index
    %389 = vector.load %arg19[%c0_452, %c16_453] : memref<32x320xf32, #tpu.memory_space<vmem>>, vector<32x256xf32>
    %c128_454 = arith.constant 128 : index
    %c0_455 = arith.constant 0 : index
    %390 = vector.load %arg18[%c128_454, %c0_455] : memref<289x256xf32, #tpu.memory_space<vmem>>, vector<32x256xf32>
    tpu.vector_store %arg18[%c128_454, %c0_455], %389 {strides = array<i32>} : memref<289x256xf32, #tpu.memory_space<vmem>>, vector<32x256xf32>,
    %c0_456 = arith.constant 0 : index
    %c32_457 = arith.constant 32 : index
    %391 = vector.load %arg19[%c0_456, %c32_457] : memref<32x320xf32, #tpu.memory_space<vmem>>, vector<32x256xf32>
    %c224_458 = arith.constant 224 : index
    %c0_459 = arith.constant 0 : index
    %392 = vector.load %arg18[%c224_458, %c0_459] : memref<289x256xf32, #tpu.memory_space<vmem>>, vector<32x256xf32>
    tpu.vector_store %arg18[%c224_458, %c0_459], %391 {strides = array<i32>} : memref<289x256xf32, #tpu.memory_space<vmem>>, vector<32x256xf32>,
    %c0_460 = arith.constant 0 : index
    %c16_461 = arith.constant 16 : index
    %393 = vector.load %arg19[%c0_460, %c16_461] : memref<32x320xf32, #tpu.memory_space<vmem>>, vector<32x256xf32>
    tpu.vector_store %arg19[%c0_460, %c16_461], %365 {strides = array<i32>} : memref<32x320xf32, #tpu.memory_space<vmem>>, vector<32x256xf32>,
    %c0_462 = arith.constant 0 : index
    %c16_463 = arith.constant 16 : index
    %394 = vector.load %arg19[%c0_462, %c16_463] : memref<32x320xf32, #tpu.memory_space<vmem>>, vector<32x16xf32>
    %c0_464 = arith.constant 0 : index
    %c0_465 = arith.constant 0 : index
    %395 = vector.load %arg19[%c0_464, %c0_465] : memref<32x320xf32, #tpu.memory_space<vmem>>, vector<32x16xf32>
    tpu.vector_store %arg19[%c0_464, %c0_465], %394 {strides = array<i32>} : memref<32x320xf32, #tpu.memory_space<vmem>>, vector<32x16xf32>,
    %c0_466 = arith.constant 0 : index
    %c256_467 = arith.constant 256 : index
    %396 = vector.load %arg19[%c0_466, %c256_467] : memref<32x320xf32, #tpu.memory_space<vmem>>, vector<32x16xf32>
    %c0_468 = arith.constant 0 : index
    %c272_469 = arith.constant 272 : index
    %397 = vector.load %arg19[%c0_468, %c272_469] : memref<32x320xf32, #tpu.memory_space<vmem>>, vector<32x16xf32>
    tpu.vector_store %arg19[%c0_468, %c272_469], %396 {strides = array<i32>} : memref<32x320xf32, #tpu.memory_space<vmem>>, vector<32x16xf32>,
    %c0_470 = arith.constant 0 : index
    %c0_471 = arith.constant 0 : index
    %398 = vector.load %arg19[%c0_470, %c0_471] : memref<32x320xf32, #tpu.memory_space<vmem>>, vector<32x256xf32>
    %c64_472 = arith.constant 64 : index
    %c0_473 = arith.constant 0 : index
    %399 = vector.load %arg18[%c64_472, %c0_473] : memref<289x256xf32, #tpu.memory_space<vmem>>, vector<32x256xf32>
    tpu.vector_store %arg18[%c64_472, %c0_473], %398 {strides = array<i32>} : memref<289x256xf32, #tpu.memory_space<vmem>>, vector<32x256xf32>,
    %c0_474 = arith.constant 0 : index
    %c16_475 = arith.constant 16 : index
    %400 = vector.load %arg19[%c0_474, %c16_475] : memref<32x320xf32, #tpu.memory_space<vmem>>, vector<32x256xf32>
    %c160_476 = arith.constant 160 : index
    %c0_477 = arith.constant 0 : index
    %401 = vector.load %arg18[%c160_476, %c0_477] : memref<289x256xf32, #tpu.memory_space<vmem>>, vector<32x256xf32>
    tpu.vector_store %arg18[%c160_476, %c0_477], %400 {strides = array<i32>} : memref<289x256xf32, #tpu.memory_space<vmem>>, vector<32x256xf32>,
    %c0_478 = arith.constant 0 : index
    %c32_479 = arith.constant 32 : index
    %402 = vector.load %arg19[%c0_478, %c32_479] : memref<32x320xf32, #tpu.memory_space<vmem>>, vector<32x256xf32>
    %c256_480 = arith.constant 256 : index
    %c0_481 = arith.constant 0 : index
    %403 = vector.load %arg18[%c256_480, %c0_481] : memref<289x256xf32, #tpu.memory_space<vmem>>, vector<32x256xf32>
    tpu.vector_store %arg18[%c256_480, %c0_481], %402 {strides = array<i32>} : memref<289x256xf32, #tpu.memory_space<vmem>>, vector<32x256xf32>,
    %cst_482 = arith.constant 1.000000e+00 : f32
    %404 = vector.broadcast %cst_482 : f32 to vector<1x256xf32>
    %c288_483 = arith.constant 288 : index
    %c0_484 = arith.constant 0 : index
    %405 = vector.load %arg18[%c288_483, %c0_484] : memref<289x256xf32, #tpu.memory_space<vmem>>, vector<1x256xf32>
    tpu.vector_store %arg18[%c288_483, %c0_484], %404 {strides = array<i32>} : memref<289x256xf32, #tpu.memory_space<vmem>>, vector<1x256xf32>,
    %c0_485 = arith.constant 0 : index
    %c0_486 = arith.constant 0 : index
    %406 = vector.load %arg5[%c0_485, %c0_486] : memref<4x289xf32, #tpu.memory_space<vmem>>, vector<4x289xf32>
    %c0_487 = arith.constant 0 : index
    %c0_488 = arith.constant 0 : index
    %407 = vector.load %arg18[%c0_487, %c0_488] : memref<289x256xf32, #tpu.memory_space<vmem>>, vector<289x256xf32>
    %cst_489 = arith.constant dense<0.000000e+00> : vector<4x256xf32>
    %408 = tpu.matmul %406, %407, %cst_489 {dimension_numbers = #tpu.dot_dimension_numbers<[1], [0], [0], [1], [0, 0, 1, 1], [], []>} : vector<4x289xf32>, vector<289x256xf32>, vector<4x256xf32> -> vector<4x256xf32>
    %c0_490 = arith.constant 0 : index
    %c0_491 = arith.constant 0 : index
    %c0_492 = arith.constant 0 : index
    %409 = vector.load %arg16[%c0_490, %c0_491, %c0_492] : memref<1x4x256xf32, #tpu.memory_space<vmem>>, vector<1x4x256xf32>
    %410 = vector.shape_cast %409 : vector<1x4x256xf32> to vector<4x256xf32>
    %411 = vector.shape_cast %408 : vector<4x256xf32> to vector<1x4x256xf32>
    tpu.vector_store %arg16[%c0_490, %c0_491, %c0_492], %411 {strides = array<i32>} : memref<1x4x256xf32, #tpu.memory_space<vmem>>, vector<1x4x256xf32>,
    return
  }
  func.func @transform_0(%arg0: i32) -> (i32, i32, i32) {
    %c0_i32 = arith.constant 0 : i32
    %c0_i32_0 = arith.constant 0 : i32
    %c0_i32_1 = arith.constant 0 : i32
    return %arg0, %c0_i32, %c0_i32_0 : i32, i32, i32
  }
  func.func @transform_1(%arg0: i32) -> (i32, i32, i32, i32) {
    %c0_i32 = arith.constant 0 : i32
    %c0_i32_0 = arith.constant 0 : i32
    %c0_i32_1 = arith.constant 0 : i32
    %c0_i32_2 = arith.constant 0 : i32
    return %arg0, %c0_i32, %c0_i32_0, %c0_i32_1 : i32, i32, i32, i32
  }
  func.func @transform_2(%arg0: i32) -> (i32, i32) {
    %c0_i32 = arith.constant 0 : i32
    %c0_i32_0 = arith.constant 0 : i32
    %c0_i32_1 = arith.constant 0 : i32
    return %c0_i32, %c0_i32_0 : i32, i32
  }
  func.func @transform_3(%arg0: i32) -> (i32, i32) {
    %c0_i32 = arith.constant 0 : i32
    %c0_i32_0 = arith.constant 0 : i32
    %c0_i32_1 = arith.constant 0 : i32
    return %c0_i32, %c0_i32_0 : i32, i32
  }
  func.func @transform_4(%arg0: i32) -> (i32, i32) {
    %c0_i32 = arith.constant 0 : i32
    %c0_i32_0 = arith.constant 0 : i32
    %c0_i32_1 = arith.constant 0 : i32
    return %c0_i32, %c0_i32_0 : i32, i32
  }
  func.func @transform_5(%arg0: i32) -> (i32, i32, i32) {
    %c0_i32 = arith.constant 0 : i32
    %c0_i32_0 = arith.constant 0 : i32
    %c0_i32_1 = arith.constant 0 : i32
    %c0_i32_2 = arith.constant 0 : i32
    return %c0_i32, %c0_i32_0, %c0_i32_1 : i32, i32, i32
  }
  func.func @transform_6(%arg0: i32) -> (i32, i32, i32) {
    %c0_i32 = arith.constant 0 : i32
    %c0_i32_0 = arith.constant 0 : i32
    %c0_i32_1 = arith.constant 0 : i32
    %c0_i32_2 = arith.constant 0 : i32
    return %c0_i32, %c0_i32_0, %c0_i32_1 : i32, i32, i32
  }
  func.func @transform_7(%arg0: i32) -> (i32, i32, i32) {
    %c0_i32 = arith.constant 0 : i32
    %c0_i32_0 = arith.constant 0 : i32
    %c0_i32_1 = arith.constant 0 : i32
    %c0_i32_2 = arith.constant 0 : i32
    return %c0_i32, %c0_i32_0, %c0_i32_1 : i32, i32, i32
  }
  func.func @transform_8(%arg0: i32) -> (i32, i32, i32) {
    %c0_i32 = arith.constant 0 : i32
    %c0_i32_0 = arith.constant 0 : i32
    %c0_i32_1 = arith.constant 0 : i32
    %c0_i32_2 = arith.constant 0 : i32
    return %c0_i32, %c0_i32_0, %c0_i32_1 : i32, i32, i32
  }
  func.func @transform_9(%arg0: i32) -> (i32, i32, i32) {
    %c0_i32 = arith.constant 0 : i32
    %c0_i32_0 = arith.constant 0 : i32
    %c0_i32_1 = arith.constant 0 : i32
    %c0_i32_2 = arith.constant 0 : i32
    return %c0_i32, %c0_i32_0, %c0_i32_1 : i32, i32, i32
  }
  func.func @transform_10(%arg0: i32) -> (i32, i32, i32) {
    %c0_i32 = arith.constant 0 : i32
    %c0_i32_0 = arith.constant 0 : i32
    %c0_i32_1 = arith.constant 0 : i32
    %c0_i32_2 = arith.constant 0 : i32
    return %c0_i32, %c0_i32_0, %c0_i32_1 : i32, i32, i32
  }
  func.func @transform_11(%arg0: i32) -> (i32, i32, i32) {
    %c0_i32 = arith.constant 0 : i32
    %c0_i32_0 = arith.constant 0 : i32
    %c0_i32_1 = arith.constant 0 : i32
    %c0_i32_2 = arith.constant 0 : i32
    return %c0_i32, %c0_i32_0, %c0_i32_1 : i32, i32, i32
  }
  func.func @transform_12(%arg0: i32) -> (i32, i32, i32) {
    %c0_i32 = arith.constant 0 : i32
    %c0_i32_0 = arith.constant 0 : i32
    %c0_i32_1 = arith.constant 0 : i32
    %c0_i32_2 = arith.constant 0 : i32
    return %c0_i32, %c0_i32_0, %c0_i32_1 : i32, i32, i32
  }
  func.func @transform_13(%arg0: i32) -> (i32, i32, i32) {
    %c0_i32 = arith.constant 0 : i32
    %c0_i32_0 = arith.constant 0 : i32
    %c0_i32_1 = arith.constant 0 : i32
    %c0_i32_2 = arith.constant 0 : i32
    return %c0_i32, %c0_i32_0, %c0_i32_1 : i32, i32, i32
  }
  func.func @transform_14(%arg0: i32) -> (i32, i32, i32) {
    %c0_i32 = arith.constant 0 : i32
    %c0_i32_0 = arith.constant 0 : i32
    %c0_i32_1 = arith.constant 0 : i32
    %c0_i32_2 = arith.constant 0 : i32
    return %c0_i32, %c0_i32_0, %c0_i32_1 : i32, i32, i32
  }
  func.func @transform_15(%arg0: i32) -> (i32, i32, i32) {
    %c0_i32 = arith.constant 0 : i32
    %c0_i32_0 = arith.constant 0 : i32
    %c0_i32_1 = arith.constant 0 : i32
    return %arg0, %c0_i32, %c0_i32_0 : i32, i32, i32
  }
  func.func @transform_16(%arg0: i32) -> (i32, i32, i32, i32) {
    %c0_i32 = arith.constant 0 : i32
    %c0_i32_0 = arith.constant 0 : i32
    %c0_i32_1 = arith.constant 0 : i32
    %c0_i32_2 = arith.constant 0 : i32
    return %arg0, %c0_i32, %c0_i32_0, %c0_i32_1 : i32, i32, i32, i32
  }
}

</mosaic_0001>

<bundles_post_ra>
// kernel: sa2dgru_forward.1
= control target key start
LH: loop header
LB: loop body
LE: loop exit
PB: predicated region body
PF: predicated region fallthrough
CT: control target
= control target key end

     0   :  { %s7443_s21 = smov 0   ;;  %s10287_s0 = inlined_call_operand.vmem [shape: f32[2,4,256], index: 0, kind: input, shape index: {}]   ;;  %s10288_s1 = inlined_call_operand.vmem [shape: f32[2,2,32,256], index: 1, kind: input, shape index: {}]   ;;  %s10289_s2 = inlined_call_operand.vmem [shape: f32[32,101], index: 2, kind: input, shape index: {}]   ;;  %s10290_s3 = inlined_call_operand.vmem [shape: f32[32,289], index: 3, kind: input, shape index: {}]   ;;  %s10291_s4 = inlined_call_operand.vmem [shape: f32[4,289], index: 4, kind: input, shape index: {}]   ;;  %s10292_s5 = inlined_call_operand.vmem [shape: f32[2,32,32], index: 5, kind: input, shape index: {}]   ;;  %s10293_s6 = inlined_call_operand.vmem [shape: f32[2,32,32], index: 6, kind: input, shape index: {}]   ;;  %s10294_s7 = inlined_call_operand.vmem [shape: f32[2,32,1], index: 7, kind: input, shape index: {}]   ;;  %s10295_s8 = inlined_call_operand.vmem [shape: f32[2,8,32], index: 8, kind: input, shape index: {}]   ;;  %s10296_s9 = inlined_call_operand.vmem [shape: f32[2,32,8], index: 9, kind: input, shape index: {}]   ;;  %s10297_s10 = inlined_call_operand.vmem [shape: f32[2,32,32], index: 10, kind: input, shape index: {}]   ;;  %s10298_s11 = inlined_call_operand.vmem [shape: f32[2,32,32], index: 11, kind: input, shape index: {}]   ;;  %s10299_s12 = inlined_call_operand.vmem [shape: f32[2,32,1], index: 12, kind: input, shape index: {}]   ;;  %s10300_s13 = inlined_call_operand.vmem [shape: f32[2,8,32], index: 13, kind: input, shape index: {}]   ;;  %s10301_s14 = inlined_call_operand.vmem [shape: f32[2,32,8], index: 14, kind: input, shape index: {}]   ;;  %s10302_s15 = inlined_call_operand.vmem [shape: f32[2,4,256], index: 15, kind: output, shape index: {0}]   ;;  %s10303_s16 = inlined_call_operand.vmem [shape: f32[2,2,32,256], index: 16, kind: output, shape index: {1}]  }
   0x1   :  { %10314 = sst [smem:[#allocation4_spill]] %s10287_s0 }
   0x2 LB: > { %s6558_s22 = sadd.s32 4294967295, %s7341_s21   ;;  %p6562_p0 = scmp.ge.s32.totalorder %s7341_s21, 1  ;;  %s7341_s21 = sphi %s7443_s21, %s27_s21  }
   0x3   : > { %p475_p1 = scmp.lt.s32.totalorder %s7341_s21, 3 }
   0x5   : > { %p476_p2 = pnand %p6562_p0, %p475_p1 }
   0x6   : > { %p535_p3 = scmp.lt.s32.totalorder (!%p476_p2), %s6558_s22, 1  ;;  %s10315_s26 = sld [smem:[#allocation4_spill]] (!%p476_p2)  ;;  %vm576_vm0 = vcmask (!%p476_p2), 1043712   ;;  %vm571_vm1 = vcmask (!%p476_p2), 261120   ;;  %vm579_vm2 = vcmask (!%p476_p2), 257024   ;;  %v555_v8 = vlaneseq (!%p476_p2) }
   0x7   : > { %479 = sbr.rel (%p476_p2) target bundleno = 9811 (0x2653), region = 80  ;;  %s7343_s28 = smov (!%p476_p2), 32   ;;  %vm598_vm3 = vcmask (!%p476_p2), 777216   ;;  %vm655_vm6 = vcmask (!%p476_p2), 793600   ;;  %vm718_vm9 = vcmask (!%p476_p2), 388352   ;;  %vm711_vm10 = vcmask (!%p476_p2), 125952  }
   0x8   : > { %s7344_s29 = smov (!%p476_p2), 95   ;;  %v556_v9 = vand.u32 (!%p476_p2), 127, %v555_v8  ;;  %s7345_s30 = smov (!%p476_p2), 97   ;;  %vm732_vm11 = vcmask (!%p476_p2), 519552   ;;  %vm725_vm12 = vcmask (!%p476_p2), 257152   ;;  %vm10313_vm13 = vcmask (!%p476_p2), 916480  }
   0x9   : > { %s10311_s0 = smov (!%p476_p2), 16   ;;  %s10309_s17 = smov (!%p476_p2), 96   ;;  %vm772_vm14 = vcmask (!%p476_p2), 785408   ;;  %vm7859_vm15 = vcmp.lt.s32.totalorder (!%p476_p2), %v555_v8, 256 }
   0xa   : > { %v557_v10 = vadd.s32 (!%p476_p2), 128, %v556_v9  ;;  %v558_v13 = vand.u32 (!%p476_p2), 15, %v556_v9  ;;  %s10307_s18 = smov (!%p476_p2), 112   ;;  %s7349_s19 = smov (!%p476_p2), 80  }
   0xb   : > { %s10305_s20 = smov (!%p476_p2), 64  }
   0xc   : > { %v559_v12 = vand.u32 (!%p476_p2), 15, %v557_v10  ;;  %vm7491_vm5 = vcmp.eq.s32.totalorder (!%p476_p2), %v558_v13, 15  ;;  %vm7533_vm7 = vcmp.eq.s32.totalorder (!%p476_p2), %v558_v13, 0 }
   0xe   : > { %s10355_s22 = smov (!%p535_p3, %s6558_s22), 1  ;;  %vm7487_vm4 = vcmp.eq.s32.totalorder %v559_v12, 15  ;;  %vm7541_vm8 = vcmp.eq.s32.totalorder %v559_v12, 0 }
   0xf   : > { %s10304_s23 = sshll.u32 %s10355_s22, 3  ;;  %s6723_s24 = sshll.u32 %s10355_s22, 7 }
  0x10   : > { %s539_s27 = scalar_lea.vmem %s10315_s26, %s10304_s23  ;;  %s8256_s23 = scalar_lea.vmem %s10303_s16, %s6723_s24 }
  0x11   : > { %v7459_v0 = vld [vmem:[%s539_s27] sm:$0xff]  ;;  %s7928_s27 = scalar_lea.vmem %s10288_s1, %s6723_s24  ;;  %s10327_s24 = smov 96  }
  0x12   : > { %567 = vrot.lane.b32.xlu0 %v7459_v0, %s7343_s28  ;;  %v7465_v1 = vcombine.high %v7459_v0, %v7459_v0 }
  0x16   : > { %569 = vrot.lane.b32.xlu0 %v7465_v1, %s7343_s28 }
  0x84   : > { %v7469_v2 = vpop.permute.xlu0 %567 }
  0x85   : > { %577 = vst.msk [vmem:[#allocation3] sm:$0xf] %vm576_vm0, %v7469_v2 }
  0x88   : > { %v7473_v3 = vpop.permute.xlu0 %569 }
  0x89   : > { %v7478_v4 = vsel %vm571_vm1, %v7469_v2, %v7473_v3  ;;  %580 = vst.msk [vmem:[#allocation3 + $0x10] sm:$0xf] %vm579_vm2, %v7473_v3 }
  0x8a   : > { %578 = vst [vmem:[#allocation3 + $0x8] sm:$0xf] %v7478_v4 }
  0x8c   : > { %v581_v5 = vld [vmem:[#allocation3] sm:$0xf] }
  0x8d   : > { %592 = vrot.lane.b32.xlu1 %v581_v5, %s7344_s29 }
  0x90   : > { %v583_v6 = vld [vmem:[#allocation3 + $0x10] sm:$0xf] }
  0x91   : > { %596 = vrot.lane.b32.xlu0 %v583_v6, %s7344_s29  ;;  %v582_v7 = vld [vmem:[#allocation3 + $0x8] sm:$0xf] }
  0x92   : > { %594 = vrot.lane.b32.xlu1 %v582_v7, %s7344_s29 }
  0xff   : > { %v593_v11 = vpop.permute.xlu1 %592 }
 0x103   : > { %v597_v14 = vpop.permute.xlu0 %596 }
 0x104   : > { %v595_v17 = vpop.permute.xlu1 %594 }
 0x105   : > { %v599_v18 = vsel %vm598_vm3, %v593_v11, %v595_v17  ;;  %v600_v19 = vsel %vm598_vm3, %v595_v17, %v597_v14 }
 0x106   : > { %v604_v20 = vsel %vm7487_vm4, %v7465_v1, %v600_v19  ;;  %v603_v21 = vsel %vm7491_vm5, %v7459_v0, %v599_v18 }
 0x107   : > { %609 = vrot.lane.b32.xlu0 %v604_v20, %s7343_s28  ;;  %607 = vrot.lane.b32.xlu1 %v603_v21, %s7343_s28 }
 0x179   : > { %v7505_v22 = vpop.permute.xlu0 %609  ;;  %v7507_v23 = vpop.permute.xlu1 %607 }
 0x17a   : > { %617 = vst.msk [vmem:[#allocation3 + $0x10] sm:$0xf] %vm579_vm2, %v7505_v22  ;;  %v7514_v24 = vsel %vm571_vm1, %v7507_v23, %v7505_v22 }
 0x17b   : > { %615 = vst.msk [vmem:[#allocation3] sm:$0xf] %vm576_vm0, %v7507_v23  ;;  %616 = vst [vmem:[#allocation3 + $0x8] sm:$0xf] %v7514_v24 }
 0x181   : > { %v7519_v25 = vld [vmem:[#allocation3 + $0x10] sm:$0xf] }
 0x182   : > { %v7521_v26 = vld [vmem:[#allocation3] sm:$0xf]  ;;  %638 = vst.msk [vmem:[#allocation3 + $0x10] sm:$0xf] %vm579_vm2, %v7473_v3  ;;  %v7525_v27 = vld [vmem:[#allocation3 + $0x8] sm:$0xf] }
 0x183   : > { %636 = vst.msk [vmem:[#allocation3] sm:$0xf] %vm576_vm0, %v7469_v2  ;;  %637 = vst [vmem:[#allocation3 + $0x8] sm:$0xf] %v7478_v4 }
 0x189   : > { %v641_v30 = vld [vmem:[#allocation3 + $0x10] sm:$0xf] }
 0x18a   : > { %v639_v28 = vld [vmem:[#allocation3] sm:$0xf]  ;;  %v640_v29 = vld [vmem:[#allocation3 + $0x8] sm:$0xf] }
 0x18b   : > { %649 = vrot.lane.b32.xlu1 %v639_v28, %s7345_s30  ;;  %651 = vrot.lane.b32.xlu0 %v640_v29, %s7345_s30 }
 0x18f   : > { %653 = vrot.lane.b32.xlu1 %v641_v30, %s7345_s30 }
 0x1fd   : > { %v650_v31 = vpop.permute.xlu1 %649  ;;  %v652_v33 = vpop.permute.xlu0 %651 }
 0x1fe   : > { %v656_v34 = vsel %vm655_vm6, %v650_v31, %v652_v33 }
 0x1ff   : > { %v660_v35 = vsel %vm7533_vm7, %v7459_v0, %v656_v34 }
 0x200   : > { %664 = vrot.lane.b32.xlu0 %v660_v35, %s7343_s28 }
 0x201   : > { %v654_v37 = vpop.permute.xlu1 %653 }
 0x202   : > { %v657_v38 = vsel %vm655_vm6, %v652_v33, %v654_v37 }
 0x203   : > { %v661_v39 = vsel %vm7541_vm8, %v7465_v1, %v657_v38 }
 0x204   : > { %666 = vrot.lane.b32.xlu1 %v661_v39, %s7343_s28 }
 0x272   : > { %v7551_v40 = vpop.permute.xlu0 %664 }
 0x273   : > { %672 = vst.msk [vmem:[#allocation3] sm:$0xf] %vm576_vm0, %v7551_v40 }
 0x276   : > { %v7555_v41 = vpop.permute.xlu1 %666 }
 0x277   : > { %v668_v42 = vsel %vm571_vm1, %v7551_v40, %v7555_v41  ;;  %674 = vst.msk [vmem:[#allocation3 + $0x10] sm:$0xf] %vm579_vm2, %v7555_v41 }
 0x278   : > { %673 = vst [vmem:[#allocation3 + $0x8] sm:$0xf] %v668_v42 }
 0x27a   : > { %v675_v45 = vld [vmem:[#allocation3] sm:$0xf] }
 0x27e   : > { %v677_v43 = vld [vmem:[#allocation3 + $0x10] sm:$0xf] }
 0x27f   : > { %685 = vrot.lane.b32.xlu1 %v677_v43, %s7345_s30  ;;  %v676_v44 = vld [vmem:[#allocation3 + $0x8] sm:$0xf] }
 0x280   : > { %683 = vrot.lane.b32.xlu0 %v676_v44, %s7345_s30 }
 0x284   : > { %681 = vrot.lane.b32.xlu0 %v675_v45, %s7345_s30 }
 0x2f1   : > { %v686_v46 = vpop.permute.xlu1 %685 }
 0x2f2   : > { %v684_v47 = vpop.permute.xlu0 %683 }
 0x2f3   : > { %v688_v48 = vsel %vm655_vm6, %v684_v47, %v686_v46 }
 0x2f4   : > { %v692_v49 = vsel %vm7541_vm8, %v7465_v1, %v688_v48 }
 0x2f5   : > { %697 = vrot.lane.b32.xlu1 %v692_v49, %s7343_s28 }
 0x2f6   : > { %v682_v50 = vpop.permute.xlu0 %681 }
 0x2f7   : > { %v687_v51 = vsel %vm655_vm6, %v682_v50, %v684_v47 }
 0x2f8   : > { %v691_v52 = vsel %vm7533_vm7, %v7459_v0, %v687_v51 }
 0x2f9   : > { %695 = vrot.lane.b32.xlu0 %v691_v52, %s7343_s28 }
 0x367   : > { %v698_v53 = vpop.permute.xlu1 %697 }
 0x368   : > { %705 = vst.msk [vmem:[#allocation3 + $0x10] sm:$0xf] %vm579_vm2, %v698_v53 }
 0x36b   : > { %v696_v54 = vpop.permute.xlu0 %695 }
 0x36c   : > { %v699_v55 = vsel %vm571_vm1, %v696_v54, %v698_v53  ;;  %703 = vst.msk [vmem:[#allocation3] sm:$0xf] %vm576_vm0, %v696_v54 }
 0x36d   : > { %704 = vst [vmem:[#allocation3 + $0x8] sm:$0xf] %v699_v55 }
 0x36f   : > { %v713_v56 = vld [vmem:[#allocation3 + $0x10] sm:$0xf] }
 0x370   : > { %715 = vrot.lane.b32.xlu1 %v713_v56, %s10311_s0 }
 0x373   : > { %v706_v57 = vld [vmem:[#allocation3] sm:$0xf] }
 0x374   : > { %v7579_v58 = vld [vmem:[#allocation3 + $0x8] sm:$0xf]  ;;  %708 = vrot.lane.b32.xlu0 %v706_v57, %s10309_s17 }
 0x375   : > { %v7581_v59 = vld [vmem:[#allocation3 + $0x8] sm:$0xf] }
 0x376   : > { %v7583_v60 = vld [vmem:[#allocation3 + $0x8] sm:$0xf] }
 0x377   : > { %v7586_v61 = vld [vmem:[#allocation3 + $0x8] sm:$0xf] }
 0x378   : > { %v735_v62 = vld [vmem:[#allocation3 + $0x8] sm:$0xf] }
 0x379   : > { %737 = vst [vmem:[#allocation2 + $0x8] sm:$0xf] %v735_v62  ;;  %821 = vst [vmem:[#allocation3 + $0x8] sm:$0xf] %v668_v42 }
 0x380   : > { %v848_v63 = vld [vmem:[#allocation3 + $0x8] sm:$0xf] }
 0x381   : > { %v7588_v5 = vld [vmem:[#allocation3 + $0x8] sm:$0xf]  ;;  %v852_v7 = vrot.slane %v848_v63, 4 }
 0x382   : > { %v7590_v6 = vld [vmem:[#allocation3 + $0x8] sm:$0xf] }
 0x383   : > { %v7592_v9 = vld [vmem:[#allocation3 + $0x8] sm:$0xf]  ;;  %856 = vst [vmem:[#allocation2 + $0x8] sm:$0xf0] %v852_v7 }
 0x384   : > { %v7594_v10 = vld [vmem:[#allocation3 + $0x8] sm:$0xf] }
 0x385   : > { %936 = vst [vmem:[#allocation3 + $0x8] sm:$0xf] %v7478_v4 }
 0x38a   : > { %v1290_v20 = vld [vmem:[#allocation2 + $0x8] sm:$0xff] }
 0x38c   : > { %v963_v11 = vld [vmem:[#allocation3 + $0x8] sm:$0xf] }
 0x38d   : > { %v7597_v12 = vld [vmem:[#allocation3 + $0x8] sm:$0xf]  ;;  %965 = vst [vmem:[#allocation2 + $0x18] sm:$0xf] %v963_v11 }
 0x38e   : > { %v7599_v13 = vld [vmem:[#allocation3 + $0x8] sm:$0xf] }
 0x38f   : > { %v7601_v14 = vld [vmem:[#allocation3 + $0x8] sm:$0xf] }
 0x390   : > { %v7603_v17 = vld [vmem:[#allocation3 + $0x8] sm:$0xf] }
 0x391   : > { %1045 = vst [vmem:[#allocation3 + $0x8] sm:$0xf] %v7514_v24 }
 0x398   : > { %v1072_v18 = vld [vmem:[#allocation3 + $0x8] sm:$0xf] }
 0x399   : > { %v1076_v19 = vrot.slane %v1072_v18, 4 }
 0x39b   : > { %1080 = vst [vmem:[#allocation2 + $0x18] sm:$0xf0] %v1076_v19 }
 0x3a2   : > { %v1292_v21 = vld [vmem:[#allocation2 + $0x18] sm:$0xff] }
 0x3a3   : > { %v6842_v28 = vpack.c.bf16 %v1292_v21, %v1290_v20 }
 0x3a5   : > { %6843 = vmatprep.subr.bf16.mxu0 %v6842_v28 }
 0x3e2   : > { %v716_v4 = vpop.permute.xlu1 %715 }
 0x3e3   : > { %719 = vst.msk [vmem:[#allocation3 + $0x10] sm:$0xf] %vm718_vm9, %v716_v4 }
 0x3e6   : > { %v709_v29 = vpop.permute.xlu0 %708 }
 0x3e7   : > { %712 = vst.msk [vmem:[#allocation3] sm:$0xf] %vm711_vm10, %v709_v29 }
 0x3ea   : > { %v727_v30 = vld [vmem:[#allocation3 + $0x10] sm:$0xf] }
 0x3eb   : > { %729 = vrot.lane.b32.xlu1 %v727_v30, %s7343_s28 }
 0x3ee   : > { %v720_v31 = vld [vmem:[#allocation3] sm:$0xf] }
 0x3ef   : > { %722 = vrot.lane.b32.xlu0 %v720_v31, %s10307_s18 }
 0x45d   : > { %v730_v24 = vpop.permute.xlu1 %729 }
 0x45e   : > { %733 = vst.msk [vmem:[#allocation3 + $0x10] sm:$0xf] %vm732_vm11, %v730_v24 }
 0x461   : > { %v723_v33 = vpop.permute.xlu0 %722 }
 0x462   : > { %726 = vst.msk [vmem:[#allocation3] sm:$0xf] %vm725_vm12, %v723_v33 }
 0x465   : > { %v7612_v34 = vld [vmem:[#allocation3 + $0x10] sm:$0xf] }
 0x466   : > { %v7614_v35 = vld [vmem:[#allocation3 + $0x10] sm:$0xf] }
 0x467   : > { %v7616_v37 = vld [vmem:[#allocation3 + $0x10] sm:$0xf] }
 0x468   : > { %v7618_v38 = vld [vmem:[#allocation3 + $0x10] sm:$0xf] }
 0x469   : > { %822 = vst.msk [vmem:[#allocation3 + $0x10] sm:$0xf] %vm579_vm2, %v7555_v41  ;;  %v734_v39 = vld [vmem:[#allocation3] sm:$0xf] }
 0x46a   : > { %v7622_v42 = vld [vmem:[#allocation3] sm:$0xf]  ;;  %736 = vst [vmem:[#allocation2] sm:$0xf] %v734_v39 }
 0x46b   : > { %v7624_v43 = vld [vmem:[#allocation3] sm:$0xf] }
 0x46c   : > { %v7626_v44 = vld [vmem:[#allocation3] sm:$0xf] }
 0x46d   : > { %v7628_v45 = vld [vmem:[#allocation3] sm:$0xf] }
 0x46e   : > { %820 = vst.msk [vmem:[#allocation3] sm:$0xf] %vm576_vm0, %v7551_v40 }
 0x470   : > { %v829_v46 = vld [vmem:[#allocation3 + $0x10] sm:$0xf] }
 0x471   : > { %831 = vrot.lane.b32.xlu1 %v829_v46, %s10311_s0 }
 0x475   : > { %v823_v47 = vld [vmem:[#allocation3] sm:$0xf] }
 0x476   : > { %825 = vrot.lane.b32.xlu0 %v823_v47, %s10309_s17 }
 0x4e3   : > { %v832_v41 = vpop.permute.xlu1 %831 }
 0x4e4   : > { %834 = vst.msk [vmem:[#allocation3 + $0x10] sm:$0xf] %vm718_vm9, %v832_v41 }
 0x4e8   : > { %v826_v48 = vpop.permute.xlu0 %825 }
 0x4e9   : > { %828 = vst.msk [vmem:[#allocation3] sm:$0xf] %vm711_vm10, %v826_v48 }
 0x4eb   : > { %v841_v49 = vld [vmem:[#allocation3 + $0x10] sm:$0xf] }
 0x4ec   : > { %843 = vrot.lane.b32.xlu1 %v841_v49, %s7343_s28 }
 0x4f0   : > { %v835_v50 = vld [vmem:[#allocation3] sm:$0xf] }
 0x4f1   : > { %837 = vrot.lane.b32.xlu0 %v835_v50, %s10307_s18 }
 0x55e   : > { %v844_v51 = vpop.permute.xlu1 %843 }
 0x55f   : > { %846 = vst.msk [vmem:[#allocation3 + $0x10] sm:$0xf] %vm732_vm11, %v844_v51 }
 0x563   : > { %v838_v40 = vpop.permute.xlu0 %837 }
 0x564   : > { %840 = vst.msk [vmem:[#allocation3] sm:$0xf] %vm725_vm12, %v838_v40 }
 0x566   : > { %v7640_v52 = vld [vmem:[#allocation3 + $0x10] sm:$0xf] }
 0x567   : > { %v7642_v53 = vld [vmem:[#allocation3 + $0x10] sm:$0xf] }
 0x568   : > { %v7644_v54 = vld [vmem:[#allocation3 + $0x10] sm:$0xf] }
 0x569   : > { %v7646_v55 = vld [vmem:[#allocation3 + $0x10] sm:$0xf] }
 0x56a   : > { %937 = vst.msk [vmem:[#allocation3 + $0x10] sm:$0xf] %vm579_vm2, %v7473_v3 }
 0x56b   : > { %v847_v56 = vld [vmem:[#allocation3] sm:$0xf] }
 0x56c   : > { %v7650_v57 = vld [vmem:[#allocation3] sm:$0xf]  ;;  %v851_v11 = vrot.slane %v847_v56, 4 }
 0x56d   : > { %v7652_v62 = vld [vmem:[#allocation3] sm:$0xf] }
 0x56e   : > { %v7654_v63 = vld [vmem:[#allocation3] sm:$0xf]  ;;  %855 = vst [vmem:[#allocation2] sm:$0xf0] %v851_v11 }
 0x56f   : > { %v7656_v7 = vld [vmem:[#allocation3] sm:$0xf] }
 0x570   : > { %935 = vst.msk [vmem:[#allocation3] sm:$0xf] %vm576_vm0, %v7469_v2 }
 0x571   : > { %v944_v18 = vld [vmem:[#allocation3 + $0x10] sm:$0xf] }
 0x572   : > { %946 = vrot.lane.b32.xlu1 %v944_v18, %s10311_s0 }
 0x577   : > { %v938_v19 = vld [vmem:[#allocation3] sm:$0xf] }
 0x578   : > { %940 = vrot.lane.b32.xlu0 %v938_v19, %s10309_s17 }
 0x5e4   : > { %v947_v3 = vpop.permute.xlu1 %946 }
 0x5e5   : > { %949 = vst.msk [vmem:[#allocation3 + $0x10] sm:$0xf] %vm718_vm9, %v947_v3 }
 0x5ea   : > { %v941_v20 = vpop.permute.xlu0 %940 }
 0x5eb   : > { %943 = vst.msk [vmem:[#allocation3] sm:$0xf] %vm711_vm10, %v941_v20  ;;  %v7712_v20 = vld [vmem:[#allocation3 + $0x8] sm:$0xf] }
 0x5ec   : > { %v956_v21 = vld [vmem:[#allocation3 + $0x10] sm:$0xf] }
 0x5ed   : > { %958 = vrot.lane.b32.xlu1 %v956_v21, %s7343_s28 }
 0x5f2   : > { %v950_v28 = vld [vmem:[#allocation3] sm:$0xf] }
 0x5f3   : > { %952 = vrot.lane.b32.xlu0 %v950_v28, %s10307_s18 }
 0x65f   : > { %v959_v2 = vpop.permute.xlu1 %958 }
 0x660   : > { %961 = vst.msk [vmem:[#allocation3 + $0x10] sm:$0xf] %vm732_vm11, %v959_v2 }
 0x665   : > { %v953_v4 = vpop.permute.xlu0 %952 }
 0x666   : > { %955 = vst.msk [vmem:[#allocation3] sm:$0xf] %vm725_vm12, %v953_v4 }
 0x667   : > { %v7668_v29 = vld [vmem:[#allocation3 + $0x10] sm:$0xf] }
 0x668   : > { %v7670_v30 = vld [vmem:[#allocation3 + $0x10] sm:$0xf] }
 0x669   : > { %v7672_v31 = vld [vmem:[#allocation3 + $0x10] sm:$0xf] }
 0x66a   : > { %v7674_v24 = vld [vmem:[#allocation3 + $0x10] sm:$0xf] }
 0x66b   : > { %1046 = vst.msk [vmem:[#allocation3 + $0x10] sm:$0xf] %vm579_vm2, %v7505_v22 }
 0x66d   : > { %v962_v33 = vld [vmem:[#allocation3] sm:$0xf] }
 0x66e   : > { %v7678_v39 = vld [vmem:[#allocation3] sm:$0xf]  ;;  %964 = vst [vmem:[#allocation2 + $0x10] sm:$0xf] %v962_v33 }
 0x66f   : > { %v7680_v46 = vld [vmem:[#allocation3] sm:$0xf] }
 0x670   : > { %v7682_v47 = vld [vmem:[#allocation3] sm:$0xf] }
 0x671   : > { %v7684_v41 = vld [vmem:[#allocation3] sm:$0xf] }
 0x672   : > { %1044 = vst.msk [vmem:[#allocation3] sm:$0xf] %vm576_vm0, %v7507_v23  ;;  %v1053_v48 = vld [vmem:[#allocation3 + $0x10] sm:$0xf] }
 0x673   : > { %1055 = vrot.lane.b32.xlu1 %v1053_v48, %s10311_s0 }
 0x677   : > { %626 = vrot.lane.b32.xlu1 %v7525_v27, %s7344_s29 }
 0x679   : > { %v1047_v49 = vld [vmem:[#allocation3] sm:$0xf] }
 0x67a   : > { %1049 = vrot.lane.b32.xlu0 %v1047_v49, %s10309_s17 }
 0x67b   : > { %624 = vrot.lane.b32.xlu1 %v7521_v26, %s7344_s29 }
 0x67e   : > { %628 = vrot.lane.b32.xlu0 %v7519_v25, %s7344_s29 }
 0x6e5   : > { %v1056_v22 = vpop.permute.xlu1 %1055 }
 0x6e6   : > { %1058 = vst.msk [vmem:[#allocation3 + $0x10] sm:$0xf] %vm718_vm9, %v1056_v22  ;;  %v1082_v22 = vld [vmem:[#allocation3 + $0x8] sm:$0xf] }
 0x6e9   : > { %v627_v50 = vpop.permute.xlu1 %626 }
 0x6ec   : > { %v1050_v23 = vpop.permute.xlu0 %1049 }
 0x6ed   : > { %1052 = vst.msk [vmem:[#allocation3] sm:$0xf] %vm711_vm10, %v1050_v23  ;;  %v1065_v40 = vld [vmem:[#allocation3 + $0x10] sm:$0xf]  ;;  %v625_v27 = vpop.permute.xlu1 %624 }
 0x6ee   : > { %1067 = vrot.lane.b32.xlu0 %v1065_v40, %s7343_s28  ;;  %v630_v25 = vsel %vm598_vm3, %v625_v27, %v627_v50 }
 0x6ef   : > { %v634_v18 = vsel %vm7491_vm5, %v7459_v0, %v630_v25  ;;  %v7720_v0 = vld [vmem:[#allocation3 + $0x8] sm:$0xf]  ;;  %v745_v25 = vrot.slane %v7579_v58, 4  ;;  %v974_v58 = vrot.slane %v7668_v29, 4 }
 0x6f0   : > { %v629_v51 = vpop.permute.xlu0 %628 }
 0x6f1   : > { %v631_v56 = vsel %vm598_vm3, %v627_v50, %v629_v51 }
 0x6f2   : > { %v635_v26 = vsel %vm7487_vm4, %v7465_v1, %v631_v56  ;;  %v7714_v1 = vld [vmem:[#allocation3 + $0x8] sm:$0xf] }
 0x6f3   : > { %1163 = vrot.lane.b32.xlu0 %v635_v26, %s7343_s28 }
 0x6f4   : > { %v1059_v11 = vld [vmem:[#allocation3] sm:$0xf] }
 0x6f5   : > { %1061 = vrot.lane.b32.xlu1 %v1059_v11, %s10307_s18 }
 0x6f9   : > { %1161 = vrot.lane.b32.xlu1 %v634_v18, %s7343_s28 }
 0x760   : > { %v1068_v19 = vpop.permute.xlu0 %1067 }
 0x761   : > { %1070 = vst.msk [vmem:[#allocation3 + $0x10] sm:$0xf] %vm732_vm11, %v1068_v19  ;;  %v1289_v19 = vld [vmem:[#allocation2] sm:$0xff] }
 0x765   : > { %v1164_v4 = vpop.permute.xlu0 %1163 }
 0x767   : > { %v1062_v3 = vpop.permute.xlu1 %1061 }
 0x768   : > { %1064 = vst.msk [vmem:[#allocation3] sm:$0xf] %vm725_vm12, %v1062_v3  ;;  %v1083_v21 = vld [vmem:[#allocation3 + $0x10] sm:$0xf] }
 0x769   : > { %v7716_v28 = vld [vmem:[#allocation3 + $0x10] sm:$0xf] }
 0x76a   : > { %v7718_v2 = vld [vmem:[#allocation3 + $0x10] sm:$0xf] }
 0x76b   : > { %v1162_v33 = vpop.permute.xlu1 %1161  ;;  %v7722_v48 = vld [vmem:[#allocation3 + $0x10] sm:$0xf] }
 0x76c   : > { %v1165_v49 = vsel %vm571_vm1, %v1162_v33, %v1164_v4  ;;  %1171 = vst.msk [vmem:[#allocation3 + $0x10] sm:$0xf] %vm579_vm2, %v1164_v4  ;;  %vm813_vm2 = vcmask 523264  }
 0x76d   : > { %1170 = vst [vmem:[#allocation3 + $0x8] sm:$0xf] %v1165_v49  ;;  %v746_v49 = vrot.slane %v7612_v34, 4  ;;  %v972_v34 = vrot.slane %v7678_v39, 4 }
 0x76f   : > { %v1071_v50 = vld [vmem:[#allocation3] sm:$0xf] }
 0x770   : > { %v7726_v23 = vld [vmem:[#allocation3] sm:$0xf]  ;;  %v1075_v27 = vrot.slane %v1071_v50, 4  ;;  %v744_v50 = vrot.slane %v7622_v42, 4 }
 0x771   : > { %v7728_v51 = vld [vmem:[#allocation3] sm:$0xf] }
 0x772   : > { %v7730_v40 = vld [vmem:[#allocation3] sm:$0xf]  ;;  %1079 = vst [vmem:[#allocation2 + $0x10] sm:$0xf0] %v1075_v27 }
 0x773   : > { %v7732_v56 = vld [vmem:[#allocation3] sm:$0xf]  ;;  %v1178_v11 = vld [vmem:[#allocation3 + $0x10] sm:$0xf] }
 0x774   : > { %1169 = vst.msk [vmem:[#allocation3] sm:$0xf] %vm576_vm0, %v1162_v33  ;;  %v1197_v26 = vld [vmem:[#allocation3 + $0x8] sm:$0xf]  ;;  %1180 = vrot.lane.b32.xlu0 %v1178_v11, %s10311_s0  ;;  %v973_v33 = vrot.slane %v7597_v12, 4  ;;  %v883_v12 = vrot.slane %v7642_v53, 4 }
 0x775   : > { %1199 = vst [vmem:[#allocation2 + $0x28] sm:$0xf] %v1197_v26  ;;  %v1201_v42 = vld [vmem:[#allocation3 + $0x8] sm:$0xf]  ;;  %vm794_vm0 = vcmask 654336  }
 0x778   : > { %749 = vrot.lane.b32.xlu0 %v745_v25, %s10307_s18  ;;  %v787_v25 = vrot.slane %v7616_v37, 4 }
 0x779   : > { %v1291_v3 = vld [vmem:[#allocation2 + $0x10] sm:$0xff] }
 0x77a   : > { %v6844_v4 = vpack.c.bf16 %v1291_v3, %v1289_v19 }
 0x77b   : > { %v1172_v18 = vld [vmem:[#allocation3] sm:$0xf] }
 0x77c   : > { %1174 = vrot.lane.b32.xlu1 %v1172_v18, %s10309_s17  ;;  %6845 = vmatpush1.bf16.msra.mxu0 %v6844_v4 }
 0x77d   : > { %865 = vrot.lane.b32.xlu0 %v7588_v5, %s10307_s18  ;;  %v882_v5 = vrot.slane %v7590_v6, 4 }
 0x780   : > { %751 = vrot.lane.b32.xlu1 %v746_v49, %s10307_s18 }
 0x781   : > { %977 = vrot.lane.b32.xlu0 %v973_v33, %s10307_s18 }
 0x784   : > { %867 = vrot.lane.b32.xlu1 %v7640_v52, %s10307_s18  ;;  %v1207_v52 = vrot.slane %v1201_v42, 4 }
 0x785   : > { %747 = vrot.lane.b32.xlu0 %v744_v50, %s10307_s18 }
 0x788   : > { %979 = vrot.lane.b32.xlu1 %v974_v58, %s10307_s18  ;;  %v1107_v58 = vrot.slane %v7716_v28, 4  ;;  %v1106_v28 = vrot.slane %v7712_v20, 4  ;;  %v1011_v20 = vrot.slane %v7682_v47, 4  ;;  %v1240_v47 = vld [vmem:[#allocation3 + $0x8] sm:$0xf] }
 0x789   : > { %975 = vrot.lane.b32.xlu0 %v972_v34, %s10307_s18 }
 0x78c   : > { %863 = vrot.lane.b32.xlu1 %v7650_v57, %s10307_s18 }
 0x78d   : > { %770 = vrot.lane.b32.xlu0 %v7614_v35, %s10309_s17 }
 0x790   : > { %768 = vrot.lane.b32.xlu1 %v7581_v59, %s10309_s17 }
 0x791   : > { %888 = vrot.lane.b32.xlu0 %v883_v12, %s10309_s17 }
 0x794   : > { %886 = vrot.lane.b32.xlu1 %v882_v5, %s10309_s17 }
 0x795   : > { %1091 = vrot.lane.b32.xlu0 %v1083_v21, %s10307_s18  ;;  %v881_v21 = vrot.slane %v7652_v62, 4 }
 0x798   : > { %1089 = vrot.lane.b32.xlu1 %v1082_v22, %s10307_s18 }
 0x79c   : > { %1211 = vrot.lane.b32.xlu1 %v1207_v52, %s10307_s18 }
 0x7e6   : > { %v1181_v59 = vpop.permute.xlu0 %1180 }
 0x7e7   : > { %1183 = vst.msk [vmem:[#allocation3 + $0x10] sm:$0xf] %vm718_vm9, %v1181_v59  ;;  %vm1328_vm9 = vcmask 1044480  }
 0x7ea   : > { %v750_v57 = vpop.permute.xlu0 %749 }
 0x7ee   : > { %v1175_v35 = vpop.permute.xlu1 %1174  ;;  %v1190_v29 = vld [vmem:[#allocation3 + $0x10] sm:$0xf] }
 0x7ef   : > { %1177 = vst.msk [vmem:[#allocation3] sm:$0xf] %vm711_vm10, %v1175_v35  ;;  %v866_v53 = vpop.permute.xlu0 %865  ;;  %1192 = vrot.lane.b32.xlu0 %v1190_v29, %s7343_s28  ;;  %vm1315_vm10 = vcmask 826368  }
 0x7f2   : > { %v752_v6 = vpop.permute.xlu1 %751 }
 0x7f3   : > { %v755_v39 = vsel %vm10313_vm13, %v750_v57, %v752_v6  ;;  %v978_v27 = vpop.permute.xlu0 %977  ;;  %884 = vrot.lane.b32.xlu0 %v881_v21, %s10309_s17  ;;  %v1222_v6 = vld [vmem:[#allocation3 + $0x8] sm:$0xf] }
 0x7f4   : > { %759 = vst [vmem:[#allocation2 + $0x28] sm:$0xf0] %v755_v39 }
 0x7f6   : > { %v868_v22 = vpop.permute.xlu1 %867  ;;  %v1184_v11 = vld [vmem:[#allocation3] sm:$0xf] }
 0x7f7   : > { %v870_v26 = vsel %vm10313_vm13, %v866_v53, %v868_v22  ;;  %1186 = vrot.lane.b32.xlu1 %v1184_v11, %s10307_s18  ;;  %v748_v19 = vpop.permute.xlu0 %747  ;;  %792 = vrot.lane.b32.xlu0 %v787_v25, %s7349_s19 }
 0x7f8   : > { %874 = vst [vmem:[#allocation2 + $0x38] sm:$0xf] %v870_v26  ;;  %v754_v4 = vsel %vm10313_vm13, %v748_v19, %v750_v57 }
 0x7f9   : > { %758 = vst [vmem:[#allocation2 + $0x20] sm:$0xf0] %v754_v4 }
 0x7fa   : > { %v980_v18 = vpop.permute.xlu1 %979 }
 0x7fb   : > { %v982_v3 = vsel %vm10313_vm13, %v978_v27, %v980_v18  ;;  %766 = vrot.lane.b32.xlu1 %v7624_v43, %s10309_s17  ;;  %v976_v49 = vpop.permute.xlu0 %975  ;;  %997 = vrot.lane.b32.xlu0 %v7670_v30, %s10309_s17  ;;  %v786_v43 = vrot.slane %v7583_v60, 4  ;;  %v1294_v30 = vld [vmem:[#allocation2 + $0x28] sm:$0xff] }
 0x7fc   : > { %986 = vst [vmem:[#allocation2 + $0x38] sm:$0xf0] %v982_v3  ;;  %v981_v37 = vsel %vm10313_vm13, %v976_v49, %v978_v27 }
 0x7fd   : > { %985 = vst [vmem:[#allocation2 + $0x30] sm:$0xf0] %v981_v37 }
 0x7fe   : > { %v864_v62 = vpop.permute.xlu1 %863 }
 0x7ff   : > { %v869_v33 = vsel %vm10313_vm13, %v864_v62, %v866_v53  ;;  %1087 = vrot.lane.b32.xlu1 %v7726_v23, %s10307_s18  ;;  %v771_v34 = vpop.permute.xlu0 %770  ;;  %1112 = vrot.lane.b32.xlu0 %v1107_v58, %s10309_s17 }
 0x800   : > { %873 = vst [vmem:[#allocation2 + $0x30] sm:$0xf] %v869_v33 }
 0x802   : > { %v7788_v50 = vpop.permute.xlu1 %768 }
 0x803   : > { %v774_v5 = vsel %vm772_vm14, %v7788_v50, %v771_v34  ;;  %790 = vrot.lane.b32.xlu1 %v786_v43, %s7349_s19  ;;  %v1296_v12 = vld [vmem:[#allocation2 + $0x38] sm:$0xff]  ;;  %v889_v52 = vpop.permute.xlu0 %888  ;;  %993 = vrot.lane.b32.xlu0 %v7680_v46, %s10309_s17  ;;  %v1013_v46 = vrot.slane %v7672_v31, 4  ;;  %v1012_v31 = vrot.slane %v7601_v14, 4  ;;  %v921_v14 = vrot.slane %v7594_v10, 4 }
 0x804   : > { %778 = vst [vmem:[#allocation2 + $0x58] sm:$0xf] %v774_v5  ;;  %v6846_v23 = vpack.c.bf16 %v1296_v12, %v1294_v30 }
 0x806   : > { %v7794_v42 = vpop.permute.xlu1 %886  ;;  %6847 = vmatprep.subr.bf16.mxu0 %v6846_v23 }
 0x807   : > { %v891_v60 = vsel %vm772_vm14, %v7794_v42, %v889_v52  ;;  %995 = vrot.lane.b32.xlu1 %v7599_v13, %s10309_s17  ;;  %v1092_v59 = vpop.permute.xlu0 %1091  ;;  %906 = vrot.lane.b32.xlu0 %v7644_v54, %s7349_s19  ;;  %v785_v13 = vrot.slane %v7626_v44, 4  ;;  %v1105_v54 = vrot.slane %v7728_v51, 4  ;;  %v922_v44 = vrot.slane %v7646_v55, 4  ;;  %v1295_v58 = vld [vmem:[#allocation2 + $0x30] sm:$0xff] }
 0x808   : > { %895 = vst [vmem:[#allocation2 + $0x58] sm:$0xf0] %v891_v60  ;;  %v1145_v55 = vrot.slane %v7720_v0, 4  ;;  %v1144_v60 = vrot.slane %v7732_v56, 4 }
 0x80a   : > { %v7803_v35 = vpop.permute.xlu1 %1089 }
 0x80b   : > { %v1094_v57 = vsel %vm10313_vm13, %v7803_v35, %v1092_v59  ;;  %1110 = vrot.lane.b32.xlu1 %v1106_v28, %s10309_s17  ;;  %1018 = vrot.lane.b32.xlu0 %v1013_v46, %s7349_s19 }
 0x80c   : > { %1098 = vst [vmem:[#allocation2 + $0x48] sm:$0xf] %v1094_v57 }
 0x80f   : > { %1229 = vrot.lane.b32.xlu1 %v1222_v6, %s10309_s17  ;;  %1130 = vrot.lane.b32.xlu0 %v7718_v2, %s7349_s19  ;;  %v1246_v2 = vrot.slane %v1240_v47, 4  ;;  %v7352_v6 = vmov 0.0  }
 0x810   : > { %1399 = vmatprep.mubr.f32.mxu0 %v7352_v6  ;;  %1631 = vmatprep.mubr.f32.mxu1 %v7352_v6 }
 0x813   : > { %788 = vrot.lane.b32.xlu1 %v785_v13, %s7349_s19  ;;  %1014 = vrot.lane.b32.xlu0 %v1011_v20, %s7349_s19 }
 0x817   : > { %1108 = vrot.lane.b32.xlu1 %v1105_v54, %s10309_s17  ;;  %811 = vrot.lane.b32.xlu0 %v7618_v38, %s10305_s20  ;;  %v1146_v38 = vrot.slane %v7722_v48, 4 }
 0x81b   : > { %904 = vrot.lane.b32.xlu1 %v7592_v9, %s7349_s19  ;;  %927 = vrot.lane.b32.xlu0 %v922_v44, %s10305_s20  ;;  %v920_v9 = vrot.slane %v7656_v7, 4  ;;  %v7351_v7 = vmov 1.0  }
 0x81c   : > { %1283 = vst.msk [vmem:[#allocation2 + $0xc4] ss:$8 sm:$0x3] %vm7859_vm15, %v7351_v7  ;;  %3872 = vst.msk [vmem:[#allocation2 + $0x240] ss:$8 sm:$0x3] %vm7859_vm15, %v7351_v7 }
 0x81f   : > { %1016 = vrot.lane.b32.xlu1 %v1012_v31, %s7349_s19  ;;  %1036 = vrot.lane.b32.xlu0 %v7674_v24, %s10305_s20 }
 0x823   : > { %1128 = vrot.lane.b32.xlu1 %v7714_v1, %s7349_s19  ;;  %1151 = vrot.lane.b32.xlu0 %v1146_v38, %s10305_s20 }
 0x827   : > { %1250 = vrot.lane.b32.xlu1 %v1246_v2, %s7349_s19  ;;  %923 = vrot.lane.b32.xlu0 %v920_v9, %s10305_s20 }
 0x82b   : > { %902 = vrot.lane.b32.xlu1 %v7654_v63, %s7349_s19  ;;  %v1261_v63 = vld [vmem:[#allocation3 + $0x8] sm:$0xf] }
 0x82f   : > { %1126 = vrot.lane.b32.xlu1 %v7730_v40, %s7349_s19 }
 0x833   : > { %809 = vrot.lane.b32.xlu1 %v7586_v61, %s10305_s20  ;;  %v7855_v61 = vpop.permute.xlu1 %1211 }
 0x837   : > { %925 = vrot.lane.b32.xlu1 %v921_v14, %s10305_s20 }
 0x83b   : > { %1034 = vrot.lane.b32.xlu1 %v7603_v17, %s10305_s20  ;;  %v6652_v17 = vld [vmem:[%s10294_s7 + $0x38] sm:$0xff] }
 0x83f   : > { %1149 = vrot.lane.b32.xlu1 %v1145_v55, %s10305_s20 }
 0x843   : > { %807 = vrot.lane.b32.xlu1 %v7628_v45, %s10305_s20 }
 0x847   : > { %1032 = vrot.lane.b32.xlu1 %v7684_v41, %s10305_s20 }
 0x84b   : > { %1268 = vrot.lane.b32.xlu1 %v1261_v63, %s10305_s20 }
 0x861   : > { %v1193_v10 = vpop.permute.xlu0 %1192 }
 0x862   : > { %1195 = vst.msk [vmem:[#allocation3 + $0x10] sm:$0xf] %vm732_vm11, %v1193_v10  ;;  %vm7355_vm11 = vmmov 0  }
 0x865   : > { %v885_v45 = vpop.permute.xlu0 %884 }
 0x866   : > { %v890_v41 = vsel %vm772_vm14, %v885_v45, %v7794_v42 }
 0x867   : > { %894 = vst [vmem:[#allocation2 + $0x50] sm:$0xf0] %v890_v41 }
 0x869   : > { %v1187_v24 = vpop.permute.xlu1 %1186  ;;  %v793_v8 = vpop.permute.xlu0 %792  ;;  %v1223_v0 = vld [vmem:[#allocation3 + $0x10] sm:$0xf] }
 0x86a   : > { %1189 = vst.msk [vmem:[#allocation3] sm:$0xf] %vm725_vm12, %v1187_v24  ;;  %1231 = vrot.lane.b32.xlu0 %v1223_v0, %s10309_s17  ;;  %v1202_v39 = vld [vmem:[#allocation3 + $0x10] sm:$0xf]  ;;  %vm1778_vm12 = vcmask 64512  }
 0x86b   : > { %v1208_v27 = vrot.slane %v1202_v39, 4  ;;  %v1241_v62 = vld [vmem:[#allocation3 + $0x10] sm:$0xf] }
 0x86c   : > { %v1262_v46 = vld [vmem:[#allocation3 + $0x10] sm:$0xf] }
 0x86d   : > { %v767_v1 = vpop.permute.xlu1 %766  ;;  %v998_v51 = vpop.permute.xlu0 %997 }
 0x86e   : > { %v773_v48 = vsel %vm772_vm14, %v767_v1, %v7788_v50  ;;  %v1247_v50 = vrot.slane %v1241_v62, 4 }
 0x86f   : > { %777 = vst [vmem:[#allocation2 + $0x50] sm:$0xf] %v773_v48 }
 0x871   : > { %v1088_v40 = vpop.permute.xlu1 %1087  ;;  %v1260_v53 = vld [vmem:[#allocation3] sm:$0xf]  ;;  %v1113_v11 = vpop.permute.xlu0 %1112 }
 0x872   : > { %v1221_v29 = vld [vmem:[#allocation3] sm:$0xf]  ;;  %v1093_v21 = vsel %vm10313_vm13, %v1088_v40, %v7803_v35  ;;  %1266 = vrot.lane.b32.xlu1 %v1260_v53, %s10305_s20 }
 0x873   : > { %1227 = vrot.lane.b32.xlu0 %v1221_v29, %s10309_s17  ;;  %v1196_v22 = vld [vmem:[#allocation3] sm:$0xf]  ;;  %1097 = vst [vmem:[#allocation2 + $0x40] sm:$0xf] %v1093_v21 }
 0x874   : > { %1198 = vst [vmem:[#allocation2 + $0x20] sm:$0xf] %v1196_v22  ;;  %v1200_v25 = vld [vmem:[#allocation3] sm:$0xf] }
 0x875   : > { %v791_v26 = vpop.permute.xlu1 %790  ;;  %v1206_v19 = vrot.slane %v1200_v25, 4  ;;  %v994_v3 = vpop.permute.xlu0 %993  ;;  %v1239_v30 = vld [vmem:[#allocation3] sm:$0xf] }
 0x876   : > { %v796_v18 = vsel %vm794_vm0, %v791_v26, %v793_v8  ;;  %v1245_v23 = vrot.slane %v1239_v30, 4 }
 0x877   : > { %1213 = vrot.lane.b32.xlu0 %v1208_v27, %s10307_s18  ;;  %800 = vst [vmem:[#allocation2 + $0x78] sm:$0xf0] %v796_v18 }
 0x879   : > { %v996_v4 = vpop.permute.xlu1 %995  ;;  %v907_v34 = vpop.permute.xlu0 %906 }
 0x87a   : > { %v999_v49 = vsel %vm772_vm14, %v994_v3, %v996_v4  ;;  %v1000_v33 = vsel %vm772_vm14, %v996_v4, %v998_v51 }
 0x87b   : > { %1209 = vrot.lane.b32.xlu0 %v1206_v19, %s10307_s18  ;;  %v1293_v37 = vld [vmem:[#allocation2 + $0x20] sm:$0xff]  ;;  %1003 = vst [vmem:[#allocation2 + $0x60] sm:$0xf] %v999_v49  ;;  %1004 = vst [vmem:[#allocation2 + $0x68] sm:$0xf] %v1000_v33  ;;  %s10328_s18 = smov 112  }
 0x87c   : > { %v6848_v43 = vpack.c.bf16 %v1295_v58, %v1293_v37 }
 0x87d   : > { %v1111_v5 = vpop.permute.xlu1 %1110  ;;  %v1019_v42 = vpop.permute.xlu0 %1018 }
 0x87e   : > { %6849 = vmatpush1.bf16.msra.mxu0 %v6848_v43  ;;  %v1115_v12 = vsel %vm772_vm14, %v1111_v5, %v1113_v11 }
 0x87f   : > { %1252 = vrot.lane.b32.xlu0 %v1247_v50, %s7349_s19  ;;  %1119 = vst [vmem:[#allocation2 + $0x68] sm:$0xf0] %v1115_v12  ;;  %v1300_v12 = vld [vmem:[#allocation2 + $0x58] sm:$0xff] }
 0x881   : > { %v7886_v52 = vpop.permute.xlu1 %1229  ;;  %v1131_v28 = vpop.permute.xlu0 %1130 }
 0x883   : > { %1248 = vrot.lane.b32.xlu0 %v1245_v23, %s7349_s19  ;;  %s10353_s19 = sshll.u32 %s10355_s22, 3 }
 0x884   : > { %s549_s0 = scalar_lea.vmem %s10302_s15, %s10353_s19 }
 0x885   : > { %v789_v59 = vpop.permute.xlu1 %788  ;;  %v1015_v20 = vpop.permute.xlu0 %1014 }
 0x886   : > { %v795_v35 = vsel %vm794_vm0, %v789_v59, %v791_v26  ;;  %v1299_v59 = vld [vmem:[#allocation2 + $0x50] sm:$0xff] }
 0x887   : > { %1147 = vrot.lane.b32.xlu0 %v1144_v60, %s10305_s20  ;;  %799 = vst [vmem:[#allocation2 + $0x70] sm:$0xf0] %v795_v35 }
 0x889   : > { %v1109_v57 = vpop.permute.xlu1 %1108  ;;  %v812_v44 = vpop.permute.xlu0 %811 }
 0x88a   : > { %v1114_v13 = vsel %vm772_vm14, %v1109_v57, %v1111_v5  ;;  %v1302_v57 = vld [vmem:[#allocation2 + $0x68] sm:$0xff] }
 0x88b   : > { %1270 = vrot.lane.b32.xlu0 %v1262_v46, %s10305_s20  ;;  %1118 = vst [vmem:[#allocation2 + $0x60] sm:$0xf0] %v1114_v13 }
 0x88d   : > { %v905_v56 = vpop.permute.xlu1 %904  ;;  %v928_v14 = vpop.permute.xlu0 %927 }
 0x88e   : > { %v909_v54 = vsel %vm794_vm0, %v905_v56, %v907_v34 }
 0x88f   : > { %913 = vst [vmem:[#allocation2 + $0x88] sm:$0xf] %v909_v54 }
 0x891   : > { %v1017_v31 = vpop.permute.xlu1 %1016  ;;  %v1037_v63 = vpop.permute.xlu0 %1036 }
 0x892   : > { %v1020_v47 = vsel %vm794_vm0, %v1015_v20, %v1017_v31  ;;  %v1021_v38 = vsel %vm794_vm0, %v1017_v31, %v1019_v42 }
 0x893   : > { %1024 = vst [vmem:[#allocation2 + $0x80] sm:$0xf0] %v1020_v47  ;;  %1025 = vst [vmem:[#allocation2 + $0x88] sm:$0xf0] %v1021_v38 }
 0x895   : > { %v1129_v2 = vpop.permute.xlu1 %1128  ;;  %v1152_v8 = vpop.permute.xlu0 %1151 }
 0x896   : > { %v1133_v9 = vsel %vm794_vm0, %v1129_v2, %v1131_v28 }
 0x897   : > { %1137 = vst [vmem:[#allocation2 + $0x98] sm:$0xf] %v1133_v9 }
 0x899   : > { %v1251_v55 = vpop.permute.xlu1 %1250  ;;  %v924_v48 = vpop.permute.xlu0 %923 }
 0x89a   : > { %v1306_v54 = vld [vmem:[#allocation2 + $0x88] sm:$0xff] }
 0x89d   : > { %v903_v10 = vpop.permute.xlu1 %902 }
 0x89e   : > { %v908_v45 = vsel %vm794_vm0, %v903_v10, %v905_v56  ;;  %v1301_v56 = vld [vmem:[#allocation2 + $0x60] sm:$0xff] }
 0x89f   : > { %912 = vst [vmem:[#allocation2 + $0x80] sm:$0xf] %v908_v45 }
 0x8a1   : > { %v1127_v24 = vpop.permute.xlu1 %1126 }
 0x8a2   : > { %v1132_v41 = vsel %vm794_vm0, %v1127_v24, %v1129_v2 }
 0x8a3   : > { %1136 = vst [vmem:[#allocation2 + $0x90] sm:$0xf] %v1132_v41 }
 0x8a5   : > { %v810_v1 = vpop.permute.xlu1 %809 }
 0x8a6   : > { %v815_v0 = vsel %vm813_vm2, %v810_v1, %v812_v44 }
 0x8a7   : > { %819 = vst [vmem:[#allocation2 + $0xa8] sm:$0xf] %v815_v0  ;;  %v7934_v0 = vld [vmem:[%s7928_s27 + $0x18] sm:$0xff] }
 0x8a9   : > { %v926_v51 = vpop.permute.xlu1 %925 }
 0x8aa   : > { %v929_v40 = vsel %vm813_vm2, %v924_v48, %v926_v51  ;;  %v930_v53 = vsel %vm813_vm2, %v926_v51, %v928_v14  ;;  %v1305_v14 = vld [vmem:[#allocation2 + $0x80] sm:$0xff]  ;;  %v7940_v51 = vld [vmem:[%s7928_s27 + $0x10] sm:$0xff] }
 0x8ab   : > { %933 = vst [vmem:[#allocation2 + $0xa0] sm:$0xf0] %v929_v40  ;;  %934 = vst [vmem:[#allocation2 + $0xa8] sm:$0xf0] %v930_v53  ;;  %v7937_v48 = vld [vmem:[%s7928_s27] sm:$0xff] }
 0x8ad   : > { %v1035_v29 = vpop.permute.xlu1 %1034 }
 0x8ae   : > { %v1039_v39 = vsel %vm813_vm2, %v1035_v29, %v1037_v63 }
 0x8af   : > { %1043 = vst [vmem:[#allocation2 + $0xb8] sm:$0xf] %v1039_v39  ;;  %v6868_v39 = vpack.c.bf16 %v7940_v51, %v7937_v48 }
 0x8b1   : > { %v1150_v21 = vpop.permute.xlu1 %1149 }
 0x8b2   : > { %v1154_v22 = vsel %vm813_vm2, %v1150_v21, %v1152_v8  ;;  %v1310_v10 = vld [vmem:[#allocation2 + $0xa8] sm:$0xff] }
 0x8b3   : > { %1158 = vst [vmem:[#allocation2 + $0xb8] sm:$0xf0] %v1154_v22  ;;  %v1286_v22 = vld [vmem:[%s10289_s2 + $0x8] sm:$0xff] }
 0x8b5   : > { %v808_v27 = vpop.permute.xlu1 %807 }
 0x8b6   : > { %v814_v11 = vsel %vm813_vm2, %v808_v27, %v810_v1  ;;  %v7931_v1 = vld [vmem:[%s7928_s27 + $0x8] sm:$0xff]  ;;  %v1287_v27 = vld [vmem:[%s10289_s2 + $0x10] sm:$0xff] }
 0x8b7   : > { %818 = vst [vmem:[#allocation2 + $0xa0] sm:$0xf] %v814_v11  ;;  %v6866_v53 = vpack.c.bf16 %v7934_v0, %v7931_v1  ;;  %v1288_v11 = vld [vmem:[%s10289_s2 + $0x18] sm:$0xff] }
 0x8b9   : > { %v1033_v26 = vpop.permute.xlu1 %1032 }
 0x8ba   : > { %v1038_v25 = vsel %vm813_vm2, %v1033_v26, %v1035_v29  ;;  %v1312_v2 = vld [vmem:[#allocation2 + $0xb8] sm:$0xff]  ;;  %v1285_v29 = vld [vmem:[%s10289_s2] sm:$0xff]  ;;  %v7963_v26 = vld [vmem:[%s7928_s27 + $0x28] sm:$0xff] }
 0x8bb   : > { %1042 = vst [vmem:[#allocation2 + $0xb0] sm:$0xf] %v1038_v25  ;;  %v6862_v45 = vpack.c.bf16 %v1312_v2, %v1310_v10  ;;  %v7966_v25 = vld [vmem:[%s7928_s27 + $0x38] sm:$0xff]  ;;  %v1440_v2 = vld [vmem:[%s10292_s5] sm:$0xff] }
 0x8bd   : > { %v1269_v18 = vpop.permute.xlu1 %1268 }
 0x8be   : > { %v1309_v24 = vld [vmem:[#allocation2 + $0xa0] sm:$0xff] }
 0x8dc   : > { %v1232_v19 = vpop.permute.xlu0 %1231 }
 0x8dd   : > { %v1234_v3 = vsel %vm772_vm14, %v7886_v52, %v1232_v19  ;;  %v7971_v19 = vld [vmem:[%s7928_s27 + $0x20] sm:$0xff] }
 0x8de   : > { %1238 = vst [vmem:[#allocation2 + $0x78] sm:$0xf] %v1234_v3  ;;  %v7974_v3 = vld [vmem:[%s7928_s27 + $0x30] sm:$0xff] }
 0x8e4   : > { %v1267_v62 = vpop.permute.xlu1 %1266 }
 0x8e5   : > { %v1228_v4 = vpop.permute.xlu0 %1227  ;;  %v1272_v33 = vsel %vm813_vm2, %v1267_v62, %v1269_v18  ;;  %v1444_v62 = vld [vmem:[%s10293_s6] sm:$0xff] }
 0x8e6   : > { %v1233_v49 = vsel %vm772_vm14, %v1228_v4, %v7886_v52  ;;  %1276 = vst [vmem:[#allocation2 + $0xc0] sm:$0xf] %v1272_v33  ;;  %v1304_v52 = vld [vmem:[#allocation2 + $0x78] sm:$0xff]  ;;  %v6872_v4 = vpack.c.bf16 %v7974_v3, %v7971_v19  ;;  %v1446_v33 = vld [vmem:[%s10293_s6 + $0x10] sm:$0xff] }
 0x8e7   : > { %1237 = vst [vmem:[#allocation2 + $0x70] sm:$0xf] %v1233_v49  ;;  %v1445_v49 = vld [vmem:[%s10293_s6 + $0x8] sm:$0xff] }
 0x8e9   : > { %v1214_v37 = vpop.permute.xlu0 %1213 }
 0x8ea   : > { %v1216_v58 = vsel %vm10313_vm13, %v7855_v61, %v1214_v37  ;;  %v1447_v37 = vld [vmem:[%s10293_s6 + $0x18] sm:$0xff] }
 0x8eb   : > { %1220 = vst [vmem:[#allocation2 + $0x48] sm:$0xf0] %v1216_v58  ;;  %v1650_v58 = vld [vmem:[%s10294_s7] sm:$0xff] }
 0x8ed   : > { %v1210_v43 = vpop.permute.xlu0 %1209 }
 0x8ee   : > { %v1215_v50 = vsel %vm10313_vm13, %v1210_v43, %v7855_v61  ;;  %v6854_v61 = vpack.c.bf16 %v1304_v52, %v1302_v57  ;;  %v1303_v46 = vld [vmem:[#allocation2 + $0x70] sm:$0xff]  ;;  %v1651_v43 = vld [vmem:[%s10294_s7 + $0x8] sm:$0xff]  ;;  %vm3105_vm13 = vcmask 261248  }
 0x8ef   : > { %1219 = vst [vmem:[#allocation2 + $0x40] sm:$0xf0] %v1215_v50  ;;  %v6856_v31 = vpack.c.bf16 %v1303_v46, %v1301_v56  ;;  %v7353_v50 = vmov 0  }
 0x8f0   : > { %7167 = vset.pattern.permute.xlu0 %v7353_v50  ;;  %7168 = vset.pattern.permute.xlu1 %v7353_v50 }
 0x8f1   : > { %v1253_v34 = vpop.permute.xlu0 %1252  ;;  %1656 = vperm.xlu0 %7167, %v1650_v58   ;;  %1661 = vperm.xlu1 %7168, %v1651_v43  }
 0x8f2   : > { %v1255_v5 = vsel %vm794_vm0, %v1251_v55, %v1253_v34  ;;  %v1298_v30 = vld [vmem:[#allocation2 + $0x48] sm:$0xff]  ;;  %v1652_v34 = vld [vmem:[%s10294_s7 + $0x10] sm:$0xff] }
 0x8f3   : > { %1259 = vst [vmem:[#allocation2 + $0x98] sm:$0xf0] %v1255_v5  ;;  %v6850_v23 = vpack.c.bf16 %v1300_v12, %v1298_v30  ;;  %v1653_v5 = vld [vmem:[%s10294_s7 + $0x18] sm:$0xff] }
 0x8f5   : > { %v1249_v42 = vpop.permute.xlu0 %1248  ;;  %6851 = vmatprep.subr.bf16.mxu0 %v6850_v23  ;;  %1666 = vperm.xlu1 %7168, %v1652_v34  }
 0x8f6   : > { %v1254_v60 = vsel %vm794_vm0, %v1249_v42, %v1251_v55  ;;  %v1297_v28 = vld [vmem:[#allocation2 + $0x40] sm:$0xff]  ;;  %1671 = vperm.xlu0 %7167, %v1653_v5   ;;  %vm2566_vm0 = vcmask 1047808  }
 0x8f7   : > { %1258 = vst [vmem:[#allocation2 + $0x90] sm:$0xf0] %v1254_v60  ;;  %v6852_v35 = vpack.c.bf16 %v1299_v59, %v1297_v28 }
 0x8f9   : > { %v1148_v13 = vpop.permute.xlu0 %1147  ;;  %6853 = vmatpush1.bf16.msra.mxu0 %v6852_v35 }
 0x8fa   : > { %v1153_v20 = vsel %vm813_vm2, %v1148_v13, %v1150_v21  ;;  %6855 = vmatprep.subr.bf16.mxu0 %v6854_v61  ;;  %v1308_v44 = vld [vmem:[#allocation2 + $0x98] sm:$0xff]  ;;  %v1313_v21 = vld [vmem:[#allocation2 + $0xc0] sm:$0x1f] }
 0x8fb   : > { %1157 = vst [vmem:[#allocation2 + $0xb0] sm:$0xf0] %v1153_v20  ;;  %v6858_v47 = vpack.c.bf16 %v1308_v44, %v1306_v54 }
 0x8fd   : > { %v1271_v38 = vpop.permute.xlu0 %1270  ;;  %6857 = vmatpush1.bf16.msra.mxu0 %v6856_v31 }
 0x8fe   : > { %v1273_v9 = vsel %vm813_vm2, %v1269_v18, %v1271_v38  ;;  %6859 = vmatprep.subr.bf16.mxu0 %v6858_v47  ;;  %v1307_v55 = vld [vmem:[#allocation2 + $0x90] sm:$0xff]  ;;  %v6870_v18 = vpack.c.bf16 %v7966_v25, %v7963_v26 }
 0x8ff   : > { %1277 = vst [vmem:[#allocation2 + $0xc8] sm:$0xf] %v1273_v9  ;;  %v6860_v63 = vpack.c.bf16 %v1307_v55, %v1305_v14  ;;  %v1441_v9 = vld [vmem:[%s10292_s5 + $0x8] sm:$0xff]  ;;  %v1442_v14 = vld [vmem:[%s10292_s5 + $0x10] sm:$0xff]  ;;  %v1443_v55 = vld [vmem:[%s10292_s5 + $0x18] sm:$0xff] }
 0x901   : > { %6861 = vmatpush1.bf16.msra.mxu0 %v6860_v63 }
 0x902   : > { %6863 = vmatprep.subr.bf16.mxu0 %v6862_v45  ;;  %v1311_v41 = vld [vmem:[#allocation2 + $0xb0] sm:$0xff] }
 0x903   : > { %v6864_v8 = vpack.c.bf16 %v1311_v41, %v1309_v24 }
 0x905   : > { %6865 = vmatpush1.bf16.msra.mxu0 %v6864_v8 }
 0x906   : > { %v1314_v40 = vld [vmem:[#allocation2 + $0xc8] sm:$0x1f] }
 0x907   : > { %6571 = vmatprep.subr.msk.mxu0 %vm1328_vm9, %v1314_v40 }
 0x909   : > { %6572 = vmatpush1.msk.msra.mxu0 %vm1328_vm9, %v1313_v21  ;;  %vm3055_vm9 = vcmask 130048  }
 0x90a   : > { %6573 = vmatmul.mubr.msk.f32.vlgmr.msra.gmra.mrb[0].mxu0 %vm1315_vm10, %v1285_v29  ;;  %6867 = vmatprep.subr.bf16.mxu0 %v6866_v53 }
 0x90b   : > { %1405 = vmatprep.mubr.f32.mxu0 %v7352_v6  ;;  %6869 = vmatpush1.bf16.msra.mxu0 %v6868_v39 }
 0x90c   : > { %6871 = vmatprep.subr.bf16.mxu0 %v6870_v18 }
 0x90e   : > { %6574 = vmatmul.mubr.msk.f32.gmra.mrb[2].mxu0 %vm1315_vm10, %v1286_v22 }
 0x90f   : > { %1411 = vmatprep.mubr.f32.mxu0 %v7352_v6  ;;  %6873 = vmatpush1.bf16.msra.mxu0 %v6872_v4 }
 0x912   : > { %6575 = vmatmul.mubr.msk.f32.gmra.mrb[4].mxu0 %vm1315_vm10, %v1287_v27 }
 0x913   : > { %1417 = vmatprep.mubr.f32.mxu0 %v7352_v6 }
 0x916   : > { %6576 = vmatmul.mubr.msk.f32.gmra.mrb[6].mxu0 %vm1315_vm10, %v1288_v11  ;;  %vm3130_vm10 = vcmask 523648  }
 0x917   : > { %1524 = vmatprep.mubr.f32.mxu0 %v7352_v6 }
 0x91a   : > { %6577 = vmatmul.mubr.msk.f32.vlgmr.msra.gmra.mrb[8].mxu0 %vm571_vm1, %v1444_v62 }
 0x91b   : > { %1530 = vmatprep.mubr.f32.mxu0 %v7352_v6 }
 0x91e   : > { %6578 = vmatmul.mubr.msk.f32.gmra.mrb[10].mxu0 %vm571_vm1, %v1445_v49 }
 0x91f   : > { %1536 = vmatprep.mubr.f32.mxu0 %v7352_v6 }
 0x922   : > { %6579 = vmatmul.mubr.msk.f32.gmra.mrb[12].mxu0 %vm571_vm1, %v1446_v33 }
 0x923   : > { %1542 = vmatprep.mubr.f32.mxu0 %v7352_v6 }
 0x926   : > { %6580 = vmatmul.mubr.msk.f32.gmra.mrb[14].mxu0 %vm571_vm1, %v1447_v37 }
 0x927   : > { %1625 = vmatprep.mubr.f32.mxu0 %v7352_v6 }
 0x970   : > { %v1657_v40 = vpop.permute.xlu0 %1656  ;;  %v1662_v53 = vpop.permute.xlu1 %1661 }
 0x974   : > { %v1667_v58 = vpop.permute.xlu1 %1666 }
 0x9dd   : > { %v1401_v30 = vpop.f32.mrb[0].mxu0 }
 0x9de   : > { %v1403_v12 = vpop.f32.mrb[1].mxu0  ;;  %v1424_v42 = vmax.f32 %v1401_v30, 0.0 }
 0x9df   : > { %v1425_v28 = vmax.f32 %v1403_v12, 0.0 }
 0x9e1   : > { %v1407_v23 = vpop.f32.mrb[2].mxu0 }
 0x9e2   : > { %v1426_v52 = vmax.f32 %v1407_v23, 0.0  ;;  %v1409_v60 = vpop.f32.mrb[3].mxu0 }
 0x9e3   : > { %v1427_v59 = vmax.f32 %v1409_v60, 0.0  ;;  %v1672_v60 = vpop.permute.xlu0 %1671 }
 0x9e4   : > { %v8010_v35 = vpack.c.bf16 %v1426_v52, %v1424_v42 }
 0x9e5   : > { %v8012_v57 = vpack.c.bf16 %v1427_v59, %v1425_v28  ;;  %v1413_v61 = vpop.f32.mrb[4].mxu0 }
 0x9e6   : > { %v1415_v46 = vpop.f32.mrb[5].mxu0  ;;  %v1428_v20 = vmax.f32 %v1413_v61, 0.0 }
 0x9e7   : > { %6875 = vmatprep.subr.bf16.mxu0 %v8012_v57  ;;  %7098 = vmatprep.subr.bf16.mxu1 %v8012_v57  ;;  %v1429_v44 = vmax.f32 %v1415_v46, 0.0 }
 0x9e8   : > { %6877 = vmatpush1.bf16.msra.mxu0 %v8010_v35  ;;  %7100 = vmatpush1.bf16.msra.mxu1 %v8010_v35 }
 0x9e9   : > { %v1419_v13 = vpop.f32.mrb[6].mxu0 }
 0x9ea   : > { %v1430_v56 = vmax.f32 %v1419_v13, 0.0  ;;  %v1421_v54 = vpop.f32.mrb[7].mxu0 }
 0x9eb   : > { %v1431_v31 = vmax.f32 %v1421_v54, 0.0 }
 0x9ec   : > { %v8018_v47 = vpack.c.bf16 %v1430_v56, %v1428_v20  ;;  %v7354_v20 = vmov 0.0|0.0  }
 0x9ed   : > { %v8020_v38 = vpack.c.bf16 %v1431_v31, %v1429_v44 }
 0x9ef   : > { %6879 = vmatprep.subr.bf16.mxu0 %v8020_v38  ;;  %7099 = vmatprep.subr.bf16.mxu1 %v8020_v38 }
 0x9f0   : > { %6881 = vmatpush1.bf16.msra.mxu0 %v8018_v47  ;;  %7101 = vmatpush1.bf16.msra.mxu1 %v8018_v47 }
 0x9f1   : > { %v1532_v63 = vpop.f32.mrb[10].mxu0  ;;  %6882 = vmatprep.subr.bf16.mxu1 %v7354_v20 }
 0x9f2   : > { %v1534_v10 = vpop.f32.mrb[11].mxu0 }
 0x9f3   : > { %6581 = vmatmul.mubr.msk.f32.vlgmr.msra.gmra.mrb[8].mxu0 %vm571_vm1, %v1440_v2  ;;  %6582 = vmatmul.mubr.msk.f32.vlgmr.msra.gmra.mrb[0].mxu1 %vm571_vm1, %v1441_v9 }
 0x9f4   : > { %1637 = vmatprep.mubr.f32.mxu1 %v7352_v6 }
 0x9f5   : > { %v1538_v45 = vpop.f32.mrb[12].mxu0 }
 0x9f6   : > { %v1540_v24 = vpop.f32.mrb[13].mxu0 }
 0x9f7   : > { %6583 = vmatmul.mubr.msk.f32.gmra.mrb[2].mxu1 %vm571_vm1, %v1442_v14 }
 0x9f8   : > { %1643 = vmatprep.mubr.f32.mxu1 %v7352_v6 }
 0x9f9   : > { %v1544_v41 = vpop.f32.mrb[14].mxu0 }
 0x9fa   : > { %v1546_v8 = vpop.f32.mrb[15].mxu0 }
 0x9fb   : > { %6584 = vmatmul.mubr.msk.f32.gmra.mrb[4].mxu1 %vm571_vm1, %v1443_v55 }
 0x9fc   : > { %6774 = vmatprep.mubr.msk.f32.mxu1 %vm7355_vm11, %v7352_v6 }
 0xac6   : > { %v1627_v29 = vpop.f32.mrb[8].mxu0  ;;  %v1633_v39 = vpop.f32.mrb[0].mxu1 }
 0xac7   : > { %v8044_v21 = vadd.f32 %v1657_v40, %v1627_v29  ;;  %v1634_v22 = vadd.f32 %v1633_v39, %v1532_v63  ;;  %v1629_v27 = vpop.f32.mrb[9].mxu0  ;;  %v1635_v11 = vpop.f32.mrb[1].mxu1  ;;  %v1776_v29 = vld [vmem:[%s10296_s9 + $0x10] sm:$0xff]  ;;  %v1777_v39 = vld [vmem:[%s10296_s9 + $0x18] sm:$0xff] }
 0xac8   : > { %v8046_v18 = vadd.f32 %v1657_v40, %v1629_v27  ;;  %v1636_v4 = vadd.f32 %v1635_v11, %v1534_v10 }
 0xac9   : > { %v8048_v62 = vadd.f32 %v1662_v53, %v1634_v22 }
 0xaca   : > { %v1682_v49 = vadd.f32 %v8046_v18, %v8044_v21  ;;  %v8052_v33 = vadd.f32 %v1662_v53, %v1636_v4  ;;  %v1639_v37 = vpop.f32.mrb[2].mxu1  ;;  %v1775_v53 = vld [vmem:[%s10296_s9 + $0x8] sm:$0xff] }
 0xacb   : > { %v1640_v43 = vadd.f32 %v1639_v37, %v1538_v45  ;;  %v1641_v50 = vpop.f32.mrb[3].mxu1  ;;  %v1699_v45 = vld [vmem:[%s10295_s8] sm:$0xff] }
 0xacc   : > { %v1642_v34 = vadd.f32 %v1641_v50, %v1540_v24  ;;  %1683 = vadd.xlane.f32.xlu1 %v1682_v49  ;;  %v1685_v5 = vadd.f32 %v8052_v33, %v8048_v62  ;;  %v1774_v24 = vld [vmem:[%s10296_s9] sm:$0xff] }
 0xacd   : > { %v8056_v30 = vadd.f32 %v1667_v58, %v1640_v43  ;;  %6779 = vmatprep.mubr.msk.f32.mxu0 %vm1778_vm12, %v1774_v24 }
 0xace   : > { %v8058_v12 = vadd.f32 %v1667_v58, %v1642_v34  ;;  %v1645_v23 = vpop.f32.mrb[4].mxu1  ;;  %1686 = vadd.xlane.f32.xlu0 %v1685_v5 }
 0xacf   : > { %v1646_v42 = vadd.f32 %v1645_v23, %v1544_v41  ;;  %v1647_v52 = vpop.f32.mrb[5].mxu1 }
 0xad0   : > { %v1648_v28 = vadd.f32 %v1647_v52, %v1546_v8  ;;  %v1688_v59 = vadd.f32 %v8058_v12, %v8056_v30 }
 0xad1   : > { %v8062_v61 = vadd.f32 %v1672_v60, %v1646_v42 }
 0xad2   : > { %v8064_v46 = vadd.f32 %v1672_v60, %v1648_v28  ;;  %1689 = vadd.xlane.f32.xlu0 %v1688_v59 }
 0xad4   : > { %v1691_v13 = vadd.f32 %v8064_v46, %v8062_v61 }
 0xad6   : > { %1692 = vadd.xlane.f32.xlu1 %v1691_v13 }
 0xb59   : > { %v1684_v56 = vpop.xlane.xlu1 %1683 }
 0xb5a   : > { %v1695_v44 = vmul.f32 0.00390625, %v1684_v56 }
 0xb5b   : > { %v1687_v54 = vpop.xlane.xlu0 %1686 }
 0xb5c   : > { %v1696_v31 = vmul.f32 0.00390625, %v1687_v54 }
 0xb5e   : > { %v6883_v2 = vpack.c.bf16 %v1696_v31, %v1695_v44  ;;  %v2195_v44 = vld [vmem:[%s10299_s12 + $0x8] sm:$0xff]  ;;  %v2194_v31 = vld [vmem:[%s10299_s12] sm:$0xff] }
 0xb5f   : > { %v1690_v9 = vpop.xlane.xlu0 %1689 }
 0xb60   : > { %6884 = vmatpush3.bf16.msra.mxu1 %v6883_v2  ;;  %v1697_v55 = vmul.f32 0.00390625, %v1690_v9  ;;  %v2197_v2 = vld [vmem:[%s10299_s12 + $0x18] sm:$0xff]  ;;  %v2196_v9 = vld [vmem:[%s10299_s12 + $0x10] sm:$0xff] }
 0xb61   : > { %6885 = vmatprep.subr.bf16.mxu1 %v7354_v20 }
 0xb63   : > { %v1693_v14 = vpop.xlane.xlu1 %1692 }
 0xb64   : > { %v1698_v63 = vmul.f32 0.00390625, %v1693_v14 }
 0xb66   : > { %v6886_v10 = vpack.c.bf16 %v1698_v63, %v1697_v55 }
 0xb68   : > { %6887 = vmatpush3.bf16.msra.mxu1 %v6886_v10 }
 0xb6b   : > { %6775 = vmatmul.mubr.msk.f32.vlgmr.msra.gmra.mrb[6].mxu1 %vm571_vm1, %v1699_v45 }
 0xb6c   : > { %2068 = vmatprep.mubr.f32.mxu1 %v7352_v6 }
 0xc3e   : > { %v1769_v41 = vpop.f32.mrb[6].mxu1 }
 0xc3f   : > { %v1773_v8 = vmax.f32 %v1769_v41, 0.0  ;;  %v6776_v40 = vpop.f32.mrb[7].mxu1 }
 0xc41   : > { %6777 = vmatprep.subr.mxu0 %v1773_v8 }
 0xc42   : > { %6778 = vmatpush3.msra.mxu0 %v1773_v8 }
 0xc43   : > { %6780 = vmatmul.mubr.msk.f32.vlgmr.msra.gmra.mrb[16].mxu0 %vm1778_vm12, %v1775_v53  ;;  %6904 = vmatprep.subr.bf16.mxu0 %v7354_v20 }
 0xc44   : > { %6782 = vmatprep.mubr.msk.f32.mxu0 %vm1778_vm12, %v1776_v29 }
 0xc47   : > { %6783 = vmatmul.mubr.msk.f32.gmra.mrb[18].mxu0 %vm1778_vm12, %v1777_v39 }
 0xc48   : > { %6793 = vmatprep.mubr.msk.f32.mxu0 %vm7355_vm11, %v7352_v6 }
 0xd16   : > { %v6781_v22 = vpop.f32.mrb[16].mxu0 }
 0xd17   : > { %v6591_v27 = vmul.f32 -1.442695, %v6781_v22  ;;  %v1857_v11 = vpop.f32.mrb[17].mxu0 }
 0xd18   : > { %v6590_v4 = vmul.f32 -1.442695, %v1857_v11 }
 0xd19   : > { %7171 = vpow2.f32 %v6591_v27 }
 0xd1a   : > { %7173 = vpow2.f32 %v6590_v4  ;;  %v6784_v49 = vpop.f32.mrb[18].mxu0 }
 0xd1b   : > { %v6593_v37 = vmul.f32 -1.442695, %v6784_v49  ;;  %v1867_v58 = vpop.f32.mrb[19].mxu0 }
 0xd1c   : > { %v6592_v43 = vmul.f32 -1.442695, %v1867_v58 }
 0xd1d   : > { %7175 = vpow2.f32 %v6593_v37 }
 0xd1e   : > { %7177 = vpow2.f32 %v6592_v43 }
 0xd23   : > { %v7172_v50 = vpop.eup %7171 }
 0xd24   : > { %v7174_v34 = vpop.eup %7173  ;;  %v1889_v5 = vadd.f32 1.0, %v7172_v50 }
 0xd25   : > { %v1888_v23 = vadd.f32 1.0, %v7174_v34 }
 0xd26   : > { %7179 = vrcp.f32 %v1889_v5 }
 0xd27   : > { %v7176_v42 = vpop.eup %7175  ;;  %7181 = vrcp.f32 %v1888_v23 }
 0xd28   : > { %v7178_v52 = vpop.eup %7177  ;;  %v1891_v60 = vadd.f32 1.0, %v7176_v42 }
 0xd29   : > { %v1890_v28 = vadd.f32 1.0, %v7178_v52 }
 0xd2a   : > { %7183 = vrcp.f32 %v1891_v60 }
 0xd2b   : > { %7185 = vrcp.f32 %v1890_v28 }
 0xd30   : > { %v7180_v59 = vpop.eup %7179 }
 0xd31   : > { %v7182_v13 = vpop.eup %7181  ;;  %1907 = vperm.xlu1 %7168, %v7180_v59  }
 0xd32   : > { %1902 = vperm.xlu0 %7167, %v7182_v13  }
 0xd34   : > { %v7184_v56 = vpop.eup %7183 }
 0xd35   : > { %v7186_v54 = vpop.eup %7185 }
 0xd36   : > { %1917 = vperm.xlu0 %7167, %v7184_v56   ;;  %1912 = vperm.xlu1 %7168, %v7186_v54  }
 0xd3a   : > { %2205 = vperm.xlu0 %7167, %v2195_v44   ;;  %2200 = vperm.xlu1 %7168, %v2194_v31  }
 0xd3e   : > { %2215 = vperm.xlu0 %7167, %v2197_v2   ;;  %2210 = vperm.xlu1 %7168, %v2196_v9  }
 0xdb0   : > { %v1908_v14 = vpop.permute.xlu1 %1907 }
 0xdb1   : > { %v1922_v55 = vmul.f32 %v1908_v14, %v8048_v62  ;;  %v1923_v63 = vmul.f32 %v1908_v14, %v8052_v33  ;;  %v1903_v10 = vpop.permute.xlu0 %1902 }
 0xdb2   : > { %v1920_v45 = vmul.f32 %v1903_v10, %v8044_v21  ;;  %v1921_v24 = vmul.f32 %v1903_v10, %v8046_v18 }
 0xdb3   : > { %v6596_v41 = vmul.f32 -1.442695, %v1922_v55  ;;  %v6597_v8 = vmul.f32 -1.442695, %v1923_v63 }
 0xdb4   : > { %v6594_v40 = vmul.f32 -1.442695, %v1920_v45  ;;  %v6595_v53 = vmul.f32 -1.442695, %v1921_v24 }
 0xdb5   : > { %7187 = vpow2.f32 %v6596_v41  ;;  %v1918_v29 = vpop.permute.xlu0 %1917  ;;  %v1913_v39 = vpop.permute.xlu1 %1912 }
 0xdb6   : > { %7189 = vpow2.f32 %v6597_v8  ;;  %v1926_v22 = vmul.f32 %v1918_v29, %v8062_v61  ;;  %v1927_v27 = vmul.f32 %v1918_v29, %v8064_v46  ;;  %v1924_v62 = vmul.f32 %v1913_v39, %v8056_v30 }
 0xdb7   : > { %7191 = vpow2.f32 %v6594_v40  ;;  %v1925_v33 = vmul.f32 %v1913_v39, %v8058_v12 }
 0xdb8   : > { %7193 = vpow2.f32 %v6595_v53  ;;  %v6600_v21 = vmul.f32 -1.442695, %v1926_v22  ;;  %v6601_v18 = vmul.f32 -1.442695, %v1927_v27  ;;  %v6598_v11 = vmul.f32 -1.442695, %v1924_v62 }
 0xdb9   : > { %v6599_v4 = vmul.f32 -1.442695, %v1925_v33  ;;  %v1980_v22 = vld [vmem:[%s10298_s11] sm:$0xff]  ;;  %v1981_v27 = vld [vmem:[%s10298_s11 + $0x8] sm:$0xff]  ;;  %v1978_v62 = vld [vmem:[%s10297_s10 + $0x10] sm:$0xff] }
 0xdba   : > { %7195 = vpow2.f32 %v6600_v21  ;;  %v1979_v33 = vld [vmem:[%s10297_s10 + $0x18] sm:$0xff]  ;;  %v2201_v21 = vpop.permute.xlu1 %2200 }
 0xdbb   : > { %7197 = vpow2.f32 %v6601_v18 }
 0xdbc   : > { %7199 = vpow2.f32 %v6598_v11 }
 0xdbd   : > { %7201 = vpow2.f32 %v6599_v4 }
 0xdbf   : > { %v7188_v49 = vpop.eup %7187 }
 0xdc0   : > { %v7190_v37 = vpop.eup %7189  ;;  %v1954_v58 = vadd.f32 1.0, %v7188_v49 }
 0xdc1   : > { %v7192_v61 = vpop.eup %7191  ;;  %v1955_v43 = vadd.f32 1.0, %v7190_v37  ;;  %v2206_v37 = vpop.permute.xlu0 %2205 }
 0xdc2   : > { %v7194_v46 = vpop.eup %7193  ;;  %7203 = vrcp.f32 %v1954_v58  ;;  %v1952_v30 = vadd.f32 1.0, %v7192_v61 }
 0xdc3   : > { %7205 = vrcp.f32 %v1955_v43  ;;  %v1953_v50 = vadd.f32 1.0, %v7194_v46 }
 0xdc4   : > { %v7196_v12 = vpop.eup %7195  ;;  %7207 = vrcp.f32 %v1952_v30 }
 0xdc5   : > { %v7198_v34 = vpop.eup %7197  ;;  %7209 = vrcp.f32 %v1953_v50  ;;  %v1958_v5 = vadd.f32 1.0, %v7196_v12  ;;  %v2211_v50 = vpop.permute.xlu1 %2210 }
 0xdc6   : > { %v7200_v23 = vpop.eup %7199  ;;  %v1959_v42 = vadd.f32 1.0, %v7198_v34 }
 0xdc7   : > { %v7202_v52 = vpop.eup %7201  ;;  %7211 = vrcp.f32 %v1958_v5  ;;  %v1956_v60 = vadd.f32 1.0, %v7200_v23 }
 0xdc8   : > { %7213 = vrcp.f32 %v1959_v42  ;;  %v1957_v28 = vadd.f32 1.0, %v7202_v52  ;;  %v2216_v52 = vpop.permute.xlu0 %2215 }
 0xdc9   : > { %7215 = vrcp.f32 %v1956_v60 }
 0xdca   : > { %7217 = vrcp.f32 %v1957_v28 }
 0xdcc   : > { %v8116_v59 = vpop.eup %7203 }
 0xdcd   : > { %v8118_v13 = vpop.eup %7205  ;;  %v1986_v56 = vmul.f32 %v8116_v59, %v7940_v51 }
 0xdce   : > { %v8122_v54 = vpop.eup %7207  ;;  %v1987_v44 = vmul.f32 %v8118_v13, %v7934_v0 }
 0xdcf   : > { %v8126_v31 = vpop.eup %7209  ;;  %v1984_v2 = vmul.f32 %v8122_v54, %v7937_v48 }
 0xdd0   : > { %v1985_v9 = vmul.f32 %v8126_v31, %v7931_v1 }
 0xdd1   : > { %v8132_v14 = vpop.eup %7211  ;;  %v6890_v55 = vpack.c.bf16 %v1986_v56, %v1984_v2 }
 0xdd2   : > { %v8134_v63 = vpop.eup %7213  ;;  %v6888_v10 = vpack.c.bf16 %v1987_v44, %v1985_v9  ;;  %v1990_v45 = vmul.f32 %v8132_v14, %v7974_v3 }
 0xdd3   : > { %v8138_v24 = vpop.eup %7215  ;;  %v1991_v41 = vmul.f32 %v8134_v63, %v7966_v25 }
 0xdd4   : > { %v8142_v8 = vpop.eup %7217  ;;  %6889 = vmatprep.subr.bf16.mxu1 %v6888_v10  ;;  %v1988_v40 = vmul.f32 %v8138_v24, %v7971_v19 }
 0xdd5   : > { %6891 = vmatpush1.bf16.msra.mxu1 %v6890_v55  ;;  %v1989_v53 = vmul.f32 %v8142_v8, %v7963_v26 }
 0xdd6   : > { %v6894_v29 = vpack.c.bf16 %v1990_v45, %v1988_v40 }
 0xdd7   : > { %v6892_v39 = vpack.c.bf16 %v1991_v41, %v1989_v53 }
 0xdd9   : > { %6893 = vmatprep.subr.bf16.mxu1 %v6892_v39 }
 0xdda   : > { %6895 = vmatpush1.bf16.msra.mxu1 %v6894_v29 }
 0xddb   : > { %6897 = vmatprep.subr.bf16.mxu1 %v8012_v57  ;;  %v1982_v57 = vld [vmem:[%s10298_s11 + $0x10] sm:$0xff] }
 0xddd   : > { %6602 = vmatmul.mubr.msk.f32.vlgmr.msra.gmra.mrb[8].mxu1 %vm571_vm1, %v1980_v22 }
 0xdde   : > { %6899 = vmatpush1.bf16.msra.mxu1 %v8010_v35  ;;  %2074 = vmatprep.mubr.f32.mxu1 %v7352_v6  ;;  %v1983_v35 = vld [vmem:[%s10298_s11 + $0x18] sm:$0xff] }
 0xddf   : > { %6901 = vmatprep.subr.bf16.mxu1 %v8020_v38  ;;  %v1977_v38 = vld [vmem:[%s10297_s10 + $0x8] sm:$0xff] }
 0xde1   : > { %6603 = vmatmul.mubr.msk.f32.gmra.mrb[10].mxu1 %vm571_vm1, %v1981_v27 }
 0xde2   : > { %6903 = vmatpush1.bf16.msra.mxu1 %v8018_v47  ;;  %2080 = vmatprep.mubr.f32.mxu1 %v7352_v6  ;;  %v1976_v47 = vld [vmem:[%s10297_s10] sm:$0xff] }
 0xde5   : > { %6604 = vmatmul.mubr.msk.f32.gmra.mrb[12].mxu1 %vm571_vm1, %v1982_v57  ;;  %v2242_v57 = vld [vmem:[%s10300_s13] sm:$0xff] }
 0xde6   : > { %2086 = vmatprep.mubr.f32.mxu1 %v7352_v6 }
 0xde9   : > { %6605 = vmatmul.mubr.msk.f32.gmra.mrb[14].mxu1 %vm571_vm1, %v1983_v35  ;;  %v2317_v35 = vld [vmem:[%s10301_s14] sm:$0xff] }
 0xdea   : > { %2169 = vmatprep.mubr.f32.mxu1 %v7352_v6 }
 0xded   : > { %6606 = vmatmul.mubr.msk.f32.vlgmr.msra.gmra.mrb[8].mxu1 %vm571_vm1, %v1976_v47 }
 0xdee   : > { %2175 = vmatprep.mubr.f32.mxu1 %v7352_v6 }
 0xdf1   : > { %6607 = vmatmul.mubr.msk.f32.gmra.mrb[10].mxu1 %vm571_vm1, %v1977_v38 }
 0xdf2   : > { %2181 = vmatprep.mubr.f32.mxu1 %v7352_v6 }
 0xdf5   : > { %6608 = vmatmul.mubr.msk.f32.gmra.mrb[12].mxu1 %vm571_vm1, %v1978_v62 }
 0xdf6   : > { %2187 = vmatprep.mubr.f32.mxu1 %v7352_v6 }
 0xdf9   : > { %6609 = vmatmul.mubr.msk.f32.gmra.mrb[14].mxu1 %vm571_vm1, %v1979_v33  ;;  %v2318_v33 = vld [vmem:[%s10301_s14 + $0x8] sm:$0xff] }
 0xdfa   : > { %4261 = vmatprep.mubr.f32.mxu1 %v7352_v6 }
 0xec0   : > { %v2171_v18 = vpop.f32.mrb[8].mxu1 }
 0xec1   : > { %v8192_v11 = vadd.f32 %v2201_v21, %v2171_v18  ;;  %v2173_v4 = vpop.f32.mrb[9].mxu1  ;;  %v2320_v18 = vld [vmem:[%s10301_s14 + $0x18] sm:$0xff] }
 0xec2   : > { %v8194_v49 = vadd.f32 %v2201_v21, %v2173_v4  ;;  %v2319_v21 = vld [vmem:[%s10301_s14 + $0x10] sm:$0xff] }
 0xec4   : > { %v2226_v58 = vadd.f32 %v8194_v49, %v8192_v11  ;;  %v2177_v61 = vpop.f32.mrb[10].mxu1 }
 0xec5   : > { %v8198_v43 = vadd.f32 %v2206_v37, %v2177_v61  ;;  %v2179_v46 = vpop.f32.mrb[11].mxu1 }
 0xec6   : > { %v8200_v30 = vadd.f32 %v2206_v37, %v2179_v46  ;;  %2227 = vadd.xlane.f32.xlu1 %v2226_v58 }
 0xec8   : > { %v2229_v12 = vadd.f32 %v8200_v30, %v8198_v43  ;;  %v2183_v34 = vpop.f32.mrb[12].mxu1 }
 0xec9   : > { %v8204_v5 = vadd.f32 %v2211_v50, %v2183_v34  ;;  %v2185_v23 = vpop.f32.mrb[13].mxu1 }
 0xeca   : > { %v8206_v42 = vadd.f32 %v2211_v50, %v2185_v23  ;;  %2230 = vadd.xlane.f32.xlu0 %v2229_v12 }
 0xecc   : > { %v2232_v60 = vadd.f32 %v8206_v42, %v8204_v5  ;;  %v2189_v28 = vpop.f32.mrb[14].mxu1 }
 0xecd   : > { %v8210_v56 = vadd.f32 %v2216_v52, %v2189_v28  ;;  %v2191_v44 = vpop.f32.mrb[15].mxu1 }
 0xece   : > { %v8212_v2 = vadd.f32 %v2216_v52, %v2191_v44  ;;  %2233 = vadd.xlane.f32.xlu0 %v2232_v60 }
 0xed0   : > { %v2235_v9 = vadd.f32 %v8212_v2, %v8210_v56 }
 0xed2   : > { %2236 = vadd.xlane.f32.xlu1 %v2235_v9 }
 0xf53   : > { %v2228_v55 = vpop.xlane.xlu1 %2227 }
 0xf54   : > { %v2238_v45 = vmul.f32 0.00390625, %v2228_v55 }
 0xf57   : > { %v2231_v10 = vpop.xlane.xlu0 %2230 }
 0xf58   : > { %v2239_v41 = vmul.f32 0.00390625, %v2231_v10 }
 0xf5a   : > { %v6905_v40 = vpack.c.bf16 %v2239_v41, %v2238_v45 }
 0xf5b   : > { %v2234_v53 = vpop.xlane.xlu0 %2233 }
 0xf5c   : > { %6906 = vmatpush3.bf16.msra.mxu0 %v6905_v40  ;;  %v2240_v39 = vmul.f32 0.00390625, %v2234_v53 }
 0xf5d   : > { %6907 = vmatprep.subr.bf16.mxu0 %v7354_v20 }
 0xf5f   : > { %v2237_v29 = vpop.xlane.xlu1 %2236 }
 0xf60   : > { %v2241_v22 = vmul.f32 0.00390625, %v2237_v29 }
 0xf62   : > { %v6908_v27 = vpack.c.bf16 %v2241_v22, %v2240_v39 }
 0xf64   : > { %6909 = vmatpush3.bf16.msra.mxu0 %v6908_v27 }
 0xf67   : > { %6794 = vmatmul.mubr.msk.f32.vlgmr.msra.gmra.mrb[20].mxu0 %vm571_vm1, %v2242_v57 }
 0xf68   : > { %6798 = vmatprep.mubr.msk.f32.mxu0 %vm1778_vm12, %v2317_v35 }
0x103a   : > { %v2312_v47 = vpop.f32.mrb[20].mxu0 }
0x103b   : > { %v2316_v38 = vmax.f32 %v2312_v47, 0.0  ;;  %v6795_v62 = vpop.f32.mrb[21].mxu0 }
0x103d   : > { %6796 = vmatprep.subr.mxu0 %v2316_v38 }
0x103e   : > { %6797 = vmatpush3.msra.mxu0 %v2316_v38 }
0x103f   : > { %6799 = vmatmul.mubr.msk.f32.vlgmr.msra.gmra.mrb[22].mxu0 %vm1778_vm12, %v2318_v33 }
0x1040   : > { %6801 = vmatprep.mubr.msk.f32.mxu0 %vm1778_vm12, %v2319_v21  ;;  %v2478_v21 = vsub.f32 1.0, %v8122_v54 }
0x1043   : > { %6802 = vmatmul.mubr.msk.f32.gmra.mrb[24].mxu0 %vm1778_vm12, %v2320_v18 }
0x1112   : > { %v6800_v4 = vpop.f32.mrb[22].mxu0 }
0x1113   : > { %v6616_v37 = vmul.f32 -1.442695, %v6800_v4  ;;  %v2399_v58 = vpop.f32.mrb[23].mxu0 }
0x1114   : > { %v6615_v61 = vmul.f32 -1.442695, %v2399_v58 }
0x1115   : > { %7219 = vpow2.f32 %v6616_v37 }
0x1116   : > { %7221 = vpow2.f32 %v6615_v61  ;;  %v6803_v46 = vpop.f32.mrb[24].mxu0  ;;  %v2484_v61 = vsub.f32 1.0, %v8132_v14 }
0x1117   : > { %v6618_v50 = vmul.f32 -1.442695, %v6803_v46  ;;  %v2409_v12 = vpop.f32.mrb[25].mxu0 }
0x1118   : > { %v6617_v34 = vmul.f32 -1.442695, %v2409_v12  ;;  %v2485_v12 = vsub.f32 1.0, %v8134_v63 }
0x1119   : > { %7223 = vpow2.f32 %v6618_v50 }
0x111a   : > { %7225 = vpow2.f32 %v6617_v34 }
0x111f   : > { %v7220_v23 = vpop.eup %7219 }
0x1120   : > { %v7222_v52 = vpop.eup %7221  ;;  %v2431_v60 = vadd.f32 1.0, %v7220_v23 }
0x1121   : > { %v2430_v28 = vadd.f32 1.0, %v7222_v52 }
0x1122   : > { %7227 = vrcp.f32 %v2431_v60 }
0x1123   : > { %v7224_v44 = vpop.eup %7223  ;;  %7229 = vrcp.f32 %v2430_v28 }
0x1124   : > { %v7226_v9 = vpop.eup %7225  ;;  %v2433_v55 = vadd.f32 1.0, %v7224_v44 }
0x1125   : > { %v2432_v10 = vadd.f32 1.0, %v7226_v9 }
0x1126   : > { %7231 = vrcp.f32 %v2433_v55 }
0x1127   : > { %7233 = vrcp.f32 %v2432_v10 }
0x112c   : > { %v7228_v45 = vpop.eup %7227 }
0x112d   : > { %v7230_v41 = vpop.eup %7229  ;;  %2449 = vperm.xlu1 %7168, %v7228_v45   ;;  %v2493_v45 = vmul.f32 %v2485_v12, %v7966_v25 }
0x112e   : > { %2444 = vperm.xlu0 %7167, %v7230_v41  }
0x1130   : > { %v7232_v40 = vpop.eup %7231 }
0x1131   : > { %v7234_v53 = vpop.eup %7233 }
0x1132   : > { %2459 = vperm.xlu0 %7167, %v7232_v40   ;;  %2454 = vperm.xlu1 %7168, %v7234_v53  }
0x11ac   : > { %v2450_v29 = vpop.permute.xlu1 %2449 }
0x11ad   : > { %v2464_v39 = vmul.f32 %v2450_v29, %v8198_v43  ;;  %v2465_v22 = vmul.f32 %v2450_v29, %v8200_v30  ;;  %v2445_v27 = vpop.permute.xlu0 %2444 }
0x11ae   : > { %v2462_v57 = vmul.f32 %v2445_v27, %v8192_v11  ;;  %v2463_v35 = vmul.f32 %v2445_v27, %v8194_v49  ;;  %v2480_v11 = vsub.f32 1.0, %v8116_v59  ;;  %v2481_v49 = vsub.f32 1.0, %v8118_v13 }
0x11af   : > { %7235 = vtanh.f32 %v2464_v39 }
0x11b0   : > { %7237 = vtanh.f32 %v2465_v22  ;;  %v2489_v58 = vmul.f32 %v2481_v49, %v7934_v0 }
0x11b1   : > { %7239 = vtanh.f32 %v2462_v57  ;;  %v2460_v47 = vpop.permute.xlu0 %2459  ;;  %v2455_v38 = vpop.permute.xlu1 %2454 }
0x11b2   : > { %7241 = vtanh.f32 %v2463_v35  ;;  %v2468_v62 = vmul.f32 %v2460_v47, %v8210_v56  ;;  %v2469_v33 = vmul.f32 %v2460_v47, %v8212_v2  ;;  %v2466_v43 = vmul.f32 %v2455_v38, %v8204_v5 }
0x11b3   : > { %v2467_v30 = vmul.f32 %v2455_v38, %v8206_v42  ;;  %v2479_v56 = vsub.f32 1.0, %v8126_v31  ;;  %v2488_v5 = vmul.f32 %v2480_v11, %v7940_v51  ;;  %v2486_v51 = vmul.f32 %v2478_v21, %v7937_v48 }
0x11b4   : > { %7243 = vtanh.f32 %v2468_v62 }
0x11b5   : > { %7245 = vtanh.f32 %v2469_v33  ;;  %v2487_v52 = vmul.f32 %v2479_v56, %v7931_v1  ;;  %v2492_v1 = vmul.f32 %v2484_v61, %v7974_v3 }
0x11b6   : > { %7247 = vtanh.f32 %v2466_v43 }
0x11b7   : > { %7249 = vtanh.f32 %v2467_v30 }
0x11b9   : > { %v7236_v18 = vpop.eup %7235 }
0x11ba   : > { %v7238_v4 = vpop.eup %7237  ;;  %v2496_v2 = vmul.f32 %v7236_v18, %v8116_v59 }
0x11bb   : > { %v7240_v37 = vpop.eup %7239  ;;  %v2497_v42 = vmul.f32 %v7238_v4, %v8118_v13  ;;  %v2482_v13 = vsub.f32 1.0, %v8138_v24 }
0x11bc   : > { %v7242_v46 = vpop.eup %7241  ;;  %v2494_v59 = vmul.f32 %v7240_v37, %v8122_v54  ;;  %v2504_v50 = vadd.f32 %v2496_v2, %v2488_v5  ;;  %v2483_v54 = vsub.f32 1.0, %v8142_v8 }
0x11bd   : > { %v2495_v34 = vmul.f32 %v7242_v46, %v8126_v31  ;;  %v2505_v23 = vadd.f32 %v2497_v42, %v2489_v58  ;;  %v2490_v3 = vmul.f32 %v2482_v13, %v7971_v19 }
0x11be   : > { %v7244_v0 = vpop.eup %7243  ;;  %2512 = vst [vmem:[%s8256_s23 + $0x10] sm:$0xff] %v2504_v50  ;;  %v8268_v60 = vmax.f32 %v2504_v50, 0.0  ;;  %v2502_v28 = vadd.f32 %v2494_v59, %v2486_v51  ;;  %v2491_v29 = vmul.f32 %v2483_v54, %v7963_v26 }
0x11bf   : > { %v7246_v44 = vpop.eup %7245  ;;  %v2500_v48 = vmul.f32 %v7244_v0, %v8132_v14  ;;  %2513 = vst [vmem:[%s8256_s23 + $0x18] sm:$0xff] %v2505_v23  ;;  %v8273_v9 = vmax.f32 %v2505_v23, 0.0  ;;  %v2503_v31 = vadd.f32 %v2495_v34, %v2487_v52 }
0x11c0   : > { %v7248_v55 = vpop.eup %7247  ;;  %v2501_v10 = vmul.f32 %v7246_v44, %v8134_v63  ;;  %2538 = vrot.lane.b32.xlu1 %v8268_v60, %s7343_s28  ;;  %2510 = vst [vmem:[%s8256_s23] sm:$0xff] %v2502_v28  ;;  %v8287_v53 = vmax.f32 %v2502_v28, 0.0 }
0x11c1   : > { %v7250_v41 = vpop.eup %7249  ;;  %v2498_v14 = vmul.f32 %v7248_v55, %v8138_v24  ;;  %2540 = vrot.lane.b32.xlu0 %v8273_v9, %s7343_s28  ;;  %2511 = vst [vmem:[%s8256_s23 + $0x8] sm:$0xff] %v2503_v31  ;;  %v2508_v63 = vadd.f32 %v2500_v48, %v2492_v1  ;;  %v8290_v39 = vmax.f32 %v2503_v31, 0.0 }
0x11c2   : > { %v2499_v40 = vmul.f32 %v7250_v41, %v8142_v8  ;;  %v2509_v25 = vadd.f32 %v2501_v10, %v2493_v45 }
0x11c3   : > { %v2506_v22 = vadd.f32 %v2498_v14, %v2490_v3  ;;  %2516 = vst [vmem:[%s8256_s23 + $0x30] sm:$0xff] %v2508_v63  ;;  %v8308_v26 = vmax.f32 %v2508_v63, 0.0 }
0x11c4   : > { %2534 = vrot.lane.b32.xlu1 %v8287_v53, %s7343_s28  ;;  %v2507_v24 = vadd.f32 %v2499_v40, %v2491_v29  ;;  %2517 = vst [vmem:[%s8256_s23 + $0x38] sm:$0xff] %v2509_v25  ;;  %v8310_v27 = vmax.f32 %v2509_v25, 0.0 }
0x11c5   : > { %2536 = vrot.lane.b32.xlu0 %v8290_v39, %s7343_s28  ;;  %2514 = vst [vmem:[%s8256_s23 + $0x20] sm:$0xff] %v2506_v22  ;;  %v8300_v19 = vmax.f32 %v2506_v22, 0.0 }
0x11c6   : > { %2515 = vst [vmem:[%s8256_s23 + $0x28] sm:$0xff] %v2507_v24  ;;  %v8302_v8 = vmax.f32 %v2507_v24, 0.0 }
0x11c8   : > { %2542 = vrot.lane.b32.xlu1 %v8300_v19, %s7343_s28 }
0x11c9   : > { %2544 = vrot.lane.b32.xlu0 %v8302_v8, %s7343_s28 }
0x11cc   : > { %2546 = vrot.lane.b32.xlu1 %v8308_v26, %s7343_s28 }
0x11cd   : > { %2548 = vrot.lane.b32.xlu0 %v8310_v27, %s7343_s28 }
0x1232   : > { %v8316_v57 = vpop.permute.xlu1 %2538 }
0x1233   : > { %v8318_v35 = vpop.permute.xlu0 %2540  ;;  %2570 = vst.msk [vmem:[#allocation3 + $0x18] sm:$0xff] %vm2566_vm0, %v8316_v57 }
0x1234   : > { %2572 = vst.msk [vmem:[#allocation3 + $0x28] sm:$0xff] %vm571_vm1, %v8318_v35  ;;  %v8362_v4 = vsel %vm571_vm1, %v8316_v57, %v8318_v35 }
0x1236   : > { %v8324_v47 = vpop.permute.xlu1 %2534 }
0x1237   : > { %v8326_v38 = vpop.permute.xlu0 %2536  ;;  %2567 = vst.msk [vmem:[#allocation3] sm:$0xff] %vm2566_vm0, %v8324_v47 }
0x1238   : > { %2569 = vst.msk [vmem:[#allocation3 + $0x10] sm:$0xff] %vm571_vm1, %v8326_v38  ;;  %v8354_v18 = vsel %vm571_vm1, %v8324_v47, %v8326_v38 }
0x123a   : > { %v8332_v62 = vpop.permute.xlu1 %2542  ;;  %v2582_v33 = vld [vmem:[#allocation3 + $0x18] sm:$0xff] }
0x123b   : > { %v8334_v43 = vpop.permute.xlu0 %2544  ;;  %2573 = vst.msk [vmem:[#allocation3 + $0x30] sm:$0xff] %vm2566_vm0, %v8332_v62  ;;  %2609 = vrot.lane.b32.xlu0 %v2582_v33, %s7344_s29  ;;  %v2584_v11 = vld [vmem:[#allocation3 + $0x28] sm:$0xff] }
0x123c   : > { %2575 = vst.msk [vmem:[#allocation3 + $0x40] sm:$0xff] %vm571_vm1, %v8334_v43  ;;  %v8370_v5 = vsel %vm571_vm1, %v8332_v62, %v8334_v43 }
0x123e   : > { %v8341_v30 = vpop.permute.xlu1 %2546  ;;  %v2579_v49 = vld [vmem:[#allocation3] sm:$0xff] }
0x123f   : > { %v8343_v21 = vpop.permute.xlu0 %2548  ;;  %2576 = vst.msk [vmem:[#allocation3 + $0x48] sm:$0xff] %vm2566_vm0, %v8341_v30  ;;  %2613 = vrot.lane.b32.xlu0 %v2584_v11, %s7344_s29  ;;  %2603 = vrot.lane.b32.xlu1 %v2579_v49, %s7344_s29  ;;  %v2581_v56 = vld [vmem:[#allocation3 + $0x10] sm:$0xff] }
0x1240   : > { %2578 = vst.msk [vmem:[#allocation3 + $0x58] sm:$0xff] %vm571_vm1, %v8343_v21  ;;  %v8380_v61 = vsel %vm571_vm1, %v8341_v30, %v8343_v21 }
0x1242   : > { %v2585_v37 = vld [vmem:[#allocation3 + $0x30] sm:$0xff] }
0x1243   : > { %2607 = vrot.lane.b32.xlu1 %v2581_v56, %s7344_s29  ;;  %2605 = vrot.lane.b32.xlu0 %v8354_v18, %s7344_s29  ;;  %v2587_v42 = vld [vmem:[#allocation3 + $0x40] sm:$0xff] }
0x1246   : > { %v2588_v2 = vld [vmem:[#allocation3 + $0x48] sm:$0xff] }
0x1247   : > { %2611 = vrot.lane.b32.xlu1 %v8362_v4, %s7344_s29  ;;  %2621 = vrot.lane.b32.xlu0 %v2588_v2, %s7344_s29  ;;  %v2590_v58 = vld [vmem:[#allocation3 + $0x58] sm:$0xff] }
0x124b   : > { %2615 = vrot.lane.b32.xlu1 %v2585_v37, %s7344_s29  ;;  %2617 = vrot.lane.b32.xlu0 %v8370_v5, %s7344_s29 }
0x124f   : > { %2619 = vrot.lane.b32.xlu1 %v2587_v42, %s7344_s29  ;;  %2625 = vrot.lane.b32.xlu0 %v2590_v58, %s7344_s29 }
0x1253   : > { %2623 = vrot.lane.b32.xlu1 %v8380_v61, %s7344_s29 }
0x12ad   : > { %v2610_v46 = vpop.permute.xlu0 %2609 }
0x12b1   : > { %v2614_v59 = vpop.permute.xlu0 %2613  ;;  %v2604_v50 = vpop.permute.xlu1 %2603 }
0x12b5   : > { %v2606_v51 = vpop.permute.xlu0 %2605  ;;  %v2608_v12 = vpop.permute.xlu1 %2607 }
0x12b6   : > { %v2627_v54 = vsel %vm598_vm3, %v2604_v50, %v2606_v51  ;;  %v2628_v44 = vsel %vm598_vm3, %v2606_v51, %v2608_v12 }
0x12b7   : > { %v2644_v1 = vsel %vm7487_vm4, %v8290_v39, %v2628_v44  ;;  %v2643_v55 = vsel %vm7491_vm5, %v8287_v53, %v2627_v54 }
0x12b9   : > { %v2622_v34 = vpop.permute.xlu0 %2621  ;;  %v2612_v23 = vpop.permute.xlu1 %2611 }
0x12ba   : > { %v2629_v52 = vsel %vm598_vm3, %v2610_v46, %v2612_v23  ;;  %v2630_v13 = vsel %vm598_vm3, %v2612_v23, %v2614_v59 }
0x12bb   : > { %v2646_v0 = vsel %vm7487_vm4, %v8273_v9, %v2630_v13  ;;  %v2645_v28 = vsel %vm7491_vm5, %v8268_v60, %v2629_v52 }
0x12bc   : > { %2665 = vrot.lane.b32.xlu0 %v2646_v0, %s7343_s28  ;;  %2663 = vrot.lane.b32.xlu1 %v2645_v28, %s7343_s28 }
0x12bd   : > { %v2618_v48 = vpop.permute.xlu0 %2617  ;;  %v2616_v31 = vpop.permute.xlu1 %2615 }
0x12be   : > { %v2631_v10 = vsel %vm598_vm3, %v2616_v31, %v2618_v48 }
0x12bf   : > { %v2647_v14 = vsel %vm7491_vm5, %v8300_v19, %v2631_v10 }
0x12c0   : > { %2661 = vrot.lane.b32.xlu0 %v2644_v1, %s7343_s28  ;;  %2659 = vrot.lane.b32.xlu1 %v2643_v55, %s7343_s28 }
0x12c1   : > { %v2620_v45 = vpop.permute.xlu1 %2619  ;;  %v2626_v63 = vpop.permute.xlu0 %2625 }
0x12c2   : > { %v2632_v41 = vsel %vm598_vm3, %v2618_v48, %v2620_v45 }
0x12c3   : > { %v2648_v3 = vsel %vm7487_vm4, %v8302_v8, %v2632_v41 }
0x12c4   : > { %2667 = vrot.lane.b32.xlu1 %v2647_v14, %s7343_s28  ;;  %2669 = vrot.lane.b32.xlu0 %v2648_v3, %s7343_s28 }
0x12c5   : > { %v2624_v40 = vpop.permute.xlu1 %2623 }
0x12c6   : > { %v2633_v29 = vsel %vm598_vm3, %v2622_v34, %v2624_v40  ;;  %v2634_v25 = vsel %vm598_vm3, %v2624_v40, %v2626_v63 }
0x12c7   : > { %v2650_v22 = vsel %vm7487_vm4, %v8310_v27, %v2634_v25  ;;  %v2649_v24 = vsel %vm7491_vm5, %v8308_v26, %v2633_v29 }
0x12c8   : > { %2673 = vrot.lane.b32.xlu0 %v2650_v22, %s7343_s28  ;;  %2671 = vrot.lane.b32.xlu1 %v2649_v24, %s7343_s28 }
0x132e   : > { %v8424_v33 = vpop.permute.xlu0 %2665  ;;  %v8426_v11 = vpop.permute.xlu1 %2663 }
0x132f   : > { %2696 = vst.msk [vmem:[#allocation3 + $0x28] sm:$0xff] %vm571_vm1, %v8424_v33 }
0x1330   : > { %2694 = vst.msk [vmem:[#allocation3 + $0x18] sm:$0xff] %vm2566_vm0, %v8426_v11 }
0x1332   : > { %v8432_v49 = vpop.permute.xlu0 %2661  ;;  %v8434_v56 = vpop.permute.xlu1 %2659 }
0x1333   : > { %2693 = vst.msk [vmem:[#allocation3 + $0x10] sm:$0xff] %vm571_vm1, %v8432_v49 }
0x1334   : > { %2691 = vst.msk [vmem:[#allocation3] sm:$0xff] %vm2566_vm0, %v8434_v56 }
0x1336   : > { %v8440_v2 = vld [vmem:[#allocation3 + $0x28] sm:$0xff]  ;;  %v8444_v42 = vpop.permute.xlu0 %2669  ;;  %v8446_v58 = vpop.permute.xlu1 %2667 }
0x1337   : > { %v8442_v37 = vld [vmem:[#allocation3 + $0x18] sm:$0xff]  ;;  %2780 = vst.msk [vmem:[#allocation3 + $0x28] sm:$0xff] %vm571_vm1, %v8318_v35  ;;  %2699 = vst.msk [vmem:[#allocation3 + $0x40] sm:$0xff] %vm571_vm1, %v8444_v42 }
0x1338   : > { %2778 = vst.msk [vmem:[#allocation3 + $0x18] sm:$0xff] %vm2566_vm0, %v8316_v57  ;;  %2697 = vst.msk [vmem:[#allocation3 + $0x30] sm:$0xff] %vm2566_vm0, %v8446_v58 }
0x133a   : > { %v8456_v46 = vld [vmem:[#allocation3 + $0x10] sm:$0xff]  ;;  %v8460_v50 = vpop.permute.xlu0 %2673  ;;  %v8462_v51 = vpop.permute.xlu1 %2671 }
0x133b   : > { %v8458_v59 = vld [vmem:[#allocation3] sm:$0xff]  ;;  %2777 = vst.msk [vmem:[#allocation3 + $0x10] sm:$0xff] %vm571_vm1, %v8326_v38  ;;  %2702 = vst.msk [vmem:[#allocation3 + $0x58] sm:$0xff] %vm571_vm1, %v8460_v50 }
0x133c   : > { %2775 = vst.msk [vmem:[#allocation3] sm:$0xff] %vm2566_vm0, %v8324_v47  ;;  %2700 = vst.msk [vmem:[#allocation3 + $0x48] sm:$0xff] %vm2566_vm0, %v8462_v51 }
0x133e   : > { %v8472_v12 = vld [vmem:[#allocation3 + $0x40] sm:$0xff]  ;;  %v2792_v52 = vld [vmem:[#allocation3 + $0x28] sm:$0xff] }
0x133f   : > { %v8474_v34 = vld [vmem:[#allocation3 + $0x30] sm:$0xff]  ;;  %v2790_v23 = vld [vmem:[#allocation3 + $0x18] sm:$0xff]  ;;  %2783 = vst.msk [vmem:[#allocation3 + $0x40] sm:$0xff] %vm571_vm1, %v8334_v43 }
0x1340   : > { %2781 = vst.msk [vmem:[#allocation3 + $0x30] sm:$0xff] %vm2566_vm0, %v8332_v62  ;;  %2817 = vrot.lane.b32.xlu0 %v2790_v23, %s7345_s30 }
0x1342   : > { %v8481_v13 = vld [vmem:[#allocation3 + $0x58] sm:$0xff]  ;;  %v2789_v54 = vld [vmem:[#allocation3 + $0x10] sm:$0xff] }
0x1343   : > { %v8483_v0 = vld [vmem:[#allocation3 + $0x48] sm:$0xff]  ;;  %v2787_v28 = vld [vmem:[#allocation3] sm:$0xff]  ;;  %2786 = vst.msk [vmem:[#allocation3 + $0x58] sm:$0xff] %vm571_vm1, %v8343_v21 }
0x1344   : > { %2784 = vst.msk [vmem:[#allocation3 + $0x48] sm:$0xff] %vm2566_vm0, %v8341_v30  ;;  %2821 = vrot.lane.b32.xlu0 %v2792_v52, %s7345_s30  ;;  %2811 = vrot.lane.b32.xlu1 %v2787_v28, %s7345_s30 }
0x1346   : > { %v2795_v31 = vld [vmem:[#allocation3 + $0x40] sm:$0xff] }
0x1347   : > { %v2793_v48 = vld [vmem:[#allocation3 + $0x30] sm:$0xff] }
0x1348   : > { %2815 = vrot.lane.b32.xlu1 %v2789_v54, %s7345_s30  ;;  %2813 = vrot.lane.b32.xlu0 %v8354_v18, %s7345_s30 }
0x134a   : > { %v2798_v1 = vld [vmem:[#allocation3 + $0x58] sm:$0xff] }
0x134b   : > { %v2796_v44 = vld [vmem:[#allocation3 + $0x48] sm:$0xff] }
0x134c   : > { %2819 = vrot.lane.b32.xlu1 %v8362_v4, %s7345_s30  ;;  %2829 = vrot.lane.b32.xlu0 %v2796_v44, %s7345_s30 }
0x1350   : > { %2823 = vrot.lane.b32.xlu1 %v2793_v48, %s7345_s30  ;;  %2825 = vrot.lane.b32.xlu0 %v8370_v5, %s7345_s30 }
0x1354   : > { %2827 = vrot.lane.b32.xlu1 %v2795_v31, %s7345_s30  ;;  %2833 = vrot.lane.b32.xlu0 %v2798_v1, %s7345_s30 }
0x1358   : > { %2831 = vrot.lane.b32.xlu1 %v8380_v61, %s7345_s30 }
0x13b2   : > { %v2818_v55 = vpop.permute.xlu0 %2817 }
0x13b6   : > { %v2822_v10 = vpop.permute.xlu0 %2821  ;;  %v2812_v45 = vpop.permute.xlu1 %2811 }
0x13ba   : > { %v2814_v41 = vpop.permute.xlu0 %2813  ;;  %v2816_v14 = vpop.permute.xlu1 %2815 }
0x13bb   : > { %v2835_v24 = vsel %vm655_vm6, %v2812_v45, %v2814_v41  ;;  %v2836_v23 = vsel %vm655_vm6, %v2814_v41, %v2816_v14 }
0x13bc   : > { %v2852_v54 = vsel %vm7541_vm8, %v8290_v39, %v2836_v23  ;;  %v2851_v44 = vsel %vm7533_vm7, %v8287_v53, %v2835_v24 }
0x13be   : > { %v2830_v3 = vpop.permute.xlu0 %2829  ;;  %v2820_v63 = vpop.permute.xlu1 %2819 }
0x13bf   : > { %v2837_v40 = vsel %vm655_vm6, %v2818_v55, %v2820_v63  ;;  %v2838_v29 = vsel %vm655_vm6, %v2820_v63, %v2822_v10 }
0x13c0   : > { %v2854_v25 = vsel %vm7541_vm8, %v8273_v9, %v2838_v29  ;;  %v2853_v22 = vsel %vm7533_vm7, %v8268_v60, %v2837_v40 }
0x13c1   : > { %2873 = vrot.lane.b32.xlu0 %v2854_v25, %s7343_s28  ;;  %2871 = vrot.lane.b32.xlu1 %v2853_v22, %s7343_s28 }
0x13c2   : > { %v2826_v52 = vpop.permute.xlu0 %2825  ;;  %v2824_v28 = vpop.permute.xlu1 %2823 }
0x13c3   : > { %v2839_v48 = vsel %vm655_vm6, %v2824_v28, %v2826_v52 }
0x13c4   : > { %v2855_v55 = vsel %vm7533_vm7, %v8300_v19, %v2839_v48 }
0x13c5   : > { %2869 = vrot.lane.b32.xlu0 %v2852_v54, %s7343_s28  ;;  %2867 = vrot.lane.b32.xlu1 %v2851_v44, %s7343_s28 }
0x13c6   : > { %v2828_v31 = vpop.permute.xlu1 %2827  ;;  %v2834_v45 = vpop.permute.xlu0 %2833 }
0x13c7   : > { %v2840_v1 = vsel %vm655_vm6, %v2826_v52, %v2828_v31 }
0x13c8   : > { %v2856_v10 = vsel %vm7541_vm8, %v8302_v8, %v2840_v1 }
0x13c9   : > { %2875 = vrot.lane.b32.xlu1 %v2855_v55, %s7343_s28  ;;  %2877 = vrot.lane.b32.xlu0 %v2856_v10, %s7343_s28 }
0x13ca   : > { %v2832_v41 = vpop.permute.xlu1 %2831 }
0x13cb   : > { %v2841_v14 = vsel %vm655_vm6, %v2830_v3, %v2832_v41  ;;  %v2842_v63 = vsel %vm655_vm6, %v2832_v41, %v2834_v45 }
0x13cc   : > { %v2858_v40 = vsel %vm7541_vm8, %v8310_v27, %v2842_v63  ;;  %v2857_v29 = vsel %vm7533_vm7, %v8308_v26, %v2841_v14 }
0x13cd   : > { %2881 = vrot.lane.b32.xlu0 %v2858_v40, %s7343_s28  ;;  %2879 = vrot.lane.b32.xlu1 %v2857_v29, %s7343_s28 }
0x1433   : > { %v2874_v25 = vpop.permute.xlu0 %2873  ;;  %v2872_v22 = vpop.permute.xlu1 %2871 }
0x1434   : > { %2904 = vst.msk [vmem:[#allocation3 + $0x28] sm:$0xff] %vm571_vm1, %v2874_v25  ;;  %v2884_v3 = vsel %vm571_vm1, %v2872_v22, %v2874_v25 }
0x1435   : > { %2902 = vst.msk [vmem:[#allocation3 + $0x18] sm:$0xff] %vm2566_vm0, %v2872_v22  ;;  %2943 = vrot.lane.b32.xlu1 %v2884_v3, %s7345_s30 }
0x1437   : > { %v2870_v24 = vpop.permute.xlu0 %2869  ;;  %v2868_v23 = vpop.permute.xlu1 %2867 }
0x1438   : > { %2901 = vst.msk [vmem:[#allocation3 + $0x10] sm:$0xff] %vm571_vm1, %v2870_v24  ;;  %v2883_v55 = vsel %vm571_vm1, %v2868_v23, %v2870_v24 }
0x1439   : > { %2899 = vst.msk [vmem:[#allocation3] sm:$0xff] %vm2566_vm0, %v2868_v23 }
0x143b   : > { %v2878_v52 = vpop.permute.xlu0 %2877  ;;  %v2876_v28 = vpop.permute.xlu1 %2875  ;;  %v2916_v54 = vld [vmem:[#allocation3 + $0x28] sm:$0xff] }
0x143c   : > { %2907 = vst.msk [vmem:[#allocation3 + $0x40] sm:$0xff] %vm571_vm1, %v2878_v52  ;;  %2945 = vrot.lane.b32.xlu0 %v2916_v54, %s7345_s30  ;;  %v2914_v31 = vld [vmem:[#allocation3 + $0x18] sm:$0xff]  ;;  %v2885_v14 = vsel %vm571_vm1, %v2876_v28, %v2878_v52 }
0x143d   : > { %2905 = vst.msk [vmem:[#allocation3 + $0x30] sm:$0xff] %vm2566_vm0, %v2876_v28 }
0x143f   : > { %v2882_v44 = vpop.permute.xlu0 %2881  ;;  %v2880_v48 = vpop.permute.xlu1 %2879  ;;  %v2913_v10 = vld [vmem:[#allocation3 + $0x10] sm:$0xff] }
0x1440   : > { %v2911_v1 = vld [vmem:[#allocation3] sm:$0xff]  ;;  %2910 = vst.msk [vmem:[#allocation3 + $0x58] sm:$0xff] %vm571_vm1, %v2882_v44  ;;  %2941 = vrot.lane.b32.xlu0 %v2914_v31, %s7345_s30  ;;  %v2886_v45 = vsel %vm571_vm1, %v2880_v48, %v2882_v44 }
0x1441   : > { %2908 = vst.msk [vmem:[#allocation3 + $0x48] sm:$0xff] %vm2566_vm0, %v2880_v48  ;;  %2935 = vrot.lane.b32.xlu1 %v2911_v1, %s7345_s30 }
0x1443   : > { %v2919_v63 = vld [vmem:[#allocation3 + $0x40] sm:$0xff] }
0x1444   : > { %2939 = vrot.lane.b32.xlu0 %v2913_v10, %s7345_s30  ;;  %v2917_v29 = vld [vmem:[#allocation3 + $0x30] sm:$0xff] }
0x1445   : > { %2937 = vrot.lane.b32.xlu1 %v2883_v55, %s7345_s30 }
0x1447   : > { %v2922_v41 = vld [vmem:[#allocation3 + $0x58] sm:$0xff] }
0x1448   : > { %2957 = vrot.lane.b32.xlu0 %v2922_v41, %s7345_s30  ;;  %v2920_v40 = vld [vmem:[#allocation3 + $0x48] sm:$0xff] }
0x1449   : > { %2955 = vrot.lane.b32.xlu1 %v2886_v45, %s7345_s30 }
0x144c   : > { %2951 = vrot.lane.b32.xlu0 %v2919_v63, %s7345_s30 }
0x144d   : > { %2949 = vrot.lane.b32.xlu1 %v2885_v14, %s7345_s30 }
0x1450   : > { %2953 = vrot.lane.b32.xlu0 %v2920_v40, %s7345_s30 }
0x1451   : > { %2947 = vrot.lane.b32.xlu1 %v2917_v29, %s7345_s30  ;;  %s10326_s30 = smov 16  }
0x14a7   : > { %v2944_v22 = vpop.permute.xlu1 %2943 }
0x14ae   : > { %v2946_v25 = vpop.permute.xlu0 %2945 }
0x14af   : > { %v2962_v3 = vsel %vm655_vm6, %v2944_v22, %v2946_v25 }
0x14b0   : > { %v2978_v24 = vsel %vm7541_vm8, %v8273_v9, %v2962_v3 }
0x14b1   : > { %2997 = vrot.lane.b32.xlu0 %v2978_v24, %s7343_s28 }
0x14b2   : > { %v2942_v23 = vpop.permute.xlu0 %2941 }
0x14b3   : > { %v2936_v52 = vpop.permute.xlu1 %2935  ;;  %v2961_v28 = vsel %vm655_vm6, %v2942_v23, %v2944_v22 }
0x14b4   : > { %v2977_v54 = vsel %vm7533_vm7, %v8268_v60, %v2961_v28 }
0x14b5   : > { %2995 = vrot.lane.b32.xlu0 %v2977_v54, %s7343_s28 }
0x14b6   : > { %v2940_v44 = vpop.permute.xlu0 %2939 }
0x14b7   : > { %v2938_v48 = vpop.permute.xlu1 %2937 }
0x14b8   : > { %v2960_v31 = vsel %vm655_vm6, %v2938_v48, %v2940_v44  ;;  %v2959_v55 = vsel %vm655_vm6, %v2936_v52, %v2938_v48 }
0x14b9   : > { %v2976_v1 = vsel %vm7541_vm8, %v8290_v39, %v2960_v31  ;;  %v2975_v14 = vsel %vm7533_vm7, %v8287_v53, %v2959_v55 }
0x14ba   : > { %2993 = vrot.lane.b32.xlu1 %v2976_v1, %s7343_s28  ;;  %v2958_v10 = vpop.permute.xlu0 %2957 }
0x14bb   : > { %v2956_v45 = vpop.permute.xlu1 %2955 }
0x14bc   : > { %v2966_v41 = vsel %vm655_vm6, %v2956_v45, %v2958_v10 }
0x14bd   : > { %v2982_v63 = vsel %vm7541_vm8, %v8310_v27, %v2966_v41 }
0x14be   : > { %2991 = vrot.lane.b32.xlu1 %v2975_v14, %s7343_s28  ;;  %3005 = vrot.lane.b32.xlu0 %v2982_v63, %s7343_s28  ;;  %v2952_v40 = vpop.permute.xlu0 %2951 }
0x14bf   : > { %v2950_v29 = vpop.permute.xlu1 %2949 }
0x14c0   : > { %v2964_v25 = vsel %vm655_vm6, %v2950_v29, %v2952_v40 }
0x14c1   : > { %v2980_v22 = vsel %vm7541_vm8, %v8302_v8, %v2964_v25 }
0x14c2   : > { %3001 = vrot.lane.b32.xlu1 %v2980_v22, %s7343_s28  ;;  %v2954_v3 = vpop.permute.xlu0 %2953 }
0x14c3   : > { %v2948_v24 = vpop.permute.xlu1 %2947  ;;  %v2965_v23 = vsel %vm655_vm6, %v2954_v3, %v2956_v45 }
0x14c4   : > { %v2963_v52 = vsel %vm655_vm6, %v2948_v24, %v2950_v29  ;;  %v2981_v28 = vsel %vm7533_vm7, %v8308_v26, %v2965_v23  ;;  %vm3080_vm6 = vcmask 392448  }
0x14c5   : > { %v2979_v54 = vsel %vm7533_vm7, %v8300_v19, %v2963_v52  ;;  %3003 = vrot.lane.b32.xlu0 %v2981_v28, %s7343_s28 }
0x14c6   : > { %2999 = vrot.lane.b32.xlu1 %v2979_v54, %s7343_s28 }
0x1523   : > { %v2998_v44 = vpop.permute.xlu0 %2997 }
0x1524   : > { %3028 = vst.msk [vmem:[#allocation3 + $0x28] sm:$0xff] %vm571_vm1, %v2998_v44 }
0x1527   : > { %v2996_v48 = vpop.permute.xlu0 %2995 }
0x1528   : > { %3026 = vst.msk [vmem:[#allocation3 + $0x18] sm:$0xff] %vm2566_vm0, %v2996_v48  ;;  %v8615_v41 = vsel %vm571_vm1, %v2996_v48, %v2998_v44 }
0x152b   : > { %v3061_v1 = vld [vmem:[#allocation3 + $0x28] sm:$0xff] }
0x152c   : > { %v2994_v31 = vpop.permute.xlu1 %2993  ;;  %3070 = vrot.lane.b32.xlu0 %v3061_v1, %s10326_s30 }
0x152d   : > { %3025 = vst.msk [vmem:[#allocation3 + $0x10] sm:$0xff] %vm571_vm1, %v2994_v31 }
0x152f   : > { %v3036_v45 = vld [vmem:[#allocation3 + $0x18] sm:$0xff] }
0x1530   : > { %v8612_v55 = vpop.permute.xlu0 %3005  ;;  %v2992_v10 = vpop.permute.xlu1 %2991  ;;  %3045 = vrot.lane.b32.xlu0 %v3036_v45, %s10327_s24 }
0x1531   : > { %3034 = vst.msk [vmem:[#allocation3 + $0x58] sm:$0xff] %vm571_vm1, %v8612_v55  ;;  %v8620_v14 = vsel %vm571_vm1, %v2992_v10, %v2994_v31 }
0x1532   : > { %3023 = vst.msk [vmem:[#allocation3] sm:$0xff] %vm2566_vm0, %v2992_v10  ;;  %v6910_v63 = vpack.c.bf16 %v8615_v41, %v8620_v14 }
0x1534   : > { %v8626_v40 = vpop.permute.xlu1 %3001  ;;  %v3060_v29 = vld [vmem:[#allocation3 + $0x10] sm:$0xff]  ;;  %6911 = vmatprep.subr.bf16.mxu0 %v6910_v63 }
0x1535   : > { %3031 = vst.msk [vmem:[#allocation3 + $0x40] sm:$0xff] %vm571_vm1, %v8626_v40  ;;  %3068 = vrot.lane.b32.xlu1 %v3060_v29, %s10326_s30 }
0x1537   : > { %v8631_v25 = vpop.permute.xlu0 %3003 }
0x1538   : > { %v8633_v22 = vpop.permute.xlu1 %2999  ;;  %v3063_v3 = vld [vmem:[#allocation3 + $0x58] sm:$0xff]  ;;  %3032 = vst.msk [vmem:[#allocation3 + $0x48] sm:$0xff] %vm2566_vm0, %v8631_v25 }
0x1539   : > { %v3035_v24 = vld [vmem:[#allocation3] sm:$0xff]  ;;  %3029 = vst.msk [vmem:[#allocation3 + $0x30] sm:$0xff] %vm2566_vm0, %v8633_v22  ;;  %3074 = vrot.lane.b32.xlu0 %v3063_v3, %s10326_s30 }
0x153a   : > { %3043 = vrot.lane.b32.xlu1 %v3035_v24, %s10327_s24 }
0x153c   : > { %v3062_v23 = vld [vmem:[#allocation3 + $0x40] sm:$0xff] }
0x153e   : > { %3072 = vrot.lane.b32.xlu1 %v3062_v23, %s10326_s30 }
0x153f   : > { %v3038_v52 = vld [vmem:[#allocation3 + $0x48] sm:$0xff] }
0x1540   : > { %v3037_v28 = vld [vmem:[#allocation3 + $0x30] sm:$0xff]  ;;  %3049 = vrot.lane.b32.xlu0 %v3038_v52, %s10327_s24 }
0x1542   : > { %3047 = vrot.lane.b32.xlu1 %v3037_v28, %s10327_s24 }
0x159e   : > { %v3071_v54 = vpop.permute.xlu0 %3070 }
0x159f   : > { %3082 = vst.msk [vmem:[#allocation3 + $0x28] sm:$0xff] %vm3080_vm6, %v3071_v54 }
0x15a2   : > { %v3046_v44 = vpop.permute.xlu0 %3045 }
0x15a3   : > { %3057 = vst.msk [vmem:[#allocation3 + $0x18] sm:$0xff] %vm3055_vm9, %v3046_v44 }
0x15a6   : > { %v3111_v31 = vld [vmem:[#allocation3 + $0x28] sm:$0xff] }
0x15a7   : > { %v3069_v48 = vpop.permute.xlu1 %3068  ;;  %3120 = vrot.lane.b32.xlu0 %v3111_v31, %s7343_s28  ;;  %v2676_v31 = vsel %vm571_vm1, %v8426_v11, %v8424_v33 }
0x15a8   : > { %3081 = vst.msk [vmem:[#allocation3 + $0x10] sm:$0xff] %vm3080_vm6, %v3069_v48  ;;  %v2675_v48 = vsel %vm571_vm1, %v8434_v56, %v8432_v49 }
0x15aa   : > { %v3086_v45 = vld [vmem:[#allocation3 + $0x18] sm:$0xff] }
0x15ab   : > { %v3075_v1 = vpop.permute.xlu0 %3074  ;;  %3095 = vrot.lane.b32.xlu0 %v3086_v45, %s10328_s18 }
0x15ac   : > { %v3044_v10 = vpop.permute.xlu1 %3043  ;;  %3084 = vst.msk [vmem:[#allocation3 + $0x58] sm:$0xff] %vm3080_vm6, %v3075_v1 }
0x15ad   : > { %3056 = vst.msk [vmem:[#allocation3] sm:$0xff] %vm3055_vm9, %v3044_v10 }
0x15af   : > { %v3110_v29 = vld [vmem:[#allocation3 + $0x10] sm:$0xff] }
0x15b0   : > { %v3073_v63 = vpop.permute.xlu1 %3072  ;;  %3118 = vrot.lane.b32.xlu1 %v3110_v29, %s7343_s28 }
0x15b1   : > { %3083 = vst.msk [vmem:[#allocation3 + $0x40] sm:$0xff] %vm3080_vm6, %v3073_v63 }
0x15b2   : > { %v3050_v3 = vpop.permute.xlu0 %3049 }
0x15b3   : > { %v3113_v23 = vld [vmem:[#allocation3 + $0x58] sm:$0xff]  ;;  %3059 = vst.msk [vmem:[#allocation3 + $0x48] sm:$0xff] %vm3055_vm9, %v3050_v3 }
0x15b4   : > { %v3048_v24 = vpop.permute.xlu1 %3047  ;;  %v3085_v52 = vld [vmem:[#allocation3] sm:$0xff]  ;;  %3124 = vrot.lane.b32.xlu0 %v3113_v23, %s7343_s28 }
0x15b5   : > { %3058 = vst.msk [vmem:[#allocation3 + $0x30] sm:$0xff] %vm3055_vm9, %v3048_v24  ;;  %3093 = vrot.lane.b32.xlu1 %v3085_v52, %s10328_s18 }
0x15b8   : > { %v3112_v28 = vld [vmem:[#allocation3 + $0x40] sm:$0xff] }
0x15b9   : > { %3122 = vrot.lane.b32.xlu1 %v3112_v28, %s7343_s28 }
0x15ba   : > { %v3088_v54 = vld [vmem:[#allocation3 + $0x48] sm:$0xff] }
0x15bb   : > { %3099 = vrot.lane.b32.xlu0 %v3088_v54, %s10328_s18 }
0x15bc   : > { %v3087_v44 = vld [vmem:[#allocation3 + $0x30] sm:$0xff] }
0x15bd   : > { %3097 = vrot.lane.b32.xlu1 %v3087_v44, %s10328_s18 }
0x15bf   : > { %2731 = vrot.lane.b32.xlu0 %v8456_v46, %s7344_s29 }
0x15c1   : > { %2729 = vrot.lane.b32.xlu1 %v2675_v48, %s7344_s29 }
0x15c3   : > { %2737 = vrot.lane.b32.xlu0 %v8440_v2, %s7344_s29 }
0x15c5   : > { %2735 = vrot.lane.b32.xlu1 %v2676_v31, %s7344_s29 }
0x1619   : > { %v3121_v1 = vpop.permute.xlu0 %3120 }
0x161a   : > { %3132 = vst.msk [vmem:[#allocation3 + $0x28] sm:$0xff] %vm3130_vm10, %v3121_v1  ;;  %v2677_v1 = vsel %vm571_vm1, %v8446_v58, %v8444_v42 }
0x161d   : > { %v3096_v49 = vpop.permute.xlu0 %3095 }
0x161e   : > { %3107 = vst.msk [vmem:[#allocation3 + $0x18] sm:$0xff] %vm3105_vm13, %v3096_v49  ;;  %v2678_v49 = vsel %vm571_vm1, %v8462_v51, %v8460_v50 }
0x1621   : > { %v8674_v56 = vld [vmem:[#allocation3 + $0x28] sm:$0xff] }
0x1622   : > { %v3119_v46 = vpop.permute.xlu1 %3118  ;;  %3300 = vst.msk [vmem:[#allocation3 + $0x28] sm:$0xff] %vm571_vm1, %v8318_v35  ;;  %v8694_v35 = vsel %vm571_vm1, %v8631_v25, %v8612_v55 }
0x1623   : > { %3131 = vst.msk [vmem:[#allocation3 + $0x10] sm:$0xff] %vm3130_vm10, %v3119_v46 }
0x1625   : > { %v8679_v33 = vld [vmem:[#allocation3 + $0x18] sm:$0xff] }
0x1626   : > { %v3125_v11 = vpop.permute.xlu0 %3124  ;;  %3298 = vst.msk [vmem:[#allocation3 + $0x18] sm:$0xff] %vm2566_vm0, %v8316_v57  ;;  %v8699_v57 = vsel %vm571_vm1, %v8633_v22, %v8626_v40 }
0x1627   : > { %v3094_v2 = vpop.permute.xlu1 %3093  ;;  %3134 = vst.msk [vmem:[#allocation3 + $0x58] sm:$0xff] %vm3130_vm10, %v3125_v11  ;;  %v6914_v40 = vpack.c.bf16 %v8694_v35, %v8699_v57 }
0x1628   : > { %3106 = vst.msk [vmem:[#allocation3] sm:$0xff] %vm3105_vm13, %v3094_v2 }
0x1629   : > { %v3332_v63 = vld [vmem:[#allocation3 + $0x28] sm:$0xff] }
0x162a   : > { %v8685_v10 = vld [vmem:[#allocation3 + $0x10] sm:$0xff]  ;;  %3341 = vrot.lane.b32.xlu0 %v3332_v63, %s10326_s30 }
0x162b   : > { %v3123_v45 = vpop.permute.xlu1 %3122  ;;  %3297 = vst.msk [vmem:[#allocation3 + $0x10] sm:$0xff] %vm571_vm1, %v8326_v38 }
0x162c   : > { %3133 = vst.msk [vmem:[#allocation3 + $0x40] sm:$0xff] %vm3130_vm10, %v3123_v45 }
0x162d   : > { %v3100_v24 = vpop.permute.xlu0 %3099  ;;  %v3308_v23 = vld [vmem:[#allocation3 + $0x18] sm:$0xff] }
0x162e   : > { %v8701_v29 = vld [vmem:[#allocation3 + $0x58] sm:$0xff]  ;;  %3109 = vst.msk [vmem:[#allocation3 + $0x48] sm:$0xff] %vm3105_vm13, %v3100_v24  ;;  %3317 = vrot.lane.b32.xlu0 %v3308_v23, %s10327_s24 }
0x162f   : > { %v8703_v3 = vld [vmem:[#allocation3] sm:$0xff]  ;;  %v3098_v38 = vpop.permute.xlu1 %3097  ;;  %3306 = vst.msk [vmem:[#allocation3 + $0x58] sm:$0xff] %vm571_vm1, %v8343_v21 }
0x1630   : > { %3295 = vst.msk [vmem:[#allocation3] sm:$0xff] %vm2566_vm0, %v8324_v47  ;;  %v6912_v55 = vpack.c.bf16 %v8679_v33, %v8703_v3 }
0x1631   : > { %3108 = vst.msk [vmem:[#allocation3 + $0x30] sm:$0xff] %vm3105_vm13, %v3098_v38 }
0x1632   : > { %6913 = vmatpush1.bf16.msra.mxu0 %v6912_v55  ;;  %v3331_v22 = vld [vmem:[#allocation3 + $0x10] sm:$0xff] }
0x1633   : > { %v8716_v25 = vld [vmem:[#allocation3 + $0x40] sm:$0xff]  ;;  %6915 = vmatprep.subr.bf16.mxu0 %v6914_v40  ;;  %3339 = vrot.lane.b32.xlu1 %v3331_v22, %s10326_s30  ;;  %v2730_v31 = vpop.permute.xlu1 %2729 }
0x1634   : > { %3303 = vst.msk [vmem:[#allocation3 + $0x40] sm:$0xff] %vm571_vm1, %v8334_v43  ;;  %v6918_v43 = vpack.c.bf16 %v8362_v4, %v8354_v18 }
0x1635   : > { %v8721_v47 = vld [vmem:[#allocation3 + $0x48] sm:$0xff] }
0x1636   : > { %v3334_v52 = vld [vmem:[#allocation3 + $0x58] sm:$0xff]  ;;  %3304 = vst.msk [vmem:[#allocation3 + $0x48] sm:$0xff] %vm2566_vm0, %v8341_v30 }
0x1637   : > { %3345 = vrot.lane.b32.xlu0 %v3334_v52, %s10326_s30  ;;  %v3307_v28 = vld [vmem:[#allocation3] sm:$0xff] }
0x1638   : > { %v8723_v21 = vld [vmem:[#allocation3 + $0x30] sm:$0xff]  ;;  %3315 = vrot.lane.b32.xlu1 %v3307_v28, %s10327_s24 }
0x1639   : > { %3301 = vst.msk [vmem:[#allocation3 + $0x30] sm:$0xff] %vm2566_vm0, %v8332_v62  ;;  %v6916_v54 = vpack.c.bf16 %v8721_v47, %v8723_v21  ;;  %v2732_v62 = vpop.permute.xlu0 %2731 }
0x163a   : > { %v2752_v42 = vsel %vm598_vm3, %v2730_v31, %v2732_v62 }
0x163b   : > { %6917 = vmatpush1.bf16.msra.mxu0 %v6916_v54  ;;  %v3333_v44 = vld [vmem:[#allocation3 + $0x40] sm:$0xff]  ;;  %v2768_v50 = vsel %vm7487_vm4, %v8290_v39, %v2752_v42 }
0x163c   : > { %6919 = vmatprep.subr.bf16.mxu0 %v6918_v43  ;;  %3343 = vrot.lane.b32.xlu1 %v3333_v44, %s10326_s30 }
0x163d   : > { %v3310_v30 = vld [vmem:[#allocation3 + $0x48] sm:$0xff] }
0x163e   : > { %3321 = vrot.lane.b32.xlu0 %v3310_v30, %s10327_s24 }
0x1640   : > { %v3309_v48 = vld [vmem:[#allocation3 + $0x30] sm:$0xff] }
0x1641   : > { %3319 = vrot.lane.b32.xlu1 %v3309_v48, %s10327_s24 }
0x1642   : > { %2733 = vrot.lane.b32.xlu0 %v8442_v37, %s7344_s29  ;;  %v2738_v37 = vpop.permute.xlu0 %2737 }
0x1645   : > { %2727 = vrot.lane.b32.xlu1 %v8458_v59, %s7344_s29  ;;  %v2736_v59 = vpop.permute.xlu1 %2735 }
0x1646   : > { %2743 = vrot.lane.b32.xlu0 %v8472_v12, %s7344_s29  ;;  %v2754_v46 = vsel %vm598_vm3, %v2736_v59, %v2738_v37 }
0x1647   : > { %v2770_v58 = vsel %vm7487_vm4, %v8273_v9, %v2754_v46 }
0x1649   : > { %2741 = vrot.lane.b32.xlu1 %v2677_v1, %s7344_s29 }
0x164a   : > { %2749 = vrot.lane.b32.xlu0 %v8481_v13, %s7344_s29 }
0x164d   : > { %2747 = vrot.lane.b32.xlu1 %v2678_v49, %s7344_s29 }
0x164e   : > { %2745 = vrot.lane.b32.xlu0 %v8483_v0, %s7344_s29 }
0x1651   : > { %2739 = vrot.lane.b32.xlu1 %v8474_v34, %s7344_s29  ;;  %s10329_s29 = smov 64  }
0x1652   : > { %3577 = vrot.lane.b32.xlu0 %v2770_v58, %s7343_s28 }
0x1655   : > { %3573 = vrot.lane.b32.xlu1 %v2768_v50, %s7343_s28 }
0x169c   : > { %v3342_v51 = vpop.permute.xlu0 %3341 }
0x169d   : > { %3352 = vst.msk [vmem:[#allocation3 + $0x28] sm:$0xff] %vm3080_vm6, %v3342_v51 }
0x16a0   : > { %v3318_v12 = vpop.permute.xlu0 %3317 }
0x16a1   : > { %3328 = vst.msk [vmem:[#allocation3 + $0x18] sm:$0xff] %vm3055_vm9, %v3318_v12 }
0x16a4   : > { %v3380_v55 = vld [vmem:[#allocation3 + $0x28] sm:$0xff] }
0x16a5   : > { %v3340_v13 = vpop.permute.xlu1 %3339 }
0x16a6   : > { %3351 = vst.msk [vmem:[#allocation3 + $0x10] sm:$0xff] %vm3080_vm6, %v3340_v13 }
0x16a8   : > { %v3356_v28 = vld [vmem:[#allocation3 + $0x18] sm:$0xff] }
0x16a9   : > { %v3346_v34 = vpop.permute.xlu0 %3345 }
0x16aa   : > { %3354 = vst.msk [vmem:[#allocation3 + $0x58] sm:$0xff] %vm3080_vm6, %v3346_v34  ;;  %v3316_v9 = vpop.permute.xlu1 %3315 }
0x16ab   : > { %3327 = vst.msk [vmem:[#allocation3] sm:$0xff] %vm3055_vm9, %v3316_v9 }
0x16ad   : > { %v3379_v40 = vld [vmem:[#allocation3 + $0x10] sm:$0xff] }
0x16ae   : > { %v3344_v0 = vpop.permute.xlu1 %3343 }
0x16af   : > { %3353 = vst.msk [vmem:[#allocation3 + $0x40] sm:$0xff] %vm3080_vm6, %v3344_v0 }
0x16b0   : > { %v3322_v39 = vpop.permute.xlu0 %3321 }
0x16b1   : > { %3330 = vst.msk [vmem:[#allocation3 + $0x48] sm:$0xff] %vm3055_vm9, %v3322_v39  ;;  %v3382_v43 = vld [vmem:[#allocation3 + $0x58] sm:$0xff] }
0x16b3   : > { %v3320_v11 = vpop.permute.xlu1 %3319 }
0x16b4   : > { %3329 = vst.msk [vmem:[#allocation3 + $0x30] sm:$0xff] %vm3055_vm9, %v3320_v11  ;;  %v2734_v2 = vpop.permute.xlu0 %2733 }
0x16b5   : > { %v2753_v45 = vsel %vm598_vm3, %v2734_v2, %v2736_v59 }
0x16b6   : > { %v2769_v38 = vsel %vm7491_vm5, %v8268_v60, %v2753_v45  ;;  %v3355_v60 = vld [vmem:[#allocation3] sm:$0xff] }
0x16b7   : > { %v2728_v63 = vpop.permute.xlu1 %2727  ;;  %3575 = vrot.lane.b32.xlu0 %v2769_v38, %s7343_s28 }
0x16b8   : > { %v2751_v24 = vsel %vm598_vm3, %v2728_v63, %v2730_v31  ;;  %v2744_v22 = vpop.permute.xlu0 %2743  ;;  %v3358_v30 = vld [vmem:[#allocation3 + $0x48] sm:$0xff] }
0x16b9   : > { %v2767_v23 = vsel %vm7491_vm5, %v8287_v53, %v2751_v24  ;;  %v3381_v53 = vld [vmem:[#allocation3 + $0x40] sm:$0xff] }
0x16ba   : > { %3571 = vrot.lane.b32.xlu1 %v2767_v23, %s7343_s28  ;;  %v6922_v23 = vpack.c.bf16 %v8380_v61, %v8370_v5 }
0x16bb   : > { %3389 = vrot.lane.b32.xlu0 %v3380_v55, %s7343_s28  ;;  %v2742_v52 = vpop.permute.xlu1 %2741  ;;  %v3357_v62 = vld [vmem:[#allocation3 + $0x30] sm:$0xff] }
0x16bc   : > { %v2750_v54 = vpop.permute.xlu0 %2749  ;;  %v2756_v31 = vsel %vm598_vm3, %v2742_v52, %v2744_v22 }
0x16bd   : > { %v2772_v46 = vsel %vm7487_vm4, %v8302_v8, %v2756_v31 }
0x16be   : > { %3387 = vrot.lane.b32.xlu1 %v3379_v40, %s7343_s28 }
0x16bf   : > { %3365 = vrot.lane.b32.xlu0 %v3356_v28, %s10328_s18  ;;  %v2748_v44 = vpop.permute.xlu1 %2747 }
0x16c0   : > { %v2758_v48 = vsel %vm598_vm3, %v2748_v44, %v2750_v54  ;;  %v2746_v1 = vpop.permute.xlu0 %2745 }
0x16c1   : > { %v2774_v37 = vsel %vm7487_vm4, %v8310_v27, %v2758_v48  ;;  %v2757_v59 = vsel %vm598_vm3, %v2746_v1, %v2748_v44 }
0x16c2   : > { %3363 = vrot.lane.b32.xlu1 %v3355_v60, %s10328_s18  ;;  %v2773_v58 = vsel %vm7491_vm5, %v8308_v26, %v2757_v59 }
0x16c3   : > { %3393 = vrot.lane.b32.xlu0 %v3382_v43, %s7343_s28  ;;  %v2740_v49 = vpop.permute.xlu1 %2739 }
0x16c4   : > { %v2755_v42 = vsel %vm598_vm3, %v2740_v49, %v2742_v52  ;;  %v3578_v50 = vpop.permute.xlu0 %3577  ;;  %vm3973_vm3 = vcmask 1040384  }
0x16c5   : > { %v2771_v27 = vsel %vm7491_vm5, %v8300_v19, %v2755_v42 }
0x16c6   : > { %3391 = vrot.lane.b32.xlu1 %v3381_v53, %s7343_s28 }
0x16c7   : > { %3369 = vrot.lane.b32.xlu0 %v3358_v30, %s10328_s18  ;;  %v3574_v51 = vpop.permute.xlu1 %3573 }
0x16ca   : > { %3367 = vrot.lane.b32.xlu1 %v3357_v62, %s10328_s18 }
0x16cb   : > { %3585 = vrot.lane.b32.xlu0 %v2774_v37, %s7343_s28 }
0x16ce   : > { %3581 = vrot.lane.b32.xlu1 %v2772_v46, %s7343_s28 }
0x16cf   : > { %3583 = vrot.lane.b32.xlu0 %v2773_v58, %s7343_s28 }
0x16d2   : > { %3579 = vrot.lane.b32.xlu1 %v2771_v27, %s7343_s28 }
0x1729   : > { %v3576_v12 = vpop.permute.xlu0 %3575 }
0x172a   : > { %v8853_v54 = vsel %vm571_vm1, %v3576_v12, %v3578_v50 }
0x172c   : > { %v3572_v8 = vpop.permute.xlu1 %3571 }
0x172d   : > { %v3390_v13 = vpop.permute.xlu0 %3389  ;;  %v8856_v43 = vsel %vm571_vm1, %v3572_v8, %v3574_v51 }
0x172e   : > { %3400 = vst.msk [vmem:[#allocation3 + $0x28] sm:$0xff] %vm3130_vm10, %v3390_v13  ;;  %v6926_v49 = vpack.c.bf16 %v8853_v54, %v8856_v43 }
0x1730   : > { %v3388_v34 = vpop.permute.xlu1 %3387 }
0x1731   : > { %3399 = vst.msk [vmem:[#allocation3 + $0x10] sm:$0xff] %vm3130_vm10, %v3388_v34  ;;  %v3366_v9 = vpop.permute.xlu0 %3365 }
0x1732   : > { %3376 = vst.msk [vmem:[#allocation3 + $0x18] sm:$0xff] %vm3105_vm13, %v3366_v9 }
0x1734   : > { %v3364_v26 = vpop.permute.xlu1 %3363 }
0x1735   : > { %3375 = vst.msk [vmem:[#allocation3] sm:$0xff] %vm3105_vm13, %v3364_v26  ;;  %v8818_v0 = vld [vmem:[#allocation3 + $0x28] sm:$0xff]  ;;  %v3394_v19 = vpop.permute.xlu0 %3393 }
0x1736   : > { %3608 = vst.msk [vmem:[#allocation3 + $0x28] sm:$0xff] %vm571_vm1, %v3578_v50 }
0x1737   : > { %3402 = vst.msk [vmem:[#allocation3 + $0x58] sm:$0xff] %vm3130_vm10, %v3394_v19 }
0x1738   : > { %v8821_v39 = vld [vmem:[#allocation3 + $0x10] sm:$0xff]  ;;  %v3392_v11 = vpop.permute.xlu1 %3391 }
0x1739   : > { %3605 = vst.msk [vmem:[#allocation3 + $0x10] sm:$0xff] %vm571_vm1, %v3574_v51  ;;  %v8826_v2 = vld [vmem:[#allocation3 + $0x18] sm:$0xff]  ;;  %v3370_v45 = vpop.permute.xlu0 %3369 }
0x173a   : > { %3401 = vst.msk [vmem:[#allocation3 + $0x40] sm:$0xff] %vm3130_vm10, %v3392_v11 }
0x173b   : > { %3606 = vst.msk [vmem:[#allocation3 + $0x18] sm:$0xff] %vm2566_vm0, %v3576_v12 }
0x173c   : > { %v8829_v63 = vld [vmem:[#allocation3] sm:$0xff]  ;;  %3378 = vst.msk [vmem:[#allocation3 + $0x48] sm:$0xff] %vm3105_vm13, %v3370_v45  ;;  %v3368_v24 = vpop.permute.xlu1 %3367 }
0x173d   : > { %3603 = vst.msk [vmem:[#allocation3] sm:$0xff] %vm2566_vm0, %v3572_v8  ;;  %v6920_v38 = vpack.c.bf16 %v8826_v2, %v8829_v63  ;;  %v8840_v40 = vpop.permute.xlu0 %3585  ;;  %v3640_v22 = vld [vmem:[#allocation3 + $0x28] sm:$0xff] }
0x173e   : > { %3377 = vst.msk [vmem:[#allocation3 + $0x30] sm:$0xff] %vm3105_vm13, %v3368_v24  ;;  %v8838_v55 = vld [vmem:[#allocation3 + $0x58] sm:$0xff]  ;;  %3649 = vrot.lane.b32.xlu0 %v3640_v22, %s10326_s30 }
0x173f   : > { %6921 = vmatpush1.bf16.msra.mxu0 %v6920_v38  ;;  %3614 = vst.msk [vmem:[#allocation3 + $0x58] sm:$0xff] %vm571_vm1, %v8840_v40 }
0x1740   : > { %v8847_v28 = vpop.permute.xlu1 %3581  ;;  %v3639_v60 = vld [vmem:[#allocation3 + $0x10] sm:$0xff]  ;;  %6923 = vmatprep.subr.bf16.mxu0 %v6922_v23 }
0x1741   : > { %v8845_v52 = vld [vmem:[#allocation3 + $0x40] sm:$0xff]  ;;  %3647 = vrot.lane.b32.xlu1 %v3639_v60, %s10326_s30  ;;  %v8860_v53 = vpop.permute.xlu0 %3583 }
0x1742   : > { %3611 = vst.msk [vmem:[#allocation3 + $0x40] sm:$0xff] %vm571_vm1, %v8847_v28  ;;  %v3616_v30 = vld [vmem:[#allocation3 + $0x18] sm:$0xff] }
0x1743   : > { %v8858_v44 = vld [vmem:[#allocation3 + $0x48] sm:$0xff]  ;;  %3625 = vrot.lane.b32.xlu0 %v3616_v30, %s10327_s24 }
0x1744   : > { %3612 = vst.msk [vmem:[#allocation3 + $0x48] sm:$0xff] %vm2566_vm0, %v8860_v53  ;;  %v8867_v62 = vpop.permute.xlu1 %3579  ;;  %v3615_v31 = vld [vmem:[#allocation3] sm:$0xff] }
0x1745   : > { %v8865_v48 = vld [vmem:[#allocation3 + $0x30] sm:$0xff]  ;;  %3623 = vrot.lane.b32.xlu1 %v3615_v31, %s10327_s24  ;;  %v8955_v22 = vsel %vm571_vm1, %v8867_v62, %v8847_v28 }
0x1746   : > { %3609 = vst.msk [vmem:[#allocation3 + $0x30] sm:$0xff] %vm2566_vm0, %v8867_v62  ;;  %v6924_v1 = vpack.c.bf16 %v8858_v44, %v8865_v48  ;;  %v3642_v37 = vld [vmem:[#allocation3 + $0x58] sm:$0xff] }
0x1747   : > { %3653 = vrot.lane.b32.xlu0 %v3642_v37, %s10326_s30 }
0x1748   : > { %6925 = vmatpush1.bf16.msra.mxu0 %v6924_v1 }
0x1749   : > { %v3641_v59 = vld [vmem:[#allocation3 + $0x40] sm:$0xff]  ;;  %6927 = vmatprep.subr.bf16.mxu0 %v6926_v49 }
0x174a   : > { %3651 = vrot.lane.b32.xlu1 %v3641_v59, %s10326_s30 }
0x174b   : > { %v3618_v46 = vld [vmem:[#allocation3 + $0x48] sm:$0xff] }
0x174c   : > { %3629 = vrot.lane.b32.xlu0 %v3618_v46, %s10327_s24 }
0x174d   : > { %v3617_v42 = vld [vmem:[#allocation3 + $0x30] sm:$0xff] }
0x174e   : > { %3627 = vrot.lane.b32.xlu1 %v3617_v42, %s10327_s24 }
0x1750   : > { %3179 = vrot.lane.b32.xlu0 %v8685_v10, %s10327_s24 }
0x1752   : > { %3177 = vrot.lane.b32.xlu1 %v8620_v14, %s10327_s24 }
0x1754   : > { %3185 = vrot.lane.b32.xlu0 %v8674_v56, %s10327_s24 }
0x1756   : > { %3183 = vrot.lane.b32.xlu1 %v8615_v41, %s10327_s24 }
0x1758   : > { %3181 = vrot.lane.b32.xlu0 %v8679_v33, %s10327_s24 }
0x175a   : > { %3175 = vrot.lane.b32.xlu1 %v8703_v3, %s10327_s24 }
0x175c   : > { %3191 = vrot.lane.b32.xlu0 %v8716_v25, %s10327_s24 }
0x175e   : > { %3189 = vrot.lane.b32.xlu1 %v8699_v57, %s10327_s24 }
0x1760   : > { %3197 = vrot.lane.b32.xlu0 %v8701_v29, %s10327_s24 }
0x1762   : > { %3195 = vrot.lane.b32.xlu1 %v8694_v35, %s10327_s24 }
0x1764   : > { %3193 = vrot.lane.b32.xlu0 %v8721_v47, %s10327_s24 }
0x1766   : > { %3187 = vrot.lane.b32.xlu1 %v8723_v21, %s10327_s24 }
0x1768   : > { %3447 = vrot.lane.b32.xlu0 %v8821_v39, %s10327_s24 }
0x176a   : > { %3445 = vrot.lane.b32.xlu1 %v8354_v18, %s10327_s24 }
0x176c   : > { %3453 = vrot.lane.b32.xlu0 %v8818_v0, %s10327_s24 }
0x176e   : > { %3451 = vrot.lane.b32.xlu1 %v8362_v4, %s10327_s24 }
0x1770   : > { %3449 = vrot.lane.b32.xlu0 %v8826_v2, %s10327_s24 }
0x1772   : > { %3443 = vrot.lane.b32.xlu1 %v8829_v63, %s10327_s24 }
0x1774   : > { %3459 = vrot.lane.b32.xlu0 %v8845_v52, %s10327_s24 }
0x1776   : > { %3457 = vrot.lane.b32.xlu1 %v8370_v5, %s10327_s24 }
0x1778   : > { %3465 = vrot.lane.b32.xlu0 %v8838_v55, %s10327_s24 }
0x177a   : > { %3463 = vrot.lane.b32.xlu1 %v8380_v61, %s10327_s24 }
0x177c   : > { %3461 = vrot.lane.b32.xlu0 %v8858_v44, %s10327_s24 }
0x177e   : > { %3455 = vrot.lane.b32.xlu1 %v8865_v48, %s10327_s24 }
0x17b0   : > { %v3650_v58 = vpop.permute.xlu0 %3649 }
0x17b1   : > { %3660 = vst.msk [vmem:[#allocation3 + $0x28] sm:$0xff] %vm3080_vm6, %v3650_v58 }
0x17b3   : > { %v3648_v27 = vpop.permute.xlu1 %3647 }
0x17b4   : > { %3659 = vst.msk [vmem:[#allocation3 + $0x10] sm:$0xff] %vm3080_vm6, %v3648_v27 }
0x17b5   : > { %v3626_v50 = vpop.permute.xlu0 %3625 }
0x17b6   : > { %3636 = vst.msk [vmem:[#allocation3 + $0x18] sm:$0xff] %vm3055_vm9, %v3626_v50 }
0x17b7   : > { %v3624_v51 = vpop.permute.xlu1 %3623 }
0x17b8   : > { %3635 = vst.msk [vmem:[#allocation3] sm:$0xff] %vm3055_vm9, %v3624_v51  ;;  %v3688_v8 = vld [vmem:[#allocation3 + $0x28] sm:$0xff] }
0x17b9   : > { %v3654_v12 = vpop.permute.xlu0 %3653  ;;  %3697 = vrot.lane.b32.xlu0 %v3688_v8, %s7343_s28 }
0x17ba   : > { %3662 = vst.msk [vmem:[#allocation3 + $0x58] sm:$0xff] %vm3080_vm6, %v3654_v12 }
0x17bb   : > { %v3687_v34 = vld [vmem:[#allocation3 + $0x10] sm:$0xff] }
0x17bc   : > { %v3652_v13 = vpop.permute.xlu1 %3651  ;;  %3695 = vrot.lane.b32.xlu1 %v3687_v34, %s7343_s28 }
0x17bd   : > { %3661 = vst.msk [vmem:[#allocation3 + $0x40] sm:$0xff] %vm3080_vm6, %v3652_v13  ;;  %v3664_v26 = vld [vmem:[#allocation3 + $0x18] sm:$0xff] }
0x17be   : > { %v3630_v9 = vpop.permute.xlu0 %3629  ;;  %3673 = vrot.lane.b32.xlu0 %v3664_v26, %s10328_s18 }
0x17bf   : > { %3638 = vst.msk [vmem:[#allocation3 + $0x48] sm:$0xff] %vm3055_vm9, %v3630_v9  ;;  %v3663_v11 = vld [vmem:[#allocation3] sm:$0xff] }
0x17c0   : > { %v3628_v19 = vpop.permute.xlu1 %3627  ;;  %3671 = vrot.lane.b32.xlu1 %v3663_v11, %s10328_s18 }
0x17c1   : > { %3637 = vst.msk [vmem:[#allocation3 + $0x30] sm:$0xff] %vm3055_vm9, %v3628_v19  ;;  %v3690_v45 = vld [vmem:[#allocation3 + $0x58] sm:$0xff] }
0x17c2   : > { %3701 = vrot.lane.b32.xlu0 %v3690_v45, %s7343_s28 }
0x17c4   : > { %v3689_v24 = vld [vmem:[#allocation3 + $0x40] sm:$0xff] }
0x17c5   : > { %3699 = vrot.lane.b32.xlu1 %v3689_v24, %s7343_s28 }
0x17c6   : > { %v3666_v38 = vld [vmem:[#allocation3 + $0x48] sm:$0xff] }
0x17c7   : > { %3677 = vrot.lane.b32.xlu0 %v3666_v38, %s10328_s18 }
0x17c8   : > { %v3665_v23 = vld [vmem:[#allocation3 + $0x30] sm:$0xff] }
0x17c9   : > { %3675 = vrot.lane.b32.xlu1 %v3665_v23, %s10328_s18 }
0x17cb   : > { %3251 = vrot.lane.b32.xlu0 %v8685_v10, %s10329_s29  ;;  %v8964_v10 = vsel %vm571_vm1, %v8860_v53, %v8840_v40 }
0x17cc   : > { %v6930_v12 = vpack.c.bf16 %v8964_v10, %v8955_v22 }
0x17cd   : > { %3753 = vrot.lane.b32.xlu1 %v8856_v43, %s10327_s24 }
0x17cf   : > { %3257 = vrot.lane.b32.xlu0 %v8674_v56, %s10329_s29  ;;  %v8982_v56 = vpop.permute.xlu0 %3179 }
0x17d1   : > { %3759 = vrot.lane.b32.xlu1 %v8853_v54, %s10327_s24 }
0x17d3   : > { %3253 = vrot.lane.b32.xlu0 %v8679_v33, %s10329_s29  ;;  %v8986_v33 = vpop.permute.xlu1 %3177 }
0x17d4   : > { %v3200_v19 = vsel %vm772_vm14, %v8986_v33, %v8982_v56 }
0x17d5   : > { %3765 = vrot.lane.b32.xlu1 %v8955_v22, %s10327_s24 }
0x17d7   : > { %3263 = vrot.lane.b32.xlu0 %v8716_v25, %s10329_s29 }
0x17d9   : > { %3771 = vrot.lane.b32.xlu1 %v8964_v10, %s10327_s24 }
0x17db   : > { %3269 = vrot.lane.b32.xlu0 %v8701_v29, %s10329_s29 }
0x17dd   : > { %3249 = vrot.lane.b32.xlu1 %v8620_v14, %s10329_s29  ;;  %v8994_v14 = vpop.permute.xlu1 %3183 }
0x17df   : > { %3265 = vrot.lane.b32.xlu0 %v8721_v47, %s10329_s29 }
0x17e1   : > { %3255 = vrot.lane.b32.xlu1 %v8615_v41, %s10329_s29  ;;  %v3186_v41 = vpop.permute.xlu0 %3185 }
0x17e2   : > { %v3202_v13 = vsel %vm772_vm14, %v8994_v14, %v3186_v41 }
0x17e3   : > { %3519 = vrot.lane.b32.xlu0 %v8821_v39, %s10329_s29  ;;  %v6934_v38 = vpack.c.bf16 %v3202_v13, %v3200_v19 }
0x17e5   : > { %3247 = vrot.lane.b32.xlu1 %v8703_v3, %s10329_s29  ;;  %v3182_v29 = vpop.permute.xlu0 %3181  ;;  %v3176_v3 = vpop.permute.xlu1 %3175 }
0x17e6   : > { %v3201_v45 = vsel %vm772_vm14, %v3182_v29, %v8994_v14  ;;  %v3199_v24 = vsel %vm772_vm14, %v3176_v3, %v8986_v33 }
0x17e7   : > { %3525 = vrot.lane.b32.xlu0 %v8818_v0, %s10329_s29  ;;  %v6936_v41 = vpack.c.bf16 %v3201_v45, %v3199_v24 }
0x17e9   : > { %3261 = vrot.lane.b32.xlu1 %v8699_v57, %s10329_s29  ;;  %v9004_v57 = vpop.permute.xlu0 %3191 }
0x17eb   : > { %3521 = vrot.lane.b32.xlu0 %v8826_v2, %s10329_s29 }
0x17ed   : > { %3267 = vrot.lane.b32.xlu1 %v8694_v35, %s10329_s29  ;;  %v9006_v35 = vpop.permute.xlu1 %3189  ;;  %v3198_v25 = vpop.permute.xlu0 %3197 }
0x17ee   : > { %v3204_v56 = vsel %vm772_vm14, %v9006_v35, %v9004_v57 }
0x17ef   : > { %3531 = vrot.lane.b32.xlu0 %v8845_v52, %s10329_s29 }
0x17f1   : > { %3259 = vrot.lane.b32.xlu1 %v8723_v21, %s10329_s29  ;;  %v9010_v47 = vpop.permute.xlu1 %3195  ;;  %v3194_v21 = vpop.permute.xlu0 %3193 }
0x17f2   : > { %v3206_v23 = vsel %vm772_vm14, %v9010_v47, %v3198_v25  ;;  %v3205_v33 = vsel %vm772_vm14, %v3194_v21, %v9010_v47 }
0x17f3   : > { %v6938_v29 = vpack.c.bf16 %v3206_v23, %v3204_v56 }
0x17f5   : > { %3517 = vrot.lane.b32.xlu1 %v8354_v18, %s10329_s29  ;;  %v3188_v0 = vpop.permute.xlu1 %3187  ;;  %v9014_v39 = vpop.permute.xlu0 %3447 }
0x17f6   : > { %v3203_v14 = vsel %vm772_vm14, %v3188_v0, %v9006_v35 }
0x17f7   : > { %v6940_v57 = vpack.c.bf16 %v3205_v33, %v3203_v14 }
0x17f9   : > { %3523 = vrot.lane.b32.xlu1 %v8362_v4, %s10329_s29  ;;  %v9016_v18 = vpop.permute.xlu1 %3445  ;;  %v3454_v4 = vpop.permute.xlu0 %3453 }
0x17fd   : > { %3515 = vrot.lane.b32.xlu1 %v8829_v63, %s10329_s29  ;;  %v9018_v2 = vpop.permute.xlu1 %3451  ;;  %v9020_v40 = vpop.permute.xlu0 %3449 }
0x17fe   : > { %v3470_v3 = vsel %vm772_vm14, %v9018_v2, %v3454_v4  ;;  %v3469_v35 = vsel %vm772_vm14, %v9020_v40, %v9018_v2 }
0x1801   : > { %3529 = vrot.lane.b32.xlu1 %v8370_v5, %s10329_s29  ;;  %v9022_v52 = vpop.permute.xlu1 %3443  ;;  %v9024_v63 = vpop.permute.xlu0 %3459 }
0x1802   : > { %v3467_v47 = vsel %vm772_vm14, %v9022_v52, %v9016_v18  ;;  %v9139_v52 = vld [vmem:[#allocation2 + $0x240] sm:$0x1] }
0x1805   : > { %v9026_v28 = vpop.permute.xlu1 %3457  ;;  %v9028_v60 = vpop.permute.xlu0 %3465 }
0x1809   : > { %v9030_v5 = vpop.permute.xlu1 %3463  ;;  %v9032_v53 = vpop.permute.xlu0 %3461 }
0x180a   : > { %v3474_v0 = vsel %vm772_vm14, %v9030_v5, %v9028_v60 }
0x180d   : > { %v9034_v30 = vpop.permute.xlu1 %3455 }
0x180e   : > { %v3471_v4 = vsel %vm772_vm14, %v9034_v30, %v9026_v28 }
0x182b   : > { %v3698_v62 = vpop.permute.xlu0 %3697 }
0x182c   : > { %3708 = vst.msk [vmem:[#allocation3 + $0x28] sm:$0xff] %vm3130_vm10, %v3698_v62  ;;  %v9164_v62 = vld [vmem:[%s7928_s27 + $0x40] sm:$0xff] }
0x182e   : > { %v3696_v31 = vpop.permute.xlu1 %3695 }
0x182f   : > { %3707 = vst.msk [vmem:[#allocation3 + $0x10] sm:$0xff] %vm3130_vm10, %v3696_v31  ;;  %v9167_v31 = vld [vmem:[%s7928_s27 + $0x50] sm:$0xff] }
0x1830   : > { %v3674_v1 = vpop.permute.xlu0 %3673 }
0x1831   : > { %3684 = vst.msk [vmem:[#allocation3 + $0x18] sm:$0xff] %vm3105_vm13, %v3674_v1 }
0x1832   : > { %v3672_v49 = vpop.permute.xlu1 %3671 }
0x1833   : > { %3683 = vst.msk [vmem:[#allocation3] sm:$0xff] %vm3105_vm13, %v3672_v49  ;;  %v9040_v59 = vld [vmem:[#allocation3 + $0x28] sm:$0xff]  ;;  %v6984_v49 = vpack.c.bf16 %v9167_v31, %v9164_v62 }
0x1834   : > { %v3702_v37 = vpop.permute.xlu0 %3701  ;;  %3761 = vrot.lane.b32.xlu0 %v9040_v59, %s10327_s24 }
0x1835   : > { %3710 = vst.msk [vmem:[#allocation3 + $0x58] sm:$0xff] %vm3130_vm10, %v3702_v37 }
0x1836   : > { %v3729_v8 = vld [vmem:[#allocation3 + $0x10] sm:$0xff] }
0x1837   : > { %v3700_v46 = vpop.permute.xlu1 %3699 }
0x1838   : > { %3709 = vst.msk [vmem:[#allocation3 + $0x40] sm:$0xff] %vm3130_vm10, %v3700_v46  ;;  %v9046_v42 = vld [vmem:[#allocation3 + $0x18] sm:$0xff] }
0x1839   : > { %v3678_v58 = vpop.permute.xlu0 %3677  ;;  %3757 = vrot.lane.b32.xlu0 %v9046_v42, %s10327_s24 }
0x183a   : > { %v3711_v27 = vld [vmem:[#allocation3] sm:$0xff]  ;;  %3686 = vst.msk [vmem:[#allocation3 + $0x48] sm:$0xff] %vm3105_vm13, %v3678_v58 }
0x183b   : > { %v3676_v50 = vpop.permute.xlu1 %3675  ;;  %3751 = vrot.lane.b32.xlu1 %v3711_v27, %s10327_s24  ;;  %v6928_v51 = vpack.c.bf16 %v9046_v42, %v3711_v27 }
0x183c   : > { %3685 = vst.msk [vmem:[#allocation3 + $0x30] sm:$0xff] %vm3105_vm13, %v3676_v50  ;;  %v3738_v9 = vld [vmem:[#allocation3 + $0x58] sm:$0xff] }
0x183d   : > { %6929 = vmatpush1.bf16.msra.mxu0 %v6928_v51  ;;  %3755 = vrot.lane.b32.xlu0 %v3729_v8, %s10327_s24 }
0x183e   : > { %6931 = vmatprep.subr.bf16.mxu0 %v6930_v12 }
0x183f   : > { %v3735_v25 = vld [vmem:[#allocation3 + $0x40] sm:$0xff]  ;;  %v3754_v40 = vpop.permute.xlu1 %3753 }
0x1841   : > { %v9059_v34 = vld [vmem:[#allocation3 + $0x48] sm:$0xff]  ;;  %3773 = vrot.lane.b32.xlu0 %v3738_v9, %s10327_s24 }
0x1843   : > { %v3715_v26 = vld [vmem:[#allocation3 + $0x30] sm:$0xff] }
0x1844   : > { %3763 = vrot.lane.b32.xlu1 %v3715_v26, %s10327_s24  ;;  %v6932_v11 = vpack.c.bf16 %v9059_v34, %v3715_v26 }
0x1845   : > { %3769 = vrot.lane.b32.xlu0 %v9059_v34, %s10327_s24 }
0x1846   : > { %6933 = vmatpush1.bf16.msra.mxu0 %v6932_v11 }
0x1847   : > { %6935 = vmatprep.subr.bf16.mxu0 %v6934_v38 }
0x1848   : > { %3535 = vrot.lane.b32.xlu1 %v8380_v61, %s10329_s29  ;;  %v3468_v61 = vsel %vm772_vm14, %v9016_v18, %v9014_v39  ;;  %v6944_v39 = vpack.c.bf16 %v3469_v35, %v3467_v47  ;;  %v3473_v18 = vsel %vm772_vm14, %v9032_v53, %v9030_v5  ;;  %v3252_v5 = vpop.permute.xlu0 %3251  ;;  %v9159_v53 = vld [vmem:[%s7928_s27 + $0x58] sm:$0xff] }
0x1849   : > { %3767 = vrot.lane.b32.xlu0 %v3735_v25, %s10327_s24  ;;  %v6942_v21 = vpack.c.bf16 %v3470_v3, %v3468_v61 }
0x184a   : > { %6937 = vmatpush1.bf16.msra.mxu0 %v6936_v41 }
0x184b   : > { %6939 = vmatprep.subr.bf16.mxu0 %v6938_v29 }
0x184c   : > { %3527 = vrot.lane.b32.xlu1 %v8865_v48, %s10329_s29  ;;  %v3472_v48 = vsel %vm772_vm14, %v9026_v28, %v9024_v63  ;;  %v6650_v28 = vld [vmem:[%s10294_s7 + $0x28] sm:$0xff]  ;;  %v3258_v37 = vpop.permute.xlu0 %3257 }
0x184d   : > { %3537 = vrot.lane.b32.xlu0 %v8838_v55, %s10329_s29  ;;  %v6946_v2 = vpack.c.bf16 %v3474_v0, %v3472_v48  ;;  %v6948_v55 = vpack.c.bf16 %v3473_v18, %v3471_v4 }
0x184e   : > { %6941 = vmatpush1.bf16.msra.mxu0 %v6940_v57 }
0x184f   : > { %6943 = vmatprep.subr.bf16.mxu0 %v6942_v21 }
0x1850   : > { %3825 = vrot.lane.b32.xlu1 %v8856_v43, %s10329_s29  ;;  %v3875_v43 = vld [vmem:[%s10290_s3 + $0x8] sm:$0xff]  ;;  %v3254_v46 = vpop.permute.xlu0 %3253 }
0x1851   : > { %3533 = vrot.lane.b32.xlu0 %v8858_v44, %s10329_s29  ;;  %4044 = vmatprep.mubr.f32.mxu0 %v3875_v43  ;;  %v6649_v44 = vld [vmem:[%s10294_s7 + $0x20] sm:$0xff] }
0x1852   : > { %6945 = vmatpush1.bf16.msra.mxu0 %v6944_v39 }
0x1853   : > { %6947 = vmatprep.subr.bf16.mxu0 %v6946_v2 }
0x1854   : > { %3831 = vrot.lane.b32.xlu1 %v8853_v54, %s10329_s29  ;;  %v3760_v54 = vpop.permute.xlu1 %3759  ;;  %v3264_v58 = vpop.permute.xlu0 %3263 }
0x1855   : > { %3827 = vrot.lane.b32.xlu0 %v3729_v8, %s10329_s29 }
0x1856   : > { %6949 = vmatpush1.bf16.msra.mxu0 %v6948_v55 }
0x1858   : > { %3823 = vrot.lane.b32.xlu1 %v3711_v27, %s10329_s29  ;;  %v3766_v63 = vpop.permute.xlu1 %3765  ;;  %v3270_v50 = vpop.permute.xlu0 %3269 }
0x1859   : > { %3833 = vrot.lane.b32.xlu0 %v9040_v59, %s10329_s29 }
0x185c   : > { %3837 = vrot.lane.b32.xlu1 %v8955_v22, %s10329_s29  ;;  %v9137_v22 = vld [vmem:[#allocation2 + $0x248] sm:$0x1]  ;;  %v3772_v60 = vpop.permute.xlu1 %3771  ;;  %v3266_v12 = vpop.permute.xlu0 %3265 }
0x185d   : > { %3829 = vrot.lane.b32.xlu0 %v9046_v42, %s10329_s29  ;;  %6221 = vst.msk [vmem:[#allocation2 + $0x240] ss:$8 sm:$0x3] %vm7859_vm15, %v7351_v7  ;;  %v9156_v7 = vld [vmem:[%s7928_s27 + $0x48] sm:$0xff]  ;;  %vm3960_vm15 = vcmask 269312  }
0x185e   : > { %v6982_v30 = vpack.c.bf16 %v9159_v53, %v9156_v7 }
0x1860   : > { %3843 = vrot.lane.b32.xlu1 %v8964_v10, %s10329_s29  ;;  %v6651_v10 = vld [vmem:[%s10294_s7 + $0x30] sm:$0xff]  ;;  %v3250_v1 = vpop.permute.xlu1 %3249  ;;  %6983 = vmatprep.subr.bf16.mxu1 %v6982_v30  ;;  %v3520_v13 = vpop.permute.xlu0 %3519 }
0x1861   : > { %3845 = vrot.lane.b32.xlu0 %v3738_v9, %s10329_s29  ;;  %6985 = vmatpush1.bf16.msra.mxu1 %v6984_v49 }
0x1864   : > { %3835 = vrot.lane.b32.xlu1 %v3715_v26, %s10329_s29  ;;  %v3256_v59 = vpop.permute.xlu1 %3255  ;;  %v3526_v9 = vpop.permute.xlu0 %3525 }
0x1865   : > { %3839 = vrot.lane.b32.xlu0 %v3735_v25, %s10329_s29  ;;  %v3274_v39 = vsel %vm813_vm2, %v3256_v59, %v3258_v37 }
0x1868   : > { %4394 = vperm.xlu1 %7168, %v6649_v44   ;;  %v3248_v42 = vpop.permute.xlu1 %3247  ;;  %v3522_v19 = vpop.permute.xlu0 %3521 }
0x1869   : > { %3841 = vrot.lane.b32.xlu0 %v9059_v34, %s10329_s29  ;;  %v3271_v44 = vsel %vm813_vm2, %v3248_v42, %v3250_v1 }
0x186c   : > { %4404 = vperm.xlu1 %7168, %v6651_v10   ;;  %v3262_v27 = vpop.permute.xlu1 %3261  ;;  %v3532_v45 = vpop.permute.xlu0 %3531 }
0x186d   : > { %4399 = vperm.xlu0 %7167, %v6650_v28   ;;  %v3276_v49 = vsel %vm813_vm2, %v3262_v27, %v3264_v58 }
0x1870   : > { %v3268_v51 = vpop.permute.xlu1 %3267 }
0x1871   : > { %4409 = vperm.xlu0 %7167, %v6652_v17   ;;  %v3278_v17 = vsel %vm813_vm2, %v3268_v51, %v3270_v50  ;;  %v3277_v42 = vsel %vm813_vm2, %v3266_v12, %v3268_v51 }
0x1874   : > { %v3260_v8 = vpop.permute.xlu1 %3259 }
0x1878   : > { %v3518_v34 = vpop.permute.xlu1 %3517 }
0x1879   : > { %v3540_v50 = vsel %vm813_vm2, %v3518_v34, %v3520_v13 }
0x187c   : > { %v3524_v26 = vpop.permute.xlu1 %3523 }
0x1880   : > { %v3516_v11 = vpop.permute.xlu1 %3515 }
0x1884   : > { %v9171_v38 = vpop.permute.xlu1 %3529 }
0x18a6   : > { %v3762_v24 = vpop.permute.xlu0 %3761 }
0x18a7   : > { %v3778_v29 = vsel %vm772_vm14, %v3760_v54, %v3762_v24 }
0x18ab   : > { %v3758_v23 = vpop.permute.xlu0 %3757 }
0x18ac   : > { %v3777_v41 = vsel %vm772_vm14, %v3758_v23, %v3760_v54  ;;  %v3542_v23 = vsel %vm813_vm2, %v3524_v26, %v3526_v9 }
0x18ad   : > { %v3752_v56 = vpop.permute.xlu1 %3751 }
0x18ae   : > { %v3775_v33 = vsel %vm772_vm14, %v3752_v56, %v3754_v40 }
0x18af   : > { %v3756_v14 = vpop.permute.xlu0 %3755  ;;  %v6952_v61 = vpack.c.bf16 %v3777_v41, %v3775_v33  ;;  %v6966_v41 = vpack.c.bf16 %v3542_v23, %v3540_v50  ;;  %v6637_v23 = vld [vmem:[%s10293_s6 + $0x20] sm:$0xff]  ;;  %v6640_v50 = vld [vmem:[%s10293_s6 + $0x38] sm:$0xff] }
0x18b0   : > { %v3776_v3 = vsel %vm772_vm14, %v3754_v40, %v3756_v14  ;;  %v3272_v40 = vsel %vm813_vm2, %v3250_v1, %v3252_v5  ;;  %v6962_v5 = vpack.c.bf16 %v3278_v17, %v3276_v49  ;;  %v3876_v17 = vld [vmem:[%s10290_s3 + $0x10] sm:$0xff]  ;;  %v9259_v49 = vld [vmem:[%s7928_s27 + $0x78] sm:$0xff] }
0x18b1   : > { %v6950_v25 = vpack.c.bf16 %v3778_v29, %v3776_v3  ;;  %v6958_v28 = vpack.c.bf16 %v3274_v39, %v3272_v40 }
0x18b3   : > { %v3774_v57 = vpop.permute.xlu0 %3773  ;;  %6951 = vmatprep.subr.bf16.mxu0 %v6950_v25 }
0x18b4   : > { %6953 = vmatpush1.bf16.msra.mxu0 %v6952_v61  ;;  %v3782_v18 = vsel %vm772_vm14, %v3772_v60, %v3774_v57  ;;  %v3874_v61 = vld [vmem:[%s10290_s3] sm:$0xff] }
0x18b6   : > { %v3764_v35 = vpop.permute.xlu1 %3763 }
0x18b7   : > { %v3770_v47 = vpop.permute.xlu0 %3769  ;;  %v3779_v55 = vsel %vm772_vm14, %v3764_v35, %v3766_v63 }
0x18b8   : > { %v3781_v0 = vsel %vm772_vm14, %v3770_v47, %v3772_v60  ;;  %v3273_v60 = vsel %vm813_vm2, %v3254_v46, %v3256_v59  ;;  %v3539_v59 = vsel %vm813_vm2, %v3516_v11, %v3518_v34 }
0x18b9   : > { %v6956_v54 = vpack.c.bf16 %v3781_v0, %v3779_v55  ;;  %v6960_v37 = vpack.c.bf16 %v3273_v60, %v3271_v44  ;;  %v3881_v0 = vld [vmem:[%s10290_s3 + $0x38] sm:$0xff]  ;;  %v9256_v60 = vld [vmem:[%s7928_s27 + $0x68] sm:$0xff] }
0x18ba   : > { %v3536_v21 = vpop.permute.xlu1 %3535 }
0x18bb   : > { %v3768_v48 = vpop.permute.xlu0 %3767 }
0x18bc   : > { %v3780_v4 = vsel %vm772_vm14, %v3766_v63, %v3768_v48  ;;  %v3275_v63 = vsel %vm813_vm2, %v3260_v8, %v3262_v27  ;;  %v3541_v27 = vsel %vm813_vm2, %v3522_v19, %v3524_v26  ;;  %v3544_v8 = vsel %vm813_vm2, %v9171_v38, %v3532_v45 }
0x18bd   : > { %v6954_v43 = vpack.c.bf16 %v3782_v18, %v3780_v4  ;;  %v6964_v56 = vpack.c.bf16 %v3277_v42, %v3275_v63  ;;  %v6968_v9 = vpack.c.bf16 %v3541_v27, %v3539_v59  ;;  %v3880_v4 = vld [vmem:[%s10290_s3 + $0x30] sm:$0xff]  ;;  %v6986_v63 = vpack.c.bf16 %v9259_v49, %v9256_v60 }
0x18be   : > { %v3528_v2 = vpop.permute.xlu1 %3527  ;;  %v6639_v42 = vld [vmem:[%s10293_s6 + $0x30] sm:$0xff] }
0x18bf   : > { %v3538_v10 = vpop.permute.xlu0 %3537  ;;  %6955 = vmatprep.subr.bf16.mxu0 %v6954_v43  ;;  %v3543_v34 = vsel %vm813_vm2, %v3528_v2, %v9171_v38  ;;  %v3878_v38 = vld [vmem:[%s10290_s3 + $0x20] sm:$0xff]  ;;  %v3884_v43 = vld [vmem:[%s10290_s3 + $0x50] sm:$0xff]  ;;  %6987 = vmatprep.subr.bf16.mxu1 %v6986_v63 }
0x18c0   : > { %6957 = vmatpush1.bf16.msra.mxu0 %v6956_v54  ;;  %v3546_v58 = vsel %vm813_vm2, %v3536_v21, %v3538_v10 }
0x18c1   : > { %6959 = vmatprep.subr.bf16.mxu0 %v6958_v28  ;;  %v6970_v13 = vpack.c.bf16 %v3546_v58, %v3544_v8  ;;  %v3883_v28 = vld [vmem:[%s10290_s3 + $0x48] sm:$0xff] }
0x18c2   : > { %v3826_v30 = vpop.permute.xlu1 %3825 }
0x18c3   : > { %v3534_v24 = vpop.permute.xlu0 %3533 }
0x18c4   : > { %6961 = vmatpush1.bf16.msra.mxu0 %v6960_v37  ;;  %v3545_v51 = vsel %vm813_vm2, %v3534_v24, %v3536_v21  ;;  %v3877_v21 = vld [vmem:[%s10290_s3 + $0x18] sm:$0xff]  ;;  %v9262_v37 = vld [vmem:[%s7928_s27 + $0x60] sm:$0xff]  ;;  %v9267_v24 = vld [vmem:[%s7928_s27 + $0x70] sm:$0xff] }
0x18c5   : > { %6963 = vmatprep.subr.bf16.mxu0 %v6962_v5  ;;  %v6972_v26 = vpack.c.bf16 %v3545_v51, %v3543_v34  ;;  %v6988_v5 = vpack.c.bf16 %v9267_v24, %v9262_v37 }
0x18c6   : > { %v3832_v1 = vpop.permute.xlu1 %3831 }
0x18c7   : > { %v3828_v46 = vpop.permute.xlu0 %3827  ;;  %6989 = vmatpush1.bf16.msra.mxu1 %v6988_v5 }
0x18c8   : > { %6965 = vmatpush1.bf16.msra.mxu0 %v6964_v56  ;;  %v3848_v29 = vsel %vm813_vm2, %v3826_v30, %v3828_v46 }
0x18c9   : > { %6967 = vmatprep.subr.bf16.mxu0 %v6966_v41 }
0x18ca   : > { %v3824_v33 = vpop.permute.xlu1 %3823  ;;  %6641 = vmatmul.mubr.msk.f32.vlgmr.msra.gmra.mrb[16].mxu1 %vm571_vm1, %v6637_v23 }
0x18cb   : > { %v3834_v12 = vpop.permute.xlu0 %3833  ;;  %v3847_v45 = vsel %vm813_vm2, %v3824_v33, %v3826_v30  ;;  %v3882_v30 = vld [vmem:[%s10290_s3 + $0x40] sm:$0xff]  ;;  %4267 = vmatprep.mubr.f32.mxu1 %v7352_v6 }
0x18cc   : > { %v3850_v14 = vsel %vm813_vm2, %v3832_v1, %v3834_v12  ;;  %6969 = vmatpush1.bf16.msra.mxu0 %v6968_v9 }
0x18cd   : > { %6971 = vmatprep.subr.bf16.mxu0 %v6970_v13  ;;  %v6974_v3 = vpack.c.bf16 %v3850_v14, %v3848_v29 }
0x18ce   : > { %v3838_v11 = vpop.permute.xlu1 %3837 }
0x18cf   : > { %v3830_v19 = vpop.permute.xlu0 %3829 }
0x18d0   : > { %v3849_v25 = vsel %vm813_vm2, %v3830_v19, %v3832_v1  ;;  %6973 = vmatpush1.bf16.msra.mxu0 %v6972_v26  ;;  %v6638_v1 = vld [vmem:[%s10293_s6 + $0x28] sm:$0xff] }
0x18d1   : > { %6975 = vmatprep.subr.bf16.mxu0 %v6974_v3  ;;  %v6976_v57 = vpack.c.bf16 %v3849_v25, %v3847_v45  ;;  %6642 = vmatmul.mubr.msk.f32.gmra.mrb[18].mxu1 %vm571_vm1, %v6638_v1  ;;  %v6633_v25 = vld [vmem:[%s10292_s5 + $0x20] sm:$0xff] }
0x18d2   : > { %v3844_v35 = vpop.permute.xlu1 %3843  ;;  %4273 = vmatprep.mubr.f32.mxu1 %v7352_v6 }
0x18d3   : > { %v3846_v47 = vpop.permute.xlu0 %3845  ;;  %4045 = vmatmul.mubr.f32.vlgmr.msra.gmra.mrb[26].mxu0 %v3874_v61  ;;  %v6634_v61 = vld [vmem:[%s10292_s5 + $0x28] sm:$0xff] }
0x18d4   : > { %6977 = vmatpush1.bf16.msra.mxu0 %v6976_v57  ;;  %4050 = vmatprep.mubr.f32.mxu0 %v3878_v38  ;;  %v3854_v39 = vsel %vm813_vm2, %v3844_v35, %v3846_v47  ;;  %v6635_v57 = vld [vmem:[%s10292_s5 + $0x30] sm:$0xff]  ;;  %v6636_v38 = vld [vmem:[%s10292_s5 + $0x38] sm:$0xff] }
0x18d5   : > { %6643 = vmatmul.mubr.msk.f32.gmra.mrb[20].mxu1 %vm571_vm1, %v6639_v42 }
0x18d6   : > { %v3836_v2 = vpop.permute.xlu1 %3835  ;;  %4279 = vmatprep.mubr.f32.mxu1 %v7352_v6 }
0x18d7   : > { %v3840_v48 = vpop.permute.xlu0 %3839  ;;  %4051 = vmatmul.mubr.f32.gmra.mrb[28].mxu0 %v3877_v21  ;;  %v3851_v54 = vsel %vm813_vm2, %v3836_v2, %v3838_v11 }
0x18d8   : > { %v3852_v18 = vsel %vm813_vm2, %v3838_v11, %v3840_v48  ;;  %4056 = vmatprep.mubr.f32.mxu0 %v3881_v0 }
0x18d9   : > { %v6978_v55 = vpack.c.bf16 %v3854_v39, %v3852_v18  ;;  %6644 = vmatmul.mubr.msk.f32.gmra.mrb[22].mxu1 %vm571_vm1, %v6640_v50 }
0x18da   : > { %4362 = vmatprep.mubr.f32.mxu1 %v7352_v6 }
0x18db   : > { %v3842_v40 = vpop.permute.xlu0 %3841  ;;  %6979 = vmatprep.subr.bf16.mxu0 %v6978_v55  ;;  %4057 = vmatmul.mubr.f32.gmra.mrb[30].mxu0 %v3880_v4 }
0x18dc   : > { %v3853_v44 = vsel %vm813_vm2, %v3842_v40, %v3844_v35  ;;  %4062 = vmatprep.mubr.f32.mxu0 %v3884_v43  ;;  %vm5456_vm2 = vcmask 924672  }
0x18dd   : > { %v6980_v10 = vpack.c.bf16 %v3853_v44, %v3851_v54 }
0x18df   : > { %6981 = vmatpush1.bf16.msra.mxu0 %v6980_v10 }
0x18e0   : > { %4063 = vmatmul.mubr.f32.gmra.mrb[32].mxu0 %v3883_v28  ;;  %6619 = vmatprep.subr.msk.mxu0 %vm3973_vm3, %v9137_v22  ;;  %v3879_v22 = vld [vmem:[%s10290_s3 + $0x28] sm:$0xff] }
0x18e1   : > { %4133 = vmatprep.mubr.f32.mxu0 %v7352_v6 }
0x18e3   : > { %6620 = vmatpush1.msk.msra.mxu0 %vm3973_vm3, %v9139_v52  ;;  %v3885_v52 = vld [vmem:[%s10290_s3 + $0x58] sm:$0xff] }
0x18e4   : > { %6621 = vmatmul.mubr.msk.f32.vlgmr.msra.gmra.mrb[26].mxu0 %vm3960_vm15, %v3876_v17  ;;  %7020 = vmatprep.subr.bf16.mxu0 %v7354_v20 }
0x18e5   : > { %4139 = vmatprep.mubr.f32.mxu0 %v7352_v6 }
0x18e7   : > { %v4395_v35 = vpop.permute.xlu1 %4394 }
0x18e8   : > { %6622 = vmatmul.mubr.msk.f32.gmra.mrb[28].mxu0 %vm3960_vm15, %v3879_v22 }
0x18e9   : > { %4145 = vmatprep.mubr.f32.mxu0 %v7352_v6 }
0x18eb   : > { %v4405_v40 = vpop.permute.xlu1 %4404 }
0x18ec   : > { %6623 = vmatmul.mubr.msk.f32.gmra.mrb[30].mxu0 %vm3960_vm15, %v3882_v30  ;;  %v4400_v39 = vpop.permute.xlu0 %4399 }
0x18ed   : > { %4151 = vmatprep.mubr.f32.mxu0 %v7352_v6 }
0x18f0   : > { %6624 = vmatmul.mubr.msk.f32.gmra.mrb[32].mxu0 %vm3960_vm15, %v3885_v52  ;;  %v4410_v22 = vpop.permute.xlu0 %4409 }
0x18f1   : > { %6831 = vmatprep.mubr.msk.f32.mxu0 %vm7355_vm11, %v7352_v6 }
0x19b7   : > { %v4135_v56 = vpop.f32.mrb[26].mxu0 }
0x19b8   : > { %v4137_v59 = vpop.f32.mrb[27].mxu0  ;;  %v4158_v41 = vmax.f32 %v4135_v56, 0.0 }
0x19b9   : > { %v4159_v27 = vmax.f32 %v4137_v59, 0.0 }
0x19bb   : > { %v4141_v46 = vpop.f32.mrb[28].mxu0 }
0x19bc   : > { %v4160_v58 = vmax.f32 %v4141_v46, 0.0  ;;  %v4143_v33 = vpop.f32.mrb[29].mxu0 }
0x19bd   : > { %v4161_v8 = vmax.f32 %v4143_v33, 0.0 }
0x19be   : > { %v9291_v9 = vpack.c.bf16 %v4160_v58, %v4158_v41 }
0x19bf   : > { %v9293_v51 = vpack.c.bf16 %v4161_v8, %v4159_v27  ;;  %v4147_v12 = vpop.f32.mrb[30].mxu0 }
0x19c0   : > { %v4149_v13 = vpop.f32.mrb[31].mxu0  ;;  %v4162_v34 = vmax.f32 %v4147_v12, 0.0  ;;  %v6653_v12 = vld [vmem:[%s10295_s8 + $0x8] sm:$0xff] }
0x19c1   : > { %6991 = vmatprep.subr.bf16.mxu1 %v9293_v51  ;;  %v4163_v26 = vmax.f32 %v4149_v13, 0.0  ;;  %v6655_v13 = vld [vmem:[%s10296_s9 + $0x20] sm:$0xff] }
0x19c2   : > { %6993 = vmatpush1.bf16.msra.mxu1 %v9291_v9 }
0x19c3   : > { %v4153_v14 = vpop.f32.mrb[32].mxu0 }
0x19c4   : > { %v4164_v11 = vmax.f32 %v4153_v14, 0.0  ;;  %v4155_v29 = vpop.f32.mrb[33].mxu0 }
0x19c5   : > { %v4165_v19 = vmax.f32 %v4155_v29, 0.0  ;;  %v6656_v29 = vld [vmem:[%s10296_s9 + $0x28] sm:$0xff] }
0x19c6   : > { %v9297_v3 = vpack.c.bf16 %v4164_v11, %v4162_v34 }
0x19c7   : > { %v9299_v45 = vpack.c.bf16 %v4165_v19, %v4163_v26  ;;  %v6657_v26 = vld [vmem:[%s10296_s9 + $0x30] sm:$0xff]  ;;  %v6658_v19 = vld [vmem:[%s10296_s9 + $0x38] sm:$0xff] }
0x19c9   : > { %6995 = vmatprep.subr.bf16.mxu1 %v9299_v45 }
0x19ca   : > { %6997 = vmatpush1.bf16.msra.mxu1 %v9297_v3 }
0x19cb   : > { %6998 = vmatprep.subr.bf16.mxu1 %v7354_v20 }
0x19cd   : > { %6645 = vmatmul.mubr.msk.f32.vlgmr.msra.gmra.mrb[16].mxu1 %vm571_vm1, %v6633_v25 }
0x19ce   : > { %4368 = vmatprep.mubr.f32.mxu1 %v7352_v6 }
0x19d1   : > { %6646 = vmatmul.mubr.msk.f32.gmra.mrb[18].mxu1 %vm571_vm1, %v6634_v61 }
0x19d2   : > { %4374 = vmatprep.mubr.f32.mxu1 %v7352_v6 }
0x19d5   : > { %6647 = vmatmul.mubr.msk.f32.gmra.mrb[20].mxu1 %vm571_vm1, %v6635_v57 }
0x19d6   : > { %4380 = vmatprep.mubr.f32.mxu1 %v7352_v6 }
0x19d9   : > { %6648 = vmatmul.mubr.msk.f32.gmra.mrb[22].mxu1 %vm571_vm1, %v6636_v38 }
0x19da   : > { %6812 = vmatprep.mubr.msk.f32.mxu1 %vm7355_vm11, %v7352_v6 }
0x1aa0   : > { %v4364_v47 = vpop.f32.mrb[16].mxu1 }
0x1aa1   : > { %v9325_v21 = vadd.f32 %v4395_v35, %v4364_v47  ;;  %v4366_v0 = vpop.f32.mrb[17].mxu1 }
0x1aa2   : > { %v9327_v48 = vadd.f32 %v4395_v35, %v4366_v0 }
0x1aa4   : > { %v4420_v18 = vadd.f32 %v9327_v48, %v9325_v21  ;;  %v4370_v4 = vpop.f32.mrb[18].mxu1 }
0x1aa5   : > { %v9331_v2 = vadd.f32 %v4400_v39, %v4370_v4  ;;  %v4372_v55 = vpop.f32.mrb[19].mxu1 }
0x1aa6   : > { %v9333_v43 = vadd.f32 %v4400_v39, %v4372_v55  ;;  %4421 = vadd.xlane.f32.xlu1 %v4420_v18 }
0x1aa8   : > { %v4423_v54 = vadd.f32 %v9333_v43, %v9331_v2  ;;  %v4376_v44 = vpop.f32.mrb[20].mxu1 }
0x1aa9   : > { %v9337_v10 = vadd.f32 %v4405_v40, %v4376_v44  ;;  %v4378_v28 = vpop.f32.mrb[21].mxu1 }
0x1aaa   : > { %v9339_v17 = vadd.f32 %v4405_v40, %v4378_v28  ;;  %4424 = vadd.xlane.f32.xlu0 %v4423_v54 }
0x1aac   : > { %v4426_v30 = vadd.f32 %v9339_v17, %v9337_v10  ;;  %v4382_v52 = vpop.f32.mrb[22].mxu1 }
0x1aad   : > { %v9343_v63 = vadd.f32 %v4410_v22, %v4382_v52  ;;  %v4384_v5 = vpop.f32.mrb[23].mxu1 }
0x1aae   : > { %v9345_v23 = vadd.f32 %v4410_v22, %v4384_v5  ;;  %4427 = vadd.xlane.f32.xlu0 %v4426_v30 }
0x1ab0   : > { %v4429_v1 = vadd.f32 %v9345_v23, %v9343_v63 }
0x1ab2   : > { %4430 = vadd.xlane.f32.xlu1 %v4429_v1 }
0x1b33   : > { %v4422_v42 = vpop.xlane.xlu1 %4421 }
0x1b34   : > { %v4432_v56 = vmul.f32 0.00390625, %v4422_v42  ;;  %v6692_v42 = vld [vmem:[%s10299_s12 + $0x28] sm:$0xff] }
0x1b37   : > { %v4425_v50 = vpop.xlane.xlu0 %4424 }
0x1b38   : > { %v4433_v59 = vmul.f32 0.00390625, %v4425_v50  ;;  %v6691_v50 = vld [vmem:[%s10299_s12 + $0x20] sm:$0xff] }
0x1b3a   : > { %v6999_v46 = vpack.c.bf16 %v4433_v59, %v4432_v56  ;;  %v6694_v56 = vld [vmem:[%s10299_s12 + $0x38] sm:$0xff]  ;;  %v6693_v59 = vld [vmem:[%s10299_s12 + $0x30] sm:$0xff] }
0x1b3b   : > { %v4428_v41 = vpop.xlane.xlu0 %4427 }
0x1b3c   : > { %7000 = vmatpush3.bf16.msra.mxu1 %v6999_v46  ;;  %v4434_v33 = vmul.f32 0.00390625, %v4428_v41 }
0x1b3d   : > { %7001 = vmatprep.subr.bf16.mxu1 %v7354_v20 }
0x1b3f   : > { %v4431_v58 = vpop.xlane.xlu1 %4430 }
0x1b40   : > { %v4435_v27 = vmul.f32 0.00390625, %v4431_v58 }
0x1b42   : > { %v7002_v8 = vpack.c.bf16 %v4435_v27, %v4434_v33 }
0x1b44   : > { %7003 = vmatpush3.bf16.msra.mxu1 %v7002_v8 }
0x1b47   : > { %6813 = vmatmul.mubr.msk.f32.vlgmr.msra.gmra.mrb[24].mxu1 %vm571_vm1, %v6653_v12 }
0x1b48   : > { %6817 = vmatprep.mubr.msk.f32.mxu1 %vm1778_vm12, %v6655_v13 }
0x1c1a   : > { %v4507_v14 = vpop.f32.mrb[24].mxu1 }
0x1c1b   : > { %v4511_v34 = vmax.f32 %v4507_v14, 0.0  ;;  %v6814_v11 = vpop.f32.mrb[25].mxu1 }
0x1c1d   : > { %6815 = vmatprep.subr.mxu1 %v4511_v34 }
0x1c1e   : > { %6816 = vmatpush3.msra.mxu1 %v4511_v34 }
0x1c1f   : > { %6818 = vmatmul.mubr.msk.f32.vlgmr.msra.gmra.mrb[26].mxu1 %vm1778_vm12, %v6656_v29 }
0x1c20   : > { %6820 = vmatprep.mubr.msk.f32.mxu1 %vm1778_vm12, %v6657_v26 }
0x1c23   : > { %6821 = vmatmul.mubr.msk.f32.gmra.mrb[28].mxu1 %vm1778_vm12, %v6658_v19 }
0x1c24   : > { %4808 = vmatprep.mubr.f32.mxu1 %v7352_v6 }
0x1cf2   : > { %v6819_v25 = vpop.f32.mrb[26].mxu1 }
0x1cf3   : > { %v6664_v61 = vmul.f32 -1.442695, %v6819_v25  ;;  %v4595_v57 = vpop.f32.mrb[27].mxu1 }
0x1cf4   : > { %v6663_v38 = vmul.f32 -1.442695, %v4595_v57 }
0x1cf5   : > { %7251 = vpow2.f32 %v6664_v61 }
0x1cf6   : > { %7253 = vpow2.f32 %v6663_v38  ;;  %v6822_v35 = vpop.f32.mrb[28].mxu1 }
0x1cf7   : > { %v6666_v47 = vmul.f32 -1.442695, %v6822_v35  ;;  %v4605_v0 = vpop.f32.mrb[29].mxu1 }
0x1cf8   : > { %v6665_v39 = vmul.f32 -1.442695, %v4605_v0 }
0x1cf9   : > { %7255 = vpow2.f32 %v6666_v47 }
0x1cfa   : > { %7257 = vpow2.f32 %v6665_v39 }
0x1cff   : > { %v7252_v18 = vpop.eup %7251 }
0x1d00   : > { %v7254_v4 = vpop.eup %7253  ;;  %v4627_v55 = vadd.f32 1.0, %v7252_v18 }
0x1d01   : > { %v4626_v40 = vadd.f32 1.0, %v7254_v4 }
0x1d02   : > { %7259 = vrcp.f32 %v4627_v55 }
0x1d03   : > { %v7256_v54 = vpop.eup %7255  ;;  %7261 = vrcp.f32 %v4626_v40 }
0x1d04   : > { %v7258_v44 = vpop.eup %7257  ;;  %v4629_v28 = vadd.f32 1.0, %v7256_v54 }
0x1d05   : > { %v4628_v22 = vadd.f32 1.0, %v7258_v44 }
0x1d06   : > { %7263 = vrcp.f32 %v4629_v28 }
0x1d07   : > { %7265 = vrcp.f32 %v4628_v22 }
0x1d0c   : > { %v7260_v30 = vpop.eup %7259 }
0x1d0d   : > { %v7262_v52 = vpop.eup %7261  ;;  %4645 = vperm.xlu1 %7168, %v7260_v30  }
0x1d0e   : > { %4640 = vperm.xlu0 %7167, %v7262_v52  }
0x1d10   : > { %v7264_v5 = vpop.eup %7263 }
0x1d11   : > { %v7266_v1 = vpop.eup %7265 }
0x1d12   : > { %4655 = vperm.xlu0 %7167, %v7264_v5   ;;  %4650 = vperm.xlu1 %7168, %v7266_v1  }
0x1d16   : > { %4946 = vperm.xlu0 %7167, %v6692_v42   ;;  %4941 = vperm.xlu1 %7168, %v6691_v50  }
0x1d1a   : > { %4956 = vperm.xlu0 %7167, %v6694_v56   ;;  %4951 = vperm.xlu1 %7168, %v6693_v59  }
0x1d8c   : > { %v4646_v46 = vpop.permute.xlu1 %4645 }
0x1d8d   : > { %v4660_v41 = vmul.f32 %v4646_v46, %v9331_v2  ;;  %v4661_v58 = vmul.f32 %v4646_v46, %v9333_v43  ;;  %v4641_v33 = vpop.permute.xlu0 %4640 }
0x1d8e   : > { %v4658_v27 = vmul.f32 %v4641_v33, %v9325_v21  ;;  %v4659_v8 = vmul.f32 %v4641_v33, %v9327_v48 }
0x1d8f   : > { %v6669_v12 = vmul.f32 -1.442695, %v4660_v41  ;;  %v6670_v13 = vmul.f32 -1.442695, %v4661_v58 }
0x1d90   : > { %v6667_v14 = vmul.f32 -1.442695, %v4658_v27  ;;  %v6668_v34 = vmul.f32 -1.442695, %v4659_v8 }
0x1d91   : > { %7267 = vpow2.f32 %v6669_v12  ;;  %v4656_v11 = vpop.permute.xlu0 %4655  ;;  %v4651_v29 = vpop.permute.xlu1 %4650  ;;  %v6679_v12 = vld [vmem:[%s10298_s11 + $0x20] sm:$0xff] }
0x1d92   : > { %7269 = vpow2.f32 %v6670_v13  ;;  %v4664_v26 = vmul.f32 %v4656_v11, %v9343_v63  ;;  %v4665_v19 = vmul.f32 %v4656_v11, %v9345_v23  ;;  %v4662_v2 = vmul.f32 %v4651_v29, %v9337_v10  ;;  %v6680_v13 = vld [vmem:[%s10298_s11 + $0x28] sm:$0xff] }
0x1d93   : > { %7271 = vpow2.f32 %v6667_v14  ;;  %v4663_v43 = vmul.f32 %v4651_v29, %v9339_v17  ;;  %v6677_v14 = vld [vmem:[%s10297_s10 + $0x30] sm:$0xff] }
0x1d94   : > { %7273 = vpow2.f32 %v6668_v34  ;;  %v6673_v21 = vmul.f32 -1.442695, %v4664_v26  ;;  %v6674_v48 = vmul.f32 -1.442695, %v4665_v19  ;;  %v6671_v25 = vmul.f32 -1.442695, %v4662_v2 }
0x1d95   : > { %v6672_v61 = vmul.f32 -1.442695, %v4663_v43  ;;  %v6678_v34 = vld [vmem:[%s10297_s10 + $0x38] sm:$0xff]  ;;  %v4942_v11 = vpop.permute.xlu1 %4941  ;;  %v4947_v43 = vpop.permute.xlu0 %4946 }
0x1d96   : > { %7275 = vpow2.f32 %v6673_v21 }
0x1d97   : > { %7277 = vpow2.f32 %v6674_v48 }
0x1d98   : > { %7279 = vpow2.f32 %v6671_v25 }
0x1d99   : > { %7281 = vpow2.f32 %v6672_v61 }
0x1d9b   : > { %v7268_v57 = vpop.eup %7267 }
0x1d9c   : > { %v7270_v38 = vpop.eup %7269  ;;  %v4692_v35 = vadd.f32 1.0, %v7268_v57 }
0x1d9d   : > { %v7272_v63 = vpop.eup %7271  ;;  %v4693_v47 = vadd.f32 1.0, %v7270_v38  ;;  %v4952_v38 = vpop.permute.xlu1 %4951 }
0x1d9e   : > { %v7274_v23 = vpop.eup %7273  ;;  %7283 = vrcp.f32 %v4692_v35  ;;  %v4690_v10 = vadd.f32 1.0, %v7272_v63 }
0x1d9f   : > { %7285 = vrcp.f32 %v4693_v47  ;;  %v4691_v0 = vadd.f32 1.0, %v7274_v23 }
0x1da0   : > { %v7276_v17 = vpop.eup %7275  ;;  %7287 = vrcp.f32 %v4690_v10 }
0x1da1   : > { %v7278_v39 = vpop.eup %7277  ;;  %7289 = vrcp.f32 %v4691_v0  ;;  %v4696_v18 = vadd.f32 1.0, %v7276_v17  ;;  %v4957_v0 = vpop.permute.xlu0 %4956 }
0x1da2   : > { %v7280_v4 = vpop.eup %7279  ;;  %v4697_v55 = vadd.f32 1.0, %v7278_v39 }
0x1da3   : > { %v7282_v40 = vpop.eup %7281  ;;  %7291 = vrcp.f32 %v4696_v18  ;;  %v4694_v54 = vadd.f32 1.0, %v7280_v4 }
0x1da4   : > { %7293 = vrcp.f32 %v4697_v55  ;;  %v4695_v44 = vadd.f32 1.0, %v7282_v40 }
0x1da5   : > { %7295 = vrcp.f32 %v4694_v54 }
0x1da6   : > { %7297 = vrcp.f32 %v4695_v44 }
0x1da8   : > { %v9391_v28 = vpop.eup %7283 }
0x1da9   : > { %v9393_v22 = vpop.eup %7285  ;;  %v4726_v30 = vmul.f32 %v9391_v28, %v9167_v31 }
0x1daa   : > { %v9397_v52 = vpop.eup %7287  ;;  %v4727_v5 = vmul.f32 %v9393_v22, %v9159_v53 }
0x1dab   : > { %v9401_v1 = vpop.eup %7289  ;;  %v4724_v42 = vmul.f32 %v9397_v52, %v9164_v62 }
0x1dac   : > { %v4725_v50 = vmul.f32 %v9401_v1, %v9156_v7 }
0x1dad   : > { %v9407_v56 = vpop.eup %7291  ;;  %v7006_v59 = vpack.c.bf16 %v4726_v30, %v4724_v42 }
0x1dae   : > { %v9409_v46 = vpop.eup %7293  ;;  %v7004_v41 = vpack.c.bf16 %v4727_v5, %v4725_v50  ;;  %v4730_v31 = vmul.f32 %v9407_v56, %v9267_v24 }
0x1daf   : > { %v9413_v58 = vpop.eup %7295  ;;  %v4731_v53 = vmul.f32 %v9409_v46, %v9259_v49 }
0x1db0   : > { %v9417_v33 = vpop.eup %7297  ;;  %7005 = vmatprep.subr.bf16.mxu1 %v7004_v41  ;;  %v4728_v7 = vmul.f32 %v9413_v58, %v9262_v37 }
0x1db1   : > { %7007 = vmatpush1.bf16.msra.mxu1 %v7006_v59  ;;  %v4729_v62 = vmul.f32 %v9417_v33, %v9256_v60 }
0x1db2   : > { %v7010_v27 = vpack.c.bf16 %v4730_v31, %v4728_v7  ;;  %v6695_v7 = vld [vmem:[%s10300_s13 + $0x8] sm:$0xff] }
0x1db3   : > { %v7008_v8 = vpack.c.bf16 %v4731_v53, %v4729_v62  ;;  %v6697_v62 = vld [vmem:[%s10301_s14 + $0x20] sm:$0xff] }
0x1db5   : > { %7009 = vmatprep.subr.bf16.mxu1 %v7008_v8 }
0x1db6   : > { %7011 = vmatpush1.bf16.msra.mxu1 %v7010_v27 }
0x1db7   : > { %7013 = vmatprep.subr.bf16.mxu1 %v9293_v51  ;;  %v6681_v51 = vld [vmem:[%s10298_s11 + $0x30] sm:$0xff] }
0x1db9   : > { %6683 = vmatmul.mubr.msk.f32.vlgmr.msra.gmra.mrb[30].mxu1 %vm571_vm1, %v6679_v12  ;;  %v6698_v12 = vld [vmem:[%s10301_s14 + $0x28] sm:$0xff] }
0x1dba   : > { %7015 = vmatpush1.bf16.msra.mxu1 %v9291_v9  ;;  %4814 = vmatprep.mubr.f32.mxu1 %v7352_v6  ;;  %v6682_v9 = vld [vmem:[%s10298_s11 + $0x38] sm:$0xff] }
0x1dbb   : > { %7017 = vmatprep.subr.bf16.mxu1 %v9299_v45  ;;  %v6676_v45 = vld [vmem:[%s10297_s10 + $0x28] sm:$0xff] }
0x1dbd   : > { %6684 = vmatmul.mubr.msk.f32.gmra.mrb[32].mxu1 %vm571_vm1, %v6680_v13  ;;  %v6699_v13 = vld [vmem:[%s10301_s14 + $0x30] sm:$0xff] }
0x1dbe   : > { %7019 = vmatpush1.bf16.msra.mxu1 %v9297_v3  ;;  %4820 = vmatprep.mubr.f32.mxu1 %v7352_v6  ;;  %v6675_v3 = vld [vmem:[%s10297_s10 + $0x20] sm:$0xff] }
0x1dc1   : > { %6685 = vmatmul.mubr.msk.f32.gmra.mrb[34].mxu1 %vm571_vm1, %v6681_v51  ;;  %v6700_v51 = vld [vmem:[%s10301_s14 + $0x38] sm:$0xff] }
0x1dc2   : > { %4826 = vmatprep.mubr.f32.mxu1 %v7352_v6 }
0x1dc5   : > { %6686 = vmatmul.mubr.msk.f32.gmra.mrb[36].mxu1 %vm571_vm1, %v6682_v9 }
0x1dc6   : > { %4909 = vmatprep.mubr.f32.mxu1 %v7352_v6 }
0x1dc9   : > { %6687 = vmatmul.mubr.msk.f32.vlgmr.msra.gmra.mrb[30].mxu1 %vm571_vm1, %v6675_v3 }
0x1dca   : > { %4915 = vmatprep.mubr.f32.mxu1 %v7352_v6 }
0x1dcd   : > { %6688 = vmatmul.mubr.msk.f32.gmra.mrb[32].mxu1 %vm571_vm1, %v6676_v45 }
0x1dce   : > { %4921 = vmatprep.mubr.f32.mxu1 %v7352_v6 }
0x1dd1   : > { %6689 = vmatmul.mubr.msk.f32.gmra.mrb[34].mxu1 %vm571_vm1, %v6677_v14 }
0x1dd2   : > { %4927 = vmatprep.mubr.f32.mxu1 %v7352_v6 }
0x1dd5   : > { %6690 = vmatmul.mubr.msk.f32.gmra.mrb[36].mxu1 %vm571_vm1, %v6678_v34 }
0x1e9c   : > { %v4911_v29 = vpop.f32.mrb[30].mxu1 }
0x1e9d   : > { %v9466_v26 = vadd.f32 %v4942_v11, %v4911_v29  ;;  %v4913_v19 = vpop.f32.mrb[31].mxu1 }
0x1e9e   : > { %v9468_v2 = vadd.f32 %v4942_v11, %v4913_v19 }
0x1ea0   : > { %v4967_v21 = vadd.f32 %v9468_v2, %v9466_v26  ;;  %v4917_v48 = vpop.f32.mrb[32].mxu1 }
0x1ea1   : > { %v9472_v25 = vadd.f32 %v4947_v43, %v4917_v48  ;;  %v4919_v61 = vpop.f32.mrb[33].mxu1 }
0x1ea2   : > { %v9474_v57 = vadd.f32 %v4947_v43, %v4919_v61  ;;  %4968 = vadd.xlane.f32.xlu1 %v4967_v21 }
0x1ea4   : > { %v4970_v35 = vadd.f32 %v9474_v57, %v9472_v25  ;;  %v4923_v63 = vpop.f32.mrb[34].mxu1 }
0x1ea5   : > { %v9478_v47 = vadd.f32 %v4952_v38, %v4923_v63  ;;  %v4925_v23 = vpop.f32.mrb[35].mxu1 }
0x1ea6   : > { %v9480_v10 = vadd.f32 %v4952_v38, %v4925_v23  ;;  %4971 = vadd.xlane.f32.xlu0 %v4970_v35 }
0x1ea8   : > { %v4973_v17 = vadd.f32 %v9480_v10, %v9478_v47  ;;  %v4929_v39 = vpop.f32.mrb[36].mxu1 }
0x1ea9   : > { %v9484_v18 = vadd.f32 %v4957_v0, %v4929_v39  ;;  %v4931_v4 = vpop.f32.mrb[37].mxu1 }
0x1eaa   : > { %v9486_v55 = vadd.f32 %v4957_v0, %v4931_v4  ;;  %4974 = vadd.xlane.f32.xlu0 %v4973_v17 }
0x1eac   : > { %v4976_v40 = vadd.f32 %v9486_v55, %v9484_v18 }
0x1eae   : > { %4977 = vadd.xlane.f32.xlu1 %v4976_v40 }
0x1f2f   : > { %v4969_v54 = vpop.xlane.xlu1 %4968 }
0x1f30   : > { %v4979_v30 = vmul.f32 0.00390625, %v4969_v54 }
0x1f33   : > { %v4972_v44 = vpop.xlane.xlu0 %4971 }
0x1f34   : > { %v4980_v5 = vmul.f32 0.00390625, %v4972_v44 }
0x1f36   : > { %v7021_v42 = vpack.c.bf16 %v4980_v5, %v4979_v30 }
0x1f37   : > { %v4975_v50 = vpop.xlane.xlu0 %4974 }
0x1f38   : > { %7022 = vmatpush3.bf16.msra.mxu0 %v7021_v42  ;;  %v4981_v41 = vmul.f32 0.00390625, %v4975_v50 }
0x1f39   : > { %7023 = vmatprep.subr.bf16.mxu0 %v7354_v20 }
0x1f3b   : > { %v4978_v59 = vpop.xlane.xlu1 %4977 }
0x1f3c   : > { %v4982_v31 = vmul.f32 0.00390625, %v4978_v59 }
0x1f3e   : > { %v7024_v53 = vpack.c.bf16 %v4982_v31, %v4981_v41  ;;  %v5221_v31 = vsub.f32 1.0, %v9397_v52 }
0x1f40   : > { %7025 = vmatpush3.bf16.msra.mxu0 %v7024_v53 }
0x1f43   : > { %6832 = vmatmul.mubr.msk.f32.vlgmr.msra.gmra.mrb[34].mxu0 %vm571_vm1, %v6695_v7  ;;  %vm5310_vm1 = vcmask 1047680  }
0x1f44   : > { %6836 = vmatprep.mubr.msk.f32.mxu0 %vm1778_vm12, %v6697_v62 }
0x2016   : > { %v5054_v27 = vpop.f32.mrb[34].mxu0 }
0x2017   : > { %v5058_v8 = vmax.f32 %v5054_v27, 0.0  ;;  %v6833_v20 = vpop.f32.mrb[35].mxu0  ;;  %v7332_v27 = vld [vmem:[%s7928_s27 + $0x58] sm:$0xff] }
0x2019   : > { %6834 = vmatprep.subr.mxu0 %v5058_v8 }
0x201a   : > { %6835 = vmatpush3.msra.mxu0 %v5058_v8 }
0x201b   : > { %6837 = vmatmul.mubr.msk.f32.vlgmr.msra.gmra.mrb[36].mxu0 %vm1778_vm12, %v6698_v12  ;;  %v5227_v12 = vsub.f32 1.0, %v9407_v56 }
0x201c   : > { %6839 = vmatprep.mubr.msk.f32.mxu0 %vm1778_vm12, %v6699_v13 }
0x201f   : > { %6840 = vmatmul.mubr.msk.f32.gmra.mrb[38].mxu0 %vm1778_vm12, %v6700_v51 }
0x2020   : > { %6446 = vmatprep.mubr.f32.mxu0 %v7352_v6 }
0x20ee   : > { %v6838_v9 = vpop.f32.mrb[36].mxu0 }
0x20ef   : > { %v6706_v3 = vmul.f32 -1.442695, %v6838_v9  ;;  %v5142_v45 = vpop.f32.mrb[37].mxu0  ;;  %v7333_v9 = vld [vmem:[%s7928_s27 + $0x40] sm:$0xff] }
0x20f0   : > { %v6705_v14 = vmul.f32 -1.442695, %v5142_v45 }
0x20f1   : > { %7299 = vpow2.f32 %v6706_v3  ;;  %v5229_v3 = vmul.f32 %v7333_v9, %v5221_v31 }
0x20f2   : > { %7301 = vpow2.f32 %v6705_v14  ;;  %v6841_v34 = vpop.f32.mrb[38].mxu0  ;;  %v5228_v14 = vsub.f32 1.0, %v9409_v46 }
0x20f3   : > { %v6708_v11 = vmul.f32 -1.442695, %v6841_v34  ;;  %v5152_v29 = vpop.f32.mrb[39].mxu0 }
0x20f4   : > { %v6707_v19 = vmul.f32 -1.442695, %v5152_v29 }
0x20f5   : > { %7303 = vpow2.f32 %v6708_v11  ;;  %v7334_v11 = vld [vmem:[%s7928_s27 + $0x48] sm:$0xff] }
0x20f6   : > { %7305 = vpow2.f32 %v6707_v19  ;;  %v5225_v19 = vsub.f32 1.0, %v9413_v58 }
0x20fb   : > { %v7300_v43 = vpop.eup %7299 }
0x20fc   : > { %v7302_v21 = vpop.eup %7301  ;;  %v5174_v48 = vadd.f32 1.0, %v7300_v43 }
0x20fd   : > { %v5173_v61 = vadd.f32 1.0, %v7302_v21 }
0x20fe   : > { %7307 = vrcp.f32 %v5174_v48  ;;  %v5226_v48 = vsub.f32 1.0, %v9417_v33 }
0x20ff   : > { %v7304_v38 = vpop.eup %7303  ;;  %7309 = vrcp.f32 %v5173_v61 }
0x2100   : > { %v7306_v6 = vpop.eup %7305  ;;  %v5176_v35 = vadd.f32 1.0, %v7304_v38 }
0x2101   : > { %v5175_v63 = vadd.f32 1.0, %v7306_v6  ;;  %v5235_v6 = vmul.f32 %v9267_v24, %v5227_v12  ;;  %v5233_v24 = vmul.f32 %v9262_v37, %v5225_v19 }
0x2102   : > { %7311 = vrcp.f32 %v5176_v35 }
0x2103   : > { %7313 = vrcp.f32 %v5175_v63  ;;  %v5236_v63 = vmul.f32 %v9259_v49, %v5228_v14 }
0x2108   : > { %v7308_v23 = vpop.eup %7307 }
0x2109   : > { %v7310_v0 = vpop.eup %7309  ;;  %5192 = vperm.xlu1 %7168, %v7308_v23  }
0x210a   : > { %5187 = vperm.xlu0 %7167, %v7310_v0  }
0x210c   : > { %v7312_v17 = vpop.eup %7311 }
0x210d   : > { %v7314_v39 = vpop.eup %7313 }
0x210e   : > { %5202 = vperm.xlu0 %7167, %v7312_v17   ;;  %5197 = vperm.xlu1 %7168, %v7314_v39  }
0x2188   : > { %v5193_v4 = vpop.permute.xlu1 %5192 }
0x2189   : > { %v5207_v40 = vmul.f32 %v5193_v4, %v9472_v25  ;;  %v5208_v54 = vmul.f32 %v5193_v4, %v9474_v57  ;;  %v5188_v44 = vpop.permute.xlu0 %5187  ;;  %v5234_v4 = vmul.f32 %v9256_v60, %v5226_v48 }
0x218a   : > { %v5205_v30 = vmul.f32 %v5188_v44, %v9466_v26  ;;  %v5206_v5 = vmul.f32 %v5188_v44, %v9468_v2  ;;  %v5223_v26 = vsub.f32 1.0, %v9391_v28  ;;  %v5224_v2 = vsub.f32 1.0, %v9393_v22 }
0x218b   : > { %7315 = vtanh.f32 %v5207_v40 }
0x218c   : > { %7317 = vtanh.f32 %v5208_v54  ;;  %v5232_v8 = vmul.f32 %v7332_v27, %v5224_v2 }
0x218d   : > { %7319 = vtanh.f32 %v5205_v30  ;;  %v5203_v42 = vpop.permute.xlu0 %5202  ;;  %v5198_v50 = vpop.permute.xlu1 %5197 }
0x218e   : > { %7321 = vtanh.f32 %v5206_v5  ;;  %v5211_v59 = vmul.f32 %v5203_v42, %v9484_v18  ;;  %v5212_v41 = vmul.f32 %v5203_v42, %v9486_v55  ;;  %v5209_v25 = vmul.f32 %v5198_v50, %v9478_v47  ;;  %v7331_v47 = vld [vmem:[%s7928_s27 + $0x50] sm:$0xff]  ;;  %s7356_s27 = smov 113  }
0x218f   : > { %v5210_v57 = vmul.f32 %v5198_v50, %v9480_v10  ;;  %v5222_v18 = vsub.f32 1.0, %v9401_v1  ;;  %v5231_v7 = vmul.f32 %v7331_v47, %v5223_v26 }
0x2190   : > { %7323 = vtanh.f32 %v5211_v59 }
0x2191   : > { %7325 = vtanh.f32 %v5212_v41 }
0x2192   : > { %7327 = vtanh.f32 %v5209_v25 }
0x2193   : > { %7329 = vtanh.f32 %v5210_v57 }
0x2195   : > { %v7316_v53 = vpop.eup %7315 }
0x2196   : > { %v7318_v55 = vpop.eup %7317  ;;  %v5239_v10 = vmul.f32 %v7316_v53, %v9391_v28  ;;  %v5230_v28 = vmul.f32 %v7334_v11, %v5222_v18 }
0x2197   : > { %v7320_v62 = vpop.eup %7319  ;;  %v5240_v20 = vmul.f32 %v7318_v55, %v9393_v22 }
0x2198   : > { %v7322_v13 = vpop.eup %7321  ;;  %v5247_v51 = vadd.f32 %v5239_v10, %v5231_v7  ;;  %v5237_v45 = vmul.f32 %v7320_v62, %v9397_v52 }
0x2199   : > { %v5248_v34 = vadd.f32 %v5240_v20, %v5232_v8  ;;  %v5238_v29 = vmul.f32 %v7322_v13, %v9401_v1 }
0x219a   : > { %v7324_v22 = vpop.eup %7323  ;;  %6711 = vst [vmem:[%s8256_s23 + $0x50] sm:$0xff] %v5247_v51  ;;  %v9536_v43 = vmax.f32 %v5247_v51, 0.0  ;;  %v5245_v21 = vadd.f32 %v5237_v45, %v5229_v3 }
0x219b   : > { %v7326_v61 = vpop.eup %7325  ;;  %6712 = vst [vmem:[%s8256_s23 + $0x58] sm:$0xff] %v5248_v34  ;;  %v9540_v52 = vmax.f32 %v5248_v34, 0.0  ;;  %v5246_v38 = vadd.f32 %v5238_v29, %v5230_v28  ;;  %v5243_v35 = vmul.f32 %v7324_v22, %v9407_v56 }
0x219c   : > { %v7328_v1 = vpop.eup %7327  ;;  %5282 = vrot.lane.b32.xlu1 %v9536_v43, %s10326_s30  ;;  %6709 = vst [vmem:[%s8256_s23 + $0x40] sm:$0xff] %v5245_v21  ;;  %v5244_v23 = vmul.f32 %v7326_v61, %v9409_v46  ;;  %v9554_v39 = vmax.f32 %v5245_v21, 0.0 }
0x219d   : > { %v7330_v0 = vpop.eup %7329  ;;  %5284 = vrot.lane.b32.xlu0 %v9540_v52, %s10326_s30  ;;  %6710 = vst [vmem:[%s8256_s23 + $0x48] sm:$0xff] %v5246_v38  ;;  %v5241_v56 = vmul.f32 %v7328_v1, %v9413_v58  ;;  %v5251_v17 = vadd.f32 %v5243_v35, %v5235_v6  ;;  %v9558_v40 = vmax.f32 %v5246_v38, 0.0 }
0x219e   : > { %v5242_v49 = vmul.f32 %v7330_v0, %v9417_v33  ;;  %v5252_v46 = vadd.f32 %v5244_v23, %v5236_v63 }
0x219f   : > { %v5249_v54 = vadd.f32 %v5241_v56, %v5233_v24  ;;  %6715 = vst [vmem:[%s8256_s23 + $0x70] sm:$0xff] %v5251_v17  ;;  %v9576_v58 = vmax.f32 %v5251_v17, 0.0 }
0x21a0   : > { %5278 = vrot.lane.b32.xlu1 %v9554_v39, %s10326_s30  ;;  %v5250_v44 = vadd.f32 %v5242_v49, %v5234_v4  ;;  %6716 = vst [vmem:[%s8256_s23 + $0x78] sm:$0xff] %v5252_v46  ;;  %v9578_v33 = vmax.f32 %v5252_v46, 0.0 }
0x21a1   : > { %5280 = vrot.lane.b32.xlu0 %v9558_v40, %s10326_s30  ;;  %6713 = vst [vmem:[%s8256_s23 + $0x60] sm:$0xff] %v5249_v54  ;;  %v9568_v37 = vmax.f32 %v5249_v54, 0.0 }
0x21a2   : > { %6714 = vst [vmem:[%s8256_s23 + $0x68] sm:$0xff] %v5250_v44  ;;  %v9570_v60 = vmax.f32 %v5250_v44, 0.0  ;;  %s7357_s23 = smov 111  }
0x21a4   : > { %5286 = vrot.lane.b32.xlu1 %v9568_v37, %s10326_s30 }
0x21a5   : > { %5288 = vrot.lane.b32.xlu0 %v9570_v60, %s10326_s30 }
0x21a8   : > { %5290 = vrot.lane.b32.xlu1 %v9576_v58, %s10326_s30 }
0x21a9   : > { %5292 = vrot.lane.b32.xlu0 %v9578_v33, %s10326_s30 }
0x220e   : > { %v9584_v30 = vpop.permute.xlu1 %5282 }
0x220f   : > { %v9586_v5 = vpop.permute.xlu0 %5284  ;;  %5314 = vst.msk [vmem:[#allocation3 + $0x18] sm:$0xff] %vm5310_vm1, %v9584_v30 }
0x2210   : > { %5316 = vst.msk [vmem:[#allocation3 + $0x28] sm:$0xff] %vm3055_vm9, %v9586_v5  ;;  %v9595_v42 = vsel %vm3055_vm9, %v9584_v30, %v9586_v5 }
0x2211   : > { %5440 = vrot.lane.b32.xlu1 %v9595_v42, %s7356_s27  ;;  %5812 = vst [vmem:[#allocation2 + $0x58] sm:$0xff] %v9595_v42 }
0x2212   : > { %v9600_v50 = vpop.permute.xlu1 %5278 }
0x2213   : > { %v9602_v59 = vpop.permute.xlu0 %5280  ;;  %5311 = vst.msk [vmem:[#allocation3] sm:$0xff] %vm5310_vm1, %v9600_v50 }
0x2214   : > { %5313 = vst.msk [vmem:[#allocation3 + $0x10] sm:$0xff] %vm3055_vm9, %v9602_v59  ;;  %v9611_v41 = vsel %vm3055_vm9, %v9600_v50, %v9602_v59 }
0x2215   : > { %5810 = vst [vmem:[#allocation2 + $0x48] sm:$0xff] %v9611_v41 }
0x2216   : > { %v9614_v25 = vld [vmem:[#allocation3 + $0x18] sm:$0xff]  ;;  %v9616_v57 = vpop.permute.xlu1 %5286 }
0x2217   : > { %v9618_v26 = vld [vmem:[#allocation3 + $0x28] sm:$0xff]  ;;  %5399 = vst.msk [vmem:[#allocation3 + $0x18] sm:$0xff] %vm5310_vm1, %v9584_v30  ;;  %v9622_v2 = vpop.permute.xlu0 %5288  ;;  %5317 = vst.msk [vmem:[#allocation3 + $0x30] sm:$0xff] %vm5310_vm1, %v9616_v57 }
0x2218   : > { %5401 = vst.msk [vmem:[#allocation3 + $0x28] sm:$0xff] %vm3055_vm9, %v9586_v5  ;;  %5319 = vst.msk [vmem:[#allocation3 + $0x40] sm:$0xff] %vm3055_vm9, %v9622_v2  ;;  %v9633_v31 = vsel %vm3055_vm9, %v9616_v57, %v9622_v2 }
0x2219   : > { %5814 = vst [vmem:[#allocation2 + $0x68] sm:$0xff] %v9633_v31 }
0x221a   : > { %v9636_v53 = vld [vmem:[#allocation3] sm:$0xff]  ;;  %v9638_v18 = vpop.permute.xlu1 %5290 }
0x221b   : > { %v9640_v55 = vld [vmem:[#allocation3 + $0x10] sm:$0xff]  ;;  %5396 = vst.msk [vmem:[#allocation3] sm:$0xff] %vm5310_vm1, %v9600_v50  ;;  %v9644_v47 = vpop.permute.xlu0 %5292  ;;  %5320 = vst.msk [vmem:[#allocation3 + $0x48] sm:$0xff] %vm5310_vm1, %v9638_v18 }
0x221c   : > { %5398 = vst.msk [vmem:[#allocation3 + $0x10] sm:$0xff] %vm3055_vm9, %v9602_v59  ;;  %5322 = vst.msk [vmem:[#allocation3 + $0x58] sm:$0xff] %vm3055_vm9, %v9644_v47  ;;  %v9655_v7 = vsel %vm3055_vm9, %v9638_v18, %v9644_v47 }
0x221d   : > { %5816 = vst [vmem:[#allocation2 + $0x78] sm:$0xff] %v9655_v7 }
0x221e   : > { %v9658_v10 = vld [vmem:[#allocation3 + $0x30] sm:$0xff]  ;;  %v5411_v13 = vld [vmem:[#allocation3 + $0x18] sm:$0xff] }
0x221f   : > { %v9660_v62 = vld [vmem:[#allocation3 + $0x40] sm:$0xff]  ;;  %5402 = vst.msk [vmem:[#allocation3 + $0x30] sm:$0xff] %vm5310_vm1, %v9616_v57  ;;  %v5413_v27 = vld [vmem:[#allocation3 + $0x28] sm:$0xff] }
0x2220   : > { %5404 = vst.msk [vmem:[#allocation3 + $0x40] sm:$0xff] %vm3055_vm9, %v9622_v2  ;;  %5442 = vrot.lane.b32.xlu0 %v5413_v27, %s7356_s27 }
0x2222   : > { %v9667_v8 = vld [vmem:[#allocation3 + $0x48] sm:$0xff]  ;;  %v5408_v20 = vld [vmem:[#allocation3] sm:$0xff] }
0x2223   : > { %v9669_v12 = vld [vmem:[#allocation3 + $0x58] sm:$0xff]  ;;  %5405 = vst.msk [vmem:[#allocation3 + $0x48] sm:$0xff] %vm5310_vm1, %v9638_v18  ;;  %5432 = vrot.lane.b32.xlu1 %v5408_v20, %s7356_s27  ;;  %v5410_v51 = vld [vmem:[#allocation3 + $0x10] sm:$0xff] }
0x2224   : > { %5407 = vst.msk [vmem:[#allocation3 + $0x58] sm:$0xff] %vm3055_vm9, %v9644_v47  ;;  %5438 = vrot.lane.b32.xlu0 %v5411_v13, %s7356_s27 }
0x2226   : > { %v5414_v45 = vld [vmem:[#allocation3 + $0x30] sm:$0xff] }
0x2227   : > { %5434 = vrot.lane.b32.xlu1 %v9611_v41, %s7356_s27  ;;  %v5416_v3 = vld [vmem:[#allocation3 + $0x40] sm:$0xff] }
0x2228   : > { %5436 = vrot.lane.b32.xlu0 %v5410_v51, %s7356_s27 }
0x222a   : > { %v5417_v14 = vld [vmem:[#allocation3 + $0x48] sm:$0xff] }
0x222b   : > { %v5419_v9 = vld [vmem:[#allocation3 + $0x58] sm:$0xff]  ;;  %5452 = vrot.lane.b32.xlu1 %v9655_v7, %s7356_s27 }
0x222c   : > { %5454 = vrot.lane.b32.xlu0 %v5419_v9, %s7356_s27 }
0x222f   : > { %5446 = vrot.lane.b32.xlu1 %v9633_v31, %s7356_s27 }
0x2230   : > { %5448 = vrot.lane.b32.xlu0 %v5416_v3, %s7356_s27 }
0x2233   : > { %5444 = vrot.lane.b32.xlu1 %v5414_v45, %s7356_s27 }
0x2234   : > { %5450 = vrot.lane.b32.xlu0 %v5417_v14, %s7356_s27 }
0x2283   : > { %v5441_v34 = vpop.permute.xlu1 %5440 }
0x2292   : > { %v5443_v11 = vpop.permute.xlu0 %5442 }
0x2293   : > { %v5460_v28 = vsel %vm5456_vm2, %v5441_v34, %v5443_v11 }
0x2294   : > { %v5476_v29 = vsel %vm7541_vm8, %v9540_v52, %v5460_v28 }
0x2295   : > { %5495 = vrot.lane.b32.xlu0 %v5476_v29, %s10326_s30  ;;  %v5433_v19 = vpop.permute.xlu1 %5432 }
0x2296   : > { %v5439_v22 = vpop.permute.xlu0 %5438 }
0x2297   : > { %v5459_v21 = vsel %vm5456_vm2, %v5439_v22, %v5441_v34 }
0x2298   : > { %v5475_v48 = vsel %vm7533_vm7, %v9536_v43, %v5459_v21 }
0x2299   : > { %5493 = vrot.lane.b32.xlu0 %v5475_v48, %s10326_s30  ;;  %v5435_v61 = vpop.permute.xlu1 %5434 }
0x229a   : > { %v5437_v38 = vpop.permute.xlu0 %5436  ;;  %v5457_v1 = vsel %vm5456_vm2, %v5433_v19, %v5435_v61 }
0x229b   : > { %v5458_v6 = vsel %vm5456_vm2, %v5435_v61, %v5437_v38  ;;  %v5473_v24 = vsel %vm7533_vm7, %v9554_v39, %v5457_v1 }
0x229c   : > { %v5474_v35 = vsel %vm7541_vm8, %v9558_v40, %v5458_v6 }
0x229d   : > { %5491 = vrot.lane.b32.xlu1 %v5474_v35, %s10326_s30  ;;  %v5453_v63 = vpop.permute.xlu1 %5452 }
0x229e   : > { %v5455_v23 = vpop.permute.xlu0 %5454 }
0x229f   : > { %v5464_v0 = vsel %vm5456_vm2, %v5453_v63, %v5455_v23 }
0x22a0   : > { %v5480_v56 = vsel %vm7541_vm8, %v9578_v33, %v5464_v0 }
0x22a1   : > { %5489 = vrot.lane.b32.xlu1 %v5473_v24, %s10326_s30  ;;  %5503 = vrot.lane.b32.xlu0 %v5480_v56, %s10326_s30  ;;  %v5447_v17 = vpop.permute.xlu1 %5446 }
0x22a2   : > { %v5449_v4 = vpop.permute.xlu0 %5448 }
0x22a3   : > { %v5462_v49 = vsel %vm5456_vm2, %v5447_v17, %v5449_v4 }
0x22a4   : > { %v5478_v46 = vsel %vm7541_vm8, %v9570_v60, %v5462_v49 }
0x22a5   : > { %5499 = vrot.lane.b32.xlu1 %v5478_v46, %s10326_s30  ;;  %v5445_v54 = vpop.permute.xlu1 %5444 }
0x22a6   : > { %v5451_v44 = vpop.permute.xlu0 %5450  ;;  %v5461_v27 = vsel %vm5456_vm2, %v5445_v54, %v5447_v17 }
0x22a7   : > { %v5463_v20 = vsel %vm5456_vm2, %v5451_v44, %v5453_v63  ;;  %v5477_v13 = vsel %vm7533_vm7, %v9568_v37, %v5461_v27 }
0x22a8   : > { %v5479_v51 = vsel %vm7533_vm7, %v9576_v58, %v5463_v20  ;;  %vm5371_vm7 = vcmask 908288  }
0x22a9   : > { %5501 = vrot.lane.b32.xlu0 %v5479_v51, %s10326_s30  ;;  %5497 = vrot.lane.b32.xlu1 %v5477_v13, %s10326_s30  ;;  %v7034_v51 = vpack.c.bf16 %v9595_v42, %v9611_v41 }
0x2307   : > { %v5496_v36 = vpop.permute.xlu0 %5495 }
0x2308   : > { %5526 = vst.msk [vmem:[#allocation3 + $0x28] sm:$0xff] %vm3055_vm9, %v5496_v36 }
0x230b   : > { %v5494_v9 = vpop.permute.xlu0 %5493 }
0x230c   : > { %v9730_v3 = vsel %vm3055_vm9, %v5494_v9, %v5496_v36  ;;  %5524 = vst.msk [vmem:[#allocation3 + $0x18] sm:$0xff] %vm5310_vm1, %v5494_v9 }
0x230d   : > { %5592 = vst [vmem:[#allocation2 + $0x18] sm:$0xff] %v9730_v3 }
0x230f   : > { %v5492_v45 = vpop.permute.xlu1 %5491  ;;  %v5558_v14 = vld [vmem:[#allocation3 + $0x28] sm:$0xff] }
0x2310   : > { %5523 = vst.msk [vmem:[#allocation3 + $0x10] sm:$0xff] %vm3055_vm9, %v5492_v45  ;;  %5567 = vrot.lane.b32.xlu0 %v5558_v14, %s10326_s30 }
0x2313   : > { %v5504_v32 = vpop.permute.xlu0 %5503  ;;  %v5490_v34 = vpop.permute.xlu1 %5489  ;;  %v5534_v11 = vld [vmem:[#allocation3 + $0x18] sm:$0xff] }
0x2314   : > { %5532 = vst.msk [vmem:[#allocation3 + $0x58] sm:$0xff] %vm3055_vm9, %v5504_v32  ;;  %v9738_v28 = vsel %vm3055_vm9, %v5490_v34, %v5492_v45  ;;  %5543 = vrot.lane.b32.xlu0 %v5534_v11, %s10328_s18 }
0x2315   : > { %5521 = vst.msk [vmem:[#allocation3] sm:$0xff] %vm5310_vm1, %v5490_v34  ;;  %5590 = vst [vmem:[#allocation2 + $0x8] sm:$0xff] %v9738_v28  ;;  %v7026_v29 = vpack.c.bf16 %v9730_v3, %v9738_v28 }
0x2317   : > { %v5500_v19 = vpop.permute.xlu1 %5499  ;;  %v5557_v22 = vld [vmem:[#allocation3 + $0x10] sm:$0xff]  ;;  %7027 = vmatprep.subr.bf16.mxu1 %v7026_v29 }
0x2318   : > { %5529 = vst.msk [vmem:[#allocation3 + $0x40] sm:$0xff] %vm3055_vm9, %v5500_v19  ;;  %5565 = vrot.lane.b32.xlu1 %v5557_v22, %s10326_s30 }
0x231b   : > { %v5502_v21 = vpop.permute.xlu0 %5501  ;;  %v5498_v48 = vpop.permute.xlu1 %5497  ;;  %v5560_v61 = vld [vmem:[#allocation3 + $0x58] sm:$0xff] }
0x231c   : > { %v5533_v38 = vld [vmem:[#allocation3] sm:$0xff]  ;;  %v9748_v6 = vsel %vm3055_vm9, %v5502_v21, %v5504_v32  ;;  %5530 = vst.msk [vmem:[#allocation3 + $0x48] sm:$0xff] %vm5310_vm1, %v5502_v21  ;;  %v9752_v35 = vsel %vm3055_vm9, %v5498_v48, %v5500_v19  ;;  %5527 = vst.msk [vmem:[#allocation3 + $0x30] sm:$0xff] %vm5310_vm1, %v5498_v48  ;;  %5571 = vrot.lane.b32.xlu0 %v5560_v61, %s10326_s30 }
0x231d   : > { %5541 = vrot.lane.b32.xlu1 %v5533_v38, %s10328_s18  ;;  %5596 = vst [vmem:[#allocation2 + $0x38] sm:$0xff] %v9748_v6  ;;  %5594 = vst [vmem:[#allocation2 + $0x28] sm:$0xff] %v9752_v35 }
0x231f   : > { %v5559_v1 = vld [vmem:[#allocation3 + $0x40] sm:$0xff] }
0x2321   : > { %5569 = vrot.lane.b32.xlu1 %v5559_v1, %s10326_s30 }
0x2323   : > { %v5536_v63 = vld [vmem:[#allocation3 + $0x48] sm:$0xff]  ;;  %v5535_v23 = vld [vmem:[#allocation3 + $0x30] sm:$0xff] }
0x2324   : > { %5547 = vrot.lane.b32.xlu0 %v5536_v63, %s10328_s18 }
0x2325   : > { %5545 = vrot.lane.b32.xlu1 %v5535_v23, %s10328_s18 }
0x2328   : > { %5351 = vrot.lane.b32.xlu0 %v9640_v55, %s7357_s23 }
0x2329   : > { %5349 = vrot.lane.b32.xlu1 %v9611_v41, %s7357_s23 }
0x232c   : > { %5357 = vrot.lane.b32.xlu0 %v9618_v26, %s7357_s23 }
0x232d   : > { %5355 = vrot.lane.b32.xlu1 %v9595_v42, %s7357_s23 }
0x2330   : > { %5353 = vrot.lane.b32.xlu0 %v9614_v25, %s7357_s23 }
0x2331   : > { %5347 = vrot.lane.b32.xlu1 %v9636_v53, %s7357_s23 }
0x2334   : > { %5363 = vrot.lane.b32.xlu0 %v9660_v62, %s7357_s23 }
0x2335   : > { %5361 = vrot.lane.b32.xlu1 %v9633_v31, %s7357_s23 }
0x2338   : > { %5369 = vrot.lane.b32.xlu0 %v9669_v12, %s7357_s23 }
0x2339   : > { %5367 = vrot.lane.b32.xlu1 %v9655_v7, %s7357_s23 }
0x233c   : > { %5365 = vrot.lane.b32.xlu0 %v9667_v8, %s7357_s23 }
0x233d   : > { %5359 = vrot.lane.b32.xlu1 %v9658_v10, %s7357_s23 }
0x2382   : > { %v5568_v55 = vpop.permute.xlu0 %5567 }
0x2383   : > { %5578 = vst.msk [vmem:[#allocation3 + $0x28] sm:$0xff] %vm3105_vm13, %v5568_v55 }
0x2386   : > { %v5544_v26 = vpop.permute.xlu0 %5543 }
0x2387   : > { %5554 = vst.msk [vmem:[#allocation3 + $0x18] sm:$0xff] %vm3055_vm9, %v5544_v26 }
0x238a   : > { %v9776_v25 = vld [vmem:[#allocation3 + $0x28] sm:$0xff]  ;;  %v5566_v53 = vpop.permute.xlu1 %5565 }
0x238b   : > { %5746 = vst.msk [vmem:[#allocation3 + $0x28] sm:$0xff] %vm3055_vm9, %v9586_v5 }
0x238c   : > { %5577 = vst.msk [vmem:[#allocation3 + $0x10] sm:$0xff] %vm3105_vm13, %v5566_v53 }
0x238e   : > { %v9781_v62 = vld [vmem:[#allocation3 + $0x18] sm:$0xff]  ;;  %v5572_v12 = vpop.permute.xlu0 %5571 }
0x238f   : > { %v5542_v8 = vpop.permute.xlu1 %5541  ;;  %5591 = vst [vmem:[#allocation2 + $0x10] sm:$0xff] %v9781_v62  ;;  %5744 = vst.msk [vmem:[#allocation3 + $0x18] sm:$0xff] %vm5310_vm1, %v9584_v30 }
0x2390   : > { %5580 = vst.msk [vmem:[#allocation3 + $0x58] sm:$0xff] %vm3105_vm13, %v5572_v12 }
0x2391   : > { %5553 = vst.msk [vmem:[#allocation3] sm:$0xff] %vm3055_vm9, %v5542_v8 }
0x2392   : > { %v5778_v15 = vld [vmem:[#allocation3 + $0x28] sm:$0xff] }
0x2393   : > { %v5570_v10 = vpop.permute.xlu1 %5569  ;;  %v9788_v0 = vld [vmem:[#allocation3 + $0x10] sm:$0xff] }
0x2394   : > { %5579 = vst.msk [vmem:[#allocation3 + $0x40] sm:$0xff] %vm3105_vm13, %v5570_v10 }
0x2395   : > { %5743 = vst.msk [vmem:[#allocation3 + $0x10] sm:$0xff] %vm3055_vm9, %v9602_v59  ;;  %v7030_v59 = vpack.c.bf16 %v9748_v6, %v9752_v35 }
0x2396   : > { %v5548_v56 = vpop.permute.xlu0 %5547 }
0x2397   : > { %v9793_v5 = vld [vmem:[#allocation3 + $0x58] sm:$0xff]  ;;  %v5546_v17 = vpop.permute.xlu1 %5545  ;;  %5556 = vst.msk [vmem:[#allocation3 + $0x48] sm:$0xff] %vm3055_vm9, %v5548_v56 }
0x2398   : > { %v9795_v24 = vld [vmem:[#allocation3] sm:$0xff]  ;;  %5752 = vst.msk [vmem:[#allocation3 + $0x58] sm:$0xff] %vm3055_vm9, %v9644_v47  ;;  %5555 = vst.msk [vmem:[#allocation3 + $0x30] sm:$0xff] %vm3055_vm9, %v5546_v17 }
0x2399   : > { %5589 = vst [vmem:[#allocation2] sm:$0xff] %v9795_v24  ;;  %5741 = vst.msk [vmem:[#allocation3] sm:$0xff] %vm5310_vm1, %v9600_v50  ;;  %v7028_v30 = vpack.c.bf16 %v9781_v62, %v9795_v24 }
0x239a   : > { %v5352_v47 = vpop.permute.xlu0 %5351 }
0x239b   : > { %7029 = vmatpush1.bf16.msra.mxu1 %v7028_v30  ;;  %v9808_v4 = vld [vmem:[#allocation3 + $0x40] sm:$0xff]  ;;  %v5350_v49 = vpop.permute.xlu1 %5349 }
0x239c   : > { %7031 = vmatprep.subr.bf16.mxu1 %v7030_v59  ;;  %5749 = vst.msk [vmem:[#allocation3 + $0x40] sm:$0xff] %vm3055_vm9, %v9622_v2  ;;  %v5373_v50 = vsel %vm5371_vm7, %v5350_v49, %v5352_v47 }
0x239d   : > { %v5389_v46 = vsel %vm7487_vm4, %v9558_v40, %v5373_v50 }
0x239e   : > { %5971 = vrot.lane.b32.xlu1 %v5389_v46, %s10326_s30  ;;  %v9817_v54 = vld [vmem:[#allocation3 + $0x48] sm:$0xff]  ;;  %v5358_v27 = vpop.permute.xlu0 %5357 }
0x239f   : > { %v9819_v44 = vld [vmem:[#allocation3 + $0x30] sm:$0xff]  ;;  %v5356_v20 = vpop.permute.xlu1 %5355  ;;  %5595 = vst [vmem:[#allocation2 + $0x30] sm:$0xff] %v9817_v54  ;;  %5750 = vst.msk [vmem:[#allocation3 + $0x48] sm:$0xff] %vm5310_vm1, %v9638_v18  ;;  %v5780_v16 = vld [vmem:[#allocation3 + $0x58] sm:$0xff] }
0x23a0   : > { %5593 = vst [vmem:[#allocation2 + $0x20] sm:$0xff] %v9819_v44  ;;  %5747 = vst.msk [vmem:[#allocation3 + $0x30] sm:$0xff] %vm5310_vm1, %v9616_v57  ;;  %v5375_v40 = vsel %vm5371_vm7, %v5356_v20, %v5358_v27  ;;  %v7032_v2 = vpack.c.bf16 %v9817_v54, %v9819_v44  ;;  %v5753_v1 = vld [vmem:[#allocation3] sm:$0xff] }
0x23a1   : > { %v5391_v13 = vsel %vm7487_vm4, %v9540_v52, %v5375_v40 }
0x23a2   : > { %5975 = vrot.lane.b32.xlu0 %v5391_v13, %s10326_s30  ;;  %7033 = vmatpush1.bf16.msra.mxu1 %v7032_v2  ;;  %v5354_v18 = vpop.permute.xlu0 %5353 }
0x23a3   : > { %v5348_v36 = vpop.permute.xlu1 %5347  ;;  %7035 = vmatprep.subr.bf16.mxu1 %v7034_v51  ;;  %v5374_v57 = vsel %vm5371_vm7, %v5354_v18, %v5356_v20 }
0x23a4   : > { %v5372_v9 = vsel %vm5371_vm7, %v5348_v36, %v5350_v49  ;;  %v5390_v45 = vsel %vm7491_vm5, %v9536_v43, %v5374_v57 }
0x23a5   : > { %v5388_v52 = vsel %vm7491_vm5, %v9554_v39, %v5372_v9 }
0x23a6   : > { %5973 = vrot.lane.b32.xlu0 %v5390_v45, %s10326_s30  ;;  %5969 = vrot.lane.b32.xlu1 %v5388_v52, %s10326_s30  ;;  %v5364_v14 = vpop.permute.xlu0 %5363  ;;  %v5756_v63 = vld [vmem:[#allocation3 + $0x48] sm:$0xff] }
0x23a7   : > { %v5362_v32 = vpop.permute.xlu1 %5361  ;;  %v5755_v23 = vld [vmem:[#allocation3 + $0x30] sm:$0xff] }
0x23a8   : > { %v5377_v34 = vsel %vm5371_vm7, %v5362_v32, %v5364_v14 }
0x23a9   : > { %v5393_v11 = vsel %vm7487_vm4, %v9570_v60, %v5377_v34  ;;  %v7038_v34 = vpack.c.bf16 %v9655_v7, %v9633_v31 }
0x23aa   : > { %5979 = vrot.lane.b32.xlu1 %v5393_v11, %s10326_s30  ;;  %v5370_v29 = vpop.permute.xlu0 %5369 }
0x23ab   : > { %v5368_v43 = vpop.permute.xlu1 %5367 }
0x23ac   : > { %v5379_v19 = vsel %vm5371_vm7, %v5368_v43, %v5370_v29 }
0x23ad   : > { %v5395_v39 = vsel %vm7487_vm4, %v9578_v33, %v5379_v19  ;;  %v5777_v33 = vld [vmem:[#allocation3 + $0x10] sm:$0xff]  ;;  %vm10330_vm4 = vcmask 916480  }
0x23ae   : > { %5983 = vrot.lane.b32.xlu0 %v5395_v39, %s10326_s30  ;;  %v5366_v22 = vpop.permute.xlu0 %5365  ;;  %vm10332_vm8 = vmmov %vm10330_vm4 }
0x23af   : > { %v5360_v21 = vpop.permute.xlu1 %5359  ;;  %v5378_v48 = vsel %vm5371_vm7, %v5366_v22, %v5368_v43  ;;  %vm10333_vm11 = vmmov %vm10330_vm4 }
0x23b0   : > { %v5376_v61 = vsel %vm5371_vm7, %v5360_v21, %v5362_v32  ;;  %v5394_v60 = vsel %vm7491_vm5, %v9576_v58, %v5378_v48  ;;  %v5754_v58 = vld [vmem:[#allocation3 + $0x18] sm:$0xff]  ;;  %vm10334_vm12 = vmmov %vm10330_vm4 }
0x23b1   : > { %v5392_v38 = vsel %vm7491_vm5, %v9568_v37, %v5376_v61  ;;  %v5779_v37 = vld [vmem:[#allocation3 + $0x40] sm:$0xff]  ;;  %vm10331_vm5 = vmmov %vm10330_vm4 }
0x23b2   : > { %5981 = vrot.lane.b32.xlu0 %v5394_v60, %s10326_s30  ;;  %5977 = vrot.lane.b32.xlu1 %v5392_v38, %s10326_s30  ;;  %vm10335_vm0 = vmmov %vm10330_vm4 }
0x23b3   : > { %vm10336_vm6 = vmmov %vm10335_vm0 }
0x23b4   : > { %vm10337_vm10 = vmmov %vm10335_vm0 }
0x23b5   : > { %vm10339_vm2 = vmmov %vm10335_vm0 }
0x23b6   : > { %5625 = vrot.lane.b32.xlu0 %v9788_v0, %s10328_s18  ;;  %5623 = vrot.lane.b32.xlu1 %v9738_v28, %s10328_s18  ;;  %vm10340_vm7 = vmmov %vm10335_vm0 }
0x23ba   : > { %5787 = vrot.lane.b32.xlu0 %v5778_v15, %s10326_s30  ;;  %5785 = vrot.lane.b32.xlu1 %v5777_v33, %s10326_s30 }
0x23be   : > { %5763 = vrot.lane.b32.xlu0 %v5754_v58, %s10328_s18  ;;  %5761 = vrot.lane.b32.xlu1 %v5753_v1, %s10328_s18 }
0x23c2   : > { %5791 = vrot.lane.b32.xlu0 %v5780_v16, %s10326_s30  ;;  %5789 = vrot.lane.b32.xlu1 %v5779_v37, %s10326_s30 }
0x23c6   : > { %5767 = vrot.lane.b32.xlu0 %v5756_v63, %s10328_s18  ;;  %5765 = vrot.lane.b32.xlu1 %v5755_v23, %s10328_s18 }
0x23ca   : > { %5631 = vrot.lane.b32.xlu0 %v9776_v25, %s10328_s18  ;;  %5629 = vrot.lane.b32.xlu1 %v9730_v3, %s10328_s18 }
0x23ce   : > { %5627 = vrot.lane.b32.xlu0 %v9781_v62, %s10328_s18  ;;  %5621 = vrot.lane.b32.xlu1 %v9795_v24, %s10328_s18 }
0x23d2   : > { %5637 = vrot.lane.b32.xlu0 %v9808_v4, %s10328_s18  ;;  %5635 = vrot.lane.b32.xlu1 %v9752_v35, %s10328_s18 }
0x23d6   : > { %5643 = vrot.lane.b32.xlu0 %v9793_v5, %s10328_s18  ;;  %5641 = vrot.lane.b32.xlu1 %v9748_v6, %s10328_s18 }
0x23da   : > { %5639 = vrot.lane.b32.xlu0 %v9817_v54, %s10328_s18  ;;  %5633 = vrot.lane.b32.xlu1 %v9819_v44, %s10328_s18 }
0x23de   : > { %5843 = vrot.lane.b32.xlu1 %v9611_v41, %s10328_s18 }
0x23e2   : > { %5849 = vrot.lane.b32.xlu1 %v9595_v42, %s10328_s18 }
0x23e6   : > { %5855 = vrot.lane.b32.xlu1 %v9633_v31, %s10328_s18 }
0x23ea   : > { %5861 = vrot.lane.b32.xlu1 %v9655_v7, %s10328_s18 }
0x2410   : > { %v5972_v55 = vpop.permute.xlu1 %5971 }
0x2414   : > { %v5976_v26 = vpop.permute.xlu0 %5975 }
0x2418   : > { %v5974_v53 = vpop.permute.xlu0 %5973  ;;  %v5970_v12 = vpop.permute.xlu1 %5969 }
0x2419   : > { %v9907_v8 = vsel %vm3055_vm9, %v5974_v53, %v5976_v26  ;;  %v9910_v10 = vsel %vm3055_vm9, %v5970_v12, %v5972_v55 }
0x241a   : > { %6002 = vst [vmem:[#allocation3 + $0x8] sm:$0xff] %v9910_v10  ;;  %6103 = vrot.lane.b32.xlu1 %v9910_v10, %s10328_s18  ;;  %6070 = vst [vmem:[#allocation2 + $0x88] sm:$0xff] %v9910_v10  ;;  %v7042_v58 = vpack.c.bf16 %v9907_v8, %v9910_v10 }
0x241b   : > { %6072 = vst [vmem:[#allocation2 + $0x98] sm:$0xff] %v9907_v8 }
0x241c   : > { %v5980_v56 = vpop.permute.xlu1 %5979 }
0x241e   : > { %6109 = vrot.lane.b32.xlu1 %v9907_v8, %s10328_s18 }
0x2420   : > { %v5984_v17 = vpop.permute.xlu0 %5983 }
0x2424   : > { %v9919_v30 = vpop.permute.xlu0 %5981  ;;  %v5978_v59 = vpop.permute.xlu1 %5977 }
0x2425   : > { %v9923_v47 = vsel %vm3055_vm9, %v9919_v30, %v5984_v17  ;;  %v9926_v49 = vsel %vm3055_vm9, %v5978_v59, %v5980_v56 }
0x2426   : > { %6115 = vrot.lane.b32.xlu1 %v9926_v49, %s10328_s18  ;;  %6074 = vst [vmem:[#allocation2 + $0xa8] sm:$0xff] %v9926_v49  ;;  %6076 = vst [vmem:[#allocation2 + $0xb8] sm:$0xff] %v9923_v47 }
0x2428   : > { %v5626_v50 = vpop.permute.xlu0 %5625  ;;  %v5624_v46 = vpop.permute.xlu1 %5623 }
0x2429   : > { %v9933_v27 = vsel %vm10330_vm4, %v5624_v46, %v5626_v50  ;;  %vm10341_vm4 = vmmov %vm10335_vm0 }
0x242a   : > { %5662 = vst [vmem:[#allocation2 + $0xc8] sm:$0xff] %v9933_v27 }
0x242c   : > { %v5788_v20 = vpop.permute.xlu0 %5787  ;;  %v5786_v40 = vpop.permute.xlu1 %5785 }
0x242d   : > { %5798 = vst.msk [vmem:[#allocation3 + $0x28] sm:$0xff] %vm3105_vm13, %v5788_v20  ;;  %5797 = vst.msk [vmem:[#allocation3 + $0x10] sm:$0xff] %vm3105_vm13, %v5786_v40 }
0x2430   : > { %v5764_v2 = vpop.permute.xlu0 %5763  ;;  %v5762_v13 = vpop.permute.xlu1 %5761 }
0x2431   : > { %5774 = vst.msk [vmem:[#allocation3 + $0x18] sm:$0xff] %vm3055_vm9, %v5764_v2  ;;  %5773 = vst.msk [vmem:[#allocation3] sm:$0xff] %vm3055_vm9, %v5762_v13 }
0x2434   : > { %v5792_v51 = vpop.permute.xlu0 %5791  ;;  %v5790_v18 = vpop.permute.xlu1 %5789  ;;  %v9940_v36 = vld [vmem:[#allocation3 + $0x28] sm:$0xff]  ;;  %v9942_v57 = vld [vmem:[#allocation3 + $0x10] sm:$0xff] }
0x2435   : > { %5800 = vst.msk [vmem:[#allocation3 + $0x58] sm:$0xff] %vm3105_vm13, %v5792_v51  ;;  %5799 = vst.msk [vmem:[#allocation3 + $0x40] sm:$0xff] %vm3105_vm13, %v5790_v18  ;;  %5851 = vrot.lane.b32.xlu0 %v9940_v36, %s10328_s18 }
0x2436   : > { %6006 = vst.msk [vmem:[#allocation3 + $0x28] sm:$0xff] %vm3055_vm9, %v5976_v26  ;;  %6003 = vst.msk [vmem:[#allocation3 + $0x10] sm:$0xff] %vm3055_vm9, %v5972_v55 }
0x2438   : > { %v5768_v9 = vpop.permute.xlu0 %5767  ;;  %v5766_v45 = vpop.permute.xlu1 %5765  ;;  %v9950_v52 = vld [vmem:[#allocation3 + $0x18] sm:$0xff]  ;;  %v9952_v14 = vld [vmem:[#allocation3] sm:$0xff] }
0x2439   : > { %5776 = vst.msk [vmem:[#allocation3 + $0x48] sm:$0xff] %vm3055_vm9, %v5768_v9  ;;  %5775 = vst.msk [vmem:[#allocation3 + $0x30] sm:$0xff] %vm3055_vm9, %v5766_v45  ;;  %5847 = vrot.lane.b32.xlu0 %v9950_v52, %s10328_s18  ;;  %5841 = vrot.lane.b32.xlu1 %v9952_v14, %s10328_s18  ;;  %v7036_v32 = vpack.c.bf16 %v9950_v52, %v9952_v14 }
0x243a   : > { %5811 = vst [vmem:[#allocation2 + $0x50] sm:$0xff] %v9950_v52  ;;  %6004 = vst.msk [vmem:[#allocation3 + $0x18] sm:$0xff] %vm5310_vm1, %v5974_v53 }
0x243b   : > { %5809 = vst [vmem:[#allocation2 + $0x40] sm:$0xff] %v9952_v14  ;;  %6001 = vst.msk [vmem:[#allocation3] sm:$0xff] %vm5310_vm1, %v5970_v12  ;;  %7037 = vmatpush1.bf16.msra.mxu1 %v7036_v32 }
0x243c   : > { %v5632_v11 = vpop.permute.xlu0 %5631  ;;  %v5630_v29 = vpop.permute.xlu1 %5629  ;;  %v9968_v43 = vld [vmem:[#allocation3 + $0x58] sm:$0xff]  ;;  %7039 = vmatprep.subr.bf16.mxu1 %v7038_v34  ;;  %v9970_v19 = vld [vmem:[#allocation3 + $0x40] sm:$0xff] }
0x243d   : > { %v9973_v39 = vsel %vm10331_vm5, %v5630_v29, %v5632_v11  ;;  %5845 = vrot.lane.b32.xlu0 %v9942_v57, %s10328_s18  ;;  %6012 = vst.msk [vmem:[#allocation3 + $0x58] sm:$0xff] %vm3055_vm9, %v5984_v17  ;;  %6009 = vst.msk [vmem:[#allocation3 + $0x40] sm:$0xff] %vm3055_vm9, %v5980_v56  ;;  %v6037_v63 = vld [vmem:[#allocation3 + $0x10] sm:$0xff] }
0x243e   : > { %v7050_v22 = vpack.c.bf16 %v9973_v39, %v9933_v27  ;;  %vm10342_vm5 = vmmov %vm10335_vm0 }
0x2440   : > { %v5628_v21 = vpop.permute.xlu0 %5627  ;;  %v5622_v48 = vpop.permute.xlu1 %5621  ;;  %v9981_v61 = vld [vmem:[#allocation3 + $0x30] sm:$0xff]  ;;  %v9983_v60 = vld [vmem:[#allocation3 + $0x48] sm:$0xff] }
0x2441   : > { %v9986_v38 = vsel %vm10332_vm8, %v5628_v21, %v5630_v29  ;;  %v9989_v15 = vsel %vm10333_vm11, %v5622_v48, %v5624_v46  ;;  %5863 = vrot.lane.b32.xlu0 %v9968_v43, %s10328_s18  ;;  %5853 = vrot.lane.b32.xlu1 %v9981_v61, %s10328_s18  ;;  %5813 = vst [vmem:[#allocation2 + $0x60] sm:$0xff] %v9981_v61  ;;  %6007 = vst.msk [vmem:[#allocation3 + $0x30] sm:$0xff] %vm5310_vm1, %v5978_v59  ;;  %v6038_v59 = vld [vmem:[#allocation3 + $0x28] sm:$0xff]  ;;  %v6014_v2 = vld [vmem:[#allocation3 + $0x18] sm:$0xff] }
0x2442   : > { %5815 = vst [vmem:[#allocation2 + $0x70] sm:$0xff] %v9983_v60  ;;  %6010 = vst.msk [vmem:[#allocation3 + $0x48] sm:$0xff] %vm5310_vm1, %v9919_v30  ;;  %v7040_v33 = vpack.c.bf16 %v9983_v60, %v9981_v61  ;;  %v7052_v1 = vpack.c.bf16 %v9986_v38, %v9989_v15  ;;  %v6013_v53 = vld [vmem:[#allocation3] sm:$0xff] }
0x2443   : > { %5661 = vst [vmem:[#allocation2 + $0xc0] sm:$0xff] %v9989_v15  ;;  %vm10338_vm1 = vmmov %vm10335_vm0 }
0x2444   : > { %7041 = vmatpush1.bf16.msra.mxu1 %v7040_v33  ;;  %v5638_v16 = vpop.permute.xlu0 %5637  ;;  %v5636_v37 = vpop.permute.xlu1 %5635  ;;  %v6039_v50 = vld [vmem:[#allocation3 + $0x40] sm:$0xff]  ;;  %v6040_v51 = vld [vmem:[#allocation3 + $0x58] sm:$0xff]  ;;  %vm10343_vm8 = vmmov %vm10335_vm0 }
0x2445   : > { %7043 = vmatprep.subr.bf16.mxu1 %v7042_v58  ;;  %v10008_v23 = vsel %vm10334_vm12, %v5636_v37, %v5638_v16  ;;  %5859 = vrot.lane.b32.xlu0 %v9983_v60, %s10328_s18  ;;  %vm10344_vm11 = vmmov %vm10335_vm0 }
0x2446   : > { %6045 = vrot.lane.b32.xlu1 %v6037_v63, %s10326_s30  ;;  %vm10345_vm12 = vmmov %vm10335_vm0 }
0x2448   : > { %v5644_v55 = vpop.permute.xlu0 %5643  ;;  %v5642_v26 = vpop.permute.xlu1 %5641  ;;  %v6015_v13 = vld [vmem:[#allocation3 + $0x30] sm:$0xff] }
0x2449   : > { %v10014_v12 = vsel %vm10335_vm0, %v5642_v26, %v5644_v55  ;;  %5857 = vrot.lane.b32.xlu0 %v9970_v19, %s10328_s18  ;;  %v6016_v18 = vld [vmem:[#allocation3 + $0x48] sm:$0xff] }
0x244a   : > { %6021 = vrot.lane.b32.xlu1 %v6013_v53, %s10328_s18  ;;  %v7054_v56 = vpack.c.bf16 %v10014_v12, %v10008_v23 }
0x244c   : > { %v5640_v17 = vpop.permute.xlu0 %5639  ;;  %v5634_v30 = vpop.permute.xlu1 %5633 }
0x244d   : > { %v10022_v46 = vsel %vm10336_vm6, %v5640_v17, %v5642_v26  ;;  %v10025_v20 = vsel %vm10337_vm10, %v5634_v30, %v5636_v37  ;;  %6047 = vrot.lane.b32.xlu0 %v6038_v59, %s10326_s30  ;;  %v7046_v59 = vpack.c.bf16 %v9923_v47, %v9926_v49  ;;  %vm10348_vm6 = vmmov %vm10335_vm0 }
0x244e   : > { %6049 = vrot.lane.b32.xlu1 %v6039_v50, %s10326_s30  ;;  %v7056_v40 = vpack.c.bf16 %v10022_v46, %v10025_v20  ;;  %vm10349_vm10 = vmmov %vm10335_vm0 }
0x2451   : > { %6023 = vrot.lane.b32.xlu0 %v6014_v2, %s10328_s18 }
0x2452   : > { %6025 = vrot.lane.b32.xlu1 %v6015_v13, %s10328_s18 }
0x2455   : > { %6051 = vrot.lane.b32.xlu0 %v6040_v51, %s10326_s30 }
0x2456   : > { %6121 = vrot.lane.b32.xlu1 %v9923_v47, %s10328_s18 }
0x2459   : > { %6027 = vrot.lane.b32.xlu0 %v6016_v18, %s10328_s18 }
0x245a   : > { %5695 = vrot.lane.b32.xlu1 %v9738_v28, %s10327_s24 }
0x245d   : > { %5697 = vrot.lane.b32.xlu0 %v9788_v0, %s10327_s24 }
0x245e   : > { %5701 = vrot.lane.b32.xlu1 %v9730_v3, %s10327_s24  ;;  %v5844_v3 = vpop.permute.xlu1 %5843 }
0x2461   : > { %5703 = vrot.lane.b32.xlu0 %v9776_v25, %s10327_s24 }
0x2462   : > { %5693 = vrot.lane.b32.xlu1 %v9795_v24, %s10327_s24  ;;  %v5850_v28 = vpop.permute.xlu1 %5849 }
0x2465   : > { %5699 = vrot.lane.b32.xlu0 %v9781_v62, %s10327_s24 }
0x2466   : > { %5707 = vrot.lane.b32.xlu1 %v9752_v35, %s10327_s24 }
0x2469   : > { %5709 = vrot.lane.b32.xlu0 %v9808_v4, %s10327_s24 }
0x246a   : > { %5713 = vrot.lane.b32.xlu1 %v9748_v6, %s10327_s24  ;;  %v5856_v6 = vpop.permute.xlu1 %5855 }
0x246d   : > { %5715 = vrot.lane.b32.xlu0 %v9793_v5, %s10327_s24 }
0x246e   : > { %5705 = vrot.lane.b32.xlu1 %v9819_v44, %s10327_s24  ;;  %v5862_v35 = vpop.permute.xlu1 %5861 }
0x2471   : > { %5711 = vrot.lane.b32.xlu0 %v9817_v54, %s10327_s24 }
0x2472   : > { %6175 = vrot.lane.b32.xlu1 %v9910_v10, %s10327_s24 }
0x2475   : > { %5917 = vrot.lane.b32.xlu0 %v9942_v57, %s10327_s24 }
0x2476   : > { %6181 = vrot.lane.b32.xlu1 %v9907_v8, %s10327_s24 }
0x2479   : > { %5923 = vrot.lane.b32.xlu0 %v9940_v36, %s10327_s24 }
0x247a   : > { %5915 = vrot.lane.b32.xlu1 %v9611_v41, %s10327_s24 }
0x247d   : > { %5919 = vrot.lane.b32.xlu0 %v9950_v52, %s10327_s24 }
0x247e   : > { %5921 = vrot.lane.b32.xlu1 %v9595_v42, %s10327_s24 }
0x2482   : > { %5913 = vrot.lane.b32.xlu1 %v9952_v14, %s10327_s24 }
0x2486   : > { %6187 = vrot.lane.b32.xlu1 %v9926_v49, %s10327_s24 }
0x248a   : > { %6193 = vrot.lane.b32.xlu1 %v9923_v47, %s10327_s24 }
0x248c   : > { %v10081_v41 = vpop.permute.xlu1 %6103 }
0x2490   : > { %v10083_v25 = vpop.permute.xlu1 %6109 }
0x2498   : > { %v10085_v62 = vpop.permute.xlu1 %6115 }
0x24a7   : > { %v5852_v42 = vpop.permute.xlu0 %5851 }
0x24a8   : > { %v10088_v0 = vsel %vm10338_vm1, %v5850_v28, %v5852_v42  ;;  %vm10350_vm1 = vmmov %vm10335_vm0 }
0x24ab   : > { %v5848_v5 = vpop.permute.xlu0 %5847  ;;  %v5842_v24 = vpop.permute.xlu1 %5841 }
0x24ac   : > { %v10091_v4 = vsel %vm10339_vm2, %v5848_v5, %v5850_v28  ;;  %v10094_v54 = vsel %vm10340_vm7, %v5842_v24, %v5844_v3  ;;  %vm10351_vm2 = vmmov %vm10335_vm0 }
0x24ad   : > { %vm10352_vm7 = vmmov %vm10335_vm0 }
0x24af   : > { %v5846_v44 = vpop.permute.xlu0 %5845 }
0x24b0   : > { %v10097_v8 = vsel %vm10341_vm4, %v5844_v3, %v5846_v44 }
0x24b1   : > { %v7058_v39 = vpack.c.bf16 %v10088_v0, %v10097_v8 }
0x24b3   : > { %v5864_v10 = vpop.permute.xlu0 %5863  ;;  %v5854_v36 = vpop.permute.xlu1 %5853 }
0x24b4   : > { %v10100_v57 = vsel %vm10342_vm5, %v5862_v35, %v5864_v10  ;;  %v10103_v9 = vsel %vm10343_vm8, %v5854_v36, %v5856_v6 }
0x24b7   : > { %v5860_v45 = vpop.permute.xlu0 %5859 }
0x24b8   : > { %v6046_v52 = vpop.permute.xlu1 %6045  ;;  %v10106_v14 = vsel %vm10344_vm11, %v5860_v45, %v5862_v35 }
0x24b9   : > { %6057 = vst.msk [vmem:[#allocation3 + $0x10] sm:$0xff] %vm3105_vm13, %v6046_v52  ;;  %v7064_v0 = vpack.c.bf16 %v10106_v14, %v10103_v9 }
0x24bb   : > { %v5858_v32 = vpop.permute.xlu0 %5857 }
0x24bc   : > { %v6022_v34 = vpop.permute.xlu1 %6021  ;;  %v10110_v11 = vsel %vm10345_vm12, %v5856_v6, %v5858_v32 }
0x24bd   : > { %6033 = vst.msk [vmem:[#allocation3] sm:$0xff] %vm3055_vm9, %v6022_v34  ;;  %v7062_v12 = vpack.c.bf16 %v10100_v57, %v10110_v11 }
0x24bf   : > { %v6048_v29 = vpop.permute.xlu0 %6047 }
0x24c0   : > { %v6050_v21 = vpop.permute.xlu1 %6049  ;;  %6058 = vst.msk [vmem:[#allocation3 + $0x28] sm:$0xff] %vm3105_vm13, %v6048_v29  ;;  %v6079_v42 = vld [vmem:[#allocation3 + $0x10] sm:$0xff] }
0x24c1   : > { %6059 = vst.msk [vmem:[#allocation3 + $0x40] sm:$0xff] %vm3105_vm13, %v6050_v21 }
0x24c3   : > { %v6024_v33 = vpop.permute.xlu0 %6023 }
0x24c4   : > { %v6061_v48 = vld [vmem:[#allocation3] sm:$0xff]  ;;  %v6026_v58 = vpop.permute.xlu1 %6025  ;;  %6034 = vst.msk [vmem:[#allocation3 + $0x18] sm:$0xff] %vm3055_vm9, %v6024_v33 }
0x24c5   : > { %6069 = vst [vmem:[#allocation2 + $0x80] sm:$0xff] %v6061_v48  ;;  %6035 = vst.msk [vmem:[#allocation3 + $0x30] sm:$0xff] %vm3055_vm9, %v6026_v58  ;;  %6101 = vrot.lane.b32.xlu1 %v6061_v48, %s10328_s18 }
0x24c7   : > { %v6052_v16 = vpop.permute.xlu0 %6051  ;;  %v6082_v63 = vld [vmem:[#allocation3 + $0x28] sm:$0xff] }
0x24c8   : > { %v10118_v37 = vpop.permute.xlu1 %6121  ;;  %6060 = vst.msk [vmem:[#allocation3 + $0x58] sm:$0xff] %vm3105_vm13, %v6052_v16  ;;  %6111 = vrot.lane.b32.xlu0 %v6082_v63, %s10328_s18  ;;  %v6085_v57 = vld [vmem:[#allocation3 + $0x40] sm:$0xff]  ;;  %vm10346_vm13 = vmmov %vm10335_vm0 }
0x24c9   : > { %6173 = vrot.lane.b32.xlu1 %v6061_v48, %s10327_s24 }
0x24cb   : > { %v6063_v55 = vld [vmem:[#allocation3 + $0x18] sm:$0xff]  ;;  %v6028_v53 = vpop.permute.xlu0 %6027 }
0x24cc   : > { %v6065_v26 = vld [vmem:[#allocation3 + $0x30] sm:$0xff]  ;;  %v5696_v17 = vpop.permute.xlu1 %5695  ;;  %6071 = vst [vmem:[#allocation2 + $0x90] sm:$0xff] %v6063_v55  ;;  %6036 = vst.msk [vmem:[#allocation3 + $0x48] sm:$0xff] %vm3055_vm9, %v6028_v53  ;;  %6107 = vrot.lane.b32.xlu0 %v6063_v55, %s10328_s18  ;;  %v7044_v30 = vpack.c.bf16 %v6063_v55, %v6061_v48 }
0x24cd   : > { %6073 = vst [vmem:[#allocation2 + $0xa0] sm:$0xff] %v6065_v26  ;;  %6113 = vrot.lane.b32.xlu1 %v6065_v26, %s10328_s18  ;;  %v10217_v48 = vld [vmem:[%s10291_s4] sm:$0xff]  ;;  %vm10347_vm9 = vmmov %vm10335_vm0 }
0x24ce   : > { %7045 = vmatpush1.bf16.msra.mxu1 %v7044_v30  ;;  %v6301_v33 = vcombine.high %v10217_v48, %v10217_v48 }
0x24cf   : > { %v5698_v50 = vpop.permute.xlu0 %5697  ;;  %7047 = vmatprep.subr.bf16.mxu1 %v7046_v59  ;;  %v6088_v15 = vld [vmem:[#allocation3 + $0x58] sm:$0xff] }
0x24d0   : > { %v5702_v2 = vpop.permute.xlu1 %5701  ;;  %v10129_v13 = vsel %vm772_vm14, %v5696_v17, %v5698_v50  ;;  %6183 = vrot.lane.b32.xlu0 %v6082_v63, %s10327_s24  ;;  %6375 = vmatprep.mubr.f32.mxu1 %v6301_v33 }
0x24d1   : > { %5927 = vrot.lane.b32.xlu1 %v9633_v31, %s10327_s24 }
0x24d3   : > { %v6067_v51 = vld [vmem:[#allocation3 + $0x48] sm:$0xff]  ;;  %v5704_v18 = vpop.permute.xlu0 %5703 }
0x24d4   : > { %v5694_v3 = vpop.permute.xlu1 %5693  ;;  %6075 = vst [vmem:[#allocation2 + $0xb0] sm:$0xff] %v6067_v51  ;;  %v10135_v28 = vsel %vm772_vm14, %v5702_v2, %v5704_v18  ;;  %6179 = vrot.lane.b32.xlu0 %v6063_v55, %s10327_s24  ;;  %v7048_v49 = vpack.c.bf16 %v6067_v51, %v6065_v26 }
0x24d5   : > { %v10138_v47 = vsel %vm772_vm14, %v5694_v3, %v5696_v17  ;;  %5933 = vrot.lane.b32.xlu1 %v9655_v7, %s10327_s24  ;;  %v7074_v6 = vpack.c.bf16 %v10135_v28, %v10129_v13 }
0x24d6   : > { %7049 = vmatpush1.bf16.msra.mxu1 %v7048_v49 }
0x24d7   : > { %v5700_v31 = vpop.permute.xlu0 %5699  ;;  %7051 = vmatprep.subr.bf16.mxu1 %v7050_v22 }
0x24d8   : > { %v5708_v35 = vpop.permute.xlu1 %5707  ;;  %v10149_v5 = vsel %vm772_vm14, %v5700_v31, %v5702_v2  ;;  %6105 = vrot.lane.b32.xlu0 %v6079_v42, %s10328_s18 }
0x24d9   : > { %6185 = vrot.lane.b32.xlu1 %v6065_v26, %s10327_s24  ;;  %v7076_v7 = vpack.c.bf16 %v10149_v5, %v10138_v47 }
0x24da   : > { %7053 = vmatpush1.bf16.msra.mxu1 %v7052_v1 }
0x24db   : > { %v5710_v24 = vpop.permute.xlu0 %5709  ;;  %7055 = vmatprep.subr.bf16.mxu1 %v7054_v56 }
0x24dc   : > { %v5714_v44 = vpop.permute.xlu1 %5713  ;;  %v10162_v27 = vsel %vm772_vm14, %v5708_v35, %v5710_v24  ;;  %6177 = vrot.lane.b32.xlu0 %v6079_v42, %s10327_s24 }
0x24dd   : > { %5925 = vrot.lane.b32.xlu1 %v9981_v61, %s10327_s24  ;;  %v7060_v61 = vpack.c.bf16 %v10091_v4, %v10094_v54 }
0x24de   : > { %7057 = vmatpush1.bf16.msra.mxu1 %v7056_v40 }
0x24df   : > { %v5716_v22 = vpop.permute.xlu0 %5715  ;;  %7059 = vmatprep.subr.bf16.mxu1 %v7058_v39 }
0x24e0   : > { %v5706_v38 = vpop.permute.xlu1 %5705  ;;  %v10173_v1 = vsel %vm772_vm14, %v5714_v44, %v5716_v22  ;;  %6123 = vrot.lane.b32.xlu0 %v6088_v15, %s10328_s18 }
0x24e1   : > { %v10176_v23 = vsel %vm772_vm14, %v5706_v38, %v5708_v35  ;;  %v7078_v56 = vpack.c.bf16 %v10173_v1, %v10162_v27 }
0x24e2   : > { %7061 = vmatpush1.bf16.msra.mxu1 %v7060_v61 }
0x24e3   : > { %v5712_v46 = vpop.permute.xlu0 %5711  ;;  %7063 = vmatprep.subr.bf16.mxu1 %v7062_v12 }
0x24e4   : > { %v6176_v20 = vpop.permute.xlu1 %6175  ;;  %v10186_v40 = vsel %vm772_vm14, %v5712_v46, %v5714_v44  ;;  %6119 = vrot.lane.b32.xlu0 %v6067_v51, %s10328_s18 }
0x24e5   : > { %v7080_v4 = vpack.c.bf16 %v10186_v40, %v10176_v23  ;;  %v6224_v40 = vld [vmem:[%s10291_s4 + $0x8] sm:$0xf] }
0x24e6   : > { %7065 = vmatpush1.bf16.msra.mxu1 %v7064_v0 }
0x24e7   : > { %v5918_v54 = vpop.permute.xlu0 %5917 }
0x24e8   : > { %v6182_v8 = vpop.permute.xlu1 %6181  ;;  %6195 = vrot.lane.b32.xlu0 %v6088_v15, %s10327_s24 }
0x24eb   : > { %v5924_v10 = vpop.permute.xlu0 %5923 }
0x24ec   : > { %v5916_v36 = vpop.permute.xlu1 %5915  ;;  %6117 = vrot.lane.b32.xlu0 %v6085_v57, %s10328_s18 }
0x24ed   : > { %v10195_v45 = vsel %vm772_vm14, %v5916_v36, %v5918_v54 }
0x24ef   : > { %v5920_v52 = vpop.permute.xlu0 %5919 }
0x24f0   : > { %v5922_v32 = vpop.permute.xlu1 %5921  ;;  %6191 = vrot.lane.b32.xlu0 %v6067_v51, %s10327_s24 }
0x24f1   : > { %v10199_v9 = vsel %vm772_vm14, %v5920_v52, %v5922_v32  ;;  %v10202_v14 = vsel %vm772_vm14, %v5922_v32, %v5924_v10 }
0x24f2   : > { %v7082_v34 = vpack.c.bf16 %v10202_v14, %v10195_v45 }
0x24f4   : > { %v5914_v11 = vpop.permute.xlu1 %5913  ;;  %5929 = vrot.lane.b32.xlu0 %v9970_v19, %s10327_s24 }
0x24f5   : > { %v10208_v29 = vsel %vm772_vm14, %v5914_v11, %v5916_v36 }
0x24f6   : > { %v7084_v21 = vpack.c.bf16 %v10199_v9, %v10208_v29 }
0x24f8   : > { %5935 = vrot.lane.b32.xlu0 %v9968_v43, %s10327_s24  ;;  %v6188_v19 = vpop.permute.xlu1 %6187 }
0x24fc   : > { %6189 = vrot.lane.b32.xlu0 %v6085_v57, %s10327_s24  ;;  %v6194_v58 = vpop.permute.xlu1 %6193 }
0x2500   : > { %5931 = vrot.lane.b32.xlu0 %v9983_v60, %s10327_s24 }
0x2537   : > { %v6102_v16 = vpop.permute.xlu1 %6101 }
0x2538   : > { %v6125_v63 = vsel %vm10346_vm13, %v6102_v16, %v10081_v41 }
0x253a   : > { %v6112_v55 = vpop.permute.xlu0 %6111 }
0x253b   : > { %v6174_v26 = vpop.permute.xlu1 %6173  ;;  %v6128_v53 = vsel %vm10347_vm9, %v10083_v25, %v6112_v55 }
0x253c   : > { %v6197_v17 = vsel %vm772_vm14, %v6174_v26, %v6176_v20 }
0x253e   : > { %v6108_v43 = vpop.permute.xlu0 %6107 }
0x253f   : > { %v6114_v30 = vpop.permute.xlu1 %6113  ;;  %v6127_v59 = vsel %vm10335_vm0, %v6108_v43, %v10083_v25 }
0x2540   : > { %v6129_v60 = vsel %vm10348_vm6, %v6114_v30, %v10085_v62  ;;  %v7068_v25 = vpack.c.bf16 %v6127_v59, %v6125_v63 }
0x2542   : > { %v6184_v50 = vpop.permute.xlu0 %6183 }
0x2543   : > { %v5928_v2 = vpop.permute.xlu1 %5927  ;;  %v6200_v51 = vsel %vm772_vm14, %v6182_v8, %v6184_v50 }
0x2546   : > { %v6180_v18 = vpop.permute.xlu0 %6179 }
0x2547   : > { %v5934_v3 = vpop.permute.xlu1 %5933  ;;  %v6199_v49 = vsel %vm772_vm14, %v6180_v18, %v6182_v8 }
0x2548   : > { %v7092_v12 = vpack.c.bf16 %v6199_v49, %v6197_v17 }
0x254a   : > { %v6106_v31 = vpop.permute.xlu0 %6105 }
0x254b   : > { %v6186_v35 = vpop.permute.xlu1 %6185  ;;  %v6126_v42 = vsel %vm10349_vm10, %v10081_v41, %v6106_v31 }
0x254c   : > { %v6201_v24 = vsel %vm772_vm14, %v6186_v35, %v6188_v19  ;;  %v7066_v44 = vpack.c.bf16 %v6128_v53, %v6126_v42 }
0x254e   : > { %v6178_v39 = vpop.permute.xlu0 %6177  ;;  %7067 = vmatprep.subr.bf16.mxu1 %v7066_v44 }
0x254f   : > { %v5926_v22 = vpop.permute.xlu1 %5925  ;;  %v6198_v38 = vsel %vm772_vm14, %v6176_v20, %v6178_v39  ;;  %7069 = vmatpush1.bf16.msra.mxu1 %v7068_v25 }
0x2550   : > { %v5941_v15 = vsel %vm772_vm14, %v5926_v22, %v5928_v2  ;;  %v7090_v61 = vpack.c.bf16 %v6200_v51, %v6198_v38 }
0x2552   : > { %v6124_v46 = vpop.permute.xlu0 %6123  ;;  %7091 = vmatprep.subr.bf16.mxu0 %v7090_v61 }
0x2553   : > { %v6132_v0 = vsel %vm10350_vm1, %v10118_v37, %v6124_v46  ;;  %7093 = vmatpush1.bf16.msra.mxu0 %v7092_v12 }
0x2556   : > { %v6120_v41 = vpop.permute.xlu0 %6119 }
0x2557   : > { %v6131_v54 = vsel %vm10351_vm2, %v6120_v41, %v10118_v37 }
0x2558   : > { %v7072_v52 = vpack.c.bf16 %v6131_v54, %v6129_v60 }
0x255a   : > { %v6196_v8 = vpop.permute.xlu0 %6195 }
0x255b   : > { %v6204_v10 = vsel %vm772_vm14, %v6194_v58, %v6196_v8 }
0x255e   : > { %v6118_v36 = vpop.permute.xlu0 %6117 }
0x255f   : > { %v6130_v20 = vsel %vm10352_vm7, %v10085_v62, %v6118_v36 }
0x2560   : > { %v7070_v57 = vpack.c.bf16 %v6132_v0, %v6130_v20 }
0x2562   : > { %v6192_v32 = vpop.permute.xlu0 %6191  ;;  %7071 = vmatprep.subr.bf16.mxu1 %v7070_v57 }
0x2563   : > { %v6203_v11 = vsel %vm772_vm14, %v6192_v32, %v6194_v58  ;;  %7073 = vmatpush1.bf16.msra.mxu1 %v7072_v52 }
0x2564   : > { %7075 = vmatprep.subr.bf16.mxu1 %v7074_v6  ;;  %v7096_v5 = vpack.c.bf16 %v6203_v11, %v6201_v24 }
0x2566   : > { %v5930_v33 = vpop.permute.xlu0 %5929 }
0x2567   : > { %v5942_v37 = vsel %vm772_vm14, %v5928_v2, %v5930_v33  ;;  %7077 = vmatpush1.bf16.msra.mxu1 %v7076_v7  ;;  %v6298_v7 = vld [vmem:[#allocation2 + $0x248] sm:$0x1] }
0x2568   : > { %7079 = vmatprep.subr.bf16.mxu1 %v7078_v56  ;;  %v6297_v56 = vld [vmem:[#allocation2 + $0x240] sm:$0x1] }
0x256a   : > { %v5936_v62 = vpop.permute.xlu0 %5935 }
0x256b   : > { %v5944_v16 = vsel %vm772_vm14, %v5934_v3, %v5936_v62  ;;  %7081 = vmatpush1.bf16.msra.mxu1 %v7080_v4 }
0x256c   : > { %7083 = vmatprep.subr.bf16.mxu1 %v7082_v34  ;;  %v7086_v28 = vpack.c.bf16 %v5944_v16, %v5942_v37 }
0x256e   : > { %v6190_v13 = vpop.permute.xlu0 %6189 }
0x256f   : > { %v6202_v47 = vsel %vm772_vm14, %v6188_v19, %v6190_v13  ;;  %7085 = vmatpush1.bf16.msra.mxu1 %v7084_v21 }
0x2570   : > { %7087 = vmatprep.subr.bf16.mxu1 %v7086_v28  ;;  %v7094_v6 = vpack.c.bf16 %v6204_v10, %v6202_v47 }
0x2572   : > { %v5932_v27 = vpop.permute.xlu0 %5931  ;;  %7095 = vmatprep.subr.bf16.mxu0 %v7094_v6 }
0x2573   : > { %v5943_v1 = vsel %vm772_vm14, %v5932_v27, %v5934_v3  ;;  %7097 = vmatpush1.bf16.msra.mxu0 %v7096_v5 }
0x2574   : > { %v7088_v23 = vpack.c.bf16 %v5943_v1, %v5941_v15  ;;  %6717 = vmatprep.subr.msk.mxu0 %vm3973_vm3, %v6298_v7 }
0x2576   : > { %7089 = vmatpush1.bf16.msra.mxu1 %v7088_v23 }
0x2577   : > { %6718 = vmatpush1.msk.msra.mxu0 %vm3973_vm3, %v6297_v56 }
0x2578   : > { %6719 = vmatmul.mubr.msk.f32.vlgmr.msra.gmra.mrb[40].mxu0 %vm3960_vm15, %v6224_v40 }
0x2579   : > { %6376 = vmatmul.mubr.f32.vlgmr.msra.gmra.mrb[38].mxu1 %v10217_v48 }
0x264b   : > { %v6448_v4 = vpop.f32.mrb[40].mxu0 }
0x264c   : > { %v6377_v45 = vpop.f32.mrb[38].mxu1  ;;  %v6450_v9 = vpop.f32.mrb[41].mxu0 }
0x264d   : > { %v6449_v14 = vadd.f32 %v6448_v4, %v6377_v45  ;;  %v6379_v34 = vpop.f32.mrb[39].mxu1 }
0x264e   : > { %v6451_v29 = vadd.f32 %v6450_v9, %v6379_v34 }
0x2650   : > { %v6455_v21 = vcombine.low %v6449_v14, %v6451_v29 }
0x2652   : > { %6457 = vst [vmem:[%s549_s0] sm:$0xff] %v6455_v21 }
0x2653 PF: > { %s27_s21 = sadd.s32 1, %s7341_s21  }
0x2654   : > { %p24_p4 = scmp.ge.s32.totalorder %s27_s21, 4  }
0x2656   :  { %26 = sbr.rel (!%p24_p4) target bundleno = 2 (0x2), region = 139 }

</bundles_post_ra>
